<compile_context>
chip_gen: v5e
topology: v5e:2x2
jax: 0.10.0
libtpu: 0.0.40
codegen_flags: <defaults>
</compile_context>

<pallas_src>
import numpy as np
import jax
import jax.numpy as jnp
from jax.experimental import pallas as pl
from jax.experimental.pallas import tpu as pltpu

EPS = 1e-5
SLOPE = 0.2
KW = 4  # conv kernel size (fixed by the module)


# ---------------------------------------------------------------------------
# static geometry
# ---------------------------------------------------------------------------
def _conv_out(n, k, s, p):
    return (n + 2 * p - k) // s + 1


def _build_geometry(B, input_nc, ndf, H, W):
    chans = [input_nc, ndf, 2 * ndf, 4 * ndf, 5 * ndf, 1]
    strides = [2, 2, 1, 1, 1]
    layers = []
    h, w = H, W
    for i in range(5):
        s = strides[i]
        ho, wo = _conv_out(h, KW, s, 1), _conv_out(w, KW, s, 1)
        layers.append(dict(cin=chans[i], cout=chans[i + 1], stride=s,
                           hin=h, win=w, hp=h + 2, wp=w + 2, ho=ho, wo=wo))
        h, w = ho, wo
    # flattened "dense stride-1 conv" geometry for layers 2..5
    geo = {}
    for l in (2, 3, 4, 5):
        lay = layers[l - 1]
        npad = lay["hp"] * lay["wp"]
        # last dense grid position whose conv output is ever consumed downstream
        # (either by the next layer's selection or by the CIN statistics);
        # computing past it is pure waste, so the dense range is trimmed here.
        last = ((B - 1) * npad
                + (lay["ho"] - 1) * lay["stride"] * lay["wp"]
                + (lay["wo"] - 1) * lay["stride"])
        macc = last + 1
        geo[l] = dict(wp=lay["wp"], npad=npad, macc=macc,
                      m=macc + 3 * lay["wp"] + 3)
    return layers, geo


class _RowPack:
    """Packs 2-D f32 arrays into one (rows, width) slab, 8-row aligned starts."""

    def __init__(self):
        self._arrs, self._off, self._rows, self._width = [], {}, 0, 0

    def add(self, name, arr):
        arr = np.asarray(arr, np.float32)
        self._rows = -(-self._rows // 8) * 8
        self._off[name] = (self._rows, arr.shape[0], arr.shape[1])
        self._arrs.append((self._rows, arr))
        self._rows += arr.shape[0]
        self._width = max(self._width, arr.shape[1])

    def finalize(self):
        rows = -(-self._rows // 8) * 8
        slab = np.zeros((rows, self._width), np.float32)
        for r0, a in self._arrs:
            slab[r0:r0 + a.shape[0], :a.shape[1]] = a
        return slab, self._off


def _weight_layout(layers, nlatent, CH):
    off, n = {}, 0

    def add(name, rows):
        nonlocal n
        n = -(-n // 8) * 8
        off[name] = n
        n += rows

    add("W1", 16 * layers[0]["cin"])
    for l in (2, 3, 4, 5):
        add("W%d" % l, 16 * CH)
    add("b1", 1)
    add("b5", 1)
    for l in (2, 3, 4):
        add("Wsc%d" % l, nlatent)
        add("bsc%d" % l, 1)
        add("Wsh%d" % l, nlatent)
        add("bsh%d" % l, 1)
    return off, -(-n // 8) * 8


def _pack_weights(params, layers, wl_off, wl_rows, nlatent, CH):
    """Pack all weights into one (rows, CH) f32 slab (biases b2..b4 dropped:
    a conv bias directly followed by instance-norm mean subtraction cancels)."""
    slab = np.zeros((wl_rows, CH), np.float32)

    def put(name, arr):
        arr = np.asarray(arr, np.float32)
        r0 = wl_off[name]
        slab[r0:r0 + arr.shape[0], :arr.shape[1]] = arr

    lay = layers[0]
    w = np.asarray(params["w1"], np.float32)                      # torch OIHW
    put("W1", np.transpose(w, (2, 3, 1, 0)).reshape(16 * lay["cin"], lay["cout"]))
    put("b1", np.asarray(params["b1"], np.float32)[None, :])
    for l in (2, 3, 4, 5):
        lay = layers[l - 1]
        w = np.asarray(params["w%d" % l], np.float32)
        wt = np.transpose(w, (2, 3, 1, 0))                        # (4,4,cin,cout)
        big = np.zeros((KW, KW, CH, lay["cout"]), np.float32)
        big[:, :, :lay["cin"], :] = wt                            # zero-pad K to CH
        put("W%d" % l, big.reshape(16 * CH, lay["cout"]))
    put("b5", np.asarray(params["b5"], np.float32)[None, :])
    for l in (2, 3, 4):
        put("Wsc%d" % l, params["wsc%d" % l])
        put("bsc%d" % l, np.asarray(params["bsc%d" % l], np.float32)[None, :])
        put("Wsh%d" % l, params["wsh%d" % l])
        put("bsh%d" % l, np.asarray(params["bsh%d" % l], np.float32)[None, :])
    return jnp.asarray(slab)


def _build_static_slab(B, layers, geo):
    """Constant 0/1 selection + stats-mask matrices, packed into one slab."""
    ho1, wo1 = layers[0]["ho"], layers[0]["wo"]

    def src_fn(l):
        if l == 1:
            return lambda b, y, x: b * ho1 * wo1 + y * wo1 + x
        g, s = geo[l], layers[l - 1]["stride"]
        return lambda b, y, x, g=g, s=s: b * g["npad"] + y * s * g["wp"] + x * s

    def sel(l_src, n_src):
        gd = geo[l_src + 1]
        lay = layers[l_src - 1]
        fn = src_fn(l_src)
        S = np.zeros((gd["m"], n_src), np.float32)
        for b in range(B):
            for y in range(lay["ho"]):
                for x in range(lay["wo"]):
                    S[b * gd["npad"] + (y + 1) * gd["wp"] + (x + 1), fn(b, y, x)] = 1.0
        return S

    pk = _RowPack()
    pk.add("S1", sel(1, B * ho1 * wo1))
    pk.add("S2", sel(2, geo[2]["macc"]))
    pk.add("S3", sel(3, geo[3]["macc"]))
    pk.add("S4", sel(4, geo[4]["macc"]))
    sout = np.zeros((B, geo[5]["macc"]), np.float32)
    fn5 = src_fn(5)
    for b in range(B):
        sout[b, fn5(b, 0, 0)] = 1.0
    pk.add("Sout", sout)
    for l in (2, 3, 4):
        lay, g = layers[l - 1], geo[l]
        msk = np.zeros((B, g["macc"]), np.float32)
        fn = src_fn(l)
        for b in range(B):
            for y in range(lay["ho"]):
                for x in range(lay["wo"]):
                    msk[b, fn(b, y, x)] = 1.0
        pk.add("mask%d" % l, msk)
    slab, off = pk.finalize()
    return jnp.asarray(slab), off


# ---------------------------------------------------------------------------
# model builder
# ---------------------------------------------------------------------------
def build_cin_discriminator(nlatent, input_nc, ndf, H, W, B):
    layers, geo = _build_geometry(B, input_nc, ndf, H, W)
    CH = 5 * ndf                                   # uniform channel (lane) width
    assert CH >= max(l["cout"] for l in layers)
    sslab, sl_off = _build_static_slab(B, layers, geo)
    wl_off, wl_rows = _weight_layout(layers, nlatent, CH)
    ho1, wo1 = layers[0]["ho"], layers[0]["wo"]
    cin1, s1 = layers[0]["cin"], layers[0]["stride"]

    def kernel(im_ref, z_ref, w_ref, s_ref, out_ref):
        def mm(a, b):
            return jnp.dot(a, b, preferred_element_type=jnp.float32)

        def lrelu(v):
            return jnp.where(v > 0, v, SLOPE * v)

        def wrow(name, rows):
            r0 = wl_off[name]
            return w_ref[r0:r0 + rows, :]

        def srow(name):
            r0, nr, nc = sl_off[name]
            return s_ref[r0:r0 + nr, :nc]

        z = z_ref[...]                                              # (B, nlatent)

        # --- layer 1: conv as one im2col matmul, bias, LeakyReLU -------------
        h = lrelu(mm(im_ref[...], wrow("W1", 16 * cin1)) + wrow("b1", 1))

        # --- layers 2..5: dense shifted-slice conv (+ CIN/LeakyReLU on 2..4) --
        for l in (2, 3, 4, 5):
            g = geo[l]
            # zero-padded, row-flattened input of this layer (constant 0/1 matmul)
            x_pad = mm(srow("S%d" % (l - 1)), h)                    # (m_l, CH)
            wbase = wl_off["W%d" % l]
            acc = None
            for ky in range(KW):
                for kx in range(KW):
                    off = ky * g["wp"] + kx
                    w_tap = w_ref[wbase + (ky * KW + kx) * CH:
                                  wbase + (ky * KW + kx + 1) * CH, :]
                    term = mm(x_pad[off:off + g["macc"], :], w_tap)
                    acc = term if acc is None else acc + term
            if l == 5:
                h = acc
            else:
                # conditional instance norm (conv bias dropped: it cancels here)
                nval = float(layers[l - 1]["ho"] * layers[l - 1]["wo"])
                msk = srow("mask%d" % l)                            # (B, macc)
                ssum = mm(msk, acc)                                 # per (b,c) sums,
                ssq = mm(msk, acc * acc)                            # issued back-to-back
                mean = ssum * (1.0 / nval)
                var = ssq * (1.0 / nval) - mean * mean              # biased variance
                scale = mm(z, wrow("Wsc%d" % l, nlatent)) + wrow("bsc%d" % l, 1)
                shift = mm(z, wrow("Wsh%d" % l, nlatent)) + wrow("bsh%d" % l, 1)
                mult = jax.lax.rsqrt(var + EPS) * scale             # folded affine
                offs = shift - mean * mult
                # Per-batch broadcast of (mult, offs) over the contiguous dense
                # row blocks, done on the VPU (iota + select) instead of two 0/1
                # scatter matmuls.  Rows outside the valid output positions hold
                # garbage but are never read downstream (the next selection only
                # picks valid positions).
                row = jax.lax.broadcasted_iota(jnp.int32, (g["macc"], CH), 0)
                mlt_f = jnp.broadcast_to(mult[B - 1:B, :], (g["macc"], CH))
                off_f = jnp.broadcast_to(offs[B - 1:B, :], (g["macc"], CH))
                for b in range(B - 2, -1, -1):
                    pred = row < (b + 1) * g["npad"]
                    mlt_f = jnp.where(
                        pred, jnp.broadcast_to(mult[b:b + 1, :], (g["macc"], CH)), mlt_f)
                    off_f = jnp.where(
                        pred, jnp.broadcast_to(offs[b:b + 1, :], (g["macc"], CH)), off_f)
                h = lrelu(acc * mlt_f + off_f)

        # final 1x1 logit kept lane-resident: column 0 of a (B, CH) block
        out_ref[...] = mm(srow("Sout"), h) + wrow("b5", 1)

    vmem = pl.BlockSpec(memory_space=pltpu.MemorySpace.VMEM)
    call = pl.pallas_call(
        kernel,
        out_shape=jax.ShapeDtypeStruct((B, CH), jnp.float32),
        in_specs=[vmem, vmem, vmem, vmem],
        out_specs=vmem,
    )

    def forward(x, noise, wslab, sconst):
        # layout plumbing only: NCHW -> padded NHWC -> im2col rows for layer 1
        xt = jnp.transpose(x.astype(jnp.float32), (0, 2, 3, 1))
        xp = jnp.pad(xt, ((0, 0), (1, 1), (1, 1), (0, 0)))
        pats = [xp[:, ky:ky + s1 * ho1:s1, kx:kx + s1 * wo1:s1, :]
                for ky in range(KW) for kx in range(KW)]
        im = jnp.stack(pats, axis=3).reshape(B * ho1 * wo1, 16 * cin1)
        z = noise.reshape(B, nlatent).astype(jnp.float32)
        out = call(im, z, wslab, sconst)
        return out[:, :1].reshape(B, 1, 1, 1)

    fwd = jax.jit(forward)

    def pack_params(params):
        return _pack_weights(params, layers, wl_off, wl_rows, nlatent, CH)

    return fwd, pack_params, sslab


# ---------------------------------------------------------------------------
# parameters + pure-JAX reference
# ---------------------------------------------------------------------------
def init_params(key, nlatent, input_nc, ndf):
    chans = [input_nc, ndf, 2 * ndf, 4 * ndf, 5 * ndf, 1]
    ks = jax.random.split(key, 32)
    ki = 0

    def nxt():
        nonlocal ki
        k = ks[ki]
        ki += 1
        return k

    p = {}
    for l in range(1, 6):
        cin, cout = chans[l - 1], chans[l]
        bound = 1.0 / np.sqrt(cin * KW * KW)
        p["w%d" % l] = jax.random.uniform(nxt(), (cout, cin, KW, KW), jnp.float32,
                                          -bound, bound)
        p["b%d" % l] = jax.random.uniform(nxt(), (cout,), jnp.float32, -bound, bound)
    for l in (2, 3, 4):
        c = chans[l]
        bound = 1.0 / np.sqrt(nlatent)
        p["wsc%d" % l] = jax.random.uniform(nxt(), (nlatent, c), jnp.float32, -bound, bound)
        p["bsc%d" % l] = jax.random.uniform(nxt(), (c,), jnp.float32, -bound, bound)
        p["wsh%d" % l] = jax.random.uniform(nxt(), (nlatent, c), jnp.float32, -bound, bound)
        p["bsh%d" % l] = jax.random.uniform(nxt(), (c,), jnp.float32, -bound, bound)
    return p


def ref_forward(x, noise, params, nlatent):
    hi = jax.lax.Precision.HIGHEST

    def conv(h, w, b, s):
        out = jax.lax.conv_general_dilated(
            h, w, window_strides=(s, s), padding=((1, 1), (1, 1)),
            dimension_numbers=("NCHW", "OIHW", "NCHW"), precision=hi)
        return out + b.reshape(1, -1, 1, 1)

    def lrelu(h):
        return jnp.where(h > 0, h, SLOPE * h)

    def cin(h, z, wsc, bsc, wsh, bsh):
        scale = jnp.dot(z, wsc, precision=hi) + bsc
        shift = jnp.dot(z, wsh, precision=hi) + bsh
        mu = jnp.mean(h, axis=(2, 3), keepdims=True)
        var = jnp.mean((h - mu) ** 2, axis=(2, 3), keepdims=True)
        hn = (h - mu) * jax.lax.rsqrt(var + EPS)
        return hn * scale[:, :, None, None] + shift[:, :, None, None]

    z = noise.reshape(noise.shape[0], nlatent).astype(jnp.float32)
    x = x.astype(jnp.float32)
    h = lrelu(conv(x, params["w1"], params["b1"], 2))
    h = lrelu(cin(conv(h, params["w2"], params["b2"], 2), z,
                  params["wsc2"], params["bsc2"], params["wsh2"], params["bsh2"]))
    h = lrelu(cin(conv(h, params["w3"], params["b3"], 1), z,
                  params["wsc3"], params["bsc3"], params["wsh3"], params["bsh3"]))
    h = lrelu(cin(conv(h, params["w4"], params["b4"], 1), z,
                  params["wsc4"], params["bsc4"], params["wsh4"], params["bsh4"]))
    return conv(h, params["w5"], params["b5"], 1)


if __name__ == "__main__":
    B, INPUT_NC, NLATENT, NDF, H, W = 2, 4, 8, 8, 16, 16

    key = jax.random.PRNGKey(0)
    kx, kz, kp = jax.random.split(key, 3)
    x = jax.random.normal(kx, (B, INPUT_NC, H, W), jnp.float32)
    noise = jax.random.normal(kz, (B, NLATENT, 1, 1), jnp.float32)
    params = init_params(kp, NLATENT, INPUT_NC, NDF)

    forward, pack_params, sslab = build_cin_discriminator(
        NLATENT, INPUT_NC, NDF, H, W, B)
    wslab = pack_params(params)            # one-time parameter packing

    out = forward(x, noise, wslab, sslab)
    jax.block_until_ready(out)

    ref = ref_forward(x, noise, params, NLATENT)
    assert out.shape == (B, 1, 1, 1) and ref.shape == (B, 1, 1, 1)
    assert jnp.allclose(out, ref, atol=5e-3, rtol=5e-3), (out, ref)
    print("KERNEL_OK")
</pallas_src>

<mosaic_0001>
module attributes {stable_mosaic.version = 11 : i64} {
  func.func @kernel(%arg0: memref<128x64xf32, #tpu.memory_space<vmem>>, %arg1: memref<2x8xf32, #tpu.memory_space<vmem>>, %arg2: memref<2736x40xf32, #tpu.memory_space<vmem>>, %arg3: memref<392x167xf32, #tpu.memory_space<vmem>>, %arg4: memref<2x40xf32, #tpu.memory_space<vmem>>) attributes {dimension_semantics = [], scalar_prefetch = 0 : i64, scratch_operands = 0 : i64, tpu.core_type = #tpu.core_type<tc>} {
    %c0 = arith.constant 0 : index
    %c0_0 = arith.constant 0 : index
    %0 = vector.load %arg1[%c0, %c0_0] : memref<2x8xf32, #tpu.memory_space<vmem>>, vector<2x8xf32>
    %c0_1 = arith.constant 0 : index
    %c0_2 = arith.constant 0 : index
    %1 = vector.load %arg0[%c0_1, %c0_2] : memref<128x64xf32, #tpu.memory_space<vmem>>, vector<128x64xf32>
    %c0_3 = arith.constant 0 : index
    %c0_4 = arith.constant 0 : index
    %2 = vector.load %arg2[%c0_3, %c0_4] : memref<2736x40xf32, #tpu.memory_space<vmem>>, vector<64x40xf32>
    %cst = arith.constant dense<0.000000e+00> : vector<128x40xf32>
    %3 = tpu.matmul %1, %2, %cst {dimension_numbers = #tpu.dot_dimension_numbers<[1], [0], [0], [1], [0, 0, 1, 1], [], []>} : vector<128x64xf32>, vector<64x40xf32>, vector<128x40xf32> -> vector<128x40xf32>
    %c2624 = arith.constant 2624 : index
    %c0_5 = arith.constant 0 : index
    %4 = vector.load %arg2[%c2624, %c0_5] : memref<2736x40xf32, #tpu.memory_space<vmem>>, vector<1x40xf32>
    %5 = vector.broadcast %4 : vector<1x40xf32> to vector<128x40xf32>
    %6 = arith.addf %3, %5 : vector<128x40xf32>
    %cst_6 = arith.constant 0.000000e+00 : f32
    %7 = vector.broadcast %cst_6 : f32 to vector<128x40xf32>
    %8 = arith.cmpf ogt, %6, %7 : vector<128x40xf32>
    %cst_7 = arith.constant 2.000000e-01 : f32
    %9 = vector.broadcast %cst_7 : f32 to vector<128x40xf32>
    %10 = arith.mulf %9, %6 : vector<128x40xf32>
    %11 = arith.select %8, %6, %10 : vector<128x40xi1>, vector<128x40xf32>
    %c0_8 = arith.constant 0 : index
    %c0_9 = arith.constant 0 : index
    %12 = vector.load %arg3[%c0_8, %c0_9] : memref<392x167xf32, #tpu.memory_space<vmem>>, vector<200x128xf32>
    %cst_10 = arith.constant dense<0.000000e+00> : vector<200x40xf32>
    %13 = tpu.matmul %12, %11, %cst_10 {dimension_numbers = #tpu.dot_dimension_numbers<[1], [0], [0], [1], [0, 0, 1, 1], [], []>} : vector<200x128xf32>, vector<128x40xf32>, vector<200x40xf32> -> vector<200x40xf32>
    %c64 = arith.constant 64 : index
    %c0_11 = arith.constant 0 : index
    %14 = vector.load %arg2[%c64, %c0_11] : memref<2736x40xf32, #tpu.memory_space<vmem>>, vector<40x40xf32>
    %15 = vector.extract_strided_slice %13 {offsets = [0, 0], sizes = [167, 40], strides = [1, 1]} : vector<200x40xf32> to vector<167x40xf32>
    %cst_12 = arith.constant dense<0.000000e+00> : vector<167x40xf32>
    %16 = tpu.matmul %15, %14, %cst_12 {dimension_numbers = #tpu.dot_dimension_numbers<[1], [0], [0], [1], [0, 0, 1, 1], [], []>} : vector<167x40xf32>, vector<40x40xf32>, vector<167x40xf32> -> vector<167x40xf32>
    %c104 = arith.constant 104 : index
    %c0_13 = arith.constant 0 : index
    %17 = vector.load %arg2[%c104, %c0_13] : memref<2736x40xf32, #tpu.memory_space<vmem>>, vector<40x40xf32>
    %18 = vector.extract_strided_slice %13 {offsets = [1, 0], sizes = [167, 40], strides = [1, 1]} : vector<200x40xf32> to vector<167x40xf32>
    %cst_14 = arith.constant dense<0.000000e+00> : vector<167x40xf32>
    %19 = tpu.matmul %18, %17, %cst_14 {dimension_numbers = #tpu.dot_dimension_numbers<[1], [0], [0], [1], [0, 0, 1, 1], [], []>} : vector<167x40xf32>, vector<40x40xf32>, vector<167x40xf32> -> vector<167x40xf32>
    %20 = arith.addf %16, %19 : vector<167x40xf32>
    %c144 = arith.constant 144 : index
    %c0_15 = arith.constant 0 : index
    %21 = vector.load %arg2[%c144, %c0_15] : memref<2736x40xf32, #tpu.memory_space<vmem>>, vector<40x40xf32>
    %22 = vector.extract_strided_slice %13 {offsets = [2, 0], sizes = [167, 40], strides = [1, 1]} : vector<200x40xf32> to vector<167x40xf32>
    %cst_16 = arith.constant dense<0.000000e+00> : vector<167x40xf32>
    %23 = tpu.matmul %22, %21, %cst_16 {dimension_numbers = #tpu.dot_dimension_numbers<[1], [0], [0], [1], [0, 0, 1, 1], [], []>} : vector<167x40xf32>, vector<40x40xf32>, vector<167x40xf32> -> vector<167x40xf32>
    %24 = arith.addf %20, %23 : vector<167x40xf32>
    %c184 = arith.constant 184 : index
    %c0_17 = arith.constant 0 : index
    %25 = vector.load %arg2[%c184, %c0_17] : memref<2736x40xf32, #tpu.memory_space<vmem>>, vector<40x40xf32>
    %26 = vector.extract_strided_slice %13 {offsets = [3, 0], sizes = [167, 40], strides = [1, 1]} : vector<200x40xf32> to vector<167x40xf32>
    %cst_18 = arith.constant dense<0.000000e+00> : vector<167x40xf32>
    %27 = tpu.matmul %26, %25, %cst_18 {dimension_numbers = #tpu.dot_dimension_numbers<[1], [0], [0], [1], [0, 0, 1, 1], [], []>} : vector<167x40xf32>, vector<40x40xf32>, vector<167x40xf32> -> vector<167x40xf32>
    %28 = arith.addf %24, %27 : vector<167x40xf32>
    %c224 = arith.constant 224 : index
    %c0_19 = arith.constant 0 : index
    %29 = vector.load %arg2[%c224, %c0_19] : memref<2736x40xf32, #tpu.memory_space<vmem>>, vector<40x40xf32>
    %30 = vector.extract_strided_slice %13 {offsets = [10, 0], sizes = [167, 40], strides = [1, 1]} : vector<200x40xf32> to vector<167x40xf32>
    %cst_20 = arith.constant dense<0.000000e+00> : vector<167x40xf32>
    %31 = tpu.matmul %30, %29, %cst_20 {dimension_numbers = #tpu.dot_dimension_numbers<[1], [0], [0], [1], [0, 0, 1, 1], [], []>} : vector<167x40xf32>, vector<40x40xf32>, vector<167x40xf32> -> vector<167x40xf32>
    %32 = arith.addf %28, %31 : vector<167x40xf32>
    %c264 = arith.constant 264 : index
    %c0_21 = arith.constant 0 : index
    %33 = vector.load %arg2[%c264, %c0_21] : memref<2736x40xf32, #tpu.memory_space<vmem>>, vector<40x40xf32>
    %34 = vector.extract_strided_slice %13 {offsets = [11, 0], sizes = [167, 40], strides = [1, 1]} : vector<200x40xf32> to vector<167x40xf32>
    %cst_22 = arith.constant dense<0.000000e+00> : vector<167x40xf32>
    %35 = tpu.matmul %34, %33, %cst_22 {dimension_numbers = #tpu.dot_dimension_numbers<[1], [0], [0], [1], [0, 0, 1, 1], [], []>} : vector<167x40xf32>, vector<40x40xf32>, vector<167x40xf32> -> vector<167x40xf32>
    %36 = arith.addf %32, %35 : vector<167x40xf32>
    %c304 = arith.constant 304 : index
    %c0_23 = arith.constant 0 : index
    %37 = vector.load %arg2[%c304, %c0_23] : memref<2736x40xf32, #tpu.memory_space<vmem>>, vector<40x40xf32>
    %38 = vector.extract_strided_slice %13 {offsets = [12, 0], sizes = [167, 40], strides = [1, 1]} : vector<200x40xf32> to vector<167x40xf32>
    %cst_24 = arith.constant dense<0.000000e+00> : vector<167x40xf32>
    %39 = tpu.matmul %38, %37, %cst_24 {dimension_numbers = #tpu.dot_dimension_numbers<[1], [0], [0], [1], [0, 0, 1, 1], [], []>} : vector<167x40xf32>, vector<40x40xf32>, vector<167x40xf32> -> vector<167x40xf32>
    %40 = arith.addf %36, %39 : vector<167x40xf32>
    %c344 = arith.constant 344 : index
    %c0_25 = arith.constant 0 : index
    %41 = vector.load %arg2[%c344, %c0_25] : memref<2736x40xf32, #tpu.memory_space<vmem>>, vector<40x40xf32>
    %42 = vector.extract_strided_slice %13 {offsets = [13, 0], sizes = [167, 40], strides = [1, 1]} : vector<200x40xf32> to vector<167x40xf32>
    %cst_26 = arith.constant dense<0.000000e+00> : vector<167x40xf32>
    %43 = tpu.matmul %42, %41, %cst_26 {dimension_numbers = #tpu.dot_dimension_numbers<[1], [0], [0], [1], [0, 0, 1, 1], [], []>} : vector<167x40xf32>, vector<40x40xf32>, vector<167x40xf32> -> vector<167x40xf32>
    %44 = arith.addf %40, %43 : vector<167x40xf32>
    %c384 = arith.constant 384 : index
    %c0_27 = arith.constant 0 : index
    %45 = vector.load %arg2[%c384, %c0_27] : memref<2736x40xf32, #tpu.memory_space<vmem>>, vector<40x40xf32>
    %46 = vector.extract_strided_slice %13 {offsets = [20, 0], sizes = [167, 40], strides = [1, 1]} : vector<200x40xf32> to vector<167x40xf32>
    %cst_28 = arith.constant dense<0.000000e+00> : vector<167x40xf32>
    %47 = tpu.matmul %46, %45, %cst_28 {dimension_numbers = #tpu.dot_dimension_numbers<[1], [0], [0], [1], [0, 0, 1, 1], [], []>} : vector<167x40xf32>, vector<40x40xf32>, vector<167x40xf32> -> vector<167x40xf32>
    %48 = arith.addf %44, %47 : vector<167x40xf32>
    %c424 = arith.constant 424 : index
    %c0_29 = arith.constant 0 : index
    %49 = vector.load %arg2[%c424, %c0_29] : memref<2736x40xf32, #tpu.memory_space<vmem>>, vector<40x40xf32>
    %50 = vector.extract_strided_slice %13 {offsets = [21, 0], sizes = [167, 40], strides = [1, 1]} : vector<200x40xf32> to vector<167x40xf32>
    %cst_30 = arith.constant dense<0.000000e+00> : vector<167x40xf32>
    %51 = tpu.matmul %50, %49, %cst_30 {dimension_numbers = #tpu.dot_dimension_numbers<[1], [0], [0], [1], [0, 0, 1, 1], [], []>} : vector<167x40xf32>, vector<40x40xf32>, vector<167x40xf32> -> vector<167x40xf32>
    %52 = arith.addf %48, %51 : vector<167x40xf32>
    %c464 = arith.constant 464 : index
    %c0_31 = arith.constant 0 : index
    %53 = vector.load %arg2[%c464, %c0_31] : memref<2736x40xf32, #tpu.memory_space<vmem>>, vector<40x40xf32>
    %54 = vector.extract_strided_slice %13 {offsets = [22, 0], sizes = [167, 40], strides = [1, 1]} : vector<200x40xf32> to vector<167x40xf32>
    %cst_32 = arith.constant dense<0.000000e+00> : vector<167x40xf32>
    %55 = tpu.matmul %54, %53, %cst_32 {dimension_numbers = #tpu.dot_dimension_numbers<[1], [0], [0], [1], [0, 0, 1, 1], [], []>} : vector<167x40xf32>, vector<40x40xf32>, vector<167x40xf32> -> vector<167x40xf32>
    %56 = arith.addf %52, %55 : vector<167x40xf32>
    %c504 = arith.constant 504 : index
    %c0_33 = arith.constant 0 : index
    %57 = vector.load %arg2[%c504, %c0_33] : memref<2736x40xf32, #tpu.memory_space<vmem>>, vector<40x40xf32>
    %58 = vector.extract_strided_slice %13 {offsets = [23, 0], sizes = [167, 40], strides = [1, 1]} : vector<200x40xf32> to vector<167x40xf32>
    %cst_34 = arith.constant dense<0.000000e+00> : vector<167x40xf32>
    %59 = tpu.matmul %58, %57, %cst_34 {dimension_numbers = #tpu.dot_dimension_numbers<[1], [0], [0], [1], [0, 0, 1, 1], [], []>} : vector<167x40xf32>, vector<40x40xf32>, vector<167x40xf32> -> vector<167x40xf32>
    %60 = arith.addf %56, %59 : vector<167x40xf32>
    %c544 = arith.constant 544 : index
    %c0_35 = arith.constant 0 : index
    %61 = vector.load %arg2[%c544, %c0_35] : memref<2736x40xf32, #tpu.memory_space<vmem>>, vector<40x40xf32>
    %62 = vector.extract_strided_slice %13 {offsets = [30, 0], sizes = [167, 40], strides = [1, 1]} : vector<200x40xf32> to vector<167x40xf32>
    %cst_36 = arith.constant dense<0.000000e+00> : vector<167x40xf32>
    %63 = tpu.matmul %62, %61, %cst_36 {dimension_numbers = #tpu.dot_dimension_numbers<[1], [0], [0], [1], [0, 0, 1, 1], [], []>} : vector<167x40xf32>, vector<40x40xf32>, vector<167x40xf32> -> vector<167x40xf32>
    %64 = arith.addf %60, %63 : vector<167x40xf32>
    %c584 = arith.constant 584 : index
    %c0_37 = arith.constant 0 : index
    %65 = vector.load %arg2[%c584, %c0_37] : memref<2736x40xf32, #tpu.memory_space<vmem>>, vector<40x40xf32>
    %66 = vector.extract_strided_slice %13 {offsets = [31, 0], sizes = [167, 40], strides = [1, 1]} : vector<200x40xf32> to vector<167x40xf32>
    %cst_38 = arith.constant dense<0.000000e+00> : vector<167x40xf32>
    %67 = tpu.matmul %66, %65, %cst_38 {dimension_numbers = #tpu.dot_dimension_numbers<[1], [0], [0], [1], [0, 0, 1, 1], [], []>} : vector<167x40xf32>, vector<40x40xf32>, vector<167x40xf32> -> vector<167x40xf32>
    %68 = arith.addf %64, %67 : vector<167x40xf32>
    %c624 = arith.constant 624 : index
    %c0_39 = arith.constant 0 : index
    %69 = vector.load %arg2[%c624, %c0_39] : memref<2736x40xf32, #tpu.memory_space<vmem>>, vector<40x40xf32>
    %70 = vector.extract_strided_slice %13 {offsets = [32, 0], sizes = [167, 40], strides = [1, 1]} : vector<200x40xf32> to vector<167x40xf32>
    %cst_40 = arith.constant dense<0.000000e+00> : vector<167x40xf32>
    %71 = tpu.matmul %70, %69, %cst_40 {dimension_numbers = #tpu.dot_dimension_numbers<[1], [0], [0], [1], [0, 0, 1, 1], [], []>} : vector<167x40xf32>, vector<40x40xf32>, vector<167x40xf32> -> vector<167x40xf32>
    %72 = arith.addf %68, %71 : vector<167x40xf32>
    %c664 = arith.constant 664 : index
    %c0_41 = arith.constant 0 : index
    %73 = vector.load %arg2[%c664, %c0_41] : memref<2736x40xf32, #tpu.memory_space<vmem>>, vector<40x40xf32>
    %74 = vector.extract_strided_slice %13 {offsets = [33, 0], sizes = [167, 40], strides = [1, 1]} : vector<200x40xf32> to vector<167x40xf32>
    %cst_42 = arith.constant dense<0.000000e+00> : vector<167x40xf32>
    %75 = tpu.matmul %74, %73, %cst_42 {dimension_numbers = #tpu.dot_dimension_numbers<[1], [0], [0], [1], [0, 0, 1, 1], [], []>} : vector<167x40xf32>, vector<40x40xf32>, vector<167x40xf32> -> vector<167x40xf32>
    %76 = arith.addf %72, %75 : vector<167x40xf32>
    %c368 = arith.constant 368 : index
    %c0_43 = arith.constant 0 : index
    %77 = vector.load %arg3[%c368, %c0_43] : memref<392x167xf32, #tpu.memory_space<vmem>>, vector<2x167xf32>
    %cst_44 = arith.constant dense<0.000000e+00> : vector<2x40xf32>
    %78 = tpu.matmul %77, %76, %cst_44 {dimension_numbers = #tpu.dot_dimension_numbers<[1], [0], [0], [1], [0, 0, 1, 1], [], []>} : vector<2x167xf32>, vector<167x40xf32>, vector<2x40xf32> -> vector<2x40xf32>
    %79 = arith.mulf %76, %76 : vector<167x40xf32>
    %cst_45 = arith.constant dense<0.000000e+00> : vector<2x40xf32>
    %80 = tpu.matmul %77, %79, %cst_45 {dimension_numbers = #tpu.dot_dimension_numbers<[1], [0], [0], [1], [0, 0, 1, 1], [], []>} : vector<2x167xf32>, vector<167x40xf32>, vector<2x40xf32> -> vector<2x40xf32>
    %cst_46 = arith.constant 6.250000e-02 : f32
    %81 = vector.broadcast %cst_46 : f32 to vector<2x40xf32>
    %82 = arith.mulf %78, %81 : vector<2x40xf32>
    %cst_47 = arith.constant 6.250000e-02 : f32
    %83 = vector.broadcast %cst_47 : f32 to vector<2x40xf32>
    %84 = arith.mulf %80, %83 : vector<2x40xf32>
    %85 = arith.mulf %82, %82 : vector<2x40xf32>
    %86 = arith.subf %84, %85 : vector<2x40xf32>
    %c2640 = arith.constant 2640 : index
    %c0_48 = arith.constant 0 : index
    %87 = vector.load %arg2[%c2640, %c0_48] : memref<2736x40xf32, #tpu.memory_space<vmem>>, vector<8x40xf32>
    %cst_49 = arith.constant dense<0.000000e+00> : vector<2x40xf32>
    %88 = tpu.matmul %0, %87, %cst_49 {dimension_numbers = #tpu.dot_dimension_numbers<[1], [0], [0], [1], [0, 0, 1, 1], [], []>} : vector<2x8xf32>, vector<8x40xf32>, vector<2x40xf32> -> vector<2x40xf32>
    %c2648 = arith.constant 2648 : index
    %c0_50 = arith.constant 0 : index
    %89 = vector.load %arg2[%c2648, %c0_50] : memref<2736x40xf32, #tpu.memory_space<vmem>>, vector<1x40xf32>
    %90 = vector.broadcast %89 : vector<1x40xf32> to vector<2x40xf32>
    %91 = arith.addf %88, %90 : vector<2x40xf32>
    %c2656 = arith.constant 2656 : index
    %c0_51 = arith.constant 0 : index
    %92 = vector.load %arg2[%c2656, %c0_51] : memref<2736x40xf32, #tpu.memory_space<vmem>>, vector<8x40xf32>
    %cst_52 = arith.constant dense<0.000000e+00> : vector<2x40xf32>
    %93 = tpu.matmul %0, %92, %cst_52 {dimension_numbers = #tpu.dot_dimension_numbers<[1], [0], [0], [1], [0, 0, 1, 1], [], []>} : vector<2x8xf32>, vector<8x40xf32>, vector<2x40xf32> -> vector<2x40xf32>
    %c2664 = arith.constant 2664 : index
    %c0_53 = arith.constant 0 : index
    %94 = vector.load %arg2[%c2664, %c0_53] : memref<2736x40xf32, #tpu.memory_space<vmem>>, vector<1x40xf32>
    %95 = vector.broadcast %94 : vector<1x40xf32> to vector<2x40xf32>
    %96 = arith.addf %93, %95 : vector<2x40xf32>
    %cst_54 = arith.constant 9.99999974E-6 : f32
    %97 = vector.broadcast %cst_54 : f32 to vector<2x40xf32>
    %98 = arith.addf %86, %97 : vector<2x40xf32>
    %99 = math.rsqrt %98 : vector<2x40xf32>
    %100 = arith.mulf %99, %91 : vector<2x40xf32>
    %101 = arith.mulf %82, %100 : vector<2x40xf32>
    %102 = arith.subf %96, %101 : vector<2x40xf32>
    %103 = tpu.iota {dimensions = array<i32: 0>} : vector<167x40xi32>
    %104 = vector.extract_strided_slice %100 {offsets = [1, 0], sizes = [1, 40], strides = [1, 1]} : vector<2x40xf32> to vector<1x40xf32>
    %105 = vector.shape_cast %104 : vector<1x40xf32> to vector<1x40xf32>
    %106 = vector.broadcast %105 : vector<1x40xf32> to vector<167x40xf32>
    %107 = vector.extract_strided_slice %102 {offsets = [1, 0], sizes = [1, 40], strides = [1, 1]} : vector<2x40xf32> to vector<1x40xf32>
    %108 = vector.shape_cast %107 : vector<1x40xf32> to vector<1x40xf32>
    %109 = vector.broadcast %108 : vector<1x40xf32> to vector<167x40xf32>
    %c100_i32 = arith.constant 100 : i32
    %110 = vector.broadcast %c100_i32 : i32 to vector<167x40xi32>
    %111 = arith.cmpi slt, %103, %110 : vector<167x40xi32>
    %112 = vector.extract_strided_slice %100 {offsets = [0, 0], sizes = [1, 40], strides = [1, 1]} : vector<2x40xf32> to vector<1x40xf32>
    %113 = vector.shape_cast %112 : vector<1x40xf32> to vector<1x40xf32>
    %114 = vector.broadcast %113 : vector<1x40xf32> to vector<167x40xf32>
    %115 = arith.select %111, %114, %106 : vector<167x40xi1>, vector<167x40xf32>
    %116 = vector.extract_strided_slice %102 {offsets = [0, 0], sizes = [1, 40], strides = [1, 1]} : vector<2x40xf32> to vector<1x40xf32>
    %117 = vector.shape_cast %116 : vector<1x40xf32> to vector<1x40xf32>
    %118 = vector.broadcast %117 : vector<1x40xf32> to vector<167x40xf32>
    %119 = arith.select %111, %118, %109 : vector<167x40xi1>, vector<167x40xf32>
    %120 = arith.mulf %76, %115 : vector<167x40xf32>
    %121 = arith.addf %120, %119 : vector<167x40xf32>
    %cst_55 = arith.constant 0.000000e+00 : f32
    %122 = vector.broadcast %cst_55 : f32 to vector<167x40xf32>
    %123 = arith.cmpf ogt, %121, %122 : vector<167x40xf32>
    %cst_56 = arith.constant 2.000000e-01 : f32
    %124 = vector.broadcast %cst_56 : f32 to vector<167x40xf32>
    %125 = arith.mulf %124, %121 : vector<167x40xf32>
    %126 = arith.select %123, %121, %125 : vector<167x40xi1>, vector<167x40xf32>
    %c200 = arith.constant 200 : index
    %c0_57 = arith.constant 0 : index
    %127 = vector.load %arg3[%c200, %c0_57] : memref<392x167xf32, #tpu.memory_space<vmem>>, vector<72x167xf32>
    %cst_58 = arith.constant dense<0.000000e+00> : vector<72x40xf32>
    %128 = tpu.matmul %127, %126, %cst_58 {dimension_numbers = #tpu.dot_dimension_numbers<[1], [0], [0], [1], [0, 0, 1, 1], [], []>} : vector<72x167xf32>, vector<167x40xf32>, vector<72x40xf32> -> vector<72x40xf32>
    %c704 = arith.constant 704 : index
    %c0_59 = arith.constant 0 : index
    %129 = vector.load %arg2[%c704, %c0_59] : memref<2736x40xf32, #tpu.memory_space<vmem>>, vector<40x40xf32>
    %130 = vector.extract_strided_slice %128 {offsets = [0, 0], sizes = [51, 40], strides = [1, 1]} : vector<72x40xf32> to vector<51x40xf32>
    %cst_60 = arith.constant dense<0.000000e+00> : vector<51x40xf32>
    %131 = tpu.matmul %130, %129, %cst_60 {dimension_numbers = #tpu.dot_dimension_numbers<[1], [0], [0], [1], [0, 0, 1, 1], [], []>} : vector<51x40xf32>, vector<40x40xf32>, vector<51x40xf32> -> vector<51x40xf32>
    %c744 = arith.constant 744 : index
    %c0_61 = arith.constant 0 : index
    %132 = vector.load %arg2[%c744, %c0_61] : memref<2736x40xf32, #tpu.memory_space<vmem>>, vector<40x40xf32>
    %133 = vector.extract_strided_slice %128 {offsets = [1, 0], sizes = [51, 40], strides = [1, 1]} : vector<72x40xf32> to vector<51x40xf32>
    %cst_62 = arith.constant dense<0.000000e+00> : vector<51x40xf32>
    %134 = tpu.matmul %133, %132, %cst_62 {dimension_numbers = #tpu.dot_dimension_numbers<[1], [0], [0], [1], [0, 0, 1, 1], [], []>} : vector<51x40xf32>, vector<40x40xf32>, vector<51x40xf32> -> vector<51x40xf32>
    %135 = arith.addf %131, %134 : vector<51x40xf32>
    %c784 = arith.constant 784 : index
    %c0_63 = arith.constant 0 : index
    %136 = vector.load %arg2[%c784, %c0_63] : memref<2736x40xf32, #tpu.memory_space<vmem>>, vector<40x40xf32>
    %137 = vector.extract_strided_slice %128 {offsets = [2, 0], sizes = [51, 40], strides = [1, 1]} : vector<72x40xf32> to vector<51x40xf32>
    %cst_64 = arith.constant dense<0.000000e+00> : vector<51x40xf32>
    %138 = tpu.matmul %137, %136, %cst_64 {dimension_numbers = #tpu.dot_dimension_numbers<[1], [0], [0], [1], [0, 0, 1, 1], [], []>} : vector<51x40xf32>, vector<40x40xf32>, vector<51x40xf32> -> vector<51x40xf32>
    %139 = arith.addf %135, %138 : vector<51x40xf32>
    %c824 = arith.constant 824 : index
    %c0_65 = arith.constant 0 : index
    %140 = vector.load %arg2[%c824, %c0_65] : memref<2736x40xf32, #tpu.memory_space<vmem>>, vector<40x40xf32>
    %141 = vector.extract_strided_slice %128 {offsets = [3, 0], sizes = [51, 40], strides = [1, 1]} : vector<72x40xf32> to vector<51x40xf32>
    %cst_66 = arith.constant dense<0.000000e+00> : vector<51x40xf32>
    %142 = tpu.matmul %141, %140, %cst_66 {dimension_numbers = #tpu.dot_dimension_numbers<[1], [0], [0], [1], [0, 0, 1, 1], [], []>} : vector<51x40xf32>, vector<40x40xf32>, vector<51x40xf32> -> vector<51x40xf32>
    %143 = arith.addf %139, %142 : vector<51x40xf32>
    %c864 = arith.constant 864 : index
    %c0_67 = arith.constant 0 : index
    %144 = vector.load %arg2[%c864, %c0_67] : memref<2736x40xf32, #tpu.memory_space<vmem>>, vector<40x40xf32>
    %145 = vector.extract_strided_slice %128 {offsets = [6, 0], sizes = [51, 40], strides = [1, 1]} : vector<72x40xf32> to vector<51x40xf32>
    %cst_68 = arith.constant dense<0.000000e+00> : vector<51x40xf32>
    %146 = tpu.matmul %145, %144, %cst_68 {dimension_numbers = #tpu.dot_dimension_numbers<[1], [0], [0], [1], [0, 0, 1, 1], [], []>} : vector<51x40xf32>, vector<40x40xf32>, vector<51x40xf32> -> vector<51x40xf32>
    %147 = arith.addf %143, %146 : vector<51x40xf32>
    %c904 = arith.constant 904 : index
    %c0_69 = arith.constant 0 : index
    %148 = vector.load %arg2[%c904, %c0_69] : memref<2736x40xf32, #tpu.memory_space<vmem>>, vector<40x40xf32>
    %149 = vector.extract_strided_slice %128 {offsets = [7, 0], sizes = [51, 40], strides = [1, 1]} : vector<72x40xf32> to vector<51x40xf32>
    %cst_70 = arith.constant dense<0.000000e+00> : vector<51x40xf32>
    %150 = tpu.matmul %149, %148, %cst_70 {dimension_numbers = #tpu.dot_dimension_numbers<[1], [0], [0], [1], [0, 0, 1, 1], [], []>} : vector<51x40xf32>, vector<40x40xf32>, vector<51x40xf32> -> vector<51x40xf32>
    %151 = arith.addf %147, %150 : vector<51x40xf32>
    %c944 = arith.constant 944 : index
    %c0_71 = arith.constant 0 : index
    %152 = vector.load %arg2[%c944, %c0_71] : memref<2736x40xf32, #tpu.memory_space<vmem>>, vector<40x40xf32>
    %153 = vector.extract_strided_slice %128 {offsets = [8, 0], sizes = [51, 40], strides = [1, 1]} : vector<72x40xf32> to vector<51x40xf32>
    %cst_72 = arith.constant dense<0.000000e+00> : vector<51x40xf32>
    %154 = tpu.matmul %153, %152, %cst_72 {dimension_numbers = #tpu.dot_dimension_numbers<[1], [0], [0], [1], [0, 0, 1, 1], [], []>} : vector<51x40xf32>, vector<40x40xf32>, vector<51x40xf32> -> vector<51x40xf32>
    %155 = arith.addf %151, %154 : vector<51x40xf32>
    %c984 = arith.constant 984 : index
    %c0_73 = arith.constant 0 : index
    %156 = vector.load %arg2[%c984, %c0_73] : memref<2736x40xf32, #tpu.memory_space<vmem>>, vector<40x40xf32>
    %157 = vector.extract_strided_slice %128 {offsets = [9, 0], sizes = [51, 40], strides = [1, 1]} : vector<72x40xf32> to vector<51x40xf32>
    %cst_74 = arith.constant dense<0.000000e+00> : vector<51x40xf32>
    %158 = tpu.matmul %157, %156, %cst_74 {dimension_numbers = #tpu.dot_dimension_numbers<[1], [0], [0], [1], [0, 0, 1, 1], [], []>} : vector<51x40xf32>, vector<40x40xf32>, vector<51x40xf32> -> vector<51x40xf32>
    %159 = arith.addf %155, %158 : vector<51x40xf32>
    %c1024 = arith.constant 1024 : index
    %c0_75 = arith.constant 0 : index
    %160 = vector.load %arg2[%c1024, %c0_75] : memref<2736x40xf32, #tpu.memory_space<vmem>>, vector<40x40xf32>
    %161 = vector.extract_strided_slice %128 {offsets = [12, 0], sizes = [51, 40], strides = [1, 1]} : vector<72x40xf32> to vector<51x40xf32>
    %cst_76 = arith.constant dense<0.000000e+00> : vector<51x40xf32>
    %162 = tpu.matmul %161, %160, %cst_76 {dimension_numbers = #tpu.dot_dimension_numbers<[1], [0], [0], [1], [0, 0, 1, 1], [], []>} : vector<51x40xf32>, vector<40x40xf32>, vector<51x40xf32> -> vector<51x40xf32>
    %163 = arith.addf %159, %162 : vector<51x40xf32>
    %c1064 = arith.constant 1064 : index
    %c0_77 = arith.constant 0 : index
    %164 = vector.load %arg2[%c1064, %c0_77] : memref<2736x40xf32, #tpu.memory_space<vmem>>, vector<40x40xf32>
    %165 = vector.extract_strided_slice %128 {offsets = [13, 0], sizes = [51, 40], strides = [1, 1]} : vector<72x40xf32> to vector<51x40xf32>
    %cst_78 = arith.constant dense<0.000000e+00> : vector<51x40xf32>
    %166 = tpu.matmul %165, %164, %cst_78 {dimension_numbers = #tpu.dot_dimension_numbers<[1], [0], [0], [1], [0, 0, 1, 1], [], []>} : vector<51x40xf32>, vector<40x40xf32>, vector<51x40xf32> -> vector<51x40xf32>
    %167 = arith.addf %163, %166 : vector<51x40xf32>
    %c1104 = arith.constant 1104 : index
    %c0_79 = arith.constant 0 : index
    %168 = vector.load %arg2[%c1104, %c0_79] : memref<2736x40xf32, #tpu.memory_space<vmem>>, vector<40x40xf32>
    %169 = vector.extract_strided_slice %128 {offsets = [14, 0], sizes = [51, 40], strides = [1, 1]} : vector<72x40xf32> to vector<51x40xf32>
    %cst_80 = arith.constant dense<0.000000e+00> : vector<51x40xf32>
    %170 = tpu.matmul %169, %168, %cst_80 {dimension_numbers = #tpu.dot_dimension_numbers<[1], [0], [0], [1], [0, 0, 1, 1], [], []>} : vector<51x40xf32>, vector<40x40xf32>, vector<51x40xf32> -> vector<51x40xf32>
    %171 = arith.addf %167, %170 : vector<51x40xf32>
    %c1144 = arith.constant 1144 : index
    %c0_81 = arith.constant 0 : index
    %172 = vector.load %arg2[%c1144, %c0_81] : memref<2736x40xf32, #tpu.memory_space<vmem>>, vector<40x40xf32>
    %173 = vector.extract_strided_slice %128 {offsets = [15, 0], sizes = [51, 40], strides = [1, 1]} : vector<72x40xf32> to vector<51x40xf32>
    %cst_82 = arith.constant dense<0.000000e+00> : vector<51x40xf32>
    %174 = tpu.matmul %173, %172, %cst_82 {dimension_numbers = #tpu.dot_dimension_numbers<[1], [0], [0], [1], [0, 0, 1, 1], [], []>} : vector<51x40xf32>, vector<40x40xf32>, vector<51x40xf32> -> vector<51x40xf32>
    %175 = arith.addf %171, %174 : vector<51x40xf32>
    %c1184 = arith.constant 1184 : index
    %c0_83 = arith.constant 0 : index
    %176 = vector.load %arg2[%c1184, %c0_83] : memref<2736x40xf32, #tpu.memory_space<vmem>>, vector<40x40xf32>
    %177 = vector.extract_strided_slice %128 {offsets = [18, 0], sizes = [51, 40], strides = [1, 1]} : vector<72x40xf32> to vector<51x40xf32>
    %cst_84 = arith.constant dense<0.000000e+00> : vector<51x40xf32>
    %178 = tpu.matmul %177, %176, %cst_84 {dimension_numbers = #tpu.dot_dimension_numbers<[1], [0], [0], [1], [0, 0, 1, 1], [], []>} : vector<51x40xf32>, vector<40x40xf32>, vector<51x40xf32> -> vector<51x40xf32>
    %179 = arith.addf %175, %178 : vector<51x40xf32>
    %c1224 = arith.constant 1224 : index
    %c0_85 = arith.constant 0 : index
    %180 = vector.load %arg2[%c1224, %c0_85] : memref<2736x40xf32, #tpu.memory_space<vmem>>, vector<40x40xf32>
    %181 = vector.extract_strided_slice %128 {offsets = [19, 0], sizes = [51, 40], strides = [1, 1]} : vector<72x40xf32> to vector<51x40xf32>
    %cst_86 = arith.constant dense<0.000000e+00> : vector<51x40xf32>
    %182 = tpu.matmul %181, %180, %cst_86 {dimension_numbers = #tpu.dot_dimension_numbers<[1], [0], [0], [1], [0, 0, 1, 1], [], []>} : vector<51x40xf32>, vector<40x40xf32>, vector<51x40xf32> -> vector<51x40xf32>
    %183 = arith.addf %179, %182 : vector<51x40xf32>
    %c1264 = arith.constant 1264 : index
    %c0_87 = arith.constant 0 : index
    %184 = vector.load %arg2[%c1264, %c0_87] : memref<2736x40xf32, #tpu.memory_space<vmem>>, vector<40x40xf32>
    %185 = vector.extract_strided_slice %128 {offsets = [20, 0], sizes = [51, 40], strides = [1, 1]} : vector<72x40xf32> to vector<51x40xf32>
    %cst_88 = arith.constant dense<0.000000e+00> : vector<51x40xf32>
    %186 = tpu.matmul %185, %184, %cst_88 {dimension_numbers = #tpu.dot_dimension_numbers<[1], [0], [0], [1], [0, 0, 1, 1], [], []>} : vector<51x40xf32>, vector<40x40xf32>, vector<51x40xf32> -> vector<51x40xf32>
    %187 = arith.addf %183, %186 : vector<51x40xf32>
    %c1304 = arith.constant 1304 : index
    %c0_89 = arith.constant 0 : index
    %188 = vector.load %arg2[%c1304, %c0_89] : memref<2736x40xf32, #tpu.memory_space<vmem>>, vector<40x40xf32>
    %189 = vector.extract_strided_slice %128 {offsets = [21, 0], sizes = [51, 40], strides = [1, 1]} : vector<72x40xf32> to vector<51x40xf32>
    %cst_90 = arith.constant dense<0.000000e+00> : vector<51x40xf32>
    %190 = tpu.matmul %189, %188, %cst_90 {dimension_numbers = #tpu.dot_dimension_numbers<[1], [0], [0], [1], [0, 0, 1, 1], [], []>} : vector<51x40xf32>, vector<40x40xf32>, vector<51x40xf32> -> vector<51x40xf32>
    %191 = arith.addf %187, %190 : vector<51x40xf32>
    %c376 = arith.constant 376 : index
    %c0_91 = arith.constant 0 : index
    %192 = vector.load %arg3[%c376, %c0_91] : memref<392x167xf32, #tpu.memory_space<vmem>>, vector<2x51xf32>
    %cst_92 = arith.constant dense<0.000000e+00> : vector<2x40xf32>
    %193 = tpu.matmul %192, %191, %cst_92 {dimension_numbers = #tpu.dot_dimension_numbers<[1], [0], [0], [1], [0, 0, 1, 1], [], []>} : vector<2x51xf32>, vector<51x40xf32>, vector<2x40xf32> -> vector<2x40xf32>
    %194 = arith.mulf %191, %191 : vector<51x40xf32>
    %cst_93 = arith.constant dense<0.000000e+00> : vector<2x40xf32>
    %195 = tpu.matmul %192, %194, %cst_93 {dimension_numbers = #tpu.dot_dimension_numbers<[1], [0], [0], [1], [0, 0, 1, 1], [], []>} : vector<2x51xf32>, vector<51x40xf32>, vector<2x40xf32> -> vector<2x40xf32>
    %cst_94 = arith.constant 0.111111112 : f32
    %196 = vector.broadcast %cst_94 : f32 to vector<2x40xf32>
    %197 = arith.mulf %193, %196 : vector<2x40xf32>
    %cst_95 = arith.constant 0.111111112 : f32
    %198 = vector.broadcast %cst_95 : f32 to vector<2x40xf32>
    %199 = arith.mulf %195, %198 : vector<2x40xf32>
    %200 = arith.mulf %197, %197 : vector<2x40xf32>
    %201 = arith.subf %199, %200 : vector<2x40xf32>
    %c2672 = arith.constant 2672 : index
    %c0_96 = arith.constant 0 : index
    %202 = vector.load %arg2[%c2672, %c0_96] : memref<2736x40xf32, #tpu.memory_space<vmem>>, vector<8x40xf32>
    %cst_97 = arith.constant dense<0.000000e+00> : vector<2x40xf32>
    %203 = tpu.matmul %0, %202, %cst_97 {dimension_numbers = #tpu.dot_dimension_numbers<[1], [0], [0], [1], [0, 0, 1, 1], [], []>} : vector<2x8xf32>, vector<8x40xf32>, vector<2x40xf32> -> vector<2x40xf32>
    %c2680 = arith.constant 2680 : index
    %c0_98 = arith.constant 0 : index
    %204 = vector.load %arg2[%c2680, %c0_98] : memref<2736x40xf32, #tpu.memory_space<vmem>>, vector<1x40xf32>
    %205 = vector.broadcast %204 : vector<1x40xf32> to vector<2x40xf32>
    %206 = arith.addf %203, %205 : vector<2x40xf32>
    %c2688 = arith.constant 2688 : index
    %c0_99 = arith.constant 0 : index
    %207 = vector.load %arg2[%c2688, %c0_99] : memref<2736x40xf32, #tpu.memory_space<vmem>>, vector<8x40xf32>
    %cst_100 = arith.constant dense<0.000000e+00> : vector<2x40xf32>
    %208 = tpu.matmul %0, %207, %cst_100 {dimension_numbers = #tpu.dot_dimension_numbers<[1], [0], [0], [1], [0, 0, 1, 1], [], []>} : vector<2x8xf32>, vector<8x40xf32>, vector<2x40xf32> -> vector<2x40xf32>
    %c2696 = arith.constant 2696 : index
    %c0_101 = arith.constant 0 : index
    %209 = vector.load %arg2[%c2696, %c0_101] : memref<2736x40xf32, #tpu.memory_space<vmem>>, vector<1x40xf32>
    %210 = vector.broadcast %209 : vector<1x40xf32> to vector<2x40xf32>
    %211 = arith.addf %208, %210 : vector<2x40xf32>
    %cst_102 = arith.constant 9.99999974E-6 : f32
    %212 = vector.broadcast %cst_102 : f32 to vector<2x40xf32>
    %213 = arith.addf %201, %212 : vector<2x40xf32>
    %214 = math.rsqrt %213 : vector<2x40xf32>
    %215 = arith.mulf %214, %206 : vector<2x40xf32>
    %216 = arith.mulf %197, %215 : vector<2x40xf32>
    %217 = arith.subf %211, %216 : vector<2x40xf32>
    %218 = tpu.iota {dimensions = array<i32: 0>} : vector<51x40xi32>
    %219 = vector.extract_strided_slice %215 {offsets = [1, 0], sizes = [1, 40], strides = [1, 1]} : vector<2x40xf32> to vector<1x40xf32>
    %220 = vector.shape_cast %219 : vector<1x40xf32> to vector<1x40xf32>
    %221 = vector.broadcast %220 : vector<1x40xf32> to vector<51x40xf32>
    %222 = vector.extract_strided_slice %217 {offsets = [1, 0], sizes = [1, 40], strides = [1, 1]} : vector<2x40xf32> to vector<1x40xf32>
    %223 = vector.shape_cast %222 : vector<1x40xf32> to vector<1x40xf32>
    %224 = vector.broadcast %223 : vector<1x40xf32> to vector<51x40xf32>
    %c36_i32 = arith.constant 36 : i32
    %225 = vector.broadcast %c36_i32 : i32 to vector<51x40xi32>
    %226 = arith.cmpi slt, %218, %225 : vector<51x40xi32>
    %227 = vector.extract_strided_slice %215 {offsets = [0, 0], sizes = [1, 40], strides = [1, 1]} : vector<2x40xf32> to vector<1x40xf32>
    %228 = vector.shape_cast %227 : vector<1x40xf32> to vector<1x40xf32>
    %229 = vector.broadcast %228 : vector<1x40xf32> to vector<51x40xf32>
    %230 = arith.select %226, %229, %221 : vector<51x40xi1>, vector<51x40xf32>
    %231 = vector.extract_strided_slice %217 {offsets = [0, 0], sizes = [1, 40], strides = [1, 1]} : vector<2x40xf32> to vector<1x40xf32>
    %232 = vector.shape_cast %231 : vector<1x40xf32> to vector<1x40xf32>
    %233 = vector.broadcast %232 : vector<1x40xf32> to vector<51x40xf32>
    %234 = arith.select %226, %233, %224 : vector<51x40xi1>, vector<51x40xf32>
    %235 = arith.mulf %191, %230 : vector<51x40xf32>
    %236 = arith.addf %235, %234 : vector<51x40xf32>
    %cst_103 = arith.constant 0.000000e+00 : f32
    %237 = vector.broadcast %cst_103 : f32 to vector<51x40xf32>
    %238 = arith.cmpf ogt, %236, %237 : vector<51x40xf32>
    %cst_104 = arith.constant 2.000000e-01 : f32
    %239 = vector.broadcast %cst_104 : f32 to vector<51x40xf32>
    %240 = arith.mulf %239, %236 : vector<51x40xf32>
    %241 = arith.select %238, %236, %240 : vector<51x40xi1>, vector<51x40xf32>
    %c272 = arith.constant 272 : index
    %c0_105 = arith.constant 0 : index
    %242 = vector.load %arg3[%c272, %c0_105] : memref<392x167xf32, #tpu.memory_space<vmem>>, vector<50x51xf32>
    %cst_106 = arith.constant dense<0.000000e+00> : vector<50x40xf32>
    %243 = tpu.matmul %242, %241, %cst_106 {dimension_numbers = #tpu.dot_dimension_numbers<[1], [0], [0], [1], [0, 0, 1, 1], [], []>} : vector<50x51xf32>, vector<51x40xf32>, vector<50x40xf32> -> vector<50x40xf32>
    %c1344 = arith.constant 1344 : index
    %c0_107 = arith.constant 0 : index
    %244 = vector.load %arg2[%c1344, %c0_107] : memref<2736x40xf32, #tpu.memory_space<vmem>>, vector<40x40xf32>
    %245 = vector.extract_strided_slice %243 {offsets = [0, 0], sizes = [32, 40], strides = [1, 1]} : vector<50x40xf32> to vector<32x40xf32>
    %cst_108 = arith.constant dense<0.000000e+00> : vector<32x40xf32>
    %246 = tpu.matmul %245, %244, %cst_108 {dimension_numbers = #tpu.dot_dimension_numbers<[1], [0], [0], [1], [0, 0, 1, 1], [], []>} : vector<32x40xf32>, vector<40x40xf32>, vector<32x40xf32> -> vector<32x40xf32>
    %c1384 = arith.constant 1384 : index
    %c0_109 = arith.constant 0 : index
    %247 = vector.load %arg2[%c1384, %c0_109] : memref<2736x40xf32, #tpu.memory_space<vmem>>, vector<40x40xf32>
    %248 = vector.extract_strided_slice %243 {offsets = [1, 0], sizes = [32, 40], strides = [1, 1]} : vector<50x40xf32> to vector<32x40xf32>
    %cst_110 = arith.constant dense<0.000000e+00> : vector<32x40xf32>
    %249 = tpu.matmul %248, %247, %cst_110 {dimension_numbers = #tpu.dot_dimension_numbers<[1], [0], [0], [1], [0, 0, 1, 1], [], []>} : vector<32x40xf32>, vector<40x40xf32>, vector<32x40xf32> -> vector<32x40xf32>
    %250 = arith.addf %246, %249 : vector<32x40xf32>
    %c1424 = arith.constant 1424 : index
    %c0_111 = arith.constant 0 : index
    %251 = vector.load %arg2[%c1424, %c0_111] : memref<2736x40xf32, #tpu.memory_space<vmem>>, vector<40x40xf32>
    %252 = vector.extract_strided_slice %243 {offsets = [2, 0], sizes = [32, 40], strides = [1, 1]} : vector<50x40xf32> to vector<32x40xf32>
    %cst_112 = arith.constant dense<0.000000e+00> : vector<32x40xf32>
    %253 = tpu.matmul %252, %251, %cst_112 {dimension_numbers = #tpu.dot_dimension_numbers<[1], [0], [0], [1], [0, 0, 1, 1], [], []>} : vector<32x40xf32>, vector<40x40xf32>, vector<32x40xf32> -> vector<32x40xf32>
    %254 = arith.addf %250, %253 : vector<32x40xf32>
    %c1464 = arith.constant 1464 : index
    %c0_113 = arith.constant 0 : index
    %255 = vector.load %arg2[%c1464, %c0_113] : memref<2736x40xf32, #tpu.memory_space<vmem>>, vector<40x40xf32>
    %256 = vector.extract_strided_slice %243 {offsets = [3, 0], sizes = [32, 40], strides = [1, 1]} : vector<50x40xf32> to vector<32x40xf32>
    %cst_114 = arith.constant dense<0.000000e+00> : vector<32x40xf32>
    %257 = tpu.matmul %256, %255, %cst_114 {dimension_numbers = #tpu.dot_dimension_numbers<[1], [0], [0], [1], [0, 0, 1, 1], [], []>} : vector<32x40xf32>, vector<40x40xf32>, vector<32x40xf32> -> vector<32x40xf32>
    %258 = arith.addf %254, %257 : vector<32x40xf32>
    %c1504 = arith.constant 1504 : index
    %c0_115 = arith.constant 0 : index
    %259 = vector.load %arg2[%c1504, %c0_115] : memref<2736x40xf32, #tpu.memory_space<vmem>>, vector<40x40xf32>
    %260 = vector.extract_strided_slice %243 {offsets = [5, 0], sizes = [32, 40], strides = [1, 1]} : vector<50x40xf32> to vector<32x40xf32>
    %cst_116 = arith.constant dense<0.000000e+00> : vector<32x40xf32>
    %261 = tpu.matmul %260, %259, %cst_116 {dimension_numbers = #tpu.dot_dimension_numbers<[1], [0], [0], [1], [0, 0, 1, 1], [], []>} : vector<32x40xf32>, vector<40x40xf32>, vector<32x40xf32> -> vector<32x40xf32>
    %262 = arith.addf %258, %261 : vector<32x40xf32>
    %c1544 = arith.constant 1544 : index
    %c0_117 = arith.constant 0 : index
    %263 = vector.load %arg2[%c1544, %c0_117] : memref<2736x40xf32, #tpu.memory_space<vmem>>, vector<40x40xf32>
    %264 = vector.extract_strided_slice %243 {offsets = [6, 0], sizes = [32, 40], strides = [1, 1]} : vector<50x40xf32> to vector<32x40xf32>
    %cst_118 = arith.constant dense<0.000000e+00> : vector<32x40xf32>
    %265 = tpu.matmul %264, %263, %cst_118 {dimension_numbers = #tpu.dot_dimension_numbers<[1], [0], [0], [1], [0, 0, 1, 1], [], []>} : vector<32x40xf32>, vector<40x40xf32>, vector<32x40xf32> -> vector<32x40xf32>
    %266 = arith.addf %262, %265 : vector<32x40xf32>
    %c1584 = arith.constant 1584 : index
    %c0_119 = arith.constant 0 : index
    %267 = vector.load %arg2[%c1584, %c0_119] : memref<2736x40xf32, #tpu.memory_space<vmem>>, vector<40x40xf32>
    %268 = vector.extract_strided_slice %243 {offsets = [7, 0], sizes = [32, 40], strides = [1, 1]} : vector<50x40xf32> to vector<32x40xf32>
    %cst_120 = arith.constant dense<0.000000e+00> : vector<32x40xf32>
    %269 = tpu.matmul %268, %267, %cst_120 {dimension_numbers = #tpu.dot_dimension_numbers<[1], [0], [0], [1], [0, 0, 1, 1], [], []>} : vector<32x40xf32>, vector<40x40xf32>, vector<32x40xf32> -> vector<32x40xf32>
    %270 = arith.addf %266, %269 : vector<32x40xf32>
    %c1624 = arith.constant 1624 : index
    %c0_121 = arith.constant 0 : index
    %271 = vector.load %arg2[%c1624, %c0_121] : memref<2736x40xf32, #tpu.memory_space<vmem>>, vector<40x40xf32>
    %272 = vector.extract_strided_slice %243 {offsets = [8, 0], sizes = [32, 40], strides = [1, 1]} : vector<50x40xf32> to vector<32x40xf32>
    %cst_122 = arith.constant dense<0.000000e+00> : vector<32x40xf32>
    %273 = tpu.matmul %272, %271, %cst_122 {dimension_numbers = #tpu.dot_dimension_numbers<[1], [0], [0], [1], [0, 0, 1, 1], [], []>} : vector<32x40xf32>, vector<40x40xf32>, vector<32x40xf32> -> vector<32x40xf32>
    %274 = arith.addf %270, %273 : vector<32x40xf32>
    %c1664 = arith.constant 1664 : index
    %c0_123 = arith.constant 0 : index
    %275 = vector.load %arg2[%c1664, %c0_123] : memref<2736x40xf32, #tpu.memory_space<vmem>>, vector<40x40xf32>
    %276 = vector.extract_strided_slice %243 {offsets = [10, 0], sizes = [32, 40], strides = [1, 1]} : vector<50x40xf32> to vector<32x40xf32>
    %cst_124 = arith.constant dense<0.000000e+00> : vector<32x40xf32>
    %277 = tpu.matmul %276, %275, %cst_124 {dimension_numbers = #tpu.dot_dimension_numbers<[1], [0], [0], [1], [0, 0, 1, 1], [], []>} : vector<32x40xf32>, vector<40x40xf32>, vector<32x40xf32> -> vector<32x40xf32>
    %278 = arith.addf %274, %277 : vector<32x40xf32>
    %c1704 = arith.constant 1704 : index
    %c0_125 = arith.constant 0 : index
    %279 = vector.load %arg2[%c1704, %c0_125] : memref<2736x40xf32, #tpu.memory_space<vmem>>, vector<40x40xf32>
    %280 = vector.extract_strided_slice %243 {offsets = [11, 0], sizes = [32, 40], strides = [1, 1]} : vector<50x40xf32> to vector<32x40xf32>
    %cst_126 = arith.constant dense<0.000000e+00> : vector<32x40xf32>
    %281 = tpu.matmul %280, %279, %cst_126 {dimension_numbers = #tpu.dot_dimension_numbers<[1], [0], [0], [1], [0, 0, 1, 1], [], []>} : vector<32x40xf32>, vector<40x40xf32>, vector<32x40xf32> -> vector<32x40xf32>
    %282 = arith.addf %278, %281 : vector<32x40xf32>
    %c1744 = arith.constant 1744 : index
    %c0_127 = arith.constant 0 : index
    %283 = vector.load %arg2[%c1744, %c0_127] : memref<2736x40xf32, #tpu.memory_space<vmem>>, vector<40x40xf32>
    %284 = vector.extract_strided_slice %243 {offsets = [12, 0], sizes = [32, 40], strides = [1, 1]} : vector<50x40xf32> to vector<32x40xf32>
    %cst_128 = arith.constant dense<0.000000e+00> : vector<32x40xf32>
    %285 = tpu.matmul %284, %283, %cst_128 {dimension_numbers = #tpu.dot_dimension_numbers<[1], [0], [0], [1], [0, 0, 1, 1], [], []>} : vector<32x40xf32>, vector<40x40xf32>, vector<32x40xf32> -> vector<32x40xf32>
    %286 = arith.addf %282, %285 : vector<32x40xf32>
    %c1784 = arith.constant 1784 : index
    %c0_129 = arith.constant 0 : index
    %287 = vector.load %arg2[%c1784, %c0_129] : memref<2736x40xf32, #tpu.memory_space<vmem>>, vector<40x40xf32>
    %288 = vector.extract_strided_slice %243 {offsets = [13, 0], sizes = [32, 40], strides = [1, 1]} : vector<50x40xf32> to vector<32x40xf32>
    %cst_130 = arith.constant dense<0.000000e+00> : vector<32x40xf32>
    %289 = tpu.matmul %288, %287, %cst_130 {dimension_numbers = #tpu.dot_dimension_numbers<[1], [0], [0], [1], [0, 0, 1, 1], [], []>} : vector<32x40xf32>, vector<40x40xf32>, vector<32x40xf32> -> vector<32x40xf32>
    %290 = arith.addf %286, %289 : vector<32x40xf32>
    %c1824 = arith.constant 1824 : index
    %c0_131 = arith.constant 0 : index
    %291 = vector.load %arg2[%c1824, %c0_131] : memref<2736x40xf32, #tpu.memory_space<vmem>>, vector<40x40xf32>
    %292 = vector.extract_strided_slice %243 {offsets = [15, 0], sizes = [32, 40], strides = [1, 1]} : vector<50x40xf32> to vector<32x40xf32>
    %cst_132 = arith.constant dense<0.000000e+00> : vector<32x40xf32>
    %293 = tpu.matmul %292, %291, %cst_132 {dimension_numbers = #tpu.dot_dimension_numbers<[1], [0], [0], [1], [0, 0, 1, 1], [], []>} : vector<32x40xf32>, vector<40x40xf32>, vector<32x40xf32> -> vector<32x40xf32>
    %294 = arith.addf %290, %293 : vector<32x40xf32>
    %c1864 = arith.constant 1864 : index
    %c0_133 = arith.constant 0 : index
    %295 = vector.load %arg2[%c1864, %c0_133] : memref<2736x40xf32, #tpu.memory_space<vmem>>, vector<40x40xf32>
    %296 = vector.extract_strided_slice %243 {offsets = [16, 0], sizes = [32, 40], strides = [1, 1]} : vector<50x40xf32> to vector<32x40xf32>
    %cst_134 = arith.constant dense<0.000000e+00> : vector<32x40xf32>
    %297 = tpu.matmul %296, %295, %cst_134 {dimension_numbers = #tpu.dot_dimension_numbers<[1], [0], [0], [1], [0, 0, 1, 1], [], []>} : vector<32x40xf32>, vector<40x40xf32>, vector<32x40xf32> -> vector<32x40xf32>
    %298 = arith.addf %294, %297 : vector<32x40xf32>
    %c1904 = arith.constant 1904 : index
    %c0_135 = arith.constant 0 : index
    %299 = vector.load %arg2[%c1904, %c0_135] : memref<2736x40xf32, #tpu.memory_space<vmem>>, vector<40x40xf32>
    %300 = vector.extract_strided_slice %243 {offsets = [17, 0], sizes = [32, 40], strides = [1, 1]} : vector<50x40xf32> to vector<32x40xf32>
    %cst_136 = arith.constant dense<0.000000e+00> : vector<32x40xf32>
    %301 = tpu.matmul %300, %299, %cst_136 {dimension_numbers = #tpu.dot_dimension_numbers<[1], [0], [0], [1], [0, 0, 1, 1], [], []>} : vector<32x40xf32>, vector<40x40xf32>, vector<32x40xf32> -> vector<32x40xf32>
    %302 = arith.addf %298, %301 : vector<32x40xf32>
    %c1944 = arith.constant 1944 : index
    %c0_137 = arith.constant 0 : index
    %303 = vector.load %arg2[%c1944, %c0_137] : memref<2736x40xf32, #tpu.memory_space<vmem>>, vector<40x40xf32>
    %304 = vector.extract_strided_slice %243 {offsets = [18, 0], sizes = [32, 40], strides = [1, 1]} : vector<50x40xf32> to vector<32x40xf32>
    %cst_138 = arith.constant dense<0.000000e+00> : vector<32x40xf32>
    %305 = tpu.matmul %304, %303, %cst_138 {dimension_numbers = #tpu.dot_dimension_numbers<[1], [0], [0], [1], [0, 0, 1, 1], [], []>} : vector<32x40xf32>, vector<40x40xf32>, vector<32x40xf32> -> vector<32x40xf32>
    %306 = arith.addf %302, %305 : vector<32x40xf32>
    %c384_139 = arith.constant 384 : index
    %c0_140 = arith.constant 0 : index
    %307 = vector.load %arg3[%c384_139, %c0_140] : memref<392x167xf32, #tpu.memory_space<vmem>>, vector<2x32xf32>
    %cst_141 = arith.constant dense<0.000000e+00> : vector<2x40xf32>
    %308 = tpu.matmul %307, %306, %cst_141 {dimension_numbers = #tpu.dot_dimension_numbers<[1], [0], [0], [1], [0, 0, 1, 1], [], []>} : vector<2x32xf32>, vector<32x40xf32>, vector<2x40xf32> -> vector<2x40xf32>
    %309 = arith.mulf %306, %306 : vector<32x40xf32>
    %cst_142 = arith.constant dense<0.000000e+00> : vector<2x40xf32>
    %310 = tpu.matmul %307, %309, %cst_142 {dimension_numbers = #tpu.dot_dimension_numbers<[1], [0], [0], [1], [0, 0, 1, 1], [], []>} : vector<2x32xf32>, vector<32x40xf32>, vector<2x40xf32> -> vector<2x40xf32>
    %cst_143 = arith.constant 2.500000e-01 : f32
    %311 = vector.broadcast %cst_143 : f32 to vector<2x40xf32>
    %312 = arith.mulf %308, %311 : vector<2x40xf32>
    %cst_144 = arith.constant 2.500000e-01 : f32
    %313 = vector.broadcast %cst_144 : f32 to vector<2x40xf32>
    %314 = arith.mulf %310, %313 : vector<2x40xf32>
    %315 = arith.mulf %312, %312 : vector<2x40xf32>
    %316 = arith.subf %314, %315 : vector<2x40xf32>
    %c2704 = arith.constant 2704 : index
    %c0_145 = arith.constant 0 : index
    %317 = vector.load %arg2[%c2704, %c0_145] : memref<2736x40xf32, #tpu.memory_space<vmem>>, vector<8x40xf32>
    %cst_146 = arith.constant dense<0.000000e+00> : vector<2x40xf32>
    %318 = tpu.matmul %0, %317, %cst_146 {dimension_numbers = #tpu.dot_dimension_numbers<[1], [0], [0], [1], [0, 0, 1, 1], [], []>} : vector<2x8xf32>, vector<8x40xf32>, vector<2x40xf32> -> vector<2x40xf32>
    %c2712 = arith.constant 2712 : index
    %c0_147 = arith.constant 0 : index
    %319 = vector.load %arg2[%c2712, %c0_147] : memref<2736x40xf32, #tpu.memory_space<vmem>>, vector<1x40xf32>
    %320 = vector.broadcast %319 : vector<1x40xf32> to vector<2x40xf32>
    %321 = arith.addf %318, %320 : vector<2x40xf32>
    %c2720 = arith.constant 2720 : index
    %c0_148 = arith.constant 0 : index
    %322 = vector.load %arg2[%c2720, %c0_148] : memref<2736x40xf32, #tpu.memory_space<vmem>>, vector<8x40xf32>
    %cst_149 = arith.constant dense<0.000000e+00> : vector<2x40xf32>
    %323 = tpu.matmul %0, %322, %cst_149 {dimension_numbers = #tpu.dot_dimension_numbers<[1], [0], [0], [1], [0, 0, 1, 1], [], []>} : vector<2x8xf32>, vector<8x40xf32>, vector<2x40xf32> -> vector<2x40xf32>
    %c2728 = arith.constant 2728 : index
    %c0_150 = arith.constant 0 : index
    %324 = vector.load %arg2[%c2728, %c0_150] : memref<2736x40xf32, #tpu.memory_space<vmem>>, vector<1x40xf32>
    %325 = vector.broadcast %324 : vector<1x40xf32> to vector<2x40xf32>
    %326 = arith.addf %323, %325 : vector<2x40xf32>
    %cst_151 = arith.constant 9.99999974E-6 : f32
    %327 = vector.broadcast %cst_151 : f32 to vector<2x40xf32>
    %328 = arith.addf %316, %327 : vector<2x40xf32>
    %329 = math.rsqrt %328 : vector<2x40xf32>
    %330 = arith.mulf %329, %321 : vector<2x40xf32>
    %331 = arith.mulf %312, %330 : vector<2x40xf32>
    %332 = arith.subf %326, %331 : vector<2x40xf32>
    %333 = tpu.iota {dimensions = array<i32: 0>} : vector<32x40xi32>
    %334 = vector.extract_strided_slice %330 {offsets = [1, 0], sizes = [1, 40], strides = [1, 1]} : vector<2x40xf32> to vector<1x40xf32>
    %335 = vector.shape_cast %334 : vector<1x40xf32> to vector<1x40xf32>
    %336 = vector.broadcast %335 : vector<1x40xf32> to vector<32x40xf32>
    %337 = vector.extract_strided_slice %332 {offsets = [1, 0], sizes = [1, 40], strides = [1, 1]} : vector<2x40xf32> to vector<1x40xf32>
    %338 = vector.shape_cast %337 : vector<1x40xf32> to vector<1x40xf32>
    %339 = vector.broadcast %338 : vector<1x40xf32> to vector<32x40xf32>
    %c25_i32 = arith.constant 25 : i32
    %340 = vector.broadcast %c25_i32 : i32 to vector<32x40xi32>
    %341 = arith.cmpi slt, %333, %340 : vector<32x40xi32>
    %342 = vector.extract_strided_slice %330 {offsets = [0, 0], sizes = [1, 40], strides = [1, 1]} : vector<2x40xf32> to vector<1x40xf32>
    %343 = vector.shape_cast %342 : vector<1x40xf32> to vector<1x40xf32>
    %344 = vector.broadcast %343 : vector<1x40xf32> to vector<32x40xf32>
    %345 = arith.select %341, %344, %336 : vector<32x40xi1>, vector<32x40xf32>
    %346 = vector.extract_strided_slice %332 {offsets = [0, 0], sizes = [1, 40], strides = [1, 1]} : vector<2x40xf32> to vector<1x40xf32>
    %347 = vector.shape_cast %346 : vector<1x40xf32> to vector<1x40xf32>
    %348 = vector.broadcast %347 : vector<1x40xf32> to vector<32x40xf32>
    %349 = arith.select %341, %348, %339 : vector<32x40xi1>, vector<32x40xf32>
    %350 = arith.mulf %306, %345 : vector<32x40xf32>
    %351 = arith.addf %350, %349 : vector<32x40xf32>
    %cst_152 = arith.constant 0.000000e+00 : f32
    %352 = vector.broadcast %cst_152 : f32 to vector<32x40xf32>
    %353 = arith.cmpf ogt, %351, %352 : vector<32x40xf32>
    %cst_153 = arith.constant 2.000000e-01 : f32
    %354 = vector.broadcast %cst_153 : f32 to vector<32x40xf32>
    %355 = arith.mulf %354, %351 : vector<32x40xf32>
    %356 = arith.select %353, %351, %355 : vector<32x40xi1>, vector<32x40xf32>
    %c328 = arith.constant 328 : index
    %c0_154 = arith.constant 0 : index
    %357 = vector.load %arg3[%c328, %c0_154] : memref<392x167xf32, #tpu.memory_space<vmem>>, vector<32x32xf32>
    %cst_155 = arith.constant dense<0.000000e+00> : vector<32x40xf32>
    %358 = tpu.matmul %357, %356, %cst_155 {dimension_numbers = #tpu.dot_dimension_numbers<[1], [0], [0], [1], [0, 0, 1, 1], [], []>} : vector<32x32xf32>, vector<32x40xf32>, vector<32x40xf32> -> vector<32x40xf32>
    %c1984 = arith.constant 1984 : index
    %c0_156 = arith.constant 0 : index
    %359 = vector.load %arg2[%c1984, %c0_156] : memref<2736x40xf32, #tpu.memory_space<vmem>>, vector<40x40xf32>
    %360 = vector.extract_strided_slice %358 {offsets = [0, 0], sizes = [17, 40], strides = [1, 1]} : vector<32x40xf32> to vector<17x40xf32>
    %cst_157 = arith.constant dense<0.000000e+00> : vector<17x40xf32>
    %361 = tpu.matmul %360, %359, %cst_157 {dimension_numbers = #tpu.dot_dimension_numbers<[1], [0], [0], [1], [0, 0, 1, 1], [], []>} : vector<17x40xf32>, vector<40x40xf32>, vector<17x40xf32> -> vector<17x40xf32>
    %c2024 = arith.constant 2024 : index
    %c0_158 = arith.constant 0 : index
    %362 = vector.load %arg2[%c2024, %c0_158] : memref<2736x40xf32, #tpu.memory_space<vmem>>, vector<40x40xf32>
    %363 = vector.extract_strided_slice %358 {offsets = [1, 0], sizes = [17, 40], strides = [1, 1]} : vector<32x40xf32> to vector<17x40xf32>
    %cst_159 = arith.constant dense<0.000000e+00> : vector<17x40xf32>
    %364 = tpu.matmul %363, %362, %cst_159 {dimension_numbers = #tpu.dot_dimension_numbers<[1], [0], [0], [1], [0, 0, 1, 1], [], []>} : vector<17x40xf32>, vector<40x40xf32>, vector<17x40xf32> -> vector<17x40xf32>
    %365 = arith.addf %361, %364 : vector<17x40xf32>
    %c2064 = arith.constant 2064 : index
    %c0_160 = arith.constant 0 : index
    %366 = vector.load %arg2[%c2064, %c0_160] : memref<2736x40xf32, #tpu.memory_space<vmem>>, vector<40x40xf32>
    %367 = vector.extract_strided_slice %358 {offsets = [2, 0], sizes = [17, 40], strides = [1, 1]} : vector<32x40xf32> to vector<17x40xf32>
    %cst_161 = arith.constant dense<0.000000e+00> : vector<17x40xf32>
    %368 = tpu.matmul %367, %366, %cst_161 {dimension_numbers = #tpu.dot_dimension_numbers<[1], [0], [0], [1], [0, 0, 1, 1], [], []>} : vector<17x40xf32>, vector<40x40xf32>, vector<17x40xf32> -> vector<17x40xf32>
    %369 = arith.addf %365, %368 : vector<17x40xf32>
    %c2104 = arith.constant 2104 : index
    %c0_162 = arith.constant 0 : index
    %370 = vector.load %arg2[%c2104, %c0_162] : memref<2736x40xf32, #tpu.memory_space<vmem>>, vector<40x40xf32>
    %371 = vector.extract_strided_slice %358 {offsets = [3, 0], sizes = [17, 40], strides = [1, 1]} : vector<32x40xf32> to vector<17x40xf32>
    %cst_163 = arith.constant dense<0.000000e+00> : vector<17x40xf32>
    %372 = tpu.matmul %371, %370, %cst_163 {dimension_numbers = #tpu.dot_dimension_numbers<[1], [0], [0], [1], [0, 0, 1, 1], [], []>} : vector<17x40xf32>, vector<40x40xf32>, vector<17x40xf32> -> vector<17x40xf32>
    %373 = arith.addf %369, %372 : vector<17x40xf32>
    %c2144 = arith.constant 2144 : index
    %c0_164 = arith.constant 0 : index
    %374 = vector.load %arg2[%c2144, %c0_164] : memref<2736x40xf32, #tpu.memory_space<vmem>>, vector<40x40xf32>
    %375 = vector.extract_strided_slice %358 {offsets = [4, 0], sizes = [17, 40], strides = [1, 1]} : vector<32x40xf32> to vector<17x40xf32>
    %cst_165 = arith.constant dense<0.000000e+00> : vector<17x40xf32>
    %376 = tpu.matmul %375, %374, %cst_165 {dimension_numbers = #tpu.dot_dimension_numbers<[1], [0], [0], [1], [0, 0, 1, 1], [], []>} : vector<17x40xf32>, vector<40x40xf32>, vector<17x40xf32> -> vector<17x40xf32>
    %377 = arith.addf %373, %376 : vector<17x40xf32>
    %c2184 = arith.constant 2184 : index
    %c0_166 = arith.constant 0 : index
    %378 = vector.load %arg2[%c2184, %c0_166] : memref<2736x40xf32, #tpu.memory_space<vmem>>, vector<40x40xf32>
    %379 = vector.extract_strided_slice %358 {offsets = [5, 0], sizes = [17, 40], strides = [1, 1]} : vector<32x40xf32> to vector<17x40xf32>
    %cst_167 = arith.constant dense<0.000000e+00> : vector<17x40xf32>
    %380 = tpu.matmul %379, %378, %cst_167 {dimension_numbers = #tpu.dot_dimension_numbers<[1], [0], [0], [1], [0, 0, 1, 1], [], []>} : vector<17x40xf32>, vector<40x40xf32>, vector<17x40xf32> -> vector<17x40xf32>
    %381 = arith.addf %377, %380 : vector<17x40xf32>
    %c2224 = arith.constant 2224 : index
    %c0_168 = arith.constant 0 : index
    %382 = vector.load %arg2[%c2224, %c0_168] : memref<2736x40xf32, #tpu.memory_space<vmem>>, vector<40x40xf32>
    %383 = vector.extract_strided_slice %358 {offsets = [6, 0], sizes = [17, 40], strides = [1, 1]} : vector<32x40xf32> to vector<17x40xf32>
    %cst_169 = arith.constant dense<0.000000e+00> : vector<17x40xf32>
    %384 = tpu.matmul %383, %382, %cst_169 {dimension_numbers = #tpu.dot_dimension_numbers<[1], [0], [0], [1], [0, 0, 1, 1], [], []>} : vector<17x40xf32>, vector<40x40xf32>, vector<17x40xf32> -> vector<17x40xf32>
    %385 = arith.addf %381, %384 : vector<17x40xf32>
    %c2264 = arith.constant 2264 : index
    %c0_170 = arith.constant 0 : index
    %386 = vector.load %arg2[%c2264, %c0_170] : memref<2736x40xf32, #tpu.memory_space<vmem>>, vector<40x40xf32>
    %387 = vector.extract_strided_slice %358 {offsets = [7, 0], sizes = [17, 40], strides = [1, 1]} : vector<32x40xf32> to vector<17x40xf32>
    %cst_171 = arith.constant dense<0.000000e+00> : vector<17x40xf32>
    %388 = tpu.matmul %387, %386, %cst_171 {dimension_numbers = #tpu.dot_dimension_numbers<[1], [0], [0], [1], [0, 0, 1, 1], [], []>} : vector<17x40xf32>, vector<40x40xf32>, vector<17x40xf32> -> vector<17x40xf32>
    %389 = arith.addf %385, %388 : vector<17x40xf32>
    %c2304 = arith.constant 2304 : index
    %c0_172 = arith.constant 0 : index
    %390 = vector.load %arg2[%c2304, %c0_172] : memref<2736x40xf32, #tpu.memory_space<vmem>>, vector<40x40xf32>
    %391 = vector.extract_strided_slice %358 {offsets = [8, 0], sizes = [17, 40], strides = [1, 1]} : vector<32x40xf32> to vector<17x40xf32>
    %cst_173 = arith.constant dense<0.000000e+00> : vector<17x40xf32>
    %392 = tpu.matmul %391, %390, %cst_173 {dimension_numbers = #tpu.dot_dimension_numbers<[1], [0], [0], [1], [0, 0, 1, 1], [], []>} : vector<17x40xf32>, vector<40x40xf32>, vector<17x40xf32> -> vector<17x40xf32>
    %393 = arith.addf %389, %392 : vector<17x40xf32>
    %c2344 = arith.constant 2344 : index
    %c0_174 = arith.constant 0 : index
    %394 = vector.load %arg2[%c2344, %c0_174] : memref<2736x40xf32, #tpu.memory_space<vmem>>, vector<40x40xf32>
    %395 = vector.extract_strided_slice %358 {offsets = [9, 0], sizes = [17, 40], strides = [1, 1]} : vector<32x40xf32> to vector<17x40xf32>
    %cst_175 = arith.constant dense<0.000000e+00> : vector<17x40xf32>
    %396 = tpu.matmul %395, %394, %cst_175 {dimension_numbers = #tpu.dot_dimension_numbers<[1], [0], [0], [1], [0, 0, 1, 1], [], []>} : vector<17x40xf32>, vector<40x40xf32>, vector<17x40xf32> -> vector<17x40xf32>
    %397 = arith.addf %393, %396 : vector<17x40xf32>
    %c2384 = arith.constant 2384 : index
    %c0_176 = arith.constant 0 : index
    %398 = vector.load %arg2[%c2384, %c0_176] : memref<2736x40xf32, #tpu.memory_space<vmem>>, vector<40x40xf32>
    %399 = vector.extract_strided_slice %358 {offsets = [10, 0], sizes = [17, 40], strides = [1, 1]} : vector<32x40xf32> to vector<17x40xf32>
    %cst_177 = arith.constant dense<0.000000e+00> : vector<17x40xf32>
    %400 = tpu.matmul %399, %398, %cst_177 {dimension_numbers = #tpu.dot_dimension_numbers<[1], [0], [0], [1], [0, 0, 1, 1], [], []>} : vector<17x40xf32>, vector<40x40xf32>, vector<17x40xf32> -> vector<17x40xf32>
    %401 = arith.addf %397, %400 : vector<17x40xf32>
    %c2424 = arith.constant 2424 : index
    %c0_178 = arith.constant 0 : index
    %402 = vector.load %arg2[%c2424, %c0_178] : memref<2736x40xf32, #tpu.memory_space<vmem>>, vector<40x40xf32>
    %403 = vector.extract_strided_slice %358 {offsets = [11, 0], sizes = [17, 40], strides = [1, 1]} : vector<32x40xf32> to vector<17x40xf32>
    %cst_179 = arith.constant dense<0.000000e+00> : vector<17x40xf32>
    %404 = tpu.matmul %403, %402, %cst_179 {dimension_numbers = #tpu.dot_dimension_numbers<[1], [0], [0], [1], [0, 0, 1, 1], [], []>} : vector<17x40xf32>, vector<40x40xf32>, vector<17x40xf32> -> vector<17x40xf32>
    %405 = arith.addf %401, %404 : vector<17x40xf32>
    %c2464 = arith.constant 2464 : index
    %c0_180 = arith.constant 0 : index
    %406 = vector.load %arg2[%c2464, %c0_180] : memref<2736x40xf32, #tpu.memory_space<vmem>>, vector<40x40xf32>
    %407 = vector.extract_strided_slice %358 {offsets = [12, 0], sizes = [17, 40], strides = [1, 1]} : vector<32x40xf32> to vector<17x40xf32>
    %cst_181 = arith.constant dense<0.000000e+00> : vector<17x40xf32>
    %408 = tpu.matmul %407, %406, %cst_181 {dimension_numbers = #tpu.dot_dimension_numbers<[1], [0], [0], [1], [0, 0, 1, 1], [], []>} : vector<17x40xf32>, vector<40x40xf32>, vector<17x40xf32> -> vector<17x40xf32>
    %409 = arith.addf %405, %408 : vector<17x40xf32>
    %c2504 = arith.constant 2504 : index
    %c0_182 = arith.constant 0 : index
    %410 = vector.load %arg2[%c2504, %c0_182] : memref<2736x40xf32, #tpu.memory_space<vmem>>, vector<40x40xf32>
    %411 = vector.extract_strided_slice %358 {offsets = [13, 0], sizes = [17, 40], strides = [1, 1]} : vector<32x40xf32> to vector<17x40xf32>
    %cst_183 = arith.constant dense<0.000000e+00> : vector<17x40xf32>
    %412 = tpu.matmul %411, %410, %cst_183 {dimension_numbers = #tpu.dot_dimension_numbers<[1], [0], [0], [1], [0, 0, 1, 1], [], []>} : vector<17x40xf32>, vector<40x40xf32>, vector<17x40xf32> -> vector<17x40xf32>
    %413 = arith.addf %409, %412 : vector<17x40xf32>
    %c2544 = arith.constant 2544 : index
    %c0_184 = arith.constant 0 : index
    %414 = vector.load %arg2[%c2544, %c0_184] : memref<2736x40xf32, #tpu.memory_space<vmem>>, vector<40x40xf32>
    %415 = vector.extract_strided_slice %358 {offsets = [14, 0], sizes = [17, 40], strides = [1, 1]} : vector<32x40xf32> to vector<17x40xf32>
    %cst_185 = arith.constant dense<0.000000e+00> : vector<17x40xf32>
    %416 = tpu.matmul %415, %414, %cst_185 {dimension_numbers = #tpu.dot_dimension_numbers<[1], [0], [0], [1], [0, 0, 1, 1], [], []>} : vector<17x40xf32>, vector<40x40xf32>, vector<17x40xf32> -> vector<17x40xf32>
    %417 = arith.addf %413, %416 : vector<17x40xf32>
    %c2584 = arith.constant 2584 : index
    %c0_186 = arith.constant 0 : index
    %418 = vector.load %arg2[%c2584, %c0_186] : memref<2736x40xf32, #tpu.memory_space<vmem>>, vector<40x40xf32>
    %419 = vector.extract_strided_slice %358 {offsets = [15, 0], sizes = [17, 40], strides = [1, 1]} : vector<32x40xf32> to vector<17x40xf32>
    %cst_187 = arith.constant dense<0.000000e+00> : vector<17x40xf32>
    %420 = tpu.matmul %419, %418, %cst_187 {dimension_numbers = #tpu.dot_dimension_numbers<[1], [0], [0], [1], [0, 0, 1, 1], [], []>} : vector<17x40xf32>, vector<40x40xf32>, vector<17x40xf32> -> vector<17x40xf32>
    %421 = arith.addf %417, %420 : vector<17x40xf32>
    %c360 = arith.constant 360 : index
    %c0_188 = arith.constant 0 : index
    %422 = vector.load %arg3[%c360, %c0_188] : memref<392x167xf32, #tpu.memory_space<vmem>>, vector<2x17xf32>
    %cst_189 = arith.constant dense<0.000000e+00> : vector<2x40xf32>
    %423 = tpu.matmul %422, %421, %cst_189 {dimension_numbers = #tpu.dot_dimension_numbers<[1], [0], [0], [1], [0, 0, 1, 1], [], []>} : vector<2x17xf32>, vector<17x40xf32>, vector<2x40xf32> -> vector<2x40xf32>
    %c2632 = arith.constant 2632 : index
    %c0_190 = arith.constant 0 : index
    %424 = vector.load %arg2[%c2632, %c0_190] : memref<2736x40xf32, #tpu.memory_space<vmem>>, vector<1x40xf32>
    %425 = vector.broadcast %424 : vector<1x40xf32> to vector<2x40xf32>
    %426 = arith.addf %423, %425 : vector<2x40xf32>
    %c0_191 = arith.constant 0 : index
    %c0_192 = arith.constant 0 : index
    %427 = vector.load %arg4[%c0_191, %c0_192] : memref<2x40xf32, #tpu.memory_space<vmem>>, vector<2x40xf32>
    tpu.vector_store %arg4[%c0_191, %c0_192], %426 {strides = array<i32>} : memref<2x40xf32, #tpu.memory_space<vmem>>, vector<2x40xf32>,
    return
  }
}

</mosaic_0001>

<bundles_post_ra>
// kernel: forward.1
= control target key start
LH: loop header
LB: loop body
LE: loop exit
PB: predicated region body
PF: predicated region fallthrough
CT: control target
= control target key end

     0   :  { %vm44_vm0 = vcmask 523264   ;;  %s11366_s2 = inlined_call_operand.vmem [shape: f32[2736,40], index: 2, kind: input, shape index: {}]   ;;  %s11367_s0 = inlined_call_operand.vmem [shape: f32[128,64], index: 0, kind: input, shape index: {}]   ;;  %s11368_s3 = inlined_call_operand.vmem [shape: f32[392,167], index: 3, kind: input, shape index: {}]   ;;  %s11369_s1 = inlined_call_operand.vmem [shape: f32[2,8], index: 1, kind: input, shape index: {}]   ;;  %s11370_s4 = inlined_call_operand.vmem [shape: f32[2,40], index: 4, kind: output, shape index: {}]  }
   0x1   :  { %v41_v0 = vld [vmem:[%s11366_s2 + $0x38] sm:$0xff]  ;;  %v40_v1 = vld [vmem:[%s11366_s2 + $0x30] sm:$0xff]  ;;  %v39_v2 = vld [vmem:[%s11366_s2 + $0x28] sm:$0xff] }
   0x2   :  { %101 = vmatpush.msra.mxu0 %v41_v0  ;;  %v38_v3 = vld [vmem:[%s11366_s2 + $0x20] sm:$0xff]  ;;  %v37_v4 = vld [vmem:[%s11366_s2 + $0x18] sm:$0xff]  ;;  %v36_v5 = vld [vmem:[%s11366_s2 + $0x10] sm:$0xff] }
   0x3   :  { %v35_v6 = vld [vmem:[%s11366_s2 + $0x8] sm:$0xff]  ;;  %v34_v7 = vld [vmem:[%s11366_s2] sm:$0xff]  ;;  %v20_v10 = vld [vmem:[%s11367_s0 + $0x10] sm:$0xff] }
   0x4   :  { %102 = vmatpush.msra.mxu0 %v40_v1  ;;  %v18_v8 = vld [vmem:[%s11367_s0] sm:$0xff]  ;;  %v19_v9 = vld [vmem:[%s11367_s0 + $0x8] sm:$0xff]  ;;  %v21_v11 = vld [vmem:[%s11367_s0 + $0x18] sm:$0xff] }
   0x5   :  { %v22_v12 = vld [vmem:[%s11367_s0 + $0x20] sm:$0xff]  ;;  %v23_v13 = vld [vmem:[%s11367_s0 + $0x28] sm:$0xff]  ;;  %v24_v14 = vld [vmem:[%s11367_s0 + $0x30] sm:$0xff] }
   0x6   :  { %103 = vmatpush.msra.mxu0 %v39_v2  ;;  %v25_v15 = vld [vmem:[%s11367_s0 + $0x38] sm:$0xff]  ;;  %v26_v16 = vld [vmem:[%s11367_s0 + $0x40] sm:$0xff]  ;;  %v27_v17 = vld [vmem:[%s11367_s0 + $0x48] sm:$0xff] }
   0x7   :  { %v28_v18 = vld [vmem:[%s11367_s0 + $0x50] sm:$0xff]  ;;  %v29_v19 = vld [vmem:[%s11367_s0 + $0x58] sm:$0xff]  ;;  %v30_v20 = vld [vmem:[%s11367_s0 + $0x60] sm:$0xff] }
   0x8   :  { %104 = vmatpush.msra.mxu0 %v38_v3  ;;  %v31_v21 = vld [vmem:[%s11367_s0 + $0x68] sm:$0xff]  ;;  %v32_v22 = vld [vmem:[%s11367_s0 + $0x70] sm:$0xff]  ;;  %v33_v23 = vld [vmem:[%s11367_s0 + $0x78] sm:$0xff] }
   0x9   :  { %v6931_v39 = vld [vmem:[%s11366_s2 + $0xa40] ss:$0 sm:$0xff] }
   0xa   :  { %105 = vmatpush.msra.mxu0 %v37_v4 }
   0xc   :  { %106 = vmatpush.msra.mxu0 %v36_v5 }
   0xe   :  { %107 = vmatpush.msra.mxu0 %v35_v6 }
  0x10   :  { %108 = vmatpush.msra.mxu0 %v34_v7 }
  0x11   :  { %6172 = vmatmul.msk.f32.vlgmr.msra.gmra.mxu0 %vm44_vm0, %v18_v8 }
  0x19   :  { %6173 = vmatmul.msk.f32.gmra.mxu0 %vm44_vm0, %v19_v9 }
  0x21   :  { %6174 = vmatmul.msk.f32.gmra.mxu0 %vm44_vm0, %v20_v10 }
  0x29   :  { %6175 = vmatmul.msk.f32.gmra.mxu0 %vm44_vm0, %v21_v11 }
  0x31   :  { %6176 = vmatmul.msk.f32.gmra.mxu0 %vm44_vm0, %v22_v12 }
  0x39   :  { %6177 = vmatmul.msk.f32.gmra.mxu0 %vm44_vm0, %v23_v13 }
  0x41   :  { %6178 = vmatmul.msk.f32.gmra.mxu0 %vm44_vm0, %v24_v14 }
  0x49   :  { %6179 = vmatmul.msk.f32.gmra.mxu0 %vm44_vm0, %v25_v15 }
  0x51   :  { %6180 = vmatmul.msk.f32.gmra.mxu0 %vm44_vm0, %v26_v16 }
  0x59   :  { %6181 = vmatmul.msk.f32.gmra.mxu0 %vm44_vm0, %v27_v17 }
  0x61   :  { %6182 = vmatmul.msk.f32.gmra.mxu0 %vm44_vm0, %v28_v18 }
  0x69   :  { %6183 = vmatmul.msk.f32.gmra.mxu0 %vm44_vm0, %v29_v19 }
  0x71   :  { %6184 = vmatmul.msk.f32.gmra.mxu0 %vm44_vm0, %v30_v20 }
  0x79   :  { %6185 = vmatmul.msk.f32.gmra.mxu0 %vm44_vm0, %v31_v21 }
  0x81   :  { %6186 = vmatmul.msk.f32.gmra.mxu0 %vm44_vm0, %v32_v22 }
  0x89   :  { %6187 = vmatmul.msk.f32.gmra.mxu0 %vm44_vm0, %v33_v23 }
  0x8e   :  { %v6922_v24 = vpop.f32.mrf.mxu0 }
  0x8f   :  { %v111_v16 = vadd.f32 %v6931_v39, %v6922_v24  ;;  %v207_v24 = vld [vmem:[%s11368_s3 + $0x10] sm:$0xff] }
  0x91   :  { %v174_v22 = vmul.f32 0.2, %v111_v16  ;;  %vm158_vm0 = vcmp.gt.f32.partialorder %v111_v16, 0.0 }
  0x96   :  { %v6924_v25 = vpop.f32.mrf.mxu0 }
  0x97   :  { %v114_v13 = vadd.f32 %v6931_v39, %v6924_v25  ;;  %v206_v25 = vld [vmem:[%s11368_s3] sm:$0xff] }
  0x99   :  { %v175_v20 = vmul.f32 0.2, %v114_v13  ;;  %vm159_vm15 = vcmp.gt.f32.partialorder %v114_v13, 0.0 }
  0x9b   :  { %v191_v23 = vsel %vm159_vm15, %v114_v13, %v175_v20 }
  0x9e   :  { %v6926_v26 = vpop.f32.mrf.mxu0 }
  0x9f   :  { %v117_v10 = vadd.f32 %v6931_v39, %v6926_v26  ;;  %v190_v26 = vsel %vm158_vm0, %v111_v16, %v174_v22  ;;  %v1139_v22 = vld [vmem:[%s11366_s2 + $0x118] sm:$0xff] }
  0xa1   :  { %v176_v18 = vmul.f32 0.2, %v117_v10  ;;  %vm160_vm14 = vcmp.gt.f32.partialorder %v117_v10, 0.0 }
  0xa3   :  { %v192_v21 = vsel %vm160_vm14, %v117_v10, %v176_v18  ;;  %v1141_v18 = vld [vmem:[%s11366_s2 + $0x128] sm:$0xff] }
  0xa6   :  { %v119_v27 = vpop.f32.mrf.mxu0 }
  0xa7   :  { %v120_v7 = vadd.f32 %v6931_v39, %v119_v27  ;;  %v208_v27 = vld [vmem:[%s11368_s3 + $0x20] sm:$0xff] }
  0xa9   :  { %v177_v15 = vmul.f32 0.2, %v120_v7  ;;  %vm161_vm13 = vcmp.gt.f32.partialorder %v120_v7, 0.0 }
  0xab   :  { %v193_v19 = vsel %vm161_vm13, %v120_v7, %v177_v15  ;;  %v226_v15 = vld [vmem:[%s11368_s3 + $0x140] sm:$0xff] }
  0xae   :  { %v122_v28 = vpop.f32.mrf.mxu0 }
  0xaf   :  { %v123_v4 = vadd.f32 %v6931_v39, %v122_v28  ;;  %v209_v28 = vld [vmem:[%s11368_s3 + $0x30] sm:$0xff] }
  0xb1   :  { %v178_v12 = vmul.f32 0.2, %v123_v4  ;;  %vm162_vm12 = vcmp.gt.f32.partialorder %v123_v4, 0.0 }
  0xb3   :  { %v194_v17 = vsel %vm162_vm12, %v123_v4, %v178_v12 }
  0xb6   :  { %v125_v29 = vpop.f32.mrf.mxu0 }
  0xb7   :  { %v126_v1 = vadd.f32 %v6931_v39, %v125_v29  ;;  %v210_v29 = vld [vmem:[%s11368_s3 + $0x40] sm:$0xff] }
  0xb9   :  { %v179_v9 = vmul.f32 0.2, %v126_v1  ;;  %vm163_vm11 = vcmp.gt.f32.partialorder %v126_v1, 0.0 }
  0xbb   :  { %v195_v14 = vsel %vm163_vm11, %v126_v1, %v179_v9  ;;  %v225_v9 = vld [vmem:[%s11368_s3 + $0x130] sm:$0xff] }
  0xbe   :  { %v128_v30 = vpop.f32.mrf.mxu0 }
  0xbf   :  { %v129_v62 = vadd.f32 %v6931_v39, %v128_v30  ;;  %v211_v30 = vld [vmem:[%s11368_s3 + $0x50] sm:$0xff] }
  0xc1   :  { %v180_v6 = vmul.f32 0.2, %v129_v62  ;;  %vm164_vm10 = vcmp.gt.f32.partialorder %v129_v62, 0.0 }
  0xc3   :  { %v196_v11 = vsel %vm164_vm10, %v129_v62, %v180_v6  ;;  %vm11445_vm10 = vcmask 64512  }
  0xc6   :  { %v131_v31 = vpop.f32.mrf.mxu0 }
  0xc7   :  { %v132_v59 = vadd.f32 %v6931_v39, %v131_v31  ;;  %v212_v31 = vld [vmem:[%s11368_s3 + $0x60] sm:$0xff] }
  0xc9   :  { %v181_v3 = vmul.f32 0.2, %v132_v59  ;;  %vm165_vm9 = vcmp.gt.f32.partialorder %v132_v59, 0.0 }
  0xcb   :  { %v197_v8 = vsel %vm165_vm9, %v132_v59, %v181_v3  ;;  %v223_v59 = vld [vmem:[%s11368_s3 + $0x110] sm:$0xff]  ;;  %v224_v3 = vld [vmem:[%s11368_s3 + $0x120] sm:$0xff]  ;;  %vm2697_vm9 = vcmask 318464  }
  0xce   :  { %v134_v32 = vpop.f32.mrf.mxu0 }
  0xcf   :  { %v135_v56 = vadd.f32 %v6931_v39, %v134_v32  ;;  %v213_v32 = vld [vmem:[%s11368_s3 + $0x70] sm:$0xff] }
  0xd1   :  { %v182_v0 = vmul.f32 0.2, %v135_v56  ;;  %vm166_vm8 = vcmp.gt.f32.partialorder %v135_v56, 0.0 }
  0xd3   :  { %v198_v5 = vsel %vm166_vm8, %v135_v56, %v182_v0  ;;  %vm2049_vm8 = vcmask 1040384  }
  0xd6   :  { %v137_v33 = vpop.f32.mrf.mxu0 }
  0xd7   :  { %v138_v53 = vadd.f32 %v6931_v39, %v137_v33  ;;  %v214_v33 = vld [vmem:[%s11368_s3 + $0x80] sm:$0xff] }
  0xd9   :  { %v183_v61 = vmul.f32 0.2, %v138_v53  ;;  %vm167_vm7 = vcmp.gt.f32.partialorder %v138_v53, 0.0 }
  0xdb   :  { %v199_v2 = vsel %vm167_vm7, %v138_v53, %v183_v61  ;;  %v641_v53 = vld [vmem:[%s11366_s2 + $0x90] sm:$0xff]  ;;  %vm1857_vm7 = vcmask 1041408  }
  0xde   :  { %v140_v34 = vpop.f32.mrf.mxu0 }
  0xdf   :  { %v141_v50 = vadd.f32 %v6931_v39, %v140_v34  ;;  %v215_v34 = vld [vmem:[%s11368_s3 + $0x90] sm:$0xff] }
  0xe1   :  { %v184_v58 = vmul.f32 0.2, %v141_v50  ;;  %vm168_vm6 = vcmp.gt.f32.partialorder %v141_v50, 0.0 }
  0xe3   :  { %v200_v63 = vsel %vm168_vm6, %v141_v50, %v184_v58  ;;  %v329_v50 = vld [vmem:[%s11366_s2 + $0x70] sm:$0xff]  ;;  %vm1444_vm6 = vcmask 1042432  }
  0xe6   :  { %v143_v35 = vpop.f32.mrf.mxu0 }
  0xe7   :  { %v144_v47 = vadd.f32 %v6931_v39, %v143_v35  ;;  %v216_v35 = vld [vmem:[%s11368_s3 + $0xa0] sm:$0xff] }
  0xe9   :  { %v185_v55 = vmul.f32 0.2, %v144_v47  ;;  %vm169_vm5 = vcmp.gt.f32.partialorder %v144_v47, 0.0 }
  0xeb   :  { %v201_v60 = vsel %vm169_vm5, %v144_v47, %v185_v55  ;;  %v330_v47 = vld [vmem:[%s11366_s2 + $0x78] sm:$0xff]  ;;  %v221_v55 = vld [vmem:[%s11368_s3 + $0xf0] sm:$0xff]  ;;  %vm1252_vm5 = vcmask 1043456  }
  0xee   :  { %v146_v36 = vpop.f32.mrf.mxu0 }
  0xef   :  { %v147_v44 = vadd.f32 %v6931_v39, %v146_v36  ;;  %v327_v36 = vld [vmem:[%s11366_s2 + $0x60] sm:$0xff] }
  0xf0   :  { %572 = vmatpush.msrb.mxu0 %v327_v36  ;;  %6788 = vmatpush.msra.mxu3 %v327_v36 }
  0xf1   :  { %v186_v52 = vmul.f32 0.2, %v147_v44  ;;  %vm170_vm4 = vcmp.gt.f32.partialorder %v147_v44, 0.0 }
  0xf3   :  { %v202_v57 = vsel %vm170_vm4, %v147_v44, %v186_v52  ;;  %v645_v44 = vld [vmem:[%s11366_s2 + $0xb0] sm:$0xff]  ;;  %v328_v52 = vld [vmem:[%s11366_s2 + $0x68] sm:$0xff]  ;;  %vm839_vm4 = vcmask 1044480  }
  0xf6   :  { %v149_v37 = vpop.f32.mrf.mxu0 }
  0xf7   :  { %v150_v42 = vadd.f32 %v6931_v39, %v149_v37  ;;  %v326_v37 = vld [vmem:[%s11366_s2 + $0x58] sm:$0xff] }
  0xf8   :  { %573 = vmatpush.msrb.mxu0 %v326_v37  ;;  %6789 = vmatpush.msra.mxu3 %v326_v37 }
  0xf9   :  { %v187_v49 = vmul.f32 0.2, %v150_v42  ;;  %vm171_vm3 = vcmp.gt.f32.partialorder %v150_v42, 0.0 }
  0xfb   :  { %v203_v54 = vsel %vm171_vm3, %v150_v42, %v187_v49  ;;  %v218_v42 = vld [vmem:[%s11368_s3 + $0xc0] sm:$0xff]  ;;  %v219_v49 = vld [vmem:[%s11368_s3 + $0xd0] sm:$0xff]  ;;  %vm647_vm3 = vcmask 1045504  }
  0xfe   :  { %v152_v38 = vpop.f32.mrf.mxu0 }
  0xff   :  { %v153_v40 = vadd.f32 %v6931_v39, %v152_v38  ;;  %v217_v38 = vld [vmem:[%s11368_s3 + $0xb0] sm:$0xff] }
 0x101   :  { %v188_v46 = vmul.f32 0.2, %v153_v40  ;;  %vm172_vm2 = vcmp.gt.f32.partialorder %v153_v40, 0.0 }
 0x103   :  { %v204_v51 = vsel %vm172_vm2, %v153_v40, %v188_v46  ;;  %v324_v40 = vld [vmem:[%s11366_s2 + $0x48] sm:$0xff]  ;;  %vm354_vm2 = vcmask 1046528  }
 0x104   :  { %v644_v46 = vld [vmem:[%s11366_s2 + $0xa8] sm:$0xff] }
 0x106   :  { %v155_v41 = vpop.f32.mrf.mxu0 }
 0x107   :  { %v156_v43 = vadd.f32 %v6931_v39, %v155_v41  ;;  %v325_v39 = vld [vmem:[%s11366_s2 + $0x50] sm:$0xff]  ;;  %v323_v41 = vld [vmem:[%s11366_s2 + $0x40] sm:$0xff] }
 0x108   :  { %574 = vmatpush.msrb.mxu0 %v325_v39  ;;  %6790 = vmatpush.msra.mxu3 %v325_v39 }
 0x109   :  { %vm173_vm1 = vcmp.gt.f32.partialorder %v156_v43, 0.0  ;;  %v189_v45 = vmul.f32 0.2, %v156_v43 }
 0x10a   :  { %575 = vmatpush.msrb.mxu0 %v324_v40  ;;  %6791 = vmatpush.msra.mxu3 %v324_v40 }
 0x10b   :  { %v205_v48 = vsel %vm173_vm1, %v156_v43, %v189_v45  ;;  %v332_v43 = vld [vmem:[%s11366_s2 + $0x88] sm:$0xff]  ;;  %v331_v45 = vld [vmem:[%s11366_s2 + $0x80] sm:$0xff]  ;;  %vm396_vm1 = vcmask 326656  }
 0x10c   :  { %231 = vmatpush.msra.mxu1 %v205_v48  ;;  %576 = vmatpush.msrb.mxu0 %v323_v41  ;;  %v643_v48 = vld [vmem:[%s11366_s2 + $0xa0] sm:$0xff] }
 0x10d   :  { %6792 = vmatpush.msra.mxu3 %v323_v41  ;;  %450 = vmatpush.msra.mxu2 %v332_v43 }
 0x10e   :  { %232 = vmatpush.msra.mxu1 %v204_v51  ;;  %744 = vmatpush.msra.mxu0 %v645_v44  ;;  %v642_v51 = vld [vmem:[%s11366_s2 + $0x98] sm:$0xff]  ;;  %v230_v44 = vld [vmem:[%s11368_s3 + $0x180] sm:$0xff] }
 0x10f   :  { %451 = vmatpush.msra.mxu2 %v331_v45 }
 0x110   :  { %233 = vmatpush.msra.mxu1 %v203_v54  ;;  %745 = vmatpush.msra.mxu0 %v644_v46  ;;  %v220_v54 = vld [vmem:[%s11368_s3 + $0xe0] sm:$0xff] }
 0x111   :  { %452 = vmatpush.msra.mxu2 %v330_v47 }
 0x112   :  { %234 = vmatpush.msra.mxu1 %v202_v57  ;;  %746 = vmatpush.msra.mxu0 %v643_v48  ;;  %v222_v57 = vld [vmem:[%s11368_s3 + $0x100] sm:$0xff] }
 0x113   :  { %453 = vmatpush.msra.mxu2 %v329_v50 }
 0x114   :  { %235 = vmatpush.msra.mxu1 %v201_v60  ;;  %747 = vmatpush.msra.mxu0 %v642_v51 }
 0x115   :  { %454 = vmatpush.msra.mxu2 %v328_v52 }
 0x116   :  { %236 = vmatpush.msra.mxu1 %v200_v63  ;;  %748 = vmatpush.msra.mxu0 %v641_v53 }
 0x118   :  { %237 = vmatpush.msra.mxu1 %v199_v2 }
 0x11a   :  { %238 = vmatpush.msra.mxu1 %v198_v5 }
 0x11c   :  { %239 = vmatpush.msra.mxu1 %v197_v8 }
 0x11e   :  { %240 = vmatpush.msra.mxu1 %v196_v11 }
 0x120   :  { %241 = vmatpush.msra.mxu1 %v195_v14 }
 0x122   :  { %242 = vmatpush.msra.mxu1 %v194_v17 }
 0x124   :  { %243 = vmatpush.msra.mxu1 %v193_v19 }
 0x126   :  { %244 = vmatpush.msra.mxu1 %v192_v21  ;;  %v1140_v21 = vld [vmem:[%s11366_s2 + $0x120] sm:$0xff] }
 0x128   :  { %245 = vmatpush.msra.mxu1 %v191_v23  ;;  %v1138_v23 = vld [vmem:[%s11366_s2 + $0x110] sm:$0xff] }
 0x12a   :  { %246 = vmatpush.msra.mxu1 %v190_v26  ;;  %v227_v26 = vld [vmem:[%s11368_s3 + $0x150] sm:$0xff] }
 0x12b   :  { %247 = vmatmul.f32.vlgmr.msra.gmra.mxu1 %v206_v25 }
 0x12c   :  { %1157 = vmatpush.msrb.mxu1 %v1141_v18 }
 0x12e   :  { %1158 = vmatpush.msrb.mxu1 %v1140_v21 }
 0x130   :  { %1159 = vmatpush.msrb.mxu1 %v1139_v22 }
 0x132   :  { %1160 = vmatpush.msrb.mxu1 %v1138_v23 }
 0x133   :  { %250 = vmatmul.f32.gmra.mxu1 %v207_v24 }
 0x13b   :  { %253 = vmatmul.f32.gmra.mxu1 %v208_v27 }
 0x143   :  { %256 = vmatmul.f32.gmra.mxu1 %v209_v28  ;;  %v1137_v28 = vld [vmem:[%s11366_s2 + $0x108] sm:$0xff] }
 0x144   :  { %1161 = vmatpush.msrb.mxu1 %v1137_v28 }
 0x14b   :  { %259 = vmatmul.f32.gmra.mxu1 %v210_v29 }
 0x153   :  { %262 = vmatmul.f32.gmra.mxu1 %v211_v30 }
 0x15b   :  { %265 = vmatmul.f32.gmra.mxu1 %v212_v31 }
 0x163   :  { %268 = vmatmul.f32.gmra.mxu1 %v213_v32  ;;  %v228_v32 = vld [vmem:[%s11368_s3 + $0x160] sm:$0xff] }
 0x16b   :  { %271 = vmatmul.f32.gmra.mxu1 %v214_v33 }
 0x173   :  { %274 = vmatmul.f32.gmra.mxu1 %v215_v34 }
 0x17b   :  { %277 = vmatmul.f32.gmra.mxu1 %v216_v35 }
 0x183   :  { %280 = vmatmul.f32.gmra.mxu1 %v217_v38  ;;  %v229_v38 = vld [vmem:[%s11368_s3 + $0x170] sm:$0xff] }
 0x18b   :  { %283 = vmatmul.f32.gmra.mxu1 %v218_v42 }
 0x193   :  { %286 = vmatmul.f32.gmra.mxu1 %v219_v49 }
 0x19b   :  { %289 = vmatmul.f32.gmra.mxu1 %v220_v54 }
 0x1a3   :  { %292 = vmatmul.f32.gmra.mxu1 %v221_v55 }
 0x1a8   :  { %v7045_v56 = vpop.f32.mrf.mxu1 }
 0x1a9   :  { %6209 = vmatmul.msk.f32.vlgmr.msrb.gmra.mxu0 %vm396_vm1, %v7045_v56  ;;  %v648_v60 = vrot.slane %v7045_v56, 2  ;;  %v355_v61 = vrot.slane %v7045_v56, 1 }
 0x1ab   :  { %295 = vmatmul.f32.gmra.mxu1 %v222_v57 }
 0x1b0   :  { %v7052_v58 = vpop.f32.mrf.mxu1 }
 0x1b1   :  { %6210 = vmatmul.msk.f32.vlgmr.msra.gmra.mxu3 %vm396_vm1, %v7052_v58  ;;  %v356_v62 = vrot.slane %v7052_v58, 1  ;;  %v649_v63 = vrot.slane %v7052_v58, 2  ;;  %v11371_v51 = vrot.slane %v7052_v58, 3 }
 0x1b3   :  { %298 = vmatmul.f32.gmra.mxu1 %v223_v59  ;;  %v357_v0 = vsel %vm354_vm2, %v355_v61, %v356_v62  ;;  %v650_v1 = vsel %vm647_vm3, %v648_v60, %v649_v63 }
 0x1b4   :  { %6188 = vmatmul.msk.f32.vlgmr.msra.gmra.mxu2 %vm396_vm1, %v357_v0  ;;  %6230 = vmatmul.msk.f32.vlgmr.msra.gmra.mxu0 %vm396_vm1, %v650_v1 }
 0x1b8   :  { %v7067_v2 = vpop.f32.mrf.mxu1 }
 0x1b9   :  { %11448 = vst [vmem:[#allocation2_spill] sm:$0xff] %v7067_v2  ;;  %6211 = vmatmul.msk.f32.gmra.mxu3 %vm396_vm1, %v7067_v2  ;;  %v358_v4 = vrot.slane %v7067_v2, 1  ;;  %v651_v5 = vrot.slane %v7067_v2, 2  ;;  %v843_v49 = vrot.slane %v7067_v2, 3 }
 0x1bb   :  { %301 = vmatmul.f32.gmra.mxu1 %v224_v3  ;;  %v359_v6 = vsel %vm354_vm2, %v356_v62, %v358_v4  ;;  %v7078_v7 = vsel %vm647_vm3, %v649_v63, %v651_v5  ;;  %v7217_v54 = vsel %vm839_vm4, %v11371_v51, %v843_v49 }
 0x1bc   :  { %6189 = vmatmul.msk.f32.gmra.mxu2 %vm396_vm1, %v359_v6  ;;  %6231 = vmatmul.msk.f32.gmra.mxu0 %vm396_vm1, %v7078_v7 }
 0x1c0   :  { %v7083_v8 = vpop.f32.mrf.mxu1 }
 0x1c1   :  { %11449 = vst [vmem:[#allocation3_spill] sm:$0xff] %v7083_v8  ;;  %6212 = vmatmul.msk.f32.gmra.mxu3 %vm396_vm1, %v7083_v8  ;;  %v360_v10 = vrot.slane %v7083_v8, 1  ;;  %v653_v11 = vrot.slane %v7083_v8, 2  ;;  %v845_v59 = vrot.slane %v7083_v8, 3 }
 0x1c3   :  { %304 = vmatmul.f32.gmra.mxu1 %v225_v9  ;;  %v361_v12 = vsel %vm354_vm2, %v358_v4, %v360_v10  ;;  %v7094_v13 = vsel %vm647_vm3, %v651_v5, %v653_v11  ;;  %v7239_v63 = vsel %vm839_vm4, %v843_v49, %v845_v59 }
 0x1c4   :  { %6190 = vmatmul.msk.f32.gmra.mxu2 %vm396_vm1, %v361_v12  ;;  %6232 = vmatmul.msk.f32.gmra.mxu0 %vm396_vm1, %v7094_v13 }
 0x1c8   :  { %v7099_v14 = vpop.f32.mrf.mxu1 }
 0x1c9   :  { %11450 = vst [vmem:[#allocation4_spill] sm:$0xff] %v7099_v14  ;;  %6213 = vmatmul.msk.f32.gmra.mxu3 %vm396_vm1, %v7099_v14  ;;  %v362_v16 = vrot.slane %v7099_v14, 1  ;;  %v655_v17 = vrot.slane %v7099_v14, 2  ;;  %v847_v3 = vrot.slane %v7099_v14, 3 }
 0x1cb   :  { %307 = vmatmul.f32.gmra.mxu1 %v226_v15  ;;  %v363_v19 = vsel %vm354_vm2, %v360_v10, %v362_v16  ;;  %v7113_v20 = vsel %vm647_vm3, %v653_v11, %v655_v17  ;;  %v7261_v9 = vsel %vm839_vm4, %v845_v59, %v847_v3 }
 0x1cc   :  { %6191 = vmatmul.msk.f32.gmra.mxu2 %vm396_vm1, %v363_v19  ;;  %6233 = vmatmul.msk.f32.gmra.mxu0 %vm396_vm1, %v7113_v20 }
 0x1d0   :  { %v7127_v25 = vpop.f32.mrf.mxu1 }
 0x1d1   :  { %6214 = vmatmul.msk.f32.gmra.mxu3 %vm396_vm1, %v7127_v25  ;;  %v364_v24 = vrot.slane %v7127_v25, 1  ;;  %v657_v27 = vrot.slane %v7127_v25, 2  ;;  %v849_v12 = vrot.slane %v7127_v25, 3 }
 0x1d3   :  { %310 = vmatmul.f32.gmra.mxu1 %v227_v26  ;;  %v7140_v29 = vsel %vm354_vm2, %v362_v16, %v364_v24  ;;  %v7143_v30 = vsel %vm647_vm3, %v655_v17, %v657_v27  ;;  %v7283_v18 = vsel %vm839_vm4, %v847_v3, %v849_v12 }
 0x1d4   :  { %11451 = vst [vmem:[#allocation5_spill] sm:$0xff] %v7140_v29  ;;  %6192 = vmatmul.msk.f32.gmra.mxu2 %vm396_vm1, %v7140_v29  ;;  %6234 = vmatmul.msk.f32.gmra.mxu0 %vm396_vm1, %v7143_v30 }
 0x1d8   :  { %v7149_v31 = vpop.f32.mrf.mxu1 }
 0x1d9   :  { %6215 = vmatmul.msk.f32.gmra.mxu3 %vm396_vm1, %v7149_v31  ;;  %v366_v33 = vrot.slane %v7149_v31, 1  ;;  %v659_v34 = vrot.slane %v7149_v31, 2  ;;  %v851_v22 = vrot.slane %v7149_v31, 3 }
 0x1db   :  { %313 = vmatmul.f32.gmra.mxu1 %v228_v32  ;;  %v7159_v35 = vsel %vm354_vm2, %v364_v24, %v366_v33  ;;  %v7162_v36 = vsel %vm647_vm3, %v657_v27, %v659_v34  ;;  %v7305_v27 = vsel %vm839_vm4, %v849_v12, %v851_v22 }
 0x1dc   :  { %11452 = vst [vmem:[#allocation6_spill] sm:$0xff] %v7159_v35  ;;  %6193 = vmatmul.msk.f32.gmra.mxu2 %vm396_vm1, %v7159_v35  ;;  %6235 = vmatmul.msk.f32.gmra.mxu0 %vm396_vm1, %v7162_v36 }
 0x1e0   :  { %v7168_v37 = vpop.f32.mrf.mxu1 }
 0x1e1   :  { %6216 = vmatmul.msk.f32.gmra.mxu3 %vm396_vm1, %v7168_v37  ;;  %v368_v39 = vrot.slane %v7168_v37, 1  ;;  %v661_v40 = vrot.slane %v7168_v37, 2 }
 0x1e3   :  { %316 = vmatmul.f32.gmra.mxu1 %v229_v38  ;;  %v7178_v41 = vsel %vm354_vm2, %v366_v33, %v368_v39  ;;  %v7181_v42 = vsel %vm647_vm3, %v659_v34, %v661_v40  ;;  %v853_v33 = vrot.slane %v7168_v37, 3 }
 0x1e4   :  { %11453 = vst [vmem:[#allocation7_spill] sm:$0xff] %v7178_v41  ;;  %6194 = vmatmul.msk.f32.gmra.mxu2 %vm396_vm1, %v7178_v41  ;;  %6236 = vmatmul.msk.f32.gmra.mxu0 %vm396_vm1, %v7181_v42 }
 0x1e8   :  { %v7187_v43 = vpop.f32.mrf.mxu1 }
 0x1e9   :  { %6217 = vmatmul.msk.f32.gmra.mxu3 %vm396_vm1, %v7187_v43  ;;  %v370_v45 = vrot.slane %v7187_v43, 1  ;;  %v663_v46 = vrot.slane %v7187_v43, 2  ;;  %v855_v49 = vrot.slane %v7187_v43, 3 }
 0x1eb   :  { %319 = vmatmul.f32.gmra.mxu1 %v230_v44  ;;  %v7197_v47 = vsel %vm354_vm2, %v368_v39, %v370_v45  ;;  %v7200_v48 = vsel %vm647_vm3, %v661_v40, %v663_v46  ;;  %v7327_v40 = vsel %vm839_vm4, %v851_v22, %v853_v33 }
 0x1ec   :  { %11454 = vst [vmem:[#allocation8_spill] sm:$0xff] %v7197_v47  ;;  %6195 = vmatmul.msk.f32.gmra.mxu2 %vm396_vm1, %v7197_v47  ;;  %6237 = vmatmul.msk.f32.gmra.mxu0 %vm396_vm1, %v7200_v48 }
 0x1f0   :  { %v7207_v50 = vpop.f32.mrf.mxu1 }
 0x1f1   :  { %6218 = vmatmul.msk.f32.gmra.mxu3 %vm396_vm1, %v7207_v50  ;;  %v372_v52 = vrot.slane %v7207_v50, 1  ;;  %v665_v53 = vrot.slane %v7207_v50, 2 }
 0x1f3   :  { %6293 = vmatmul.msk.f32.vlgmr.msrb.gmra.mxu1 %vm396_vm1, %v7217_v54  ;;  %v7222_v55 = vsel %vm354_vm2, %v370_v45, %v372_v52  ;;  %v7225_v57 = vsel %vm647_vm3, %v663_v46, %v665_v53  ;;  %v838_v46 = vld [vmem:[%s11366_s2 + $0xd8] sm:$0xff] }
 0x1f4   :  { %11455 = vst [vmem:[#allocation9_spill] sm:$0xff] %v7222_v55  ;;  %6196 = vmatmul.msk.f32.gmra.mxu2 %vm396_vm1, %v7222_v55  ;;  %6238 = vmatmul.msk.f32.gmra.mxu0 %vm396_vm1, %v7225_v57 }
 0x1f5   :  { %936 = vmatpush.msrb.mxu2 %v838_v46  ;;  %v1027_v46 = vld [vmem:[%s11366_s2 + $0xe8] sm:$0xff] }
 0x1f8   :  { %v7232_v60 = vpop.f32.mrf.mxu1 }
 0x1f9   :  { %6219 = vmatmul.msk.f32.gmra.mxu3 %vm396_vm1, %v7232_v60  ;;  %v374_v61 = vrot.slane %v7232_v60, 1  ;;  %v667_v62 = vrot.slane %v7232_v60, 2 }
 0x1fb   :  { %6294 = vmatmul.msk.f32.gmra.mxu1 %vm396_vm1, %v7239_v63  ;;  %v7244_v0 = vsel %vm354_vm2, %v372_v52, %v374_v61  ;;  %v7247_v1 = vsel %vm647_vm3, %v665_v53, %v667_v62 }
 0x1fc   :  { %11456 = vst [vmem:[#allocation10_spill] sm:$0xff] %v7244_v0  ;;  %6197 = vmatmul.msk.f32.gmra.mxu2 %vm396_vm1, %v7244_v0  ;;  %6239 = vmatmul.msk.f32.gmra.mxu0 %vm396_vm1, %v7247_v1 }
 0x200   :  { %v7254_v4 = vpop.f32.mrf.mxu1 }
 0x201   :  { %11457 = vst [vmem:[#allocation11_spill] sm:$0xff] %v7254_v4  ;;  %6220 = vmatmul.msk.f32.gmra.mxu3 %vm396_vm1, %v7254_v4  ;;  %v376_v5 = vrot.slane %v7254_v4, 1  ;;  %v669_v6 = vrot.slane %v7254_v4, 2 }
 0x203   :  { %6295 = vmatmul.msk.f32.gmra.mxu1 %vm396_vm1, %v7261_v9  ;;  %v7266_v10 = vsel %vm354_vm2, %v374_v61, %v376_v5  ;;  %v7269_v11 = vsel %vm647_vm3, %v667_v62, %v669_v6  ;;  %v7352_v61 = vsel %vm839_vm4, %v853_v33, %v855_v49 }
 0x204   :  { %11458 = vst [vmem:[#allocation12_spill] sm:$0xff] %v7266_v10  ;;  %6198 = vmatmul.msk.f32.gmra.mxu2 %vm396_vm1, %v7266_v10  ;;  %6240 = vmatmul.msk.f32.gmra.mxu0 %vm396_vm1, %v7269_v11 }
 0x208   :  { %v7276_v15 = vpop.f32.mrf.mxu1 }
 0x209   :  { %11459 = vst [vmem:[#allocation13_spill] sm:$0xff] %v7276_v15  ;;  %6221 = vmatmul.msk.f32.gmra.mxu3 %vm396_vm1, %v7276_v15  ;;  %v378_v16 = vrot.slane %v7276_v15, 1  ;;  %v671_v17 = vrot.slane %v7276_v15, 2 }
 0x20b   :  { %6296 = vmatmul.msk.f32.gmra.mxu1 %vm396_vm1, %v7283_v18  ;;  %v7288_v19 = vsel %vm354_vm2, %v376_v5, %v378_v16  ;;  %v7291_v21 = vsel %vm647_vm3, %v669_v6, %v671_v17  ;;  %v857_v5 = vrot.slane %v7207_v50, 3  ;;  %v1030_v6 = vld [vmem:[%s11366_s2 + $0x100] sm:$0xff] }
 0x20c   :  { %11460 = vst [vmem:[#allocation14_spill] sm:$0xff] %v7288_v19  ;;  %6199 = vmatmul.msk.f32.gmra.mxu2 %vm396_vm1, %v7288_v19  ;;  %6241 = vmatmul.msk.f32.gmra.mxu0 %vm396_vm1, %v7291_v21 }
 0x20d   :  { %1047 = vmatpush.msrb.mxu3 %v1030_v6 }
 0x210   :  { %v7298_v23 = vpop.f32.mrf.mxu1 }
 0x211   :  { %6222 = vmatmul.msk.f32.gmra.mxu3 %vm396_vm1, %v7298_v23  ;;  %v380_v26 = vrot.slane %v7298_v23, 1  ;;  %v673_v24 = vrot.slane %v7298_v23, 2 }
 0x213   :  { %6297 = vmatmul.msk.f32.gmra.mxu1 %vm396_vm1, %v7305_v27  ;;  %v7310_v28 = vsel %vm354_vm2, %v378_v16, %v380_v26  ;;  %v7313_v32 = vsel %vm647_vm3, %v671_v17, %v673_v24 }
 0x214   :  { %11461 = vst [vmem:[#allocation15_spill] sm:$0xff] %v7310_v28  ;;  %6200 = vmatmul.msk.f32.gmra.mxu2 %vm396_vm1, %v7310_v28  ;;  %6242 = vmatmul.msk.f32.gmra.mxu0 %vm396_vm1, %v7313_v32 }
 0x218   :  { %v7320_v34 = vpop.f32.mrf.mxu1 }
 0x219   :  { %6223 = vmatmul.msk.f32.gmra.mxu3 %vm396_vm1, %v7320_v34  ;;  %v382_v38 = vrot.slane %v7320_v34, 1  ;;  %v675_v39 = vrot.slane %v7320_v34, 2 }
 0x21b   :  { %6298 = vmatmul.msk.f32.gmra.mxu1 %vm396_vm1, %v7327_v40  ;;  %v7332_v44 = vsel %vm354_vm2, %v380_v26, %v382_v38  ;;  %v7335_v45 = vsel %vm647_vm3, %v673_v24, %v675_v39  ;;  %v1029_v26 = vld [vmem:[%s11366_s2 + $0xf8] sm:$0xff]  ;;  %v7380_v24 = vsel %vm839_vm4, %v855_v49, %v857_v5  ;;  %v859_v49 = vrot.slane %v7232_v60, 3 }
 0x21c   :  { %11462 = vst [vmem:[#allocation16_spill] sm:$0xff] %v7332_v44  ;;  %6201 = vmatmul.msk.f32.gmra.mxu2 %vm396_vm1, %v7332_v44  ;;  %6243 = vmatmul.msk.f32.gmra.mxu0 %vm396_vm1, %v7335_v45 }
 0x21d   :  { %1048 = vmatpush.msrb.mxu3 %v1029_v26 }
 0x220   :  { %v7345_v52 = vpop.f32.mrf.mxu1 }
 0x221   :  { %6224 = vmatmul.msk.f32.gmra.mxu3 %vm396_vm1, %v7345_v52  ;;  %v384_v53 = vrot.slane %v7345_v52, 1  ;;  %v677_v59 = vrot.slane %v7345_v52, 2 }
 0x223   :  { %6299 = vmatmul.msk.f32.gmra.mxu1 %vm396_vm1, %v7352_v61  ;;  %v7357_v62 = vsel %vm354_vm2, %v382_v38, %v384_v53  ;;  %v7360_v3 = vsel %vm647_vm3, %v675_v39, %v677_v59  ;;  %v1028_v39 = vld [vmem:[%s11366_s2 + $0xf0] sm:$0xff] }
 0x224   :  { %11463 = vst [vmem:[#allocation17_spill] sm:$0xff] %v7357_v62  ;;  %6202 = vmatmul.msk.f32.gmra.mxu2 %vm396_vm1, %v7357_v62  ;;  %6244 = vmatmul.msk.f32.gmra.mxu0 %vm396_vm1, %v7360_v3 }
 0x225   :  { %1049 = vmatpush.msrb.mxu3 %v1028_v39  ;;  %v1251_v39 = vld [vmem:[%s11366_s2 + $0x150] sm:$0xff] }
 0x226   :  { %v578_v16 = vpop.f32.mrf.mxu0  ;;  %1349 = vmatpush.msrb.mxu0 %v1251_v39  ;;  %v836_v39 = vld [vmem:[%s11366_s2 + $0xc8] sm:$0xff] }
 0x227   :  { %1050 = vmatpush.msrb.mxu3 %v1027_v46 }
 0x228   :  { %v7370_v12 = vpop.f32.mrf.mxu1 }
 0x229   :  { %6225 = vmatmul.msk.f32.gmra.mxu3 %vm396_vm1, %v7370_v12  ;;  %v386_v17 = vrot.slane %v7370_v12, 1  ;;  %v679_v22 = vrot.slane %v7370_v12, 2 }
 0x22b   :  { %6300 = vmatmul.msk.f32.gmra.mxu1 %vm396_vm1, %v7380_v24  ;;  %v7385_v33 = vsel %vm354_vm2, %v384_v53, %v386_v17  ;;  %v7388_v38 = vsel %vm647_vm3, %v677_v59, %v679_v22  ;;  %v1026_v53 = vld [vmem:[%s11366_s2 + $0xe0] sm:$0xff] }
 0x22c   :  { %11464 = vst [vmem:[#allocation18_spill] sm:$0xff] %v7385_v33  ;;  %6203 = vmatmul.msk.f32.gmra.mxu2 %vm396_vm1, %v7385_v33  ;;  %6245 = vmatmul.msk.f32.gmra.mxu0 %vm396_vm1, %v7388_v38  ;;  %v7411_v33 = vsel %vm839_vm4, %v857_v5, %v859_v49 }
 0x22d   :  { %1051 = vmatpush.msrb.mxu3 %v1026_v53  ;;  %v837_v53 = vld [vmem:[%s11366_s2 + $0xd0] sm:$0xff] }
 0x22e   :  { %937 = vmatpush.msrb.mxu2 %v837_v53  ;;  %v835_v53 = vld [vmem:[%s11366_s2 + $0xc0] sm:$0xff] }
 0x230   :  { %v7404_v59 = vpop.f32.mrf.mxu1  ;;  %938 = vmatpush.msrb.mxu2 %v836_v39 }
 0x231   :  { %6226 = vmatmul.msk.f32.gmra.mxu3 %vm396_vm1, %v7404_v59  ;;  %v750_v6 = vpop.f32.mrf.mxu0  ;;  %v388_v26 = vrot.slane %v7404_v59, 1  ;;  %v681_v51 = vrot.slane %v7404_v59, 2 }
 0x232   :  { %939 = vmatpush.msrb.mxu2 %v835_v53 }
 0x233   :  { %6301 = vmatmul.msk.f32.gmra.mxu1 %vm396_vm1, %v7411_v33  ;;  %v7419_v46 = vsel %vm354_vm2, %v386_v17, %v388_v26  ;;  %v7422_v62 = vsel %vm647_vm3, %v679_v22, %v681_v51  ;;  %v1250_v17 = vld [vmem:[%s11366_s2 + $0x148] sm:$0xff]  ;;  %v861_v22 = vrot.slane %v7254_v4, 3 }
 0x234   :  { %11465 = vst [vmem:[#allocation19_spill] sm:$0xff] %v7419_v46  ;;  %6204 = vmatmul.msk.f32.gmra.mxu2 %vm396_vm1, %v7419_v46  ;;  %v581_v5 = vpop.f32.mrf.mxu3  ;;  %6246 = vmatmul.msk.f32.gmra.mxu0 %vm396_vm1, %v7422_v62  ;;  %v1249_v46 = vld [vmem:[%s11366_s2 + $0x140] sm:$0xff] }
 0x235   :  { %11466 = vst [vmem:[#allocation20_spill] sm:$0xff] %v7422_v62  ;;  %1350 = vmatpush.msrb.mxu0 %v1250_v17  ;;  %v1248_v17 = vld [vmem:[%s11366_s2 + $0x138] sm:$0xff] }
 0x237   :  { %v456_v44 = vpop.f32.mrf.mxu2  ;;  %1351 = vmatpush.msrb.mxu0 %v1249_v46  ;;  %v1247_v46 = vld [vmem:[%s11366_s2 + $0x130] sm:$0xff] }
 0x238   :  { %v579_v28 = vadd.f32 %v578_v16, %v456_v44  ;;  %v7441_v19 = vpop.f32.mrf.mxu1  ;;  %v834_v44 = vld [vmem:[%s11366_s2 + $0xb8] sm:$0xff]  ;;  %v7457_v16 = vsel %vm839_vm4, %v859_v49, %v861_v22 }
 0x239   :  { %6227 = vmatmul.msk.f32.gmra.mxu3 %vm396_vm1, %v7441_v19  ;;  %v753_v10 = vpop.f32.mrf.mxu0  ;;  %v390_v0 = vrot.slane %v7441_v19, 1  ;;  %v683_v39 = vrot.slane %v7441_v19, 2  ;;  %1352 = vmatpush.msrb.mxu0 %v1248_v17 }
 0x23a   :  { %v7462_v55 = vadd.f32 %v750_v6, %v579_v28  ;;  %940 = vmatpush.msrb.mxu2 %v834_v44  ;;  %v863_v28 = vrot.slane %v7276_v15, 3 }
 0x23b   :  { %6302 = vmatmul.msk.f32.gmra.mxu1 %vm396_vm1, %v7457_v16  ;;  %v7467_v47 = vsel %vm354_vm2, %v388_v26, %v390_v0  ;;  %v7470_v53 = vsel %vm647_vm3, %v681_v51, %v683_v39  ;;  %1353 = vmatpush.msrb.mxu0 %v1247_v46 }
 0x23c   :  { %11467 = vst [vmem:[#allocation21_spill] sm:$0xff] %v7462_v55  ;;  %6205 = vmatmul.msk.f32.gmra.mxu2 %vm396_vm1, %v7467_v47  ;;  %v584_v49 = vpop.f32.mrf.mxu3  ;;  %6247 = vmatmul.msk.f32.gmra.mxu0 %vm396_vm1, %v7470_v53 }
 0x23d   :  { %11468 = vst [vmem:[#allocation22_spill] sm:$0xff] %v7467_v47  ;;  %v7484_v47 = vsel %vm839_vm4, %v861_v22, %v863_v28  ;;  %v865_v22 = vrot.slane %v7298_v23, 3 }
 0x23e   :  { %11469 = vst [vmem:[#allocation23_spill] sm:$0xff] %v7470_v53 }
 0x23f   :  { %v459_v6 = vpop.f32.mrf.mxu2 }
 0x240   :  { %v582_v17 = vadd.f32 %v581_v5, %v459_v6  ;;  %v7477_v41 = vpop.f32.mrf.mxu1 }
 0x241   :  { %6228 = vmatmul.msk.f32.gmra.mxu3 %vm396_vm1, %v7477_v41  ;;  %v756_v51 = vpop.f32.mrf.mxu0  ;;  %v392_v26 = vrot.slane %v7477_v41, 1  ;;  %v685_v44 = vrot.slane %v7477_v41, 2 }
 0x242   :  { %v7486_v35 = vadd.f32 %v753_v10, %v582_v17 }
 0x243   :  { %6303 = vmatmul.msk.f32.gmra.mxu1 %vm396_vm1, %v7484_v47  ;;  %v7491_v5 = vsel %vm354_vm2, %v390_v0, %v392_v26  ;;  %v7494_v46 = vsel %vm647_vm3, %v683_v39, %v685_v44 }
 0x244   :  { %11470 = vst [vmem:[#allocation24_spill] sm:$0xff] %v7486_v35  ;;  %6206 = vmatmul.msk.f32.gmra.mxu2 %vm396_vm1, %v7491_v5  ;;  %v587_v6 = vpop.f32.mrf.mxu3  ;;  %6248 = vmatmul.msk.f32.gmra.mxu0 %vm396_vm1, %v7494_v46 }
 0x245   :  { %11471 = vst [vmem:[#allocation25_spill] sm:$0xff] %v7491_v5  ;;  %v7510_v5 = vsel %vm839_vm4, %v863_v28, %v865_v22  ;;  %v867_v28 = vrot.slane %v7320_v34, 3 }
 0x246   :  { %11472 = vst [vmem:[#allocation26_spill] sm:$0xff] %v7494_v46 }
 0x247   :  { %v462_v10 = vpop.f32.mrf.mxu2 }
 0x248   :  { %v585_v17 = vadd.f32 %v584_v49, %v462_v10  ;;  %v7501_v29 = vpop.f32.mrf.mxu1 }
 0x249   :  { %6229 = vmatmul.msk.f32.gmra.mxu3 %vm396_vm1, %v7501_v29  ;;  %v759_v0 = vpop.f32.mrf.mxu0  ;;  %v7506_v39 = vrot.slane %v7501_v29, 1  ;;  %v687_v35 = vrot.slane %v7501_v29, 2 }
 0x24a   :  { %v7512_v55 = vadd.f32 %v756_v51, %v585_v17 }
 0x24b   :  { %11473 = vst [vmem:[#allocation27_spill] sm:$0xff] %v7506_v39  ;;  %6304 = vmatmul.msk.f32.gmra.mxu1 %vm396_vm1, %v7510_v5  ;;  %v7518_v49 = vsel %vm354_vm2, %v392_v26, %v7506_v39  ;;  %v7521_v10 = vsel %vm647_vm3, %v685_v44, %v687_v35  ;;  %v7534_v44 = vsel %vm839_vm4, %v865_v22, %v867_v28 }
 0x24c   :  { %11474 = vst [vmem:[#allocation28_spill] sm:$0xff] %v7512_v55  ;;  %6207 = vmatmul.msk.f32.gmra.mxu2 %vm396_vm1, %v7518_v49  ;;  %v590_v46 = vpop.f32.mrf.mxu3  ;;  %6249 = vmatmul.msk.f32.gmra.mxu0 %vm396_vm1, %v7521_v10 }
 0x24d   :  { %11475 = vst [vmem:[#allocation29_spill] sm:$0xff] %v7518_v49 }
 0x24e   :  { %11476 = vst [vmem:[#allocation30_spill] sm:$0xff] %v7521_v10 }
 0x24f   :  { %v465_v51 = vpop.f32.mrf.mxu2  ;;  %11477 = vst [vmem:[#allocation31_spill] sm:$0xff] %v7534_v44 }
 0x250   :  { %v588_v17 = vadd.f32 %v587_v6, %v465_v51  ;;  %v7528_v55 = vpop.f32.mrf.mxu1 }
 0x251   :  { %v762_v53 = vpop.f32.mrf.mxu0  ;;  %6272 = vmatmul.msk.f32.vlgmr.msrb.gmra.mxu3 %vm396_vm1, %v7078_v7  ;;  %v11391_v26 = vrot.slane %v7528_v55, 2  ;;  %v869_v7 = vrot.slane %v7345_v52, 3 }
 0x252   :  { %v7536_v49 = vadd.f32 %v759_v0, %v588_v17  ;;  %v1254_v0 = vrot.slane %v7067_v2, 4 }
 0x253   :  { %6305 = vmatmul.msk.f32.gmra.mxu1 %vm396_vm1, %v7534_v44  ;;  %v7543_v6 = vsel %vm647_vm3, %v687_v35, %v11391_v26  ;;  %v840_v35 = vrot.slane %v7045_v56, 3  ;;  %v1253_v26 = vrot.slane %v7052_v58, 4  ;;  %v871_v56 = vrot.slane %v7370_v12, 3 }
 0x254   :  { %11478 = vst [vmem:[#allocation32_spill] sm:$0xff] %v7536_v49  ;;  %6208 = vmatmul.msk.f32.gmra.mxu2 %vm396_vm1, %v7506_v39  ;;  %v593_v51 = vpop.f32.mrf.mxu3  ;;  %6250 = vmatmul.msk.f32.gmra.mxu0 %vm396_vm1, %v7543_v6  ;;  %v7558_v39 = vsel %vm839_vm4, %v867_v28, %v869_v7 }
 0x255   :  { %11479 = vst [vmem:[#allocation33_spill] sm:$0xff] %v7543_v6  ;;  %v1255_v62 = vsel %vm1252_vm5, %v1253_v26, %v1254_v0 }
 0x257   :  { %v468_v22 = vpop.f32.mrf.mxu2 }
 0x258   :  { %v591_v17 = vadd.f32 %v590_v46, %v468_v22  ;;  %v7551_v49 = vpop.f32.mrf.mxu1  ;;  %v11481_v46 = vrot.slane %v7052_v58, 3 }
 0x259   :  { %v765_v10 = vpop.f32.mrf.mxu0  ;;  %6273 = vmatmul.msk.f32.gmra.mxu3 %vm396_vm1, %v7094_v13 }
 0x25a   :  { %v7560_v6 = vadd.f32 %v762_v53, %v591_v17  ;;  %v842_v22 = vsel %vm839_vm4, %v840_v35, %v11481_v46  ;;  %v1256_v53 = vrot.slane %v7083_v8, 4  ;;  %v7577_v35 = vsel %vm839_vm4, %v869_v7, %v871_v56 }
 0x25b   :  { %6306 = vmatmul.msk.f32.gmra.mxu1 %vm396_vm1, %v7558_v39  ;;  %v1258_v7 = vrot.slane %v7099_v14, 4 }
 0x25c   :  { %11480 = vst [vmem:[#allocation34_spill] sm:$0xff] %v7560_v6  ;;  %v596_v44 = vpop.f32.mrf.mxu3  ;;  %6251 = vmatmul.msk.f32.vlgmr.msrb.gmra.mxu2 %vm396_vm1, %v842_v22  ;;  %6314 = vmatmul.msk.f32.vlgmr.msrb.gmra.mxu0 %vm396_vm1, %v1255_v62  ;;  %v7584_v62 = vsel %vm1252_vm5, %v1254_v0, %v1256_v53 }
 0x25f   :  { %v471_v13 = vpop.f32.mrf.mxu2 }
 0x260   :  { %v594_v28 = vadd.f32 %v593_v51, %v471_v13  ;;  %v7572_v17 = vpop.f32.mrf.mxu1 }
 0x261   :  { %11482 = vst [vmem:[#allocation35_spill] sm:$0xff] %v7572_v17  ;;  %v768_v6 = vpop.f32.mrf.mxu0  ;;  %6274 = vmatmul.msk.f32.gmra.mxu3 %vm396_vm1, %v7113_v20  ;;  %v873_v20 = vrot.slane %v7404_v59, 3 }
 0x262   :  { %v7579_v26 = vadd.f32 %v765_v10, %v594_v28 }
 0x263   :  { %6307 = vmatmul.msk.f32.gmra.mxu1 %vm396_vm1, %v7577_v35  ;;  %v7597_v0 = vsel %vm839_vm4, %v871_v56, %v873_v20  ;;  %v1260_v56 = vrot.slane %v7127_v25, 4 }
 0x264   :  { %v599_v46 = vpop.f32.mrf.mxu3  ;;  %6252 = vmatmul.msk.f32.gmra.mxu2 %vm396_vm1, %v7217_v54  ;;  %6315 = vmatmul.msk.f32.gmra.mxu0 %vm396_vm1, %v7584_v62  ;;  %v7604_v54 = vsel %vm1252_vm5, %v1256_v53, %v1258_v7  ;;  %v1746_v53 = vld [vmem:[%s11366_s2 + $0x1c8] sm:$0xff] }
 0x265   :  { %1762 = vmatpush.msra.mxu1 %v1746_v53  ;;  %v1743_v53 = vld [vmem:[%s11366_s2 + $0x1b0] sm:$0xff] }
 0x267   :  { %v474_v51 = vpop.f32.mrf.mxu2 }
 0x268   :  { %v597_v10 = vadd.f32 %v596_v44, %v474_v51  ;;  %v7592_v22 = vpop.f32.mrf.mxu1 }
 0x269   :  { %11483 = vst [vmem:[#allocation36_spill] sm:$0xff] %v7592_v22  ;;  %v771_v13 = vpop.f32.mrf.mxu0  ;;  %6275 = vmatmul.msk.f32.gmra.mxu3 %vm396_vm1, %v7143_v30  ;;  %v875_v30 = vrot.slane %v7441_v19, 3 }
 0x26a   :  { %v7599_v28 = vadd.f32 %v768_v6, %v597_v10 }
 0x26b   :  { %6308 = vmatmul.msk.f32.gmra.mxu1 %vm396_vm1, %v7597_v0 }
 0x26c   :  { %11484 = vst [vmem:[#allocation37_spill] sm:$0xff] %v7599_v28  ;;  %v602_v17 = vpop.f32.mrf.mxu3  ;;  %6253 = vmatmul.msk.f32.gmra.mxu2 %vm396_vm1, %v7239_v63  ;;  %6316 = vmatmul.msk.f32.gmra.mxu0 %vm396_vm1, %v7604_v54  ;;  %v7620_v63 = vsel %vm839_vm4, %v873_v20, %v875_v30  ;;  %v1744_v20 = vld [vmem:[%s11366_s2 + $0x1b8] sm:$0xff] }
 0x26f   :  { %v477_v44 = vpop.f32.mrf.mxu2 }
 0x270   :  { %v600_v6 = vadd.f32 %v599_v46, %v477_v44  ;;  %v7612_v51 = vpop.f32.mrf.mxu1  ;;  %v7627_v46 = vsel %vm1252_vm5, %v1258_v7, %v1260_v56 }
 0x271   :  { %v774_v10 = vpop.f32.mrf.mxu0  ;;  %6276 = vmatmul.msk.f32.gmra.mxu3 %vm396_vm1, %v7162_v36  ;;  %11486 = vst [vmem:[#allocation39_spill] sm:$0xff] %v7627_v46  ;;  %v1745_v36 = vld [vmem:[%s11366_s2 + $0x1c0] sm:$0xff] }
 0x272   :  { %v7622_v22 = vadd.f32 %v771_v13, %v600_v6  ;;  %1763 = vmatpush.msra.mxu1 %v1745_v36  ;;  %v877_v13 = vrot.slane %v7477_v41, 3  ;;  %v1262_v6 = vrot.slane %v7149_v31, 4 }
 0x273   :  { %6309 = vmatmul.msk.f32.gmra.mxu1 %vm396_vm1, %v7620_v63 }
 0x274   :  { %11485 = vst [vmem:[#allocation38_spill] sm:$0xff] %v7622_v22  ;;  %v605_v44 = vpop.f32.mrf.mxu3  ;;  %6254 = vmatmul.msk.f32.gmra.mxu2 %vm396_vm1, %v7261_v9  ;;  %6317 = vmatmul.msk.f32.gmra.mxu0 %vm396_vm1, %v7627_v46  ;;  %v7649_v36 = vsel %vm839_vm4, %v875_v30, %v877_v13  ;;  %v1742_v46 = vld [vmem:[%s11366_s2 + $0x1a8] sm:$0xff] }
 0x275   :  { %1764 = vmatpush.msra.mxu1 %v1744_v20 }
 0x277   :  { %v480_v7 = vpop.f32.mrf.mxu2  ;;  %1765 = vmatpush.msra.mxu1 %v1743_v53 }
 0x278   :  { %v603_v22 = vadd.f32 %v602_v17, %v480_v7  ;;  %v7644_v9 = vpop.f32.mrf.mxu1  ;;  %v7659_v17 = vsel %vm1252_vm5, %v1260_v56, %v1262_v6 }
 0x279   :  { %v777_v28 = vpop.f32.mrf.mxu0  ;;  %6277 = vmatmul.msk.f32.gmra.mxu3 %vm396_vm1, %v7181_v42  ;;  %11488 = vst [vmem:[#allocation41_spill] sm:$0xff] %v7659_v17  ;;  %1766 = vmatpush.msra.mxu1 %v1742_v46  ;;  %v879_v42 = vrot.slane %v7501_v29, 3 }
 0x27a   :  { %v7654_v20 = vadd.f32 %v774_v10, %v603_v22  ;;  %v1264_v22 = vrot.slane %v7168_v37, 4 }
 0x27b   :  { %6310 = vmatmul.msk.f32.gmra.mxu1 %vm396_vm1, %v7649_v36  ;;  %v7672_v56 = vsel %vm839_vm4, %v877_v13, %v879_v42  ;;  %v1266_v13 = vrot.slane %v7187_v43, 4 }
 0x27c   :  { %11487 = vst [vmem:[#allocation40_spill] sm:$0xff] %v7654_v20  ;;  %v608_v7 = vpop.f32.mrf.mxu3  ;;  %6255 = vmatmul.msk.f32.gmra.mxu2 %vm396_vm1, %v7283_v18  ;;  %6318 = vmatmul.msk.f32.gmra.mxu0 %vm396_vm1, %v7659_v17  ;;  %v7679_v46 = vsel %vm1252_vm5, %v1262_v6, %v1264_v22 }
 0x27d   :  { %11490 = vst [vmem:[#allocation43_spill] sm:$0xff] %v7679_v46 }
 0x27f   :  { %v483_v30 = vpop.f32.mrf.mxu2 }
 0x280   :  { %v606_v10 = vadd.f32 %v605_v44, %v483_v30  ;;  %v7667_v53 = vpop.f32.mrf.mxu1 }
 0x281   :  { %v780_v20 = vpop.f32.mrf.mxu0  ;;  %6278 = vmatmul.msk.f32.gmra.mxu3 %vm396_vm1, %v7200_v48  ;;  %v881_v48 = vrot.slane %v7528_v55, 3 }
 0x282   :  { %v7674_v18 = vadd.f32 %v777_v28, %v606_v10 }
 0x283   :  { %6311 = vmatmul.msk.f32.gmra.mxu1 %vm396_vm1, %v7672_v56  ;;  %v7692_v6 = vsel %vm839_vm4, %v879_v42, %v881_v48  ;;  %v1268_v42 = vrot.slane %v7207_v50, 4 }
 0x284   :  { %11489 = vst [vmem:[#allocation42_spill] sm:$0xff] %v7674_v18  ;;  %v611_v17 = vpop.f32.mrf.mxu3  ;;  %6256 = vmatmul.msk.f32.gmra.mxu2 %vm396_vm1, %v7305_v27  ;;  %6319 = vmatmul.msk.f32.gmra.mxu0 %vm396_vm1, %v7679_v46  ;;  %v7699_v27 = vsel %vm1252_vm5, %v1264_v22, %v1266_v13 }
 0x285   :  { %11492 = vst [vmem:[#allocation45_spill] sm:$0xff] %v7699_v27 }
 0x287   :  { %v486_v44 = vpop.f32.mrf.mxu2 }
 0x288   :  { %v609_v28 = vadd.f32 %v608_v7, %v486_v44  ;;  %v7687_v30 = vpop.f32.mrf.mxu1 }
 0x289   :  { %v783_v10 = vpop.f32.mrf.mxu0  ;;  %6279 = vmatmul.msk.f32.gmra.mxu3 %vm396_vm1, %v7225_v57  ;;  %v1142_v57 = vrot.slane %v7551_v49, 3 }
 0x28a   :  { %v7694_v18 = vadd.f32 %v780_v20, %v609_v28 }
 0x28b   :  { %6312 = vmatmul.msk.f32.gmra.mxu1 %vm396_vm1, %v7692_v6  ;;  %v1143_v28 = vsel %vm839_vm4, %v881_v48, %v1142_v57  ;;  %v1270_v57 = vrot.slane %v7232_v60, 4 }
 0x28c   :  { %11491 = vst [vmem:[#allocation44_spill] sm:$0xff] %v7694_v18  ;;  %v614_v46 = vpop.f32.mrf.mxu3  ;;  %6257 = vmatmul.msk.f32.gmra.mxu2 %vm396_vm1, %v7327_v40  ;;  %6320 = vmatmul.msk.f32.gmra.mxu0 %vm396_vm1, %v7699_v27  ;;  %v7716_v40 = vsel %vm1252_vm5, %v1266_v13, %v1268_v42 }
 0x28f   :  { %v489_v7 = vpop.f32.mrf.mxu2 }
 0x290   :  { %v612_v20 = vadd.f32 %v611_v17, %v489_v7  ;;  %v7707_v44 = vpop.f32.mrf.mxu1  ;;  %v1448_v17 = vrot.slane %v7083_v8, 5 }
 0x291   :  { %v786_v18 = vpop.f32.mrf.mxu0  ;;  %6280 = vmatmul.msk.f32.gmra.mxu3 %vm396_vm1, %v7247_v1 }
 0x292   :  { %v7712_v22 = vadd.f32 %v783_v10, %v612_v20  ;;  %v11402_v10 = vrot.slane %v7067_v2, 5 }
 0x293   :  { %6313 = vmatmul.msk.f32.gmra.mxu1 %vm396_vm1, %v1143_v28 }
 0x294   :  { %11493 = vst [vmem:[#allocation46_spill] sm:$0xff] %v7712_v22  ;;  %v617_v27 = vpop.f32.mrf.mxu3  ;;  %6258 = vmatmul.msk.f32.gmra.mxu2 %vm396_vm1, %v7352_v61  ;;  %6321 = vmatmul.msk.f32.gmra.mxu0 %vm396_vm1, %v7716_v40  ;;  %v7732_v61 = vsel %vm1444_vm6, %v11402_v10, %v1448_v17  ;;  %v1272_v10 = vrot.slane %v7254_v4, 4 }
 0x297   :  { %v492_v48 = vpop.f32.mrf.mxu2 }
 0x298   :  { %v615_v1 = vadd.f32 %v614_v46, %v492_v48  ;;  %v7725_v7 = vpop.f32.mrf.mxu1  ;;  %v7739_v46 = vsel %vm1252_vm5, %v1268_v42, %v1270_v57 }
 0x299   :  { %v789_v20 = vpop.f32.mrf.mxu0  ;;  %6281 = vmatmul.msk.f32.gmra.mxu3 %vm396_vm1, %v7269_v11  ;;  %11495 = vst [vmem:[#allocation48_spill] sm:$0xff] %v7739_v46  ;;  %v1450_v11 = vrot.slane %v7099_v14, 5 }
 0x29a   :  { %v7734_v13 = vadd.f32 %v786_v18, %v615_v1 }
 0x29b   :  { %6377 = vmatmul.msk.f32.vlgmr.msra.gmra.mxu1 %vm396_vm1, %v7732_v61  ;;  %v7750_v42 = vsel %vm1444_vm6, %v1448_v17, %v1450_v11  ;;  %v1274_v17 = vrot.slane %v7276_v15, 4 }
 0x29c   :  { %11494 = vst [vmem:[#allocation47_spill] sm:$0xff] %v7734_v13  ;;  %v620_v28 = vpop.f32.mrf.mxu3  ;;  %6259 = vmatmul.msk.f32.gmra.mxu2 %vm396_vm1, %v7380_v24  ;;  %6322 = vmatmul.msk.f32.gmra.mxu0 %vm396_vm1, %v7739_v46  ;;  %v7759_v24 = vsel %vm1252_vm5, %v1270_v57, %v1272_v10 }
 0x29d   :  { %11497 = vst [vmem:[#allocation50_spill] sm:$0xff] %v7759_v24 }
 0x29f   :  { %v495_v48 = vpop.f32.mrf.mxu2 }
 0x2a0   :  { %v618_v18 = vadd.f32 %v617_v27, %v495_v48  ;;  %v7754_v22 = vpop.f32.mrf.mxu1 }
 0x2a1   :  { %v792_v1 = vpop.f32.mrf.mxu0  ;;  %6282 = vmatmul.msk.f32.gmra.mxu3 %vm396_vm1, %v7291_v21  ;;  %v1452_v21 = vrot.slane %v7127_v25, 5 }
 0x2a2   :  { %v7752_v13 = vadd.f32 %v789_v20, %v618_v18 }
 0x2a3   :  { %6378 = vmatmul.msk.f32.gmra.mxu1 %vm396_vm1, %v7750_v42  ;;  %v7770_v57 = vsel %vm1444_vm6, %v1450_v11, %v1452_v21 }
 0x2a4   :  { %11496 = vst [vmem:[#allocation49_spill] sm:$0xff] %v7752_v13  ;;  %v623_v46 = vpop.f32.mrf.mxu3  ;;  %6260 = vmatmul.msk.f32.gmra.mxu2 %vm396_vm1, %v7411_v33  ;;  %6323 = vmatmul.msk.f32.gmra.mxu0 %vm396_vm1, %v7759_v24  ;;  %v7777_v33 = vsel %vm1252_vm5, %v1272_v10, %v1274_v17  ;;  %v11507_v24 = vld [vmem:[#allocation31_spill] sm:$0xff] }
 0x2a5   :  { %11499 = vst [vmem:[#allocation52_spill] sm:$0xff] %v7777_v33 }
 0x2a7   :  { %v498_v27 = vpop.f32.mrf.mxu2 }
 0x2a8   :  { %v621_v20 = vadd.f32 %v620_v28, %v498_v27  ;;  %v7783_v28 = vpop.f32.mrf.mxu1 }
 0x2a9   :  { %v795_v48 = vpop.f32.mrf.mxu0  ;;  %6283 = vmatmul.msk.f32.gmra.mxu3 %vm396_vm1, %v7313_v32  ;;  %v1454_v32 = vrot.slane %v7149_v31, 5 }
 0x2aa   :  { %v7772_v18 = vadd.f32 %v792_v1, %v621_v20  ;;  %v1276_v1 = vrot.slane %v7298_v23, 4 }
 0x2ab   :  { %6379 = vmatmul.msk.f32.gmra.mxu1 %vm396_vm1, %v7770_v57  ;;  %v7790_v10 = vsel %vm1444_vm6, %v1452_v21, %v1454_v32 }
 0x2ac   :  { %11498 = vst [vmem:[#allocation51_spill] sm:$0xff] %v7772_v18  ;;  %v626_v13 = vpop.f32.mrf.mxu3  ;;  %6261 = vmatmul.msk.f32.gmra.mxu2 %vm396_vm1, %v7457_v16  ;;  %6324 = vmatmul.msk.f32.gmra.mxu0 %vm396_vm1, %v7777_v33  ;;  %v7797_v16 = vsel %vm1252_vm5, %v1274_v17, %v1276_v1 }
 0x2ad   :  { %11501 = vst [vmem:[#allocation54_spill] sm:$0xff] %v7797_v16 }
 0x2af   :  { %v501_v11 = vpop.f32.mrf.mxu2 }
 0x2b0   :  { %v624_v27 = vadd.f32 %v623_v46, %v501_v11  ;;  %v7804_v46 = vpop.f32.mrf.mxu1 }
 0x2b1   :  { %v798_v20 = vpop.f32.mrf.mxu0  ;;  %6284 = vmatmul.msk.f32.gmra.mxu3 %vm396_vm1, %v7335_v45  ;;  %v1456_v45 = vrot.slane %v7168_v37, 5 }
 0x2b2   :  { %v7792_v18 = vadd.f32 %v795_v48, %v624_v27  ;;  %v1278_v48 = vrot.slane %v7320_v34, 4 }
 0x2b3   :  { %6380 = vmatmul.msk.f32.gmra.mxu1 %vm396_vm1, %v7790_v10  ;;  %v7810_v17 = vsel %vm1444_vm6, %v1454_v32, %v1456_v45  ;;  %v1280_v32 = vrot.slane %v7345_v52, 4 }
 0x2b4   :  { %11500 = vst [vmem:[#allocation53_spill] sm:$0xff] %v7792_v18  ;;  %v629_v33 = vpop.f32.mrf.mxu3  ;;  %6262 = vmatmul.msk.f32.gmra.mxu2 %vm396_vm1, %v7484_v47  ;;  %6325 = vmatmul.msk.f32.gmra.mxu0 %vm396_vm1, %v7797_v16  ;;  %v7817_v47 = vsel %vm1252_vm5, %v1276_v1, %v1278_v48 }
 0x2b5   :  { %11503 = vst [vmem:[#allocation56_spill] sm:$0xff] %v7817_v47 }
 0x2b7   :  { %v504_v21 = vpop.f32.mrf.mxu2 }
 0x2b8   :  { %v627_v11 = vadd.f32 %v626_v13, %v504_v21  ;;  %v7825_v21 = vpop.f32.mrf.mxu1 }
 0x2b9   :  { %v801_v27 = vpop.f32.mrf.mxu0  ;;  %6285 = vmatmul.msk.f32.gmra.mxu3 %vm396_vm1, %v7360_v3  ;;  %v1458_v3 = vrot.slane %v7187_v43, 5 }
 0x2ba   :  { %v7812_v18 = vadd.f32 %v798_v20, %v627_v11 }
 0x2bb   :  { %6381 = vmatmul.msk.f32.gmra.mxu1 %vm396_vm1, %v7810_v17  ;;  %v7830_v1 = vsel %vm1444_vm6, %v1456_v45, %v1458_v3 }
 0x2bc   :  { %11502 = vst [vmem:[#allocation55_spill] sm:$0xff] %v7812_v18  ;;  %v632_v16 = vpop.f32.mrf.mxu3  ;;  %6263 = vmatmul.msk.f32.gmra.mxu2 %vm396_vm1, %v7510_v5  ;;  %6326 = vmatmul.msk.f32.gmra.mxu0 %vm396_vm1, %v7817_v47  ;;  %v7837_v5 = vsel %vm1252_vm5, %v1278_v48, %v1280_v32 }
 0x2bd   :  { %11504 = vst [vmem:[#allocation57_spill] sm:$0xff] %v7830_v1 }
 0x2be   :  { %11506 = vst [vmem:[#allocation59_spill] sm:$0xff] %v7837_v5 }
 0x2bf   :  { %v507_v13 = vpop.f32.mrf.mxu2 }
 0x2c0   :  { %v630_v20 = vadd.f32 %v629_v33, %v507_v13  ;;  %v1460_v33 = vrot.slane %v7207_v50, 5 }
 0x2c1   :  { %v804_v11 = vpop.f32.mrf.mxu0  ;;  %6286 = vmatmul.msk.f32.gmra.mxu3 %vm396_vm1, %v7388_v38  ;;  %v1443_v38 = vld [vmem:[%s11366_s2 + $0x178] sm:$0xff] }
 0x2c2   :  { %v7832_v18 = vadd.f32 %v801_v27, %v630_v20  ;;  %1541 = vmatpush.msra.mxu2 %v1443_v38  ;;  %v1282_v27 = vrot.slane %v7370_v12, 4  ;;  %v11508_v20 = vld [vmem:[#allocation20_spill] sm:$0xff] }
 0x2c3   :  { %6382 = vmatmul.msk.f32.gmra.mxu1 %vm396_vm1, %v7830_v1 }
 0x2c4   :  { %11505 = vst [vmem:[#allocation58_spill] sm:$0xff] %v7832_v18  ;;  %v635_v47 = vpop.f32.mrf.mxu3  ;;  %6264 = vmatmul.msk.f32.gmra.mxu2 %vm396_vm1, %v11507_v24  ;;  %6327 = vmatmul.msk.f32.gmra.mxu0 %vm396_vm1, %v7837_v5  ;;  %v7851_v24 = vsel %vm1444_vm6, %v1458_v3, %v1460_v33  ;;  %v7855_v5 = vpop.f32.mrf.mxu1  ;;  %v7860_v38 = vsel %vm1252_vm5, %v1280_v32, %v1282_v27  ;;  %v11511_v32 = vld [vmem:[#allocation23_spill] sm:$0xff] }
 0x2c5   :  { %11510 = vst [vmem:[#allocation20_spill] sm:$0xff] %v7860_v38 }
 0x2c7   :  { %v510_v45 = vpop.f32.mrf.mxu2 }
 0x2c8   :  { %v633_v13 = vadd.f32 %v632_v16, %v510_v45  ;;  %v1462_v16 = vrot.slane %v7232_v60, 5 }
 0x2c9   :  { %v807_v48 = vpop.f32.mrf.mxu0  ;;  %6287 = vmatmul.msk.f32.gmra.mxu3 %vm396_vm1, %v11508_v20 }
 0x2ca   :  { %v7853_v18 = vadd.f32 %v804_v11, %v633_v13  ;;  %v1284_v11 = vrot.slane %v7404_v59, 4  ;;  %v1635_v13 = vld [vmem:[%s11366_s2 + $0x1a0] sm:$0xff] }
 0x2cb   :  { %6383 = vmatmul.msk.f32.gmra.mxu1 %vm396_vm1, %v7851_v24  ;;  %1652 = vmatpush.msra.mxu3 %v1635_v13 }
 0x2cc   :  { %11509 = vst [vmem:[#allocation31_spill] sm:$0xff] %v7853_v18  ;;  %v638_v1 = vpop.f32.mrf.mxu3  ;;  %6265 = vmatmul.msk.f32.gmra.mxu2 %vm396_vm1, %v7558_v39  ;;  %6328 = vmatmul.msk.f32.gmra.mxu0 %vm396_vm1, %v7860_v38  ;;  %v7874_v18 = vsel %vm1444_vm6, %v1460_v33, %v1462_v16  ;;  %v1634_v39 = vld [vmem:[%s11366_s2 + $0x198] sm:$0xff]  ;;  %v1633_v33 = vld [vmem:[%s11366_s2 + $0x190] sm:$0xff]  ;;  %v7893_v13 = vpop.f32.mrf.mxu1 }
 0x2cd   :  { %11512 = vst [vmem:[#allocation23_spill] sm:$0xff] %v7874_v18  ;;  %1653 = vmatpush.msra.mxu3 %v1634_v39  ;;  %v1631_v39 = vld [vmem:[%s11366_s2 + $0x180] sm:$0xff] }
 0x2ce   :  { %11515 = vst [vmem:[#allocation62_spill] sm:$0xff] %v7893_v13 }
 0x2cf   :  { %v513_v3 = vpop.f32.mrf.mxu2  ;;  %1654 = vmatpush.msra.mxu3 %v1633_v33 }
 0x2d0   :  { %v636_v45 = vadd.f32 %v635_v47, %v513_v3  ;;  %v7884_v47 = vsel %vm1252_vm5, %v1282_v27, %v1284_v11  ;;  %v1286_v27 = vrot.slane %v7441_v19, 4 }
 0x2d1   :  { %v810_v20 = vpop.f32.mrf.mxu0  ;;  %6288 = vmatmul.msk.f32.gmra.mxu3 %vm396_vm1, %v11511_v32  ;;  %11514 = vst [vmem:[#allocation61_spill] sm:$0xff] %v7884_v47 }
 0x2d2   :  { %v7879_v38 = vadd.f32 %v807_v48, %v636_v45  ;;  %v1464_v48 = vrot.slane %v7254_v4, 5  ;;  %v7913_v33 = vsel %vm1252_vm5, %v1284_v11, %v1286_v27  ;;  %v1855_v11 = vld [vmem:[%s11366_s2 + $0x1e8] sm:$0xff] }
 0x2d3   :  { %6384 = vmatmul.msk.f32.gmra.mxu1 %vm396_vm1, %v7874_v18  ;;  %11519 = vst [vmem:[#allocation64_spill] sm:$0xff] %v7913_v33 }
 0x2d4   :  { %11513 = vst [vmem:[#allocation60_spill] sm:$0xff] %v7879_v38  ;;  %6266 = vmatmul.msk.f32.gmra.mxu2 %vm396_vm1, %v7577_v35  ;;  %v1053_v3 = vpop.f32.mrf.mxu3  ;;  %6329 = vmatmul.msk.f32.gmra.mxu0 %vm396_vm1, %v7884_v47  ;;  %v1632_v35 = vld [vmem:[%s11366_s2 + $0x188] sm:$0xff]  ;;  %v11516_v38 = vld [vmem:[#allocation26_spill] sm:$0xff]  ;;  %v7903_v18 = vsel %vm1444_vm6, %v1462_v16, %v1464_v48  ;;  %v1442_v16 = vld [vmem:[%s11366_s2 + $0x170] sm:$0xff] }
 0x2d5   :  { %11517 = vst [vmem:[#allocation26_spill] sm:$0xff] %v7903_v18  ;;  %1655 = vmatpush.msra.mxu3 %v1632_v35  ;;  %1542 = vmatpush.msra.mxu2 %v1442_v16  ;;  %v1288_v35 = vrot.slane %v7477_v41, 4 }
 0x2d7   :  { %v516_v45 = vpop.f32.mrf.mxu2  ;;  %1656 = vmatpush.msra.mxu3 %v1631_v39 }
 0x2d8   :  { %v639_v32 = vadd.f32 %v638_v1, %v516_v45  ;;  %v1856_v1 = vld [vmem:[%s11366_s2 + $0x1f0] sm:$0xff]  ;;  %v7929_v45 = vpop.f32.mrf.mxu1 }
 0x2d9   :  { %6289 = vmatmul.msk.f32.gmra.mxu3 %vm396_vm1, %v11516_v38  ;;  %v1355_v47 = vpop.f32.mrf.mxu0  ;;  %1954 = vmatpush.msra.mxu0 %v1856_v1  ;;  %11520 = vst [vmem:[#allocation65_spill] sm:$0xff] %v7929_v45  ;;  %v11522_v1 = vld [vmem:[#allocation30_spill] sm:$0xff] }
 0x2da   :  { %v7908_v4 = vadd.f32 %v810_v20, %v639_v32  ;;  %v1466_v20 = vrot.slane %v7276_v15, 5  ;;  %v1441_v32 = vld [vmem:[%s11366_s2 + $0x168] sm:$0xff] }
 0x2db   :  { %6385 = vmatmul.msk.f32.gmra.mxu1 %vm396_vm1, %v7903_v18  ;;  %1955 = vmatpush.msra.mxu0 %v1855_v11  ;;  %v1440_v11 = vld [vmem:[%s11366_s2 + $0x160] sm:$0xff]  ;;  %v1853_v18 = vld [vmem:[%s11366_s2 + $0x1d8] sm:$0xff] }
 0x2dc   :  { %11518 = vst [vmem:[#allocation63_spill] sm:$0xff] %v7908_v4  ;;  %6267 = vmatmul.msk.f32.gmra.mxu2 %vm396_vm1, %v7597_v0  ;;  %v1056_v38 = vpop.f32.mrf.mxu3  ;;  %6330 = vmatmul.msk.f32.gmra.mxu0 %vm396_vm1, %v7913_v33  ;;  %v1854_v4 = vld [vmem:[%s11366_s2 + $0x1e0] sm:$0xff]  ;;  %v11521_v33 = vld [vmem:[#allocation21_spill] sm:$0xff]  ;;  %v7948_v45 = vsel %vm1444_vm6, %v1464_v48, %v1466_v20 }
 0x2dd   :  { %1543 = vmatpush.msra.mxu2 %v1441_v32  ;;  %1956 = vmatpush.msra.mxu0 %v1854_v4  ;;  %11523 = vst [vmem:[#allocation21_spill] sm:$0xff] %v7948_v45  ;;  %v7956_v4 = vsel %vm1252_vm5, %v1286_v27, %v1288_v35  ;;  %v1468_v32 = vrot.slane %v7298_v23, 5 }
 0x2de   :  { %11524 = vst [vmem:[#allocation30_spill] sm:$0xff] %v7956_v4 }
 0x2df   :  { %v942_v0 = vpop.f32.mrf.mxu2  ;;  %1544 = vmatpush.msra.mxu2 %v1440_v11  ;;  %1957 = vmatpush.msra.mxu0 %v1853_v18 }
 0x2e0   :  { %v1005_v39 = vadd.f32 %v942_v0, %v11521_v33  ;;  %v1439_v33 = vld [vmem:[%s11366_s2 + $0x158] sm:$0xff]  ;;  %v1852_v0 = vld [vmem:[%s11366_s2 + $0x1d0] sm:$0xff] }
 0x2e1   :  { %6290 = vmatmul.msk.f32.gmra.mxu3 %vm396_vm1, %v11522_v1  ;;  %v1358_v16 = vpop.f32.mrf.mxu0  ;;  %1545 = vmatpush.msra.mxu2 %v1439_v33  ;;  %v11526_v1 = vld [vmem:[#allocation24_spill] sm:$0xff] }
 0x2e2   :  { %v1116_v15 = vadd.f32 %v1053_v3, %v1005_v39  ;;  %1958 = vmatpush.msra.mxu0 %v1852_v0  ;;  %v1290_v39 = vrot.slane %v7501_v29, 4 }
 0x2e3   :  { %6386 = vmatmul.msk.f32.gmra.mxu1 %vm396_vm1, %v7948_v45  ;;  %v7971_v45 = vpop.f32.mrf.mxu1 }
 0x2e4   :  { %6268 = vmatmul.msk.f32.gmra.mxu2 %vm396_vm1, %v7620_v63  ;;  %v1059_v3 = vpop.f32.mrf.mxu3  ;;  %6331 = vmatmul.msk.f32.gmra.mxu0 %vm396_vm1, %v7956_v4  ;;  %v1226_v48 = vadd.f32 %v7612_v51, %v1116_v15  ;;  %v11527_v63 = vld [vmem:[#allocation33_spill] sm:$0xff]  ;;  %v7976_v15 = vsel %vm1444_vm6, %v1466_v20, %v1468_v32  ;;  %v1032_v51 = vrot.slane %v7551_v49, 2  ;;  %v11529_v20 = vrot.slane %v7528_v55, 2 }
 0x2e6   :  { %v7967_v27 = vadd.f32 %v1355_v47, %v1226_v48  ;;  %v7982_v47 = vsel %vm1252_vm5, %v1288_v35, %v1290_v39  ;;  %v1033_v0 = vsel %vm647_vm3, %v11529_v20, %v1032_v51  ;;  %v1470_v48 = vrot.slane %v7320_v34, 5 }
 0x2e7   :  { %v945_v18 = vpop.f32.mrf.mxu2  ;;  %11528 = vst [vmem:[#allocation24_spill] sm:$0xff] %v7982_v47  ;;  %v1292_v35 = vrot.slane %v7528_v55, 4  ;;  %v1472_v51 = vrot.slane %v7345_v52, 5 }
 0x2e8   :  { %11525 = vst [vmem:[#allocation66_spill] sm:$0xff] %v7967_v27  ;;  %v1006_v11 = vadd.f32 %v945_v18, %v11526_v1 }
 0x2e9   :  { %6291 = vmatmul.msk.f32.gmra.mxu3 %vm396_vm1, %v11527_v63  ;;  %v1361_v13 = vpop.f32.mrf.mxu0 }
 0x2ea   :  { %v1117_v4 = vadd.f32 %v1056_v38, %v1006_v11  ;;  %v11530_v11 = vld [vmem:[#allocation28_spill] sm:$0xff] }
 0x2eb   :  { %6387 = vmatmul.msk.f32.gmra.mxu1 %vm396_vm1, %v7976_v15 }
 0x2ec   :  { %6269 = vmatmul.msk.f32.gmra.mxu2 %vm396_vm1, %v7649_v36  ;;  %v1062_v33 = vpop.f32.mrf.mxu3  ;;  %6332 = vmatmul.msk.f32.gmra.mxu0 %vm396_vm1, %v7982_v47  ;;  %v1227_v38 = vadd.f32 %v7644_v9, %v1117_v4  ;;  %v7999_v47 = vsel %vm1444_vm6, %v1468_v32, %v1470_v48  ;;  %v8001_v9 = vpop.f32.mrf.mxu1  ;;  %v11422_v32 = vrot.slane %v7551_v49, 4 }
 0x2ee   :  { %v7993_v18 = vadd.f32 %v1358_v16, %v1227_v38  ;;  %v8006_v16 = vsel %vm1252_vm5, %v1290_v39, %v1292_v35 }
 0x2ef   :  { %v948_v1 = vpop.f32.mrf.mxu2 }
 0x2f0   :  { %v1007_v63 = vadd.f32 %v948_v1, %v11530_v11 }
 0x2f1   :  { %6292 = vmatmul.msk.f32.gmra.mxu3 %vm396_vm1, %v1033_v0  ;;  %v1364_v36 = vpop.f32.mrf.mxu0  ;;  %v11531_v0 = vld [vmem:[#allocation32_spill] sm:$0xff] }
 0x2f2   :  { %v1118_v27 = vadd.f32 %v1059_v3, %v1007_v63  ;;  %v1859_v63 = vrot.slane %v7083_v8, 6 }
 0x2f3   :  { %6388 = vmatmul.msk.f32.gmra.mxu1 %vm396_vm1, %v7999_v47 }
 0x2f4   :  { %6270 = vmatmul.msk.f32.gmra.mxu2 %vm396_vm1, %v7672_v56  ;;  %v1065_v4 = vpop.f32.mrf.mxu3  ;;  %6333 = vmatmul.msk.f32.gmra.mxu0 %vm396_vm1, %v8006_v16  ;;  %v1228_v3 = vadd.f32 %v7667_v53, %v1118_v27  ;;  %v8023_v56 = vsel %vm1252_vm5, %v1292_v35, %v11422_v32  ;;  %v8026_v53 = vsel %vm1444_vm6, %v1470_v48, %v1472_v51  ;;  %v8035_v27 = vpop.f32.mrf.mxu1  ;;  %v1474_v35 = vrot.slane %v7370_v12, 5 }
 0x2f5   :  { %v1861_v32 = vrot.slane %v7099_v14, 6 }
 0x2f6   :  { %v8015_v38 = vadd.f32 %v1361_v13, %v1228_v3  ;;  %v11532_v3 = vld [vmem:[#allocation34_spill] sm:$0xff] }
 0x2f7   :  { %v951_v20 = vpop.f32.mrf.mxu2 }
 0x2f8   :  { %v1008_v1 = vadd.f32 %v951_v20, %v11531_v0 }
 0x2f9   :  { %v1367_v39 = vpop.f32.mrf.mxu0  ;;  %6356 = vmatmul.msk.f32.vlgmr.msra.gmra.mxu3 %vm396_vm1, %v7584_v62 }
 0x2fa   :  { %v1119_v11 = vadd.f32 %v1062_v33, %v1008_v1 }
 0x2fb   :  { %6389 = vmatmul.msk.f32.gmra.mxu1 %vm396_vm1, %v8026_v53 }
 0x2fc   :  { %6271 = vmatmul.msk.f32.gmra.mxu2 %vm396_vm1, %v7692_v6  ;;  %v1068_v13 = vpop.f32.mrf.mxu3  ;;  %6334 = vmatmul.msk.f32.gmra.mxu0 %vm396_vm1, %v8023_v56  ;;  %v1229_v62 = vadd.f32 %v7687_v30, %v1119_v11  ;;  %v1445_v6 = vrot.slane %v7052_v58, 5  ;;  %v1858_v30 = vrot.slane %v7067_v2, 6  ;;  %v8047_v11 = vsel %vm1444_vm6, %v1472_v51, %v1474_v35  ;;  %v8061_v51 = vpop.f32.mrf.mxu1 }
 0x2fe   :  { %v8038_v33 = vadd.f32 %v1364_v36, %v1229_v62  ;;  %v11533_v36 = vrot.slane %v7067_v2, 5  ;;  %v11538_v2 = vld [vmem:[#allocation41_spill] sm:$0xff] }
 0x2ff   :  { %v954_v48 = vpop.f32.mrf.mxu2 }
 0x300   :  { %v1009_v20 = vadd.f32 %v954_v48, %v11532_v3  ;;  %v1447_v62 = vsel %vm1444_vm6, %v1445_v6, %v11533_v36  ;;  %v1860_v48 = vsel %vm1857_vm7, %v1858_v30, %v1859_v63  ;;  %v11535_v30 = vld [vmem:[#allocation39_spill] sm:$0xff] }
 0x301   :  { %v1370_v0 = vpop.f32.mrf.mxu0  ;;  %6357 = vmatmul.msk.f32.gmra.mxu3 %vm396_vm1, %v7604_v54  ;;  %v1476_v54 = vrot.slane %v7404_v59, 5 }
 0x302   :  { %v1120_v1 = vadd.f32 %v1065_v4, %v1009_v20 }
 0x303   :  { %6390 = vmatmul.msk.f32.gmra.mxu1 %vm396_vm1, %v8047_v11 }
 0x304   :  { %v1071_v3 = vpop.f32.mrf.mxu3  ;;  %6335 = vmatmul.msk.f32.vlgmr.msra.gmra.mxu2 %vm396_vm1, %v1447_v62  ;;  %6398 = vmatmul.msk.f32.vlgmr.msra.gmra.mxu0 %vm396_vm1, %v1860_v48  ;;  %v1230_v58 = vadd.f32 %v7707_v44, %v1120_v1  ;;  %v8068_v48 = vsel %vm1444_vm6, %v1474_v35, %v1476_v54  ;;  %v8073_v44 = vsel %vm1857_vm7, %v1859_v63, %v1861_v32  ;;  %v8085_v63 = vpop.f32.mrf.mxu1 }
 0x306   :  { %v8059_v4 = vadd.f32 %v1367_v39, %v1230_v58  ;;  %v1863_v58 = vrot.slane %v7127_v25, 6 }
 0x307   :  { %v957_v20 = vpop.f32.mrf.mxu2 }
 0x308   :  { %11534 = vst [vmem:[#allocation33_spill] sm:$0xff] %v8059_v4  ;;  %v1010_v6 = vadd.f32 %v957_v20, %v7579_v26  ;;  %v11537_v20 = vld [vmem:[#allocation37_spill] sm:$0xff] }
 0x309   :  { %v1373_v36 = vpop.f32.mrf.mxu0  ;;  %6358 = vmatmul.msk.f32.gmra.mxu3 %vm396_vm1, %v11535_v30 }
 0x30a   :  { %v1121_v62 = vadd.f32 %v1068_v13, %v1010_v6  ;;  %v1478_v13 = vrot.slane %v7441_v19, 5 }
 0x30b   :  { %6391 = vmatmul.msk.f32.gmra.mxu1 %vm396_vm1, %v8068_v48 }
 0x30c   :  { %v1074_v39 = vpop.f32.mrf.mxu3  ;;  %6336 = vmatmul.msk.f32.gmra.mxu2 %vm396_vm1, %v7732_v61  ;;  %6399 = vmatmul.msk.f32.gmra.mxu0 %vm396_vm1, %v8073_v44  ;;  %v1231_v26 = vadd.f32 %v7725_v7, %v1121_v62  ;;  %v8090_v4 = vsel %vm1444_vm6, %v1476_v54, %v1478_v13  ;;  %v8095_v7 = vsel %vm1857_vm7, %v1861_v32, %v1863_v58 }
 0x30d   :  { %11539 = vst [vmem:[#allocation32_spill] sm:$0xff] %v8095_v7 }
 0x30e   :  { %v8081_v1 = vadd.f32 %v1370_v0, %v1231_v26  ;;  %v1865_v26 = vrot.slane %v7149_v31, 6 }
 0x30f   :  { %v960_v35 = vpop.f32.mrf.mxu2 }
 0x310   :  { %11536 = vst [vmem:[#allocation28_spill] sm:$0xff] %v8081_v1  ;;  %v1011_v6 = vadd.f32 %v960_v35, %v11537_v20  ;;  %v11541_v35 = vld [vmem:[#allocation38_spill] sm:$0xff] }
 0x311   :  { %v1376_v30 = vpop.f32.mrf.mxu0  ;;  %6359 = vmatmul.msk.f32.gmra.mxu3 %vm396_vm1, %v11538_v2  ;;  %v1480_v2 = vrot.slane %v7477_v41, 5 }
 0x312   :  { %v1122_v61 = vadd.f32 %v1071_v3, %v1011_v6  ;;  %v11542_v6 = vld [vmem:[#allocation43_spill] sm:$0xff] }
 0x313   :  { %6392 = vmatmul.msk.f32.gmra.mxu1 %vm396_vm1, %v8090_v4 }
 0x314   :  { %v1077_v0 = vpop.f32.mrf.mxu3  ;;  %6337 = vmatmul.msk.f32.gmra.mxu2 %vm396_vm1, %v7750_v42  ;;  %6400 = vmatmul.msk.f32.gmra.mxu0 %vm396_vm1, %v8095_v7  ;;  %v1232_v62 = vadd.f32 %v7754_v22, %v1122_v61  ;;  %v8110_v42 = vsel %vm1444_vm6, %v1478_v13, %v1480_v2  ;;  %v2351_v22 = vld [vmem:[%s11366_s2 + $0x268] sm:$0xff]  ;;  %v8115_v61 = vpop.f32.mrf.mxu1  ;;  %v11546_v7 = vld [vmem:[#allocation45_spill] sm:$0xff] }
 0x315   :  { %2367 = vmatpush.msrb.mxu1 %v2351_v22 }
 0x316   :  { %v8103_v3 = vadd.f32 %v1373_v36, %v1232_v62  ;;  %v8120_v36 = vsel %vm1857_vm7, %v1863_v58, %v1865_v26  ;;  %v2349_v58 = vld [vmem:[%s11366_s2 + $0x258] sm:$0xff] }
 0x317   :  { %v963_v54 = vpop.f32.mrf.mxu2  ;;  %11543 = vst [vmem:[#allocation39_spill] sm:$0xff] %v8120_v36 }
 0x318   :  { %11540 = vst [vmem:[#allocation34_spill] sm:$0xff] %v8103_v3  ;;  %v1012_v20 = vadd.f32 %v963_v54, %v11541_v35  ;;  %v1482_v54 = vrot.slane %v7501_v29, 5 }
 0x319   :  { %v1379_v32 = vpop.f32.mrf.mxu0  ;;  %6360 = vmatmul.msk.f32.gmra.mxu3 %vm396_vm1, %v11542_v6  ;;  %v11545_v6 = vld [vmem:[#allocation40_spill] sm:$0xff] }
 0x31a   :  { %v1123_v1 = vadd.f32 %v1074_v39, %v1012_v20  ;;  %v2350_v39 = vld [vmem:[%s11366_s2 + $0x260] sm:$0xff] }
 0x31b   :  { %6393 = vmatmul.msk.f32.gmra.mxu1 %vm396_vm1, %v8110_v42 }
 0x31c   :  { %v1080_v62 = vpop.f32.mrf.mxu3  ;;  %6338 = vmatmul.msk.f32.gmra.mxu2 %vm396_vm1, %v7770_v57  ;;  %6401 = vmatmul.msk.f32.gmra.mxu0 %vm396_vm1, %v8120_v36  ;;  %v1233_v13 = vadd.f32 %v7783_v28, %v1123_v1  ;;  %v1867_v57 = vrot.slane %v7168_v37, 6  ;;  %v8141_v1 = vsel %vm1444_vm6, %v1480_v2, %v1482_v54  ;;  %v8159_v2 = vpop.f32.mrf.mxu1 }
 0x31d   :  { %2368 = vmatpush.msrb.mxu1 %v2350_v39 }
 0x31e   :  { %v8134_v35 = vadd.f32 %v1376_v30, %v1233_v13  ;;  %v2348_v30 = vld [vmem:[%s11366_s2 + $0x250] sm:$0xff]  ;;  %v8149_v22 = vsel %vm1857_vm7, %v1865_v26, %v1867_v57 }
 0x31f   :  { %v966_v20 = vpop.f32.mrf.mxu2  ;;  %2369 = vmatpush.msrb.mxu1 %v2349_v58  ;;  %11547 = vst [vmem:[#allocation41_spill] sm:$0xff] %v8149_v22  ;;  %v1869_v58 = vrot.slane %v7187_v43, 6 }
 0x320   :  { %11544 = vst [vmem:[#allocation37_spill] sm:$0xff] %v8134_v35  ;;  %v1013_v3 = vadd.f32 %v966_v20, %v11545_v6 }
 0x321   :  { %v1382_v36 = vpop.f32.mrf.mxu0  ;;  %6361 = vmatmul.msk.f32.gmra.mxu3 %vm396_vm1, %v11546_v7  ;;  %v2347_v7 = vld [vmem:[%s11366_s2 + $0x248] sm:$0xff]  ;;  %2370 = vmatpush.msrb.mxu1 %v2348_v30 }
 0x322   :  { %v1124_v28 = vadd.f32 %v1077_v0, %v1013_v3  ;;  %v1484_v3 = vrot.slane %v7528_v55, 5 }
 0x323   :  { %6394 = vmatmul.msk.f32.gmra.mxu1 %vm396_vm1, %v8141_v1 }
 0x324   :  { %v1083_v39 = vpop.f32.mrf.mxu3  ;;  %6339 = vmatmul.msk.f32.gmra.mxu2 %vm396_vm1, %v7790_v10  ;;  %6402 = vmatmul.msk.f32.gmra.mxu0 %vm396_vm1, %v8149_v22  ;;  %v1234_v0 = vadd.f32 %v7804_v46, %v1124_v28  ;;  %v11549_v10 = vld [vmem:[#allocation42_spill] sm:$0xff]  ;;  %v8169_v46 = vsel %vm1444_vm6, %v1482_v54, %v1484_v3  ;;  %v8184_v54 = vpop.f32.mrf.mxu1 }
 0x325   :  { %2371 = vmatpush.msrb.mxu1 %v2347_v7 }
 0x326   :  { %v8162_v26 = vadd.f32 %v1379_v32, %v1234_v0  ;;  %v8174_v32 = vsel %vm1857_vm7, %v1867_v57, %v1869_v58  ;;  %v1871_v0 = vrot.slane %v7207_v50, 6  ;;  %v11552_v57 = vld [vmem:[#allocation44_spill] sm:$0xff] }
 0x327   :  { %v969_v13 = vpop.f32.mrf.mxu2  ;;  %11550 = vst [vmem:[#allocation43_spill] sm:$0xff] %v8174_v32 }
 0x328   :  { %11548 = vst [vmem:[#allocation38_spill] sm:$0xff] %v8162_v26  ;;  %v1014_v20 = vadd.f32 %v969_v13, %v11549_v10 }
 0x329   :  { %v1385_v6 = vpop.f32.mrf.mxu0  ;;  %6362 = vmatmul.msk.f32.gmra.mxu3 %vm396_vm1, %v7716_v40  ;;  %v1486_v40 = vrot.slane %v7551_v49, 5 }
 0x32a   :  { %v1125_v35 = vadd.f32 %v1080_v62, %v1014_v20  ;;  %v11553_v20 = vld [vmem:[#allocation48_spill] sm:$0xff] }
 0x32b   :  { %6395 = vmatmul.msk.f32.gmra.mxu1 %vm396_vm1, %v8169_v46  ;;  %v8191_v26 = vsel %vm1444_vm6, %v1484_v3, %v1486_v40 }
 0x32c   :  { %v1086_v28 = vpop.f32.mrf.mxu3  ;;  %6340 = vmatmul.msk.f32.gmra.mxu2 %vm396_vm1, %v7810_v17  ;;  %6403 = vmatmul.msk.f32.gmra.mxu0 %vm396_vm1, %v8174_v32  ;;  %v1235_v30 = vadd.f32 %v7825_v21, %v1125_v35  ;;  %11554 = vst [vmem:[#allocation45_spill] sm:$0xff] %v8191_v26  ;;  %v8196_v21 = vsel %vm1857_vm7, %v1869_v58, %v1871_v0  ;;  %v11556_v35 = vld [vmem:[#allocation57_spill] sm:$0xff]  ;;  %v8209_v32 = vpop.f32.mrf.mxu1 }
 0x32d   :  { %11555 = vst [vmem:[#allocation42_spill] sm:$0xff] %v8196_v21 }
 0x32e   :  { %v8182_v62 = vadd.f32 %v1382_v36, %v1235_v30  ;;  %v11557_v30 = vld [vmem:[#allocation35_spill] sm:$0xff] }
 0x32f   :  { %v972_v7 = vpop.f32.mrf.mxu2 }
 0x330   :  { %11551 = vst [vmem:[#allocation40_spill] sm:$0xff] %v8182_v62  ;;  %v1015_v13 = vadd.f32 %v972_v7, %v11552_v57  ;;  %v1747_v7 = vrot.slane %v11557_v30, 5 }
 0x331   :  { %v1388_v10 = vpop.f32.mrf.mxu0  ;;  %6363 = vmatmul.msk.f32.gmra.mxu3 %vm396_vm1, %v11553_v20  ;;  %v11559_v20 = vld [vmem:[#allocation46_spill] sm:$0xff] }
 0x332   :  { %v1126_v17 = vadd.f32 %v1083_v39, %v1015_v13  ;;  %v1873_v13 = vrot.slane %v7232_v60, 6  ;;  %v1748_v58 = vsel %vm1444_vm6, %v1486_v40, %v1747_v7  ;;  %v11562_v40 = vld [vmem:[#allocation62_spill] sm:$0xff]  ;;  %v2053_v7 = vrot.slane %v7099_v14, 7 }
 0x333   :  { %6396 = vmatmul.msk.f32.gmra.mxu1 %vm396_vm1, %v8191_v26 }
 0x334   :  { %v1089_v36 = vpop.f32.mrf.mxu3  ;;  %6341 = vmatmul.msk.f32.gmra.mxu2 %vm396_vm1, %v11556_v35  ;;  %6404 = vmatmul.msk.f32.gmra.mxu0 %vm396_vm1, %v8196_v21  ;;  %v1236_v39 = vadd.f32 %v7855_v5, %v1126_v17  ;;  %v11560_v35 = vld [vmem:[#allocation50_spill] sm:$0xff]  ;;  %v8215_v5 = vsel %vm1857_vm7, %v1871_v0, %v1873_v13  ;;  %v11429_v0 = vrot.slane %v7083_v8, 7 }
 0x335   :  { %11561 = vst [vmem:[#allocation48_spill] sm:$0xff] %v8215_v5  ;;  %v11574_v8 = vld [vmem:[#allocation54_spill] sm:$0xff] }
 0x336   :  { %v8204_v57 = vadd.f32 %v1385_v6, %v1236_v39 }
 0x337   :  { %v975_v3 = vpop.f32.mrf.mxu2 }
 0x338   :  { %11558 = vst [vmem:[#allocation44_spill] sm:$0xff] %v8204_v57  ;;  %v1016_v62 = vadd.f32 %v975_v3, %v11559_v20  ;;  %v11565_v20 = vld [vmem:[#allocation47_spill] sm:$0xff]  ;;  %v11566_v57 = vld [vmem:[#allocation52_spill] sm:$0xff] }
 0x339   :  { %v1391_v22 = vpop.f32.mrf.mxu0  ;;  %6364 = vmatmul.msk.f32.gmra.mxu3 %vm396_vm1, %v11560_v35 }
 0x33a   :  { %v1127_v21 = vadd.f32 %v1086_v28, %v1016_v62  ;;  %v11564_v28 = vld [vmem:[#allocation11_spill] sm:$0xff] }
 0x33b   :  { %6397 = vmatmul.msk.f32.gmra.mxu1 %vm396_vm1, %v1748_v58  ;;  %v1875_v62 = vrot.slane %v11564_v28, 6 }
 0x33c   :  { %v1092_v6 = vpop.f32.mrf.mxu3  ;;  %6342 = vmatmul.msk.f32.gmra.mxu2 %vm396_vm1, %v7851_v24  ;;  %6405 = vmatmul.msk.f32.gmra.mxu0 %vm396_vm1, %v8215_v5  ;;  %v1237_v17 = vadd.f32 %v11562_v40, %v1127_v21  ;;  %v8233_v21 = vsel %vm2049_vm8, %v11429_v0, %v2053_v7 }
 0x33d   :  { %11567 = vst [vmem:[#allocation35_spill] sm:$0xff] %v8233_v21  ;;  %v8240_v40 = vsel %vm1857_vm7, %v1873_v13, %v1875_v62 }
 0x33e   :  { %v8223_v39 = vadd.f32 %v1388_v10, %v1237_v17  ;;  %v8235_v10 = vpop.f32.mrf.mxu1  ;;  %11568 = vst [vmem:[#allocation46_spill] sm:$0xff] %v8240_v40 }
 0x33f   :  { %v978_v3 = vpop.f32.mrf.mxu2 }
 0x340   :  { %11563 = vst [vmem:[#allocation57_spill] sm:$0xff] %v8223_v39  ;;  %v1017_v58 = vadd.f32 %v978_v3, %v11565_v20  ;;  %v11569_v3 = vld [vmem:[#allocation23_spill] sm:$0xff]  ;;  %v2055_v20 = vrot.slane %v7127_v25, 7  ;;  %v11572_v39 = vld [vmem:[#allocation13_spill] sm:$0xff] }
 0x341   :  { %v1394_v35 = vpop.f32.mrf.mxu0  ;;  %6365 = vmatmul.msk.f32.gmra.mxu3 %vm396_vm1, %v11566_v57  ;;  %v1877_v5 = vrot.slane %v11572_v39, 6 }
 0x342   :  { %v1128_v24 = vadd.f32 %v1089_v36, %v1017_v58  ;;  %v11570_v36 = vld [vmem:[#allocation65_spill] sm:$0xff] }
 0x343   :  { %6461 = vmatmul.msk.f32.vlgmr.msrb.gmra.mxu1 %vm396_vm1, %v8233_v21  ;;  %v11573_v21 = vld [vmem:[#allocation49_spill] sm:$0xff] }
 0x344   :  { %v1095_v17 = vpop.f32.mrf.mxu3  ;;  %6343 = vmatmul.msk.f32.gmra.mxu2 %vm396_vm1, %v11569_v3  ;;  %6406 = vmatmul.msk.f32.gmra.mxu0 %vm396_vm1, %v8240_v40  ;;  %v1238_v57 = vadd.f32 %v11570_v36, %v1128_v24  ;;  %v8255_v3 = vsel %vm2049_vm8, %v2053_v7, %v2055_v20  ;;  %v8260_v24 = vsel %vm1857_vm7, %v1875_v62, %v1877_v5  ;;  %v11576_v36 = vld [vmem:[#allocation26_spill] sm:$0xff]  ;;  %v11578_v62 = vld [vmem:[#allocation51_spill] sm:$0xff]  ;;  %v11579_v40 = vld [vmem:[#allocation56_spill] sm:$0xff] }
 0x345   :  { %11575 = vst [vmem:[#allocation62_spill] sm:$0xff] %v8260_v24 }
 0x346   :  { %v8248_v58 = vadd.f32 %v1391_v22, %v1238_v57 }
 0x347   :  { %v981_v0 = vpop.f32.mrf.mxu2 }
 0x348   :  { %11571 = vst [vmem:[#allocation50_spill] sm:$0xff] %v8248_v58  ;;  %v1018_v14 = vadd.f32 %v981_v0, %v11573_v21  ;;  %v1879_v21 = vrot.slane %v7298_v23, 6 }
 0x349   :  { %v1397_v13 = vpop.f32.mrf.mxu0  ;;  %6366 = vmatmul.msk.f32.gmra.mxu3 %vm396_vm1, %v11574_v8  ;;  %v8267_v8 = vpop.f32.mrf.mxu1 }
 0x34a   :  { %v1129_v26 = vadd.f32 %v1092_v6, %v1018_v14  ;;  %v2057_v14 = vrot.slane %v7149_v31, 7 }
 0x34b   :  { %6462 = vmatmul.msk.f32.gmra.mxu1 %vm396_vm1, %v8255_v3 }
 0x34c   :  { %v1098_v22 = vpop.f32.mrf.mxu3  ;;  %6344 = vmatmul.msk.f32.gmra.mxu2 %vm396_vm1, %v11576_v36  ;;  %6407 = vmatmul.msk.f32.gmra.mxu0 %vm396_vm1, %v8260_v24  ;;  %v1239_v0 = vadd.f32 %v7971_v45, %v1129_v26  ;;  %v8277_v24 = vsel %vm2049_vm8, %v2055_v20, %v2057_v14  ;;  %v8282_v45 = vsel %vm1857_vm7, %v1877_v5, %v1879_v21  ;;  %v11584_v5 = vld [vmem:[#allocation53_spill] sm:$0xff] }
 0x34d   :  { %11580 = vst [vmem:[#allocation47_spill] sm:$0xff] %v8277_v24 }
 0x34e   :  { %v8270_v6 = vadd.f32 %v1394_v35, %v1239_v0  ;;  %11581 = vst [vmem:[#allocation52_spill] sm:$0xff] %v8282_v45  ;;  %v11582_v35 = vld [vmem:[#allocation21_spill] sm:$0xff] }
 0x34f   :  { %v984_v7 = vpop.f32.mrf.mxu2 }
 0x350   :  { %11577 = vst [vmem:[#allocation11_spill] sm:$0xff] %v8270_v6  ;;  %v1019_v57 = vadd.f32 %v984_v7, %v11578_v62  ;;  %v1881_v62 = vrot.slane %v7320_v34, 6 }
 0x351   :  { %v1400_v58 = vpop.f32.mrf.mxu0  ;;  %6367 = vmatmul.msk.f32.gmra.mxu3 %vm396_vm1, %v11579_v40  ;;  %v2059_v40 = vrot.slane %v7168_v37, 7  ;;  %v8292_v20 = vpop.f32.mrf.mxu1 }
 0x352   :  { %v1130_v36 = vadd.f32 %v1095_v17, %v1019_v57 }
 0x353   :  { %6463 = vmatmul.msk.f32.gmra.mxu1 %vm396_vm1, %v8277_v24  ;;  %v11585_v24 = vld [vmem:[#allocation59_spill] sm:$0xff] }
 0x354   :  { %v1101_v26 = vpop.f32.mrf.mxu3  ;;  %6345 = vmatmul.msk.f32.gmra.mxu2 %vm396_vm1, %v11582_v35  ;;  %6408 = vmatmul.msk.f32.gmra.mxu0 %vm396_vm1, %v8282_v45  ;;  %v1240_v0 = vadd.f32 %v8001_v9, %v1130_v36  ;;  %v8299_v45 = vsel %vm2049_vm8, %v2057_v14, %v2059_v40  ;;  %v8304_v9 = vsel %vm1857_vm7, %v1879_v21, %v1881_v62 }
 0x355   :  { %11586 = vst [vmem:[#allocation65_spill] sm:$0xff] %v8304_v9 }
 0x356   :  { %v8290_v17 = vadd.f32 %v1397_v13, %v1240_v0  ;;  %v1883_v0 = vrot.slane %v7345_v52, 6 }
 0x357   :  { %v987_v7 = vpop.f32.mrf.mxu2 }
 0x358   :  { %11583 = vst [vmem:[#allocation23_spill] sm:$0xff] %v8290_v17  ;;  %v1020_v57 = vadd.f32 %v987_v7, %v11584_v5  ;;  %v11588_v7 = vld [vmem:[#allocation55_spill] sm:$0xff]  ;;  %v11589_v17 = vld [vmem:[#allocation20_spill] sm:$0xff] }
 0x359   :  { %v1403_v6 = vpop.f32.mrf.mxu0  ;;  %6368 = vmatmul.msk.f32.gmra.mxu3 %vm396_vm1, %v11585_v24  ;;  %v2061_v24 = vrot.slane %v7187_v43, 7  ;;  %v8316_v21 = vpop.f32.mrf.mxu1 }
 0x35a   :  { %v1131_v35 = vadd.f32 %v1098_v22, %v1020_v57 }
 0x35b   :  { %6464 = vmatmul.msk.f32.gmra.mxu1 %vm396_vm1, %v8299_v45 }
 0x35c   :  { %v1104_v13 = vpop.f32.mrf.mxu3  ;;  %6346 = vmatmul.msk.f32.gmra.mxu2 %vm396_vm1, %v7976_v15  ;;  %6409 = vmatmul.msk.f32.gmra.mxu0 %vm396_vm1, %v8304_v9  ;;  %v1241_v36 = vadd.f32 %v8035_v27, %v1131_v35  ;;  %v8321_v9 = vsel %vm2049_vm8, %v2059_v40, %v2061_v24  ;;  %v8326_v27 = vsel %vm1857_vm7, %v1881_v62, %v1883_v0 }
 0x35d   :  { %11590 = vst [vmem:[#allocation49_spill] sm:$0xff] %v8326_v27 }
 0x35e   :  { %v8312_v22 = vadd.f32 %v1400_v58, %v1241_v36  ;;  %v1885_v36 = vrot.slane %v7370_v12, 6 }
 0x35f   :  { %v990_v14 = vpop.f32.mrf.mxu2 }
 0x360   :  { %11587 = vst [vmem:[#allocation13_spill] sm:$0xff] %v8312_v22  ;;  %v1021_v5 = vadd.f32 %v990_v14, %v11588_v7  ;;  %v11592_v14 = vld [vmem:[#allocation58_spill] sm:$0xff] }
 0x361   :  { %v1406_v57 = vpop.f32.mrf.mxu0  ;;  %6369 = vmatmul.msk.f32.gmra.mxu3 %vm396_vm1, %v11589_v17 }
 0x362   :  { %v1132_v15 = vadd.f32 %v1101_v26, %v1021_v5  ;;  %v2063_v26 = vrot.slane %v7207_v50, 7  ;;  %v11593_v5 = vld [vmem:[#allocation61_spill] sm:$0xff] }
 0x363   :  { %6465 = vmatmul.msk.f32.gmra.mxu1 %vm396_vm1, %v8321_v9 }
 0x364   :  { %v1107_v58 = vpop.f32.mrf.mxu3  ;;  %6347 = vmatmul.msk.f32.gmra.mxu2 %vm396_vm1, %v7999_v47  ;;  %6410 = vmatmul.msk.f32.gmra.mxu0 %vm396_vm1, %v8326_v27  ;;  %v1242_v35 = vadd.f32 %v8061_v51, %v1132_v15  ;;  %v8341_v47 = vsel %vm2049_vm8, %v2061_v24, %v2063_v26  ;;  %v8343_v27 = vpop.f32.mrf.mxu1  ;;  %v8348_v51 = vsel %vm1857_vm7, %v1883_v0, %v1885_v36  ;;  %v2065_v15 = vrot.slane %v7232_v60, 7 }
 0x365   :  { %11594 = vst [vmem:[#allocation26_spill] sm:$0xff] %v8348_v51 }
 0x366   :  { %v8334_v17 = vadd.f32 %v1403_v6, %v1242_v35 }
 0x367   :  { %v993_v40 = vpop.f32.mrf.mxu2 }
 0x368   :  { %11591 = vst [vmem:[#allocation54_spill] sm:$0xff] %v8334_v17  ;;  %v1022_v7 = vadd.f32 %v993_v40, %v11592_v14  ;;  %v1887_v40 = vrot.slane %v7404_v59, 6  ;;  %v11596_v14 = vld [vmem:[#allocation31_spill] sm:$0xff] }
 0x369   :  { %v1409_v62 = vpop.f32.mrf.mxu0  ;;  %6370 = vmatmul.msk.f32.gmra.mxu3 %vm396_vm1, %v11593_v5  ;;  %v11597_v5 = vld [vmem:[#allocation64_spill] sm:$0xff] }
 0x36a   :  { %v1133_v22 = vadd.f32 %v1104_v13, %v1022_v7  ;;  %v2048_v13 = vld [vmem:[%s11366_s2 + $0x218] sm:$0xff] }
 0x36b   :  { %6466 = vmatmul.msk.f32.gmra.mxu1 %vm396_vm1, %v8341_v47  ;;  %2146 = vmatpush.msrb.mxu2 %v2048_v13 }
 0x36c   :  { %v1110_v6 = vpop.f32.mrf.mxu3  ;;  %6348 = vmatmul.msk.f32.gmra.mxu2 %vm396_vm1, %v8026_v53  ;;  %6411 = vmatmul.msk.f32.gmra.mxu0 %vm396_vm1, %v8348_v51  ;;  %v1243_v24 = vadd.f32 %v8085_v63, %v1133_v22  ;;  %v8366_v51 = vsel %vm2049_vm8, %v2063_v26, %v2065_v15  ;;  %v8371_v63 = vsel %vm1857_vm7, %v1885_v36, %v1887_v40  ;;  %v8378_v13 = vpop.f32.mrf.mxu1  ;;  %v11599_v36 = vld [vmem:[#allocation60_spill] sm:$0xff] }
 0x36e   :  { %v8359_v35 = vadd.f32 %v1406_v57, %v1243_v24 }
 0x36f   :  { %v996_v0 = vpop.f32.mrf.mxu2 }
 0x370   :  { %11595 = vst [vmem:[#allocation51_spill] sm:$0xff] %v8359_v35  ;;  %v1023_v7 = vadd.f32 %v996_v0, %v11596_v14  ;;  %v1889_v0 = vrot.slane %v7441_v19, 6  ;;  %v11604_v35 = vld [vmem:[#allocation24_spill] sm:$0xff] }
 0x371   :  { %v1412_v53 = vpop.f32.mrf.mxu0  ;;  %6371 = vmatmul.msk.f32.gmra.mxu3 %vm396_vm1, %v11597_v5  ;;  %v11600_v5 = vld [vmem:[#allocation30_spill] sm:$0xff] }
 0x372   :  { %v1134_v17 = vadd.f32 %v1107_v58, %v1023_v7  ;;  %v2067_v58 = vrot.slane %v11564_v28, 7 }
 0x373   :  { %6467 = vmatmul.msk.f32.gmra.mxu1 %vm396_vm1, %v8366_v51 }
 0x374   :  { %v1113_v22 = vpop.f32.mrf.mxu3  ;;  %6349 = vmatmul.msk.f32.gmra.mxu2 %vm396_vm1, %v8047_v11  ;;  %6412 = vmatmul.msk.f32.gmra.mxu0 %vm396_vm1, %v8371_v63  ;;  %v1244_v57 = vadd.f32 %v8115_v61, %v1134_v17  ;;  %v2240_v11 = vld [vmem:[%s11366_s2 + $0x240] sm:$0xff]  ;;  %v8391_v17 = vsel %vm2049_vm8, %v2065_v15, %v2067_v58 }
 0x375   :  { %2257 = vmatpush.msrb.mxu3 %v2240_v11 }
 0x376   :  { %v8381_v26 = vadd.f32 %v1409_v62, %v1244_v57  ;;  %v2239_v62 = vld [vmem:[%s11366_s2 + $0x238] sm:$0xff]  ;;  %v8399_v57 = vsel %vm1857_vm7, %v1887_v40, %v1889_v0  ;;  %v8412_v40 = vpop.f32.mrf.mxu1 }
 0x377   :  { %v999_v24 = vpop.f32.mrf.mxu2  ;;  %11601 = vst [vmem:[#allocation21_spill] sm:$0xff] %v8399_v57  ;;  %2258 = vmatpush.msrb.mxu3 %v2239_v62  ;;  %v2236_v62 = vld [vmem:[%s11366_s2 + $0x220] sm:$0xff] }
 0x378   :  { %11598 = vst [vmem:[#allocation56_spill] sm:$0xff] %v8381_v26  ;;  %v1024_v14 = vadd.f32 %v999_v24, %v11599_v36  ;;  %v2069_v36 = vrot.slane %v11572_v39, 7  ;;  %v11603_v26 = vld [vmem:[#allocation63_spill] sm:$0xff] }
 0x379   :  { %v1415_v7 = vpop.f32.mrf.mxu0  ;;  %6372 = vmatmul.msk.f32.gmra.mxu3 %vm396_vm1, %v11600_v5  ;;  %v2237_v5 = vld [vmem:[%s11366_s2 + $0x228] sm:$0xff] }
 0x37a   :  { %v1135_v61 = vadd.f32 %v1110_v6, %v1024_v14  ;;  %v2238_v6 = vld [vmem:[%s11366_s2 + $0x230] sm:$0xff] }
 0x37b   :  { %6468 = vmatmul.msk.f32.gmra.mxu1 %vm396_vm1, %v8391_v17  ;;  %2259 = vmatpush.msrb.mxu3 %v2238_v6 }
 0x37c   :  { %6350 = vmatmul.msk.f32.gmra.mxu2 %vm396_vm1, %v8068_v48  ;;  %v1658_v24 = vpop.f32.mrf.mxu3  ;;  %6413 = vmatmul.msk.f32.gmra.mxu0 %vm396_vm1, %v8399_v57  ;;  %v1245_v15 = vadd.f32 %v8159_v2, %v1135_v61  ;;  %v1891_v48 = vrot.slane %v7477_v41, 6 }
 0x37d   :  { %2260 = vmatpush.msrb.mxu3 %v2237_v5  ;;  %v2046_v5 = vld [vmem:[%s11366_s2 + $0x208] sm:$0xff] }
 0x37e   :  { %v8410_v14 = vadd.f32 %v1412_v53, %v1245_v15  ;;  %v8422_v53 = vsel %vm2049_vm8, %v2067_v58, %v2069_v36  ;;  %v8430_v6 = vsel %vm1857_vm7, %v1889_v0, %v1891_v48  ;;  %v2047_v58 = vld [vmem:[%s11366_s2 + $0x210] sm:$0xff] }
 0x37f   :  { %v1002_v11 = vpop.f32.mrf.mxu2  ;;  %2261 = vmatpush.msrb.mxu3 %v2236_v62  ;;  %2147 = vmatpush.msrb.mxu2 %v2047_v58  ;;  %v8457_v62 = vpop.f32.mrf.mxu1  ;;  %v2458_v58 = vld [vmem:[%s11366_s2 + $0x278] sm:$0xff] }
 0x380   :  { %11602 = vst [vmem:[#allocation53_spill] sm:$0xff] %v8410_v14  ;;  %v1025_v57 = vadd.f32 %v1002_v11, %v11603_v26  ;;  %v2460_v26 = vld [vmem:[%s11366_s2 + $0x288] sm:$0xff]  ;;  %v1893_v11 = vrot.slane %v7501_v29, 6  ;;  %v2459_v14 = vld [vmem:[%s11366_s2 + $0x280] sm:$0xff] }
 0x381   :  { %6373 = vmatmul.msk.f32.gmra.mxu3 %vm396_vm1, %v11604_v35  ;;  %v1960_v2 = vpop.f32.mrf.mxu0  ;;  %v2461_v35 = vld [vmem:[%s11366_s2 + $0x290] sm:$0xff]  ;;  %2148 = vmatpush.msrb.mxu2 %v2046_v5  ;;  %v2073_v5 = vrot.slane %v7320_v34, 7 }
 0x382   :  { %v1136_v61 = vadd.f32 %v1113_v22, %v1025_v57  ;;  %2481 = vmatpush.msrb.mxu0 %v2461_v35  ;;  %v2071_v57 = vrot.slane %v7298_v23, 7  ;;  %v2045_v35 = vld [vmem:[%s11366_s2 + $0x200] sm:$0xff] }
 0x383   :  { %6469 = vmatmul.msk.f32.gmra.mxu1 %vm396_vm1, %v8422_v53  ;;  %2149 = vmatpush.msrb.mxu2 %v2045_v35 }
 0x384   :  { %6351 = vmatmul.msk.f32.gmra.mxu2 %vm396_vm1, %v8090_v4  ;;  %v1661_v22 = vpop.f32.mrf.mxu3  ;;  %6414 = vmatmul.msk.f32.gmra.mxu0 %vm396_vm1, %v8430_v6  ;;  %v1246_v0 = vadd.f32 %v8184_v54, %v1136_v61  ;;  %v11606_v54 = vld [vmem:[#allocation66_spill] sm:$0xff] }
 0x385   :  { %2482 = vmatpush.msrb.mxu0 %v2460_v26 }
 0x386   :  { %v8447_v4 = vadd.f32 %v1415_v7, %v1246_v0  ;;  %v8468_v0 = vsel %vm2049_vm8, %v2069_v36, %v2071_v57 }
 0x387   :  { %v1547_v15 = vpop.f32.mrf.mxu2  ;;  %2483 = vmatpush.msrb.mxu0 %v2459_v14  ;;  %v2457_v14 = vld [vmem:[%s11366_s2 + $0x270] sm:$0xff] }
 0x388   :  { %11605 = vst [vmem:[#allocation59_spill] sm:$0xff] %v8447_v4  ;;  %v1610_v61 = vadd.f32 %v1547_v15, %v11606_v54  ;;  %v2044_v15 = vld [vmem:[%s11366_s2 + $0x1f8] sm:$0xff]  ;;  %v8494_v4 = vsel %vm2049_vm8, %v2071_v57, %v2073_v5  ;;  %v2075_v57 = vrot.slane %v7345_v52, 7 }
 0x389   :  { %6374 = vmatmul.msk.f32.gmra.mxu3 %vm396_vm1, %v8006_v16  ;;  %v1963_v7 = vpop.f32.mrf.mxu0  ;;  %v8476_v16 = vsel %vm1857_vm7, %v1891_v48, %v1893_v11  ;;  %2484 = vmatpush.msrb.mxu0 %v2458_v58 }
 0x38a   :  { %v1721_v26 = vadd.f32 %v1658_v24, %v1610_v61  ;;  %2150 = vmatpush.msrb.mxu2 %v2044_v15  ;;  %v1895_v61 = vrot.slane %v7528_v55, 6 }
 0x38b   :  { %6470 = vmatmul.msk.f32.gmra.mxu1 %vm396_vm1, %v8468_v0  ;;  %2485 = vmatpush.msrb.mxu0 %v2457_v14  ;;  %v1897_v14 = vrot.slane %v7551_v49, 6 }
 0x38c   :  { %6352 = vmatmul.msk.f32.gmra.mxu2 %vm396_vm1, %v8110_v42  ;;  %v1664_v24 = vpop.f32.mrf.mxu3  ;;  %6415 = vmatmul.msk.f32.gmra.mxu0 %vm396_vm1, %v8476_v16  ;;  %v1831_v36 = vadd.f32 %v8209_v32, %v1721_v26  ;;  %v8496_v32 = vpop.f32.mrf.mxu1 }
 0x38e   :  { %v8487_v48 = vadd.f32 %v1960_v2, %v1831_v36  ;;  %v8501_v2 = vsel %vm1857_vm7, %v1893_v11, %v1895_v61  ;;  %v11608_v36 = vrot.slane %v7551_v49, 4 }
 0x38f   :  { %v1550_v54 = vpop.f32.mrf.mxu2 }
 0x390   :  { %11607 = vst [vmem:[#allocation55_spill] sm:$0xff] %v8487_v48  ;;  %v1611_v35 = vadd.f32 %v1550_v54, %v7993_v18  ;;  %v8519_v48 = vsel %vm2049_vm8, %v2073_v5, %v2075_v57 }
 0x391   :  { %6375 = vmatmul.msk.f32.gmra.mxu3 %vm396_vm1, %v8023_v56  ;;  %v1966_v42 = vpop.f32.mrf.mxu0  ;;  %v1637_v56 = vrot.slane %v11557_v30, 4 }
 0x392   :  { %v1722_v58 = vadd.f32 %v1661_v22, %v1611_v35 }
 0x393   :  { %6471 = vmatmul.msk.f32.gmra.mxu1 %vm396_vm1, %v8494_v4 }
 0x394   :  { %6353 = vmatmul.msk.f32.gmra.mxu2 %vm396_vm1, %v8141_v1  ;;  %v1667_v18 = vpop.f32.mrf.mxu3  ;;  %6416 = vmatmul.msk.f32.gmra.mxu0 %vm396_vm1, %v8501_v2  ;;  %v1832_v22 = vadd.f32 %v8235_v10, %v1722_v58  ;;  %v1638_v1 = vsel %vm1252_vm5, %v11608_v36, %v1637_v56  ;;  %v8524_v10 = vsel %vm1857_vm7, %v1895_v61, %v1897_v14  ;;  %v8531_v58 = vpop.f32.mrf.mxu1 }
 0x396   :  { %v8510_v26 = vadd.f32 %v1963_v7, %v1832_v22  ;;  %v11443_v22 = vrot.slane %v11557_v30, 6 }
 0x397   :  { %v1553_v15 = vpop.f32.mrf.mxu2 }
 0x398   :  { %v1612_v11 = vadd.f32 %v1553_v15, %v8015_v38 }
 0x399   :  { %6376 = vmatmul.msk.f32.gmra.mxu3 %vm396_vm1, %v1638_v1  ;;  %v1969_v54 = vpop.f32.mrf.mxu0 }
 0x39a   :  { %v1723_v35 = vadd.f32 %v1664_v24, %v1612_v11  ;;  %v2077_v24 = vrot.slane %v7370_v12, 7 }
 0x39b   :  { %6472 = vmatmul.msk.f32.gmra.mxu1 %vm396_vm1, %v8519_v48 }
 0x39c   :  { %6354 = vmatmul.msk.f32.gmra.mxu2 %vm396_vm1, %v8169_v46  ;;  %v1670_v38 = vpop.f32.mrf.mxu3  ;;  %6417 = vmatmul.msk.f32.gmra.mxu0 %vm396_vm1, %v8524_v10  ;;  %v1833_v7 = vadd.f32 %v8267_v8, %v1723_v35  ;;  %v8541_v11 = vsel %vm2049_vm8, %v2075_v57, %v2077_v24  ;;  %v8548_v8 = vsel %vm1857_vm7, %v1897_v14, %v11443_v22  ;;  %v8558_v36 = vpop.f32.mrf.mxu1  ;;  %v11613_v35 = vld [vmem:[#allocation33_spill] sm:$0xff] }
 0x39d   :  { %11610 = vst [vmem:[#allocation58_spill] sm:$0xff] %v8548_v8 }
 0x39e   :  { %v8534_v5 = vadd.f32 %v1966_v42, %v1833_v7  ;;  %v11611_v42 = vld [vmem:[#allocation45_spill] sm:$0xff] }
 0x39f   :  { %v1556_v56 = vpop.f32.mrf.mxu2 }
 0x3a0   :  { %11609 = vst [vmem:[#allocation20_spill] sm:$0xff] %v8534_v5  ;;  %v1613_v61 = vadd.f32 %v1556_v56, %v8038_v33  ;;  %v11614_v56 = vld [vmem:[#allocation32_spill] sm:$0xff] }
 0x3a1   :  { %v1972_v15 = vpop.f32.mrf.mxu0  ;;  %6440 = vmatmul.msk.f32.vlgmr.msrb.gmra.mxu3 %vm396_vm1, %v8073_v44 }
 0x3a2   :  { %v1724_v46 = vadd.f32 %v1667_v18, %v1613_v61  ;;  %v2079_v18 = vrot.slane %v7404_v59, 7  ;;  %v11615_v61 = vld [vmem:[#allocation2_spill] sm:$0xff] }
 0x3a3   :  { %6473 = vmatmul.msk.f32.gmra.mxu1 %vm396_vm1, %v8541_v11 }
 0x3a4   :  { %6355 = vmatmul.msk.f32.gmra.mxu2 %vm396_vm1, %v11611_v42  ;;  %v1673_v33 = vpop.f32.mrf.mxu3  ;;  %6418 = vmatmul.msk.f32.gmra.mxu0 %vm396_vm1, %v8548_v8  ;;  %v1834_v44 = vadd.f32 %v8292_v20, %v1724_v46  ;;  %v2050_v42 = vrot.slane %v11615_v61, 7  ;;  %v8565_v5 = vsel %vm2049_vm8, %v2077_v24, %v2079_v18  ;;  %v11616_v20 = vld [vmem:[#allocation3_spill] sm:$0xff] }
 0x3a5   :  { %v11620_v8 = vld [vmem:[#allocation39_spill] sm:$0xff] }
 0x3a6   :  { %v8556_v57 = vadd.f32 %v1969_v54, %v1834_v44  ;;  %v11617_v54 = vrot.slane %v11616_v20, 7 }
 0x3a7   :  { %v1559_v1 = vpop.f32.mrf.mxu2 }
 0x3a8   :  { %11612 = vst [vmem:[#allocation61_spill] sm:$0xff] %v8556_v57  ;;  %v1614_v7 = vadd.f32 %v1559_v1, %v11613_v35  ;;  %v2052_v46 = vsel %vm2049_vm8, %v2050_v42, %v11617_v54  ;;  %v11618_v1 = vld [vmem:[#allocation4_spill] sm:$0xff]  ;;  %v8580_v57 = vpop.f32.mrf.mxu1 }
 0x3a9   :  { %v1975_v14 = vpop.f32.mrf.mxu0  ;;  %6441 = vmatmul.msk.f32.gmra.mxu3 %vm396_vm1, %v11614_v56  ;;  %v11619_v56 = vld [vmem:[#allocation28_spill] sm:$0xff] }
 0x3aa   :  { %v1725_v22 = vadd.f32 %v1670_v38, %v1614_v7  ;;  %v2081_v38 = vrot.slane %v7441_v19, 7 }
 0x3ab   :  { %6474 = vmatmul.msk.f32.gmra.mxu1 %vm396_vm1, %v8565_v5 }
 0x3ac   :  { %v1676_v44 = vpop.f32.mrf.mxu3  ;;  %6419 = vmatmul.msk.f32.vlgmr.msrb.gmra.mxu2 %vm396_vm1, %v2052_v46  ;;  %6482 = vmatmul.msk.f32.vlgmr.msrb.gmra.mxu0 %vm396_vm1, %v11618_v1  ;;  %v1835_v35 = vadd.f32 %v8316_v21, %v1725_v22  ;;  %v8585_v54 = vsel %vm2049_vm8, %v2079_v18, %v2081_v38  ;;  %v11621_v22 = vld [vmem:[#allocation35_spill] sm:$0xff]  ;;  %v2083_v46 = vrot.slane %v7477_v41, 7 }
 0x3ae   :  { %v8577_v7 = vadd.f32 %v1972_v15, %v1835_v35 }
 0x3af   :  { %v1562_v24 = vpop.f32.mrf.mxu2 }
 0x3b0   :  { %v1615_v61 = vadd.f32 %v1562_v24, %v11619_v56  ;;  %v11623_v24 = vld [vmem:[#allocation41_spill] sm:$0xff] }
 0x3b1   :  { %v1978_v20 = vpop.f32.mrf.mxu0  ;;  %6442 = vmatmul.msk.f32.gmra.mxu3 %vm396_vm1, %v11620_v8 }
 0x3b2   :  { %v1726_v42 = vadd.f32 %v1673_v33, %v1615_v61  ;;  %v11622_v33 = vld [vmem:[#allocation34_spill] sm:$0xff]  ;;  %v8601_v61 = vsel %vm2049_vm8, %v2081_v38, %v2083_v46 }
 0x3b3   :  { %6475 = vmatmul.msk.f32.gmra.mxu1 %vm396_vm1, %v8585_v54 }
 0x3b4   :  { %v1679_v21 = vpop.f32.mrf.mxu3  ;;  %6420 = vmatmul.msk.f32.gmra.mxu2 %vm396_vm1, %v11621_v22  ;;  %6483 = vmatmul.msk.f32.gmra.mxu0 %vm396_vm1, %v7127_v25  ;;  %v1836_v15 = vadd.f32 %v8343_v27, %v1726_v42  ;;  %v8603_v22 = vpop.f32.mrf.mxu1  ;;  %v11624_v42 = vld [vmem:[#allocation37_spill] sm:$0xff] }
 0x3b6   :  { %v8595_v1 = vadd.f32 %v1975_v14, %v1836_v15  ;;  %v2085_v14 = vrot.slane %v7501_v29, 7 }
 0x3b7   :  { %v1565_v8 = vpop.f32.mrf.mxu2 }
 0x3b8   :  { %v1616_v18 = vadd.f32 %v1565_v8, %v11622_v33  ;;  %v11625_v33 = vld [vmem:[#allocation43_spill] sm:$0xff] }
 0x3b9   :  { %v1981_v35 = vpop.f32.mrf.mxu0  ;;  %6443 = vmatmul.msk.f32.gmra.mxu3 %vm396_vm1, %v11623_v24  ;;  %v8619_v24 = vsel %vm2049_vm8, %v2083_v46, %v2085_v14 }
 0x3ba   :  { %v1727_v56 = vadd.f32 %v1676_v44, %v1616_v18 }
 0x3bb   :  { %6476 = vmatmul.msk.f32.gmra.mxu1 %vm396_vm1, %v8601_v61 }
 0x3bc   :  { %v1682_v25 = vpop.f32.mrf.mxu3  ;;  %6421 = vmatmul.msk.f32.gmra.mxu2 %vm396_vm1, %v8255_v3  ;;  %6484 = vmatmul.msk.f32.gmra.mxu0 %vm396_vm1, %v7149_v31  ;;  %v1837_v27 = vadd.f32 %v8378_v13, %v1727_v56  ;;  %v11626_v3 = vld [vmem:[#allocation47_spill] sm:$0xff]  ;;  %v2087_v56 = vrot.slane %v7528_v55, 7 }
 0x3be   :  { %v8613_v44 = vadd.f32 %v1978_v20, %v1837_v27  ;;  %v8628_v20 = vpop.f32.mrf.mxu1  ;;  %v11627_v27 = vld [vmem:[#allocation38_spill] sm:$0xff] }
 0x3bf   :  { %v1568_v38 = vpop.f32.mrf.mxu2 }
 0x3c0   :  { %v1617_v15 = vadd.f32 %v1568_v38, %v11624_v42 }
 0x3c1   :  { %v1984_v8 = vpop.f32.mrf.mxu0  ;;  %6444 = vmatmul.msk.f32.gmra.mxu3 %vm396_vm1, %v11625_v33 }
 0x3c2   :  { %v1728_v18 = vadd.f32 %v1679_v21, %v1617_v15  ;;  %v11628_v15 = vld [vmem:[#allocation42_spill] sm:$0xff] }
 0x3c3   :  { %6477 = vmatmul.msk.f32.gmra.mxu1 %vm396_vm1, %v8619_v24 }
 0x3c4   :  { %v1685_v31 = vpop.f32.mrf.mxu3  ;;  %6422 = vmatmul.msk.f32.gmra.mxu2 %vm396_vm1, %v11626_v3  ;;  %6485 = vmatmul.msk.f32.gmra.mxu0 %vm396_vm1, %v7168_v37  ;;  %v1838_v13 = vadd.f32 %v8412_v40, %v1728_v18  ;;  %v8637_v3 = vsel %vm2049_vm8, %v2085_v14, %v2087_v56 }
 0x3c6   :  { %v8631_v21 = vadd.f32 %v1981_v35, %v1838_v13  ;;  %v2089_v35 = vrot.slane %v7551_v49, 7  ;;  %v11629_v13 = vld [vmem:[#allocation40_spill] sm:$0xff] }
 0x3c7   :  { %v1571_v46 = vpop.f32.mrf.mxu2 }
 0x3c8   :  { %v1618_v38 = vadd.f32 %v1571_v46, %v11627_v27 }
 0x3c9   :  { %v1987_v42 = vpop.f32.mrf.mxu0  ;;  %6445 = vmatmul.msk.f32.gmra.mxu3 %vm396_vm1, %v11628_v15 }
 0x3ca   :  { %v1729_v33 = vadd.f32 %v1682_v25, %v1618_v38  ;;  %v8649_v25 = vpop.f32.mrf.mxu1  ;;  %v11630_v38 = vld [vmem:[#allocation48_spill] sm:$0xff] }
 0x3cb   :  { %6478 = vmatmul.msk.f32.gmra.mxu1 %vm396_vm1, %v8637_v3 }
 0x3cc   :  { %v1688_v37 = vpop.f32.mrf.mxu3  ;;  %6423 = vmatmul.msk.f32.gmra.mxu2 %vm396_vm1, %v8299_v45  ;;  %6486 = vmatmul.msk.f32.gmra.mxu0 %vm396_vm1, %v7187_v43  ;;  %v1839_v40 = vadd.f32 %v8457_v62, %v1729_v33  ;;  %v8655_v45 = vsel %vm2049_vm8, %v2087_v56, %v2089_v35 }
 0x3ce   :  { %v8647_v18 = vadd.f32 %v1984_v8, %v1839_v40  ;;  %v2091_v8 = vrot.slane %v11557_v30, 7  ;;  %v11632_v40 = vld [vmem:[#allocation44_spill] sm:$0xff] }
 0x3cf   :  { %v1574_v14 = vpop.f32.mrf.mxu2 }
 0x3d0   :  { %v1619_v46 = vadd.f32 %v1574_v14, %v11629_v13 }
 0x3d1   :  { %v1990_v27 = vpop.f32.mrf.mxu0  ;;  %6446 = vmatmul.msk.f32.gmra.mxu3 %vm396_vm1, %v11630_v38  ;;  %v8673_v38 = vsel %vm2049_vm8, %v2089_v35, %v2091_v8 }
 0x3d2   :  { %v1730_v15 = vadd.f32 %v1685_v31, %v1619_v46  ;;  %v8668_v14 = vpop.f32.mrf.mxu1  ;;  %v11633_v46 = vld [vmem:[#allocation46_spill] sm:$0xff] }
 0x3d3   :  { %6479 = vmatmul.msk.f32.gmra.mxu1 %vm396_vm1, %v8655_v45 }
 0x3d4   :  { %6424 = vmatmul.msk.f32.gmra.mxu2 %vm396_vm1, %v8321_v9  ;;  %6487 = vmatmul.msk.f32.gmra.mxu0 %vm396_vm1, %v7207_v50  ;;  %v1840_v43 = vadd.f32 %v8496_v32, %v1730_v15  ;;  %v1691_v62 = vpop.f32.mrf.mxu3  ;;  %v11634_v32 = vld [vmem:[#allocation36_spill] sm:$0xff] }
 0x3d6   :  { %v8665_v33 = vadd.f32 %v1987_v42, %v1840_v43  ;;  %v2352_v42 = vrot.slane %v11634_v32, 7 }
 0x3d7   :  { %v1577_v31 = vpop.f32.mrf.mxu2 }
 0x3d8   :  { %11631 = vst [vmem:[#allocation31_spill] sm:$0xff] %v8665_v33  ;;  %v1620_v56 = vadd.f32 %v1577_v31, %v11632_v40  ;;  %v11635_v31 = vld [vmem:[#allocation57_spill] sm:$0xff]  ;;  %v11636_v40 = vld [vmem:[#allocation62_spill] sm:$0xff] }
 0x3d9   :  { %v1993_v13 = vpop.f32.mrf.mxu0  ;;  %6447 = vmatmul.msk.f32.gmra.mxu3 %vm396_vm1, %v11633_v46  ;;  %v2353_v46 = vsel %vm2049_vm8, %v2091_v8, %v2352_v42  ;;  %v11638_v8 = vld [vmem:[#allocation52_spill] sm:$0xff] }
 0x3da   :  { %v1731_v9 = vadd.f32 %v1688_v37, %v1620_v56 }
 0x3db   :  { %6480 = vmatmul.msk.f32.gmra.mxu1 %vm396_vm1, %v8673_v38 }
 0x3dc   :  { %6425 = vmatmul.msk.f32.gmra.mxu2 %vm396_vm1, %v8341_v47  ;;  %6488 = vmatmul.msk.f32.gmra.mxu0 %vm396_vm1, %v7232_v60  ;;  %v1841_v50 = vadd.f32 %v8531_v58, %v1731_v9  ;;  %v1694_v43 = vpop.f32.mrf.mxu3  ;;  %v8689_v47 = vpop.f32.mrf.mxu1  ;;  %v11637_v9 = vld [vmem:[#allocation50_spill] sm:$0xff] }
 0x3de   :  { %v8683_v15 = vadd.f32 %v1990_v27, %v1841_v50 }
 0x3df   :  { %v1580_v37 = vpop.f32.mrf.mxu2 }
 0x3e0   :  { %v1621_v35 = vadd.f32 %v1580_v37, %v11635_v31  ;;  %v11639_v37 = vld [vmem:[#allocation11_spill] sm:$0xff] }
 0x3e1   :  { %6448 = vmatmul.msk.f32.gmra.mxu3 %vm396_vm1, %v11636_v40  ;;  %v1996_v33 = vpop.f32.mrf.mxu0 }
 0x3e2   :  { %v1732_v56 = vadd.f32 %v1691_v62, %v1621_v35  ;;  %v11640_v35 = vld [vmem:[#allocation65_spill] sm:$0xff] }
 0x3e3   :  { %6481 = vmatmul.msk.f32.gmra.mxu1 %vm396_vm1, %v2353_v46 }
 0x3e4   :  { %6426 = vmatmul.msk.f32.gmra.mxu2 %vm396_vm1, %v8366_v51  ;;  %6489 = vmatmul.msk.f32.gmra.mxu0 %vm396_vm1, %v11564_v28  ;;  %v1842_v60 = vadd.f32 %v8558_v36, %v1732_v56  ;;  %v1697_v50 = vpop.f32.mrf.mxu3 }
 0x3e6   :  { %v8697_v58 = vadd.f32 %v1993_v13, %v1842_v60  ;;  %v11642_v60 = vld [vmem:[#allocation49_spill] sm:$0xff] }
 0x3e7   :  { %v1583_v27 = vpop.f32.mrf.mxu2 }
 0x3e8   :  { %v1622_v62 = vadd.f32 %v1583_v27, %v11637_v9 }
 0x3e9   :  { %6449 = vmatmul.msk.f32.gmra.mxu3 %vm396_vm1, %v11638_v8  ;;  %v1999_v51 = vpop.f32.mrf.mxu0 }
 0x3ea   :  { %v1733_v42 = vadd.f32 %v1694_v43, %v1622_v62  ;;  %v11641_v43 = vld [vmem:[#allocation23_spill] sm:$0xff]  ;;  %v11643_v62 = vld [vmem:[#allocation13_spill] sm:$0xff] }
 0x3ec   :  { %6427 = vmatmul.msk.f32.gmra.mxu2 %vm396_vm1, %v8391_v17  ;;  %6490 = vmatmul.msk.f32.gmra.mxu0 %vm396_vm1, %v11572_v39  ;;  %v1843_v28 = vadd.f32 %v8580_v57, %v1733_v42  ;;  %v1700_v56 = vpop.f32.mrf.mxu3  ;;  %v11644_v42 = vld [vmem:[#allocation26_spill] sm:$0xff] }
 0x3ee   :  { %v8707_v36 = vadd.f32 %v1996_v33, %v1843_v28 }
 0x3ef   :  { %v1586_v13 = vpop.f32.mrf.mxu2 }
 0x3f0   :  { %v1623_v31 = vadd.f32 %v1586_v13, %v11639_v37  ;;  %v11645_v13 = vld [vmem:[#allocation54_spill] sm:$0xff] }
 0x3f1   :  { %6450 = vmatmul.msk.f32.gmra.mxu3 %vm396_vm1, %v11640_v35  ;;  %v2002_v57 = vpop.f32.mrf.mxu0 }
 0x3f2   :  { %v1734_v40 = vadd.f32 %v1697_v50, %v1623_v31 }
 0x3f4   :  { %6428 = vmatmul.msk.f32.gmra.mxu2 %vm396_vm1, %v8422_v53  ;;  %6491 = vmatmul.msk.f32.gmra.mxu0 %vm396_vm1, %v7298_v23  ;;  %v1844_v39 = vadd.f32 %v8603_v22, %v1734_v40  ;;  %v1703_v53 = vpop.f32.mrf.mxu3  ;;  %v11646_v40 = vld [vmem:[#allocation51_spill] sm:$0xff] }
 0x3f6   :  { %v8717_v17 = vadd.f32 %v1999_v51, %v1844_v39 }
 0x3f7   :  { %v1589_v33 = vpop.f32.mrf.mxu2 }
 0x3f8   :  { %v1624_v46 = vadd.f32 %v1589_v33, %v11641_v43 }
 0x3f9   :  { %6451 = vmatmul.msk.f32.gmra.mxu3 %vm396_vm1, %v11642_v60  ;;  %v2005_v8 = vpop.f32.mrf.mxu0 }
 0x3fa   :  { %v1735_v27 = vadd.f32 %v1700_v56, %v1624_v46  ;;  %v11648_v46 = vld [vmem:[#allocation56_spill] sm:$0xff] }
 0x3fc   :  { %6429 = vmatmul.msk.f32.gmra.mxu2 %vm396_vm1, %v8468_v0  ;;  %6492 = vmatmul.msk.f32.gmra.mxu0 %vm396_vm1, %v7320_v34  ;;  %v1845_v23 = vadd.f32 %v8628_v20, %v1735_v27  ;;  %v1706_v20 = vpop.f32.mrf.mxu3  ;;  %v11652_v27 = vld [vmem:[#allocation59_spill] sm:$0xff] }
 0x3fe   :  { %v8727_v22 = vadd.f32 %v2002_v57, %v1845_v23  ;;  %v11647_v57 = vld [vmem:[#allocation21_spill] sm:$0xff] }
 0x3ff   :  { %v1592_v9 = vpop.f32.mrf.mxu2 }
 0x400   :  { %v1625_v50 = vadd.f32 %v1592_v9, %v11643_v62  ;;  %v2242_v9 = vrot.slane %v11634_v32, 6  ;;  %v11658_v62 = vld [vmem:[#allocation20_spill] sm:$0xff] }
 0x401   :  { %6452 = vmatmul.msk.f32.gmra.mxu3 %vm396_vm1, %v11644_v42  ;;  %v2008_v35 = vpop.f32.mrf.mxu0  ;;  %v11661_v42 = vld [vmem:[#allocation61_spill] sm:$0xff] }
 0x402   :  { %v1736_v28 = vadd.f32 %v1703_v53, %v1625_v50  ;;  %v11657_v53 = vld [vmem:[#allocation58_spill] sm:$0xff] }
 0x404   :  { %6430 = vmatmul.msk.f32.gmra.mxu2 %vm396_vm1, %v8494_v4  ;;  %6493 = vmatmul.msk.f32.gmra.mxu0 %vm396_vm1, %v7345_v52  ;;  %v1846_v34 = vadd.f32 %v8649_v25, %v1736_v28  ;;  %v1709_v39 = vpop.f32.mrf.mxu3 }
 0x406   :  { %v8737_v0 = vadd.f32 %v2005_v8, %v1846_v34  ;;  %v11660_v8 = vrot.slane %v11557_v30, 6 }
 0x407   :  { %v1595_v51 = vpop.f32.mrf.mxu2 }
 0x408   :  { %v1626_v37 = vadd.f32 %v1595_v51, %v11645_v13  ;;  %v11662_v51 = vld [vmem:[#allocation5_spill] sm:$0xff] }
 0x409   :  { %6453 = vmatmul.msk.f32.gmra.mxu3 %vm396_vm1, %v8371_v63 }
 0x40a   :  { %v1737_v31 = vadd.f32 %v1706_v20, %v1626_v37  ;;  %v11663_v37 = vld [vmem:[#allocation6_spill] sm:$0xff] }
 0x40c   :  { %6431 = vmatmul.msk.f32.gmra.mxu2 %vm396_vm1, %v8519_v48  ;;  %6494 = vmatmul.msk.f32.gmra.mxu0 %vm396_vm1, %v7370_v12  ;;  %v1847_v52 = vadd.f32 %v8668_v14, %v1737_v31  ;;  %v2575_v12 = vld [vmem:[%s11366_s2 + $0x2b8] sm:$0xff]  ;;  %v2011_v14 = vpop.f32.mrf.mxu0 }
 0x40d   :  { %2605 = vmatpush.msra.mxu2 %v2575_v12 }
 0x40e   :  { %v8747_v4 = vadd.f32 %v2008_v35, %v1847_v52  ;;  %v11664_v35 = vld [vmem:[#allocation7_spill] sm:$0xff] }
 0x40f   :  { %v1598_v25 = vpop.f32.mrf.mxu2 }
 0x410   :  { %v1627_v56 = vadd.f32 %v1598_v25, %v11646_v40  ;;  %v11665_v25 = vld [vmem:[#allocation8_spill] sm:$0xff] }
 0x411   :  { %6454 = vmatmul.msk.f32.gmra.mxu3 %vm396_vm1, %v11647_v57 }
 0x412   :  { %v1738_v63 = vadd.f32 %v1709_v39, %v1627_v56  ;;  %v11666_v56 = vld [vmem:[#allocation9_spill] sm:$0xff] }
 0x414   :  { %6432 = vmatmul.msk.f32.gmra.mxu2 %vm396_vm1, %v8541_v11  ;;  %6495 = vmatmul.msk.f32.gmra.mxu0 %vm396_vm1, %v7404_v59  ;;  %v1848_v48 = vadd.f32 %v8689_v47, %v1738_v63  ;;  %v11650_v11 = vld [vmem:[#allocation53_spill] sm:$0xff]  ;;  %v11668_v63 = vld [vmem:[#allocation10_spill] sm:$0xff] }
 0x416   :  { %v8760_v33 = vadd.f32 %v2011_v14, %v1848_v48  ;;  %v11669_v48 = vld [vmem:[#allocation12_spill] sm:$0xff]  ;;  %v8873_v14 = vpop.f32.mrf.mxu3 }
 0x417   :  { %v1601_v43 = vpop.f32.mrf.mxu2  ;;  %11670 = vst [vmem:[#allocation45_spill] sm:$0xff] %v8873_v14 }
 0x418   :  { %v8763_v60 = vadd.f32 %v1601_v43, %v11648_v46  ;;  %v8878_v46 = vpop.f32.mrf.mxu1 }
 0x419   :  { %6455 = vmatmul.msk.f32.gmra.mxu3 %vm396_vm1, %v8430_v6  ;;  %11671 = vst [vmem:[#allocation33_spill] sm:$0xff] %v8878_v46 }
 0x41a   :  { %11649 = vst [vmem:[#allocation64_spill] sm:$0xff] %v8763_v60 }
 0x41c   :  { %6433 = vmatmul.msk.f32.gmra.mxu2 %vm396_vm1, %v8565_v5  ;;  %6496 = vmatmul.msk.f32.gmra.mxu0 %vm396_vm1, %v7441_v19  ;;  %v2574_v19 = vld [vmem:[%s11366_s2 + $0x2b0] sm:$0xff] }
 0x41d   :  { %2606 = vmatpush.msra.mxu2 %v2574_v19  ;;  %v11675_v19 = vld [vmem:[#allocation15_spill] sm:$0xff] }
 0x41f   :  { %v1604_v59 = vpop.f32.mrf.mxu2 }
 0x420   :  { %v8772_v47 = vadd.f32 %v1604_v59, %v11650_v11  ;;  %v11672_v59 = vld [vmem:[#allocation14_spill] sm:$0xff]  ;;  %v8882_v11 = vpop.f32.mrf.mxu0 }
 0x421   :  { %6456 = vmatmul.msk.f32.gmra.mxu3 %vm396_vm1, %v8476_v16  ;;  %11673 = vst [vmem:[#allocation32_spill] sm:$0xff] %v8882_v11 }
 0x422   :  { %11651 = vst [vmem:[#allocation60_spill] sm:$0xff] %v8772_v47 }
 0x424   :  { %6434 = vmatmul.msk.f32.gmra.mxu2 %vm396_vm1, %v8585_v54  ;;  %6497 = vmatmul.msk.f32.gmra.mxu0 %vm396_vm1, %v7477_v41  ;;  %v11654_v41 = vld [vmem:[#allocation55_spill] sm:$0xff] }
 0x425   :  { %v2573_v54 = vld [vmem:[%s11366_s2 + $0x2a8] sm:$0xff] }
 0x426   :  { %2607 = vmatpush.msra.mxu2 %v2573_v54 }
 0x427   :  { %v1607_v6 = vpop.f32.mrf.mxu2 }
 0x428   :  { %v8781_v23 = vadd.f32 %v1607_v6, %v11652_v27  ;;  %v8887_v27 = vpop.f32.mrf.mxu3  ;;  %v8896_v54 = vpop.f32.mrf.mxu0 }
 0x429   :  { %6457 = vmatmul.msk.f32.gmra.mxu3 %vm396_vm1, %v8501_v2  ;;  %v2571_v2 = vld [vmem:[%s11366_s2 + $0x298] sm:$0xff]  ;;  %11674 = vst [vmem:[#allocation2_spill] sm:$0xff] %v8887_v27 }
 0x42a   :  { %11653 = vst [vmem:[#allocation30_spill] sm:$0xff] %v8781_v23 }
 0x42b   :  { %11677 = vst [vmem:[#allocation4_spill] sm:$0xff] %v8896_v54 }
 0x42c   :  { %6435 = vmatmul.msk.f32.gmra.mxu2 %vm396_vm1, %v8601_v61  ;;  %6498 = vmatmul.msk.f32.gmra.mxu0 %vm396_vm1, %v7501_v29  ;;  %v2572_v29 = vld [vmem:[%s11366_s2 + $0x2a0] sm:$0xff] }
 0x42d   :  { %2608 = vmatpush.msra.mxu2 %v2572_v29 }
 0x42f   :  { %v2152_v16 = vpop.f32.mrf.mxu2  ;;  %2609 = vmatpush.msra.mxu2 %v2571_v2  ;;  %v11679_v2 = vld [vmem:[#allocation16_spill] sm:$0xff] }
 0x430   :  { %v8793_v5 = vadd.f32 %v2152_v16, %v11654_v41  ;;  %v8891_v16 = vpop.f32.mrf.mxu1  ;;  %v8898_v29 = vpop.f32.mrf.mxu3 }
 0x431   :  { %6458 = vmatmul.msk.f32.gmra.mxu3 %vm396_vm1, %v8524_v10  ;;  %11676 = vst [vmem:[#allocation3_spill] sm:$0xff] %v8891_v16 }
 0x432   :  { %11655 = vst [vmem:[#allocation63_spill] sm:$0xff] %v8793_v5 }
 0x433   :  { %11678 = vst [vmem:[#allocation28_spill] sm:$0xff] %v8898_v29 }
 0x434   :  { %6436 = vmatmul.msk.f32.gmra.mxu2 %vm396_vm1, %v8619_v24  ;;  %6499 = vmatmul.msk.f32.gmra.mxu0 %vm396_vm1, %v7528_v55 }
 0x437   :  { %v2155_v61 = vpop.f32.mrf.mxu2 }
 0x438   :  { %v8811_v10 = vadd.f32 %v2155_v61, %v8510_v26  ;;  %v2243_v26 = vsel %vm1857_vm7, %v11660_v8, %v2242_v9  ;;  %v8907_v9 = vpop.f32.mrf.mxu0 }
 0x439   :  { %6459 = vmatmul.msk.f32.gmra.mxu3 %vm396_vm1, %v11657_v53  ;;  %11681 = vst [vmem:[#allocation35_spill] sm:$0xff] %v8907_v9 }
 0x43a   :  { %11656 = vst [vmem:[#allocation24_spill] sm:$0xff] %v8811_v10 }
 0x43c   :  { %6437 = vmatmul.msk.f32.gmra.mxu2 %vm396_vm1, %v8637_v3  ;;  %6500 = vmatmul.msk.f32.gmra.mxu0 %vm396_vm1, %v7551_v49 }
 0x43f   :  { %v2158_v24 = vpop.f32.mrf.mxu2 }
 0x440   :  { %v8821_v50 = vadd.f32 %v2158_v24, %v11658_v62  ;;  %v11682_v24 = vld [vmem:[#allocation17_spill] sm:$0xff] }
 0x441   :  { %6460 = vmatmul.msk.f32.gmra.mxu3 %vm396_vm1, %v2243_v26 }
 0x442   :  { %11659 = vst [vmem:[#allocation66_spill] sm:$0xff] %v8821_v50 }
 0x444   :  { %6438 = vmatmul.msk.f32.gmra.mxu2 %vm396_vm1, %v8655_v45  ;;  %6501 = vmatmul.msk.f32.gmra.mxu0 %vm396_vm1, %v11557_v30 }
 0x447   :  { %v2161_v3 = vpop.f32.mrf.mxu2 }
 0x448   :  { %v8832_v28 = vadd.f32 %v2161_v3, %v11661_v42  ;;  %v11685_v3 = vld [vmem:[#allocation18_spill] sm:$0xff]  ;;  %v8920_v42 = vpop.f32.mrf.mxu0 }
 0x449   :  { %11686 = vst [vmem:[#allocation37_spill] sm:$0xff] %v8920_v42 }
 0x44c   :  { %6439 = vmatmul.msk.f32.gmra.mxu2 %vm396_vm1, %v8673_v38  ;;  %6502 = vmatmul.msk.f32.gmra.mxu0 %vm396_vm1, %v11634_v32 }
 0x44f   :  { %v2164_v34 = vpop.f32.mrf.mxu2 }
 0x450   :  { %v8839_v20 = vadd.f32 %v2164_v34, %v8577_v7 }
 0x454   :  { %6503 = vmatmul.msk.f32.vlgmr.msra.gmra.mxu2 %vm396_vm1, %v11662_v51 }
 0x457   :  { %v2167_v45 = vpop.f32.mrf.mxu2 }
 0x458   :  { %v8844_v13 = vadd.f32 %v2167_v45, %v8595_v1 }
 0x45c   :  { %6504 = vmatmul.msk.f32.gmra.mxu2 %vm396_vm1, %v11663_v37  ;;  %v11690_v37 = vld [vmem:[#allocation19_spill] sm:$0xff] }
 0x45f   :  { %v2170_v31 = vpop.f32.mrf.mxu2 }
 0x460   :  { %v8849_v38 = vadd.f32 %v2170_v31, %v8613_v44  ;;  %v11667_v44 = vld [vmem:[#allocation31_spill] sm:$0xff] }
 0x464   :  { %6505 = vmatmul.msk.f32.gmra.mxu2 %vm396_vm1, %v11664_v35 }
 0x467   :  { %v2173_v52 = vpop.f32.mrf.mxu2 }
 0x468   :  { %v8854_v7 = vadd.f32 %v2173_v52, %v8631_v21 }
 0x46c   :  { %6506 = vmatmul.msk.f32.gmra.mxu2 %vm396_vm1, %v11665_v25  ;;  %v11694_v25 = vld [vmem:[#allocation22_spill] sm:$0xff] }
 0x46f   :  { %v2176_v40 = vpop.f32.mrf.mxu2 }
 0x470   :  { %v8859_v1 = vadd.f32 %v2176_v40, %v8647_v18 }
 0x474   :  { %6507 = vmatmul.msk.f32.gmra.mxu2 %vm396_vm1, %v11666_v56 }
 0x477   :  { %v2179_v39 = vpop.f32.mrf.mxu2 }
 0x478   :  { %v8864_v57 = vadd.f32 %v2179_v39, %v11667_v44  ;;  %v11698_v44 = vld [vmem:[#allocation25_spill] sm:$0xff] }
 0x47c   :  { %6508 = vmatmul.msk.f32.gmra.mxu2 %vm396_vm1, %v11668_v63 }
 0x47f   :  { %v2182_v12 = vpop.f32.mrf.mxu2 }
 0x480   :  { %v8869_v21 = vadd.f32 %v2182_v12, %v8683_v15 }
 0x484   :  { %6509 = vmatmul.msk.f32.gmra.mxu2 %vm396_vm1, %v11669_v48  ;;  %v11702_v48 = vld [vmem:[#allocation29_spill] sm:$0xff] }
 0x487   :  { %v2185_v18 = vpop.f32.mrf.mxu2 }
 0x488   :  { %v8876_v43 = vadd.f32 %v2185_v18, %v8697_v58 }
 0x48c   :  { %6510 = vmatmul.msk.f32.gmra.mxu2 %vm396_vm1, %v11672_v59 }
 0x48f   :  { %v2188_v6 = vpop.f32.mrf.mxu2 }
 0x490   :  { %v8885_v15 = vadd.f32 %v2188_v6, %v8707_v36  ;;  %v8902_v36 = vpop.f32.mrf.mxu1  ;;  %v2576_v6 = vrot.slane %v7528_v55, 1 }
 0x491   :  { %11680 = vst [vmem:[#allocation39_spill] sm:$0xff] %v8902_v36 }
 0x494   :  { %6511 = vmatmul.msk.f32.gmra.mxu2 %vm396_vm1, %v11675_v19 }
 0x497   :  { %v2191_v58 = vpop.f32.mrf.mxu2 }
 0x498   :  { %v8894_v41 = vadd.f32 %v2191_v58, %v8717_v17  ;;  %v8911_v17 = vpop.f32.mrf.mxu3  ;;  %v8916_v26 = vpop.f32.mrf.mxu1  ;;  %v11705_v58 = vld [vmem:[#allocation27_spill] sm:$0xff] }
 0x499   :  { %11683 = vst [vmem:[#allocation34_spill] sm:$0xff] %v8911_v17 }
 0x49a   :  { %11684 = vst [vmem:[#allocation41_spill] sm:$0xff] %v8916_v26 }
 0x49c   :  { %6512 = vmatmul.msk.f32.gmra.mxu2 %vm396_vm1, %v11679_v2  ;;  %v2577_v2 = vsel %vm354_vm2, %v11705_v58, %v2576_v6 }
 0x49f   :  { %v2194_v61 = vpop.f32.mrf.mxu2 }
 0x4a0   :  { %v8905_v53 = vadd.f32 %v2194_v61, %v8727_v22  ;;  %v8922_v22 = vpop.f32.mrf.mxu3  ;;  %v8927_v45 = vpop.f32.mrf.mxu1 }
 0x4a1   :  { %11687 = vst [vmem:[#allocation43_spill] sm:$0xff] %v8922_v22 }
 0x4a2   :  { %11689 = vst [vmem:[#allocation38_spill] sm:$0xff] %v8927_v45 }
 0x4a4   :  { %6513 = vmatmul.msk.f32.gmra.mxu2 %vm396_vm1, %v11682_v24 }
 0x4a7   :  { %v2197_v62 = vpop.f32.mrf.mxu2 }
 0x4a8   :  { %v8914_v8 = vadd.f32 %v2197_v62, %v8737_v0  ;;  %v8931_v0 = vpop.f32.mrf.mxu0  ;;  %v8936_v52 = vpop.f32.mrf.mxu3 }
 0x4a9   :  { %11691 = vst [vmem:[#allocation42_spill] sm:$0xff] %v8931_v0  ;;  %v8940_v40 = vpop.f32.mrf.mxu1 }
 0x4aa   :  { %11693 = vst [vmem:[#allocation48_spill] sm:$0xff] %v8936_v52 }
 0x4ab   :  { %11695 = vst [vmem:[#allocation44_spill] sm:$0xff] %v8940_v40 }
 0x4ac   :  { %6514 = vmatmul.msk.f32.gmra.mxu2 %vm396_vm1, %v11685_v3  ;;  %v2578_v3 = vrot.slane %v7551_v49, 1 }
 0x4af   :  { %v2200_v34 = vpop.f32.mrf.mxu2 }
 0x4b0   :  { %v8925_v51 = vadd.f32 %v2200_v34, %v8747_v4  ;;  %v8944_v56 = vpop.f32.mrf.mxu0  ;;  %v8946_v39 = vpop.f32.mrf.mxu3 }
 0x4b1   :  { %11697 = vst [vmem:[#allocation36_spill] sm:$0xff] %v8944_v56  ;;  %v8950_v63 = vpop.f32.mrf.mxu1 }
 0x4b2   :  { %11688 = vst [vmem:[#allocation47_spill] sm:$0xff] %v8925_v51 }
 0x4b3   :  { %11699 = vst [vmem:[#allocation57_spill] sm:$0xff] %v8950_v63 }
 0x4b4   :  { %6515 = vmatmul.msk.f32.gmra.mxu2 %vm396_vm1, %v11690_v37  ;;  %v2579_v37 = vsel %vm354_vm2, %v2576_v6, %v2578_v3  ;;  %v2582_v6 = vrot.slane %v11634_v32, 1 }
 0x4b7   :  { %v2203_v31 = vpop.f32.mrf.mxu2 }
 0x4b8   :  { %v8934_v35 = vadd.f32 %v2203_v31, %v8760_v33  ;;  %v8954_v12 = vpop.f32.mrf.mxu0  ;;  %v8958_v18 = vpop.f32.mrf.mxu3 }
 0x4b9   :  { %11701 = vst [vmem:[#allocation50_spill] sm:$0xff] %v8954_v12  ;;  %v8963_v19 = vpop.f32.mrf.mxu1 }
 0x4ba   :  { %11692 = vst [vmem:[#allocation40_spill] sm:$0xff] %v8934_v35 }
 0x4bb   :  { %11704 = vst [vmem:[#allocation11_spill] sm:$0xff] %v8963_v19 }
 0x4bc   :  { %6516 = vmatmul.msk.f32.gmra.mxu2 %vm396_vm1, %v11694_v25  ;;  %v2580_v25 = vrot.slane %v11557_v30, 1 }
 0x4be   :  { %v2583_v51 = vsel %vm354_vm2, %v2580_v25, %v2582_v6 }
 0x4bf   :  { %v8942_v4 = vpop.f32.mrf.mxu2 }
 0x4c0   :  { %11696 = vst [vmem:[#allocation46_spill] sm:$0xff] %v8942_v4  ;;  %v8968_v61 = vpop.f32.mrf.mxu0  ;;  %v8970_v24 = vpop.f32.mrf.mxu3 }
 0x4c1   :  { %11706 = vst [vmem:[#allocation65_spill] sm:$0xff] %v8968_v61  ;;  %v8975_v34 = vpop.f32.mrf.mxu1 }
 0x4c4   :  { %6517 = vmatmul.msk.f32.gmra.mxu2 %vm396_vm1, %v11698_v44 }
 0x4c7   :  { %v8952_v33 = vpop.f32.mrf.mxu2 }
 0x4c8   :  { %11700 = vst [vmem:[#allocation62_spill] sm:$0xff] %v8952_v33  ;;  %v8979_v55 = vpop.f32.mrf.mxu0  ;;  %v8984_v44 = vpop.f32.mrf.mxu3 }
 0x4c9   :  { %11708 = vst [vmem:[#allocation49_spill] sm:$0xff] %v8979_v55  ;;  %v8988_v58 = vpop.f32.mrf.mxu1 }
 0x4cc   :  { %6518 = vmatmul.msk.f32.gmra.mxu2 %vm396_vm1, %v11702_v48  ;;  %v2581_v48 = vsel %vm354_vm2, %v2578_v3, %v2580_v25 }
 0x4cf   :  { %v8960_v59 = vpop.f32.mrf.mxu2 }
 0x4d0   :  { %11703 = vst [vmem:[#allocation52_spill] sm:$0xff] %v8960_v59 }
 0x4d1   :  { %v8999_v30 = vpop.f32.mrf.mxu1 }
 0x4d4   :  { %6519 = vmatmul.msk.f32.gmra.mxu2 %vm396_vm1, %v2577_v2  ;;  %v8993_v2 = vpop.f32.mrf.mxu0 }
 0x4d5   :  { %11711 = vst [vmem:[#allocation54_spill] sm:$0xff] %v8993_v2 }
 0x4d7   :  { %v8972_v62 = vpop.f32.mrf.mxu2 }
 0x4d8   :  { %11707 = vst [vmem:[#allocation23_spill] sm:$0xff] %v8972_v62 }
 0x4d9   :  { %v9008_v32 = vpop.f32.mrf.mxu1 }
 0x4dc   :  { %6520 = vmatmul.msk.f32.gmra.mxu2 %vm396_vm1, %v2579_v37  ;;  %v8995_v37 = vpop.f32.mrf.mxu3  ;;  %v9003_v3 = vpop.f32.mrf.mxu0 }
 0x4df   :  { %v8981_v31 = vpop.f32.mrf.mxu2 }
 0x4e0   :  { %11709 = vst [vmem:[#allocation13_spill] sm:$0xff] %v8981_v31 }
 0x4e1   :  { %v2400_v25 = vpop.f32.mrf.mxu1 }
 0x4e4   :  { %6521 = vmatmul.msk.f32.gmra.mxu2 %vm396_vm1, %v2581_v48  ;;  %v2287_v48 = vpop.f32.mrf.mxu3  ;;  %v9010_v4 = vpop.f32.mrf.mxu0 }
 0x4e7   :  { %v8990_v49 = vpop.f32.mrf.mxu2 }
 0x4e8   :  { %11710 = vst [vmem:[#allocation26_spill] sm:$0xff] %v8990_v49 }
 0x4e9   :  { %v2403_v49 = vpop.f32.mrf.mxu1 }
 0x4ec   :  { %6522 = vmatmul.msk.f32.gmra.mxu2 %vm396_vm1, %v2583_v51  ;;  %v2290_v31 = vpop.f32.mrf.mxu3  ;;  %v9014_v51 = vpop.f32.mrf.mxu0 }
 0x4ef   :  { %v9001_v35 = vpop.f32.mrf.mxu2 }
 0x4f0   :  { %11712 = vst [vmem:[#allocation51_spill] sm:$0xff] %v9001_v35 }
 0x4f1   :  { %v2406_v54 = vpop.f32.mrf.mxu1 }
 0x4f4   :  { %6523 = vmatmul.msk.f32.gmra.mxu2 %vm396_vm1, %v2582_v6  ;;  %v2293_v11 = vpop.f32.mrf.mxu3  ;;  %v2517_v6 = vpop.f32.mrf.mxu0 }
 0x4f7   :  { %v9006_v62 = vpop.f32.mrf.mxu2 }
 0x4f8   :  { %11713 = vst [vmem:[#allocation21_spill] sm:$0xff] %v9006_v62 }
 0x4f9   :  { %v2409_v46 = vpop.f32.mrf.mxu1 }
 0x4fc   :  { %v2296_v59 = vpop.f32.mrf.mxu3  ;;  %v2520_v56 = vpop.f32.mrf.mxu0 }
 0x4fd   :  { %v2337_v29 = vadd.f32 %v2296_v59, %v8876_v43 }
 0x4ff   :  { %v9012_v42 = vpop.f32.mrf.mxu2 }
 0x500   :  { %11714 = vst [vmem:[#allocation56_spill] sm:$0xff] %v9012_v42 }
 0x501   :  { %v2412_v16 = vpop.f32.mrf.mxu1 }
 0x504   :  { %v2299_v26 = vpop.f32.mrf.mxu3  ;;  %v2523_v62 = vpop.f32.mrf.mxu0 }
 0x505   :  { %v2338_v19 = vadd.f32 %v2299_v26, %v8885_v15 }
 0x507   :  { %v9016_v33 = vpop.f32.mrf.mxu2 }
 0x508   :  { %11715 = vst [vmem:[#allocation53_spill] sm:$0xff] %v9016_v33 }
 0x509   :  { %v2415_v17 = vpop.f32.mrf.mxu1 }
 0x50c   :  { %v2302_v12 = vpop.f32.mrf.mxu3  ;;  %v2526_v42 = vpop.f32.mrf.mxu0 }
 0x50f   :  { %v9018_v0 = vpop.f32.mrf.mxu2 }
 0x510   :  { %11716 = vst [vmem:[#allocation59_spill] sm:$0xff] %v9018_v0  ;;  %v2339_v0 = vadd.f32 %v2302_v12, %v8894_v41  ;;  %v2447_v41 = vadd.f32 %v2406_v54, %v2337_v29 }
 0x511   :  { %v2418_v60 = vpop.f32.mrf.mxu1 }
 0x512   :  { %v2449_v23 = vadd.f32 %v2412_v16, %v2339_v0  ;;  %v2334_v16 = vadd.f32 %v2287_v48, %v8859_v1  ;;  %v2332_v1 = vadd.f32 %v8984_v44, %v8849_v38  ;;  %v2330_v38 = vadd.f32 %v8958_v18, %v8839_v20  ;;  %v11722_v18 = vld [vmem:[#allocation28_spill] sm:$0xff]  ;;  %v11731_v48 = vld [vmem:[#allocation43_spill] sm:$0xff] }
 0x514   :  { %v2305_v40 = vpop.f32.mrf.mxu3  ;;  %v2529_v36 = vpop.f32.mrf.mxu0  ;;  %v2563_v15 = vadd.f32 %v2526_v42, %v2449_v23  ;;  %v2444_v54 = vadd.f32 %v9008_v32, %v2334_v16  ;;  %v11737_v16 = vld [vmem:[#allocation39_spill] sm:$0xff] }
 0x515   :  { %v2340_v27 = vadd.f32 %v2305_v40, %v8905_v53  ;;  %v2448_v53 = vadd.f32 %v2409_v46, %v2338_v19  ;;  %v2561_v46 = vadd.f32 %v2520_v56, %v2447_v41 }
 0x516   :  { %v2558_v56 = vadd.f32 %v9010_v4, %v2444_v54  ;;  %v11721_v4 = vld [vmem:[#allocation30_spill] sm:$0xff]  ;;  %v11741_v54 = vld [vmem:[#allocation65_spill] sm:$0xff] }
 0x517   :  { %v9020_v35 = vpop.f32.mrf.mxu2  ;;  %v2450_v52 = vadd.f32 %v2415_v17, %v2340_v27  ;;  %v2562_v26 = vadd.f32 %v2523_v62, %v2448_v53  ;;  %v11724_v62 = vld [vmem:[#allocation48_spill] sm:$0xff] }
 0x518   :  { %11717 = vst [vmem:[#allocation55_spill] sm:$0xff] %v9020_v35 }
 0x519   :  { %v9028_v47 = vpop.f32.mrf.mxu1  ;;  %v2564_v40 = vadd.f32 %v2529_v36, %v2450_v52  ;;  %v2442_v52 = vadd.f32 %v8988_v58, %v2332_v1 }
 0x51a   :  { %11719 = vst [vmem:[#allocation20_spill] sm:$0xff] %v9028_v47 }
 0x51c   :  { %v2308_v14 = vpop.f32.mrf.mxu3  ;;  %v2532_v55 = vpop.f32.mrf.mxu0 }
 0x51d   :  { %v2341_v22 = vadd.f32 %v2308_v14, %v8914_v8  ;;  %v2336_v8 = vadd.f32 %v2293_v11, %v8869_v21  ;;  %v2333_v21 = vadd.f32 %v8995_v37, %v8854_v7 }
 0x51f   :  { %v9022_v9 = vpop.f32.mrf.mxu2  ;;  %v2451_v2 = vadd.f32 %v2418_v60, %v2341_v22  ;;  %v2335_v60 = vadd.f32 %v2290_v31, %v8864_v57  ;;  %v2446_v17 = vadd.f32 %v2403_v49, %v2336_v8  ;;  %v2443_v42 = vadd.f32 %v8999_v30, %v2333_v21  ;;  %v11720_v19 = vld [vmem:[#allocation55_spill] sm:$0xff]  ;;  %v11728_v49 = vld [vmem:[#allocation60_spill] sm:$0xff]  ;;  %v11734_v8 = vld [vmem:[#allocation53_spill] sm:$0xff] }
 0x520   :  { %v9089_v20 = vadd.f32 %v11720_v19, %v2558_v56  ;;  %v11725_v31 = vld [vmem:[#allocation11_spill] sm:$0xff]  ;;  %v11739_v21 = vld [vmem:[#allocation34_spill] sm:$0xff] }
 0x521   :  { %v2565_v35 = vadd.f32 %v2532_v55, %v2451_v2  ;;  %v9044_v43 = vpop.f32.mrf.mxu1  ;;  %v2445_v57 = vadd.f32 %v2400_v25, %v2335_v60  ;;  %v2560_v29 = vadd.f32 %v2517_v6, %v2446_v17  ;;  %v2557_v59 = vadd.f32 %v9003_v3, %v2443_v42  ;;  %v11729_v2 = vld [vmem:[#allocation2_spill] sm:$0xff]  ;;  %v11730_v3 = vld [vmem:[#allocation24_spill] sm:$0xff]  ;;  %v11732_v25 = vld [vmem:[#allocation57_spill] sm:$0xff] }
 0x522   :  { %v2440_v44 = vadd.f32 %v11725_v31, %v2330_v38  ;;  %v1740_v37 = vadd.f32 %v11729_v2, %v11728_v49  ;;  %v2327_v32 = vadd.f32 %v11731_v48, %v11730_v3  ;;  %v11733_v6 = vld [vmem:[#allocation49_spill] sm:$0xff]  ;;  %v11752_v2 = vld [vmem:[#allocation4_spill] sm:$0xff] }
 0x523   :  { %v2559_v0 = vadd.f32 %v9014_v51, %v2445_v57  ;;  %v11736_v60 = vld [vmem:[#allocation45_spill] sm:$0xff]  ;;  %v11753_v3 = vld [vmem:[#allocation52_spill] sm:$0xff] }
 0x524   :  { %v9024_v63 = vpop.f32.mrf.mxu3  ;;  %v9032_v50 = vpop.f32.mrf.mxu0  ;;  %v11749_v31 = vld [vmem:[#allocation41_spill] sm:$0xff] }
 0x525   :  { %11718 = vst [vmem:[#allocation58_spill] sm:$0xff] %v9024_v63 }
 0x527   :  { %v2641_v45 = vpop.f32.mrf.mxu2 }
 0x52c   :  { %v9035_v63 = vpop.f32.mrf.mxu3 }
 0x52f   :  { %v2644_v61 = vpop.f32.mrf.mxu2 }
 0x530   :  { %v9062_v36 = vadd.f32 %v2644_v61, %v2561_v46  ;;  %v11740_v46 = vld [vmem:[#allocation44_spill] sm:$0xff] }
 0x534   :  { %v9065_v7 = vpop.f32.mrf.mxu3 }
 0x537   :  { %v2647_v5 = vpop.f32.mrf.mxu2 }
 0x538   :  { %v9052_v23 = vadd.f32 %v2647_v5, %v2562_v26  ;;  %v2331_v5 = vadd.f32 %v8970_v24, %v8844_v13  ;;  %v9082_v13 = vpop.f32.mrf.mxu1  ;;  %v11723_v24 = vld [vmem:[#allocation66_spill] sm:$0xff]  ;;  %v11738_v26 = vld [vmem:[#allocation63_spill] sm:$0xff] }
 0x539   :  { %v2328_v55 = vadd.f32 %v11724_v62, %v11723_v24  ;;  %v2326_v57 = vadd.f32 %v11739_v21, %v11738_v26  ;;  %v11748_v62 = vld [vmem:[#allocation35_spill] sm:$0xff]  ;;  %v11759_v26 = vld [vmem:[#allocation13_spill] sm:$0xff] }
 0x53a   :  { %v2441_v12 = vadd.f32 %v8975_v34, %v2331_v5  ;;  %v11727_v34 = vld [vmem:[#allocation59_spill] sm:$0xff]  ;;  %v11742_v5 = vld [vmem:[#allocation56_spill] sm:$0xff] }
 0x53b   :  { %v9101_v58 = vadd.f32 %v11727_v34, %v2557_v59  ;;  %v2438_v1 = vadd.f32 %v11740_v46, %v2328_v55  ;;  %v11746_v59 = vld [vmem:[#allocation21_spill] sm:$0xff]  ;;  %v11751_v34 = vld [vmem:[#allocation51_spill] sm:$0xff]  ;;  %v11760_v46 = vld [vmem:[#allocation46_spill] sm:$0xff] }
 0x53f   :  { %v2650_v33 = vpop.f32.mrf.mxu2 }
 0x540   :  { %v9047_v22 = vadd.f32 %v2650_v33, %v2563_v15  ;;  %v9079_v33 = vadd.f32 %v9022_v9, %v2559_v0  ;;  %v1741_v9 = vadd.f32 %v11722_v18, %v11721_v4  ;;  %v2320_v15 = vpop.f32.mrf.mxu3  ;;  %v11743_v0 = vld [vmem:[#allocation3_spill] sm:$0xff]  ;;  %v2430_v4 = vpop.f32.mrf.mxu1  ;;  %v11747_v18 = vld [vmem:[#allocation33_spill] sm:$0xff] }
 0x541   :  { %v1850_v38 = vadd.f32 %v11743_v0, %v1740_v37  ;;  %v9164_v0 = vld [vmem:[%s11368_s3 + $0x2e0] sm:$0x3] }
 0x542   :  { %v1851_v17 = vadd.f32 %v11737_v16, %v1741_v9  ;;  %v11758_v16 = vld [vmem:[#allocation37_spill] sm:$0xff] }
 0x543   :  { %v2042_v37 = vadd.f32 %v11752_v2, %v1850_v38 }
 0x544   :  { %v2043_v55 = vadd.f32 %v11748_v62, %v1851_v17 }
 0x546   :  { %v2235_v48 = vadd.f32 %v11753_v3, %v2043_v55  ;;  %v11763_v55 = vld [vmem:[#allocation47_spill] sm:$0xff] }
 0x547   :  { %v2653_v10 = vpop.f32.mrf.mxu2 }
 0x548   :  { %v9041_v27 = vadd.f32 %v2653_v10, %v2564_v40  ;;  %v9055_v10 = vpop.f32.mrf.mxu0  ;;  %v11735_v40 = vld [vmem:[#allocation64_spill] sm:$0xff] }
 0x549   :  { %v1739_v41 = vadd.f32 %v11736_v60, %v11735_v40  ;;  %v11757_v60 = vld [vmem:[#allocation62_spill] sm:$0xff] }
 0x54b   :  { %v1849_v9 = vadd.f32 %v11747_v18, %v1739_v41  ;;  %v2234_v41 = vadd.f32 %v11757_v60, %v2042_v37  ;;  %v2752_v60 = vmul.f32 %v9089_v20, %v9089_v20 }
 0x54f   :  { %v2656_v14 = vpop.f32.mrf.mxu2 }
 0x550   :  { %v9038_v47 = vadd.f32 %v2656_v14, %v2565_v35  ;;  %v9071_v35 = vadd.f32 %v2641_v45, %v2560_v29  ;;  %v2329_v45 = vadd.f32 %v8946_v39, %v8832_v28  ;;  %v11726_v28 = vld [vmem:[#allocation54_spill] sm:$0xff]  ;;  %v9106_v30 = vpop.f32.mrf.mxu0  ;;  %v2555_v14 = vadd.f32 %v11733_v6, %v2441_v12 }
 0x551   :  { %v2556_v39 = vadd.f32 %v11726_v28, %v2442_v52  ;;  %v2554_v29 = vadd.f32 %v11741_v54, %v2440_v44  ;;  %v11744_v52 = vld [vmem:[#allocation38_spill] sm:$0xff]  ;;  %v2436_v44 = vadd.f32 %v11749_v31, %v2326_v57  ;;  %v11750_v28 = vld [vmem:[#allocation36_spill] sm:$0xff]  ;;  %v2323_v57 = vpop.f32.mrf.mxu3 }
 0x552   :  { %2704 = vmatpush.msra.mxu3 %v9038_v47  ;;  %v2439_v51 = vadd.f32 %v11732_v25, %v2329_v45  ;;  %v9124_v42 = vadd.f32 %v11742_v5, %v2555_v14  ;;  %v2437_v56 = vadd.f32 %v11744_v52, %v2327_v32  ;;  %v11745_v45 = vld [vmem:[#allocation50_spill] sm:$0xff]  ;;  %v2346_v54 = vadd.f32 %v2323_v57, %v2235_v48 }
 0x553   :  { %v9113_v53 = vadd.f32 %v11734_v8, %v2556_v39  ;;  %v9131_v19 = vadd.f32 %v11746_v59, %v2554_v29  ;;  %v2552_v39 = vadd.f32 %v11750_v28, %v2438_v1  ;;  %v11754_v32 = vld [vmem:[#allocation42_spill] sm:$0xff]  ;;  %v11756_v8 = vld [vmem:[#allocation32_spill] sm:$0xff]  ;;  %v2550_v17 = vadd.f32 %v11758_v16, %v2436_v44  ;;  %v11761_v29 = vld [vmem:[#allocation23_spill] sm:$0xff] }
 0x554   :  { %2705 = vmatpush.msra.mxu3 %v9041_v27  ;;  %v2553_v12 = vadd.f32 %v11745_v45, %v2439_v51  ;;  %v2551_v25 = vadd.f32 %v11754_v32, %v2437_v56  ;;  %v11755_v51 = vld [vmem:[#allocation26_spill] sm:$0xff]  ;;  %v2041_v40 = vadd.f32 %v11756_v8, %v1849_v9  ;;  %v2345_v52 = vadd.f32 %v2320_v15, %v2234_v41  ;;  %v2433_v56 = vpop.f32.mrf.mxu1  ;;  %v11762_v59 = vld [vmem:[#allocation40_spill] sm:$0xff] }
 0x555   :  { %v9146_v6 = vadd.f32 %v11755_v51, %v2552_v39  ;;  %v9158_v5 = vadd.f32 %v11761_v29, %v2550_v17  ;;  %v2343_v18 = vadd.f32 %v9035_v63, %v11762_v59  ;;  %v11764_v31 = vld [vmem:[#allocation58_spill] sm:$0xff]  ;;  %v11765_v63 = vld [vmem:[#allocation20_spill] sm:$0xff]  ;;  %v2759_v51 = vmul.f32 %v9038_v47, %v9038_v47 }
 0x556   :  { %2706 = vmatpush.msra.mxu3 %v9047_v22  ;;  %v9139_v49 = vadd.f32 %v11751_v34, %v2553_v12  ;;  %v9153_v21 = vadd.f32 %v11759_v26, %v2551_v25  ;;  %v2233_v1 = vadd.f32 %v11760_v46, %v2041_v40  ;;  %v2456_v12 = vadd.f32 %v2433_v56, %v2346_v54  ;;  %v2812_v34 = vld [vmem:[%s11366_s2 + $0xa50] sm:$0xff]  ;;  %v17_v8 = vld [vmem:[%s11369_s1] sm:$0x3] }
 0x557   :  { %v9057_v11 = vpop.f32.mrf.mxu2  ;;  %v2455_v9 = vadd.f32 %v2430_v4, %v2345_v52  ;;  %v2342_v44 = vadd.f32 %v11764_v31, %v11763_v55  ;;  %v2453_v2 = vadd.f32 %v9044_v43, %v2343_v18  ;;  %2834 = vmatpush.msra.mxu1 %v2812_v34  ;;  %v2753_v40 = vmul.f32 %v9079_v33, %v9079_v33 }
 0x558   :  { %2707 = vmatpush.msra.mxu3 %v9052_v23  ;;  %v2544_v14 = vpop.f32.mrf.mxu0  ;;  %v2344_v45 = vadd.f32 %v9065_v7, %v2233_v1  ;;  %6528 = vmatmul.msk.f32.vlgmr.msra.gmra.mxu1 %vm11445_vm10, %v17_v8  ;;  %v2751_v41 = vmul.f32 %v9101_v58, %v9101_v58  ;;  %v2750_v16 = vmul.f32 %v9113_v53, %v9113_v53 }
 0x559   :  { %v2569_v7 = vadd.f32 %v2544_v14, %v2455_v9  ;;  %v2452_v4 = vadd.f32 %v11765_v63, %v2342_v44  ;;  %v2754_v14 = vmul.f32 %v9071_v35, %v9071_v35  ;;  %v2749_v17 = vmul.f32 %v9124_v42, %v9124_v42 }
 0x55a   :  { %2708 = vmatpush.msra.mxu3 %v9062_v36  ;;  %v2454_v28 = vadd.f32 %v9082_v13, %v2344_v45  ;;  %v2567_v13 = vadd.f32 %v9055_v10, %v2453_v2  ;;  %v2696_v10 = vld [vmem:[%s11368_s3 + $0x2e8] sm:$0x3]  ;;  %v2748_v26 = vmul.f32 %v9131_v19, %v9131_v19  ;;  %v2747_v57 = vmul.f32 %v9139_v49, %v9139_v49 }
 0x55b   :  { %v2566_v43 = vadd.f32 %v9032_v50, %v2452_v4  ;;  %v2758_v50 = vmul.f32 %v9041_v27, %v9041_v27  ;;  %v2746_v46 = vmul.f32 %v9146_v6, %v9146_v6  ;;  %v2745_v1 = vmul.f32 %v9153_v21, %v9153_v21  ;;  %v6794_v4 = vld [vmem:[%s11366_s2 + $0xa58] ss:$0 sm:$0xff] }
 0x55c   :  { %2709 = vmatpush.msra.mxu3 %v9071_v35  ;;  %v2568_v3 = vadd.f32 %v9106_v30, %v2454_v28  ;;  %v2744_v54 = vmul.f32 %v9158_v5, %v9158_v5 }
 0x55d   :  { %v9196_v30 = vadd.f32 %v9057_v11, %v2566_v43  ;;  %v2757_v11 = vmul.f32 %v9047_v22, %v9047_v22 }
 0x55e   :  { %2710 = vmatpush.msra.mxu3 %v9079_v33 }
 0x55f   :  { %v9094_v61 = vpop.f32.mrf.mxu2  ;;  %v2760_v45 = vmul.f32 %v9196_v30, %v9196_v30 }
 0x560   :  { %2711 = vmatpush.msra.mxu3 %v9089_v20  ;;  %v2547_v62 = vpop.f32.mrf.mxu0  ;;  %v9192_v25 = vadd.f32 %v9094_v61, %v2567_v13  ;;  %v2756_v61 = vmul.f32 %v9052_v23, %v9052_v23 }
 0x561   :  { %v2570_v39 = vadd.f32 %v2547_v62, %v2456_v12  ;;  %v2839_v12 = vld [vmem:[%s11366_s2 + $0xa60] sm:$0xff] }
 0x562   :  { %2712 = vmatpush.msra.mxu3 %v9101_v58  ;;  %v2761_v56 = vmul.f32 %v9192_v25, %v9192_v25 }
 0x564   :  { %2713 = vmatpush.msra.mxu3 %v9113_v53 }
 0x566   :  { %2714 = vmatpush.msra.mxu3 %v9124_v42 }
 0x567   :  { %v2665_v24 = vpop.f32.mrf.mxu2 }
 0x568   :  { %2715 = vmatpush.msra.mxu3 %v9131_v19  ;;  %v9187_v32 = vadd.f32 %v2665_v24, %v2568_v3  ;;  %v2755_v24 = vmul.f32 %v9062_v36, %v9062_v36 }
 0x56a   :  { %2716 = vmatpush.msra.mxu3 %v9139_v49  ;;  %v2762_v52 = vmul.f32 %v9187_v32, %v9187_v32 }
 0x56c   :  { %2717 = vmatpush.msra.mxu3 %v9146_v6 }
 0x56e   :  { %2718 = vmatpush.msra.mxu3 %v9153_v21 }
 0x56f   :  { %v2668_v38 = vpop.f32.mrf.mxu2 }
 0x570   :  { %2719 = vmatpush.msra.mxu3 %v9158_v5  ;;  %v9182_v48 = vadd.f32 %v2668_v38, %v2569_v7  ;;  %v2876_v7 = vlaneseq }
 0x571   :  { %2720 = vmatmul.f32.vlgmr.msra.gmra.mxu3 %v9164_v0 }
 0x572   :  { %v2763_v38 = vmul.f32 %v9182_v48, %v9182_v48  ;;  %v9260_v43 = vshrl.u32 %v2876_v7, 7 }
 0x574   :  { %11766 = vst [vmem:[#allocation61_spill] sm:$0xff] %v9260_v43 }
 0x577   :  { %v2671_v15 = vpop.f32.mrf.mxu2 }
 0x578   :  { %v9178_v37 = vadd.f32 %v2671_v15, %v2570_v39 }
 0x57a   :  { %6524 = vmatpush.msk.msrb.mxu3 %vm354_vm2, %v9178_v37  ;;  %v2764_v29 = vmul.f32 %v9178_v37, %v9178_v37 }
 0x57c   :  { %2736 = vmatpush.msrb.mxu3 %v9182_v48 }
 0x57e   :  { %2737 = vmatpush.msrb.mxu3 %v9187_v32 }
 0x580   :  { %2738 = vmatpush.msrb.mxu3 %v9192_v25 }
 0x582   :  { %2739 = vmatpush.msrb.mxu3 %v9196_v30 }
 0x583   :  { %6525 = vmatmul.msk.f32.vlgmr.msrb.gmra.mxu3 %vm2697_vm9, %v2696_v10 }
 0x584   :  { %2768 = vmatpush.msra.mxu3 %v2759_v51 }
 0x586   :  { %2769 = vmatpush.msra.mxu3 %v2758_v50  ;;  %v6795_v50 = vld [vmem:[%s11366_s2 + $0xa68] ss:$0 sm:$0xff] }
 0x588   :  { %2770 = vmatpush.msra.mxu3 %v2757_v11 }
 0x58a   :  { %2771 = vmatpush.msra.mxu3 %v2756_v61 }
 0x58c   :  { %2772 = vmatpush.msra.mxu3 %v2755_v24  ;;  %v2889_v24 = vadd.s32 96, %v9260_v43 }
 0x58e   :  { %2773 = vmatpush.msra.mxu3 %v2754_v14  ;;  %vm2912_vm14 = vcmp.lt.s32.totalorder %v2889_v24, 100 }
 0x590   :  { %2774 = vmatpush.msra.mxu3 %v2753_v40 }
 0x592   :  { %2775 = vmatpush.msra.mxu3 %v2752_v60 }
 0x594   :  { %2776 = vmatpush.msra.mxu3 %v2751_v41 }
 0x596   :  { %2777 = vmatpush.msra.mxu3 %v2750_v16 }
 0x598   :  { %2778 = vmatpush.msra.mxu3 %v2749_v17 }
 0x59a   :  { %2779 = vmatpush.msra.mxu3 %v2748_v26 }
 0x59c   :  { %2780 = vmatpush.msra.mxu3 %v2747_v57 }
 0x59e   :  { %2781 = vmatpush.msra.mxu3 %v2746_v46 }
 0x5a0   :  { %2782 = vmatpush.msra.mxu3 %v2745_v1 }
 0x5a2   :  { %2783 = vmatpush.msra.mxu3 %v2744_v54 }
 0x5a3   :  { %2784 = vmatmul.f32.vlgmr.msra.gmra.mxu3 %v9164_v0 }
 0x5a4   :  { %6526 = vmatpush.msk.msrb.mxu3 %vm354_vm2, %v2764_v29 }
 0x5a6   :  { %2800 = vmatpush.msrb.mxu3 %v2763_v38 }
 0x5a8   :  { %2801 = vmatpush.msrb.mxu3 %v2762_v52 }
 0x5aa   :  { %2802 = vmatpush.msrb.mxu3 %v2761_v56 }
 0x5ac   :  { %2803 = vmatpush.msrb.mxu3 %v2760_v45 }
 0x5ad   :  { %6527 = vmatmul.msk.f32.vlgmr.msrb.gmra.mxu3 %vm2697_vm9, %v2696_v10 }
 0x5ae   :  { %2857 = vmatpush.msra.mxu3 %v2839_v12 }
 0x5b5   :  { %6529 = vmatmul.msk.f32.vlgmr.msra.gmra.mxu3 %vm11445_vm10, %v17_v8 }
 0x5d5   :  { %v2836_v3 = vpop.f32.mrf.mxu1 }
 0x5d6   :  { %v2837_v10 = vadd.f32 %v6794_v4, %v2836_v3 }
 0x5f4   :  { %v2721_v0 = vpop.f32.mrf.mxu3 }
 0x606   :  { %v2741_v59 = vpop.f32.mrf.mxu3 }
 0x607   :  { %v2742_v9 = vadd.f32 %v2741_v59, %v2721_v0 }
 0x609   :  { %v2808_v62 = vmul.f32 0.0625, %v2742_v9 }
 0x60b   :  { %v2810_v44 = vmul.f32 %v2808_v62, %v2808_v62 }
 0x626   :  { %v2785_v18 = vpop.f32.mrf.mxu3 }
 0x630   :  { %v2805_v55 = vpop.f32.mrf.mxu3 }
 0x631   :  { %v2806_v31 = vadd.f32 %v2805_v55, %v2785_v18 }
 0x633   :  { %v2809_v28 = vmul.f32 0.0625, %v2806_v31 }
 0x635   :  { %v2811_v39 = vsub.f32 %v2809_v28, %v2810_v44 }
 0x637   :  { %v2862_v15 = vadd.f32 1e-05, %v2811_v39 }
 0x638   :  { %v2859_v61 = vpop.f32.mrf.mxu3 }
 0x639   :  { %6801 = vrsqrt.f32 %v2862_v15  ;;  %vm2869_vm12 = vweird.f32 %v2862_v15  ;;  %v2860_v40 = vadd.f32 %v6795_v50, %v2859_v61 }
 0x63f   :  { %v6802_v34 = vpop.eup %6801 }
 0x640   :  { %v2864_v2 = vmul.f32 %v6802_v34, %v2862_v15  ;;  %vm2870_vm11 = vweird.f32 %v6802_v34 }
 0x641   :  { %vm2871_vm13 = vmor %vm2869_vm12, %vm2870_vm11 }
 0x642   :  { %v2865_v63 = vmul.f32 %v6802_v34, %v2864_v2 }
 0x644   :  { %v2866_v13 = vmul.f32 0.5, %v2865_v63 }
 0x646   :  { %v2867_v51 = vsub.f32 1.5, %v2866_v13 }
 0x648   :  { %v2868_v11 = vmul.f32 %v6802_v34, %v2867_v51 }
 0x64a   :  { %v2872_v14 = vsel %vm2871_vm13, %v6802_v34, %v2868_v11 }
 0x64b   :  { %v2873_v8 = vmul.f32 %v2872_v14, %v2837_v10 }
 0x64d   :  { %v2898_v60 = vperm.slane %v2873_v8, 1  ;;  %v9266_v41 = vperm.slane %v2873_v8, 0  ;;  %v2874_v16 = vmul.f32 %v2873_v8, %v2808_v62  ;;  %v3071_v8 = vld [vmem:[%s11368_s3 + $0x198] sm:$0xff] }
 0x64f   :  { %v2875_v17 = vsub.f32 %v2860_v40, %v2874_v16  ;;  %v2980_v26 = vmul.f32 %v2898_v60, %v9038_v47  ;;  %v2985_v57 = vmul.f32 %v2898_v60, %v9178_v37  ;;  %v2979_v46 = vmul.f32 %v2898_v60, %v9041_v27 }
 0x650   :  { %v2984_v1 = vmul.f32 %v2898_v60, %v9182_v48  ;;  %v2934_v54 = vsel %vm2912_vm14, %v9266_v41, %v2898_v60  ;;  %v2978_v52 = vmul.f32 %v2898_v60, %v9047_v22  ;;  %v2983_v56 = vmul.f32 %v2898_v60, %v9187_v32 }
 0x651   :  { %v2899_v29 = vperm.slane %v2875_v17, 1  ;;  %v9274_v38 = vperm.slane %v2875_v17, 0  ;;  %v2977_v45 = vmul.f32 %v2934_v54, %v9052_v23  ;;  %v2982_v47 = vmul.f32 %v2898_v60, %v9192_v25 }
 0x652   :  { %v2976_v37 = vmul.f32 %v9266_v41, %v9062_v36  ;;  %v2981_v27 = vmul.f32 %v2898_v60, %v9196_v30  ;;  %v2975_v28 = vmul.f32 %v9266_v41, %v9071_v35  ;;  %v2974_v39 = vmul.f32 %v9266_v41, %v9079_v33 }
 0x653   :  { %v3001_v48 = vadd.f32 %v2980_v26, %v2899_v29  ;;  %v3006_v12 = vadd.f32 %v2985_v57, %v2899_v29  ;;  %v3000_v0 = vadd.f32 %v2979_v46, %v2899_v29  ;;  %v3005_v59 = vadd.f32 %v2984_v1, %v2899_v29 }
 0x654   :  { %v2999_v18 = vadd.f32 %v2978_v52, %v2899_v29  ;;  %v3004_v9 = vadd.f32 %v2983_v56, %v2899_v29  ;;  %v2956_v22 = vsel %vm2912_vm14, %v9274_v38, %v2899_v29  ;;  %v3003_v62 = vadd.f32 %v2982_v47, %v2899_v29 }
 0x655   :  { %vm3022_vm15 = vcmp.gt.f32.partialorder %v3001_v48, 0.0  ;;  %v3043_v32 = vmul.f32 0.2, %v3001_v48  ;;  %vm3027_vm0 = vcmp.gt.f32.partialorder %v3006_v12, 0.0  ;;  %v3048_v23 = vmul.f32 0.2, %v3006_v12 }
 0x656   :  { %vm3021_vm11 = vcmp.gt.f32.partialorder %v3000_v0, 0.0  ;;  %v3042_v25 = vmul.f32 0.2, %v3000_v0  ;;  %vm3026_vm12 = vcmp.gt.f32.partialorder %v3005_v59, 0.0  ;;  %v3047_v36 = vmul.f32 0.2, %v3005_v59 }
 0x657   :  { %v3064_v55 = vsel %vm3022_vm15, %v3001_v48, %v3043_v32  ;;  %v3069_v30 = vsel %vm3027_vm0, %v3006_v12, %v3048_v23  ;;  %vm3020_vm13 = vcmp.gt.f32.partialorder %v2999_v18, 0.0  ;;  %v3041_v31 = vmul.f32 0.2, %v2999_v18 }
 0x658   :  { %3118 = vmatpush.msrb.mxu1 %v3064_v55  ;;  %6530 = vmatpush.msk.msrb.mxu3 %vm354_vm2, %v3069_v30  ;;  %vm3025_vm10 = vcmp.gt.f32.partialorder %v3004_v9, 0.0  ;;  %v3046_v44 = vmul.f32 0.2, %v3004_v9  ;;  %v3063_v15 = vsel %vm3021_vm11, %v3000_v0, %v3042_v25  ;;  %v3068_v34 = vsel %vm3026_vm12, %v3005_v59, %v3047_v36 }
 0x659   :  { %v2998_v2 = vadd.f32 %v2977_v45, %v2956_v22  ;;  %v3045_v7 = vmul.f32 0.2, %v3003_v62  ;;  %v3062_v63 = vsel %vm3020_vm13, %v2999_v18, %v3041_v31  ;;  %vm3024_vm14 = vcmp.gt.f32.partialorder %v3003_v62, 0.0 }
 0x65a   :  { %3119 = vmatpush.msrb.mxu1 %v3063_v15  ;;  %3174 = vmatpush.msrb.mxu3 %v3068_v34  ;;  %v2997_v4 = vadd.f32 %v2976_v37, %v9274_v38  ;;  %v3002_v3 = vadd.f32 %v2981_v27, %v2899_v29  ;;  %v3067_v13 = vsel %vm3025_vm10, %v3004_v9, %v3046_v44  ;;  %v3073_v27 = vld [vmem:[%s11368_s3 + $0x1a8] sm:$0xff]  ;;  %v3079_v15 = vld [vmem:[%s11368_s3 + $0x1d8] sm:$0xff]  ;;  %v3074_v34 = vld [vmem:[%s11368_s3 + $0x1b0] sm:$0xff] }
 0x65b   :  { %vm3019_vm15 = vcmp.gt.f32.partialorder %v2998_v2, 0.0  ;;  %v3040_v51 = vmul.f32 0.2, %v2998_v2  ;;  %v2996_v10 = vadd.f32 %v2975_v28, %v9274_v38  ;;  %v3066_v11 = vsel %vm3024_vm14, %v3003_v62, %v3045_v7  ;;  %v3077_v28 = vld [vmem:[%s11368_s3 + $0x1c8] sm:$0xff] }
 0x65c   :  { %3120 = vmatpush.msrb.mxu1 %v3062_v63  ;;  %3175 = vmatpush.msrb.mxu3 %v3067_v13  ;;  %vm3018_vm0 = vcmp.gt.f32.partialorder %v2997_v4, 0.0  ;;  %v3039_v35 = vmul.f32 0.2, %v2997_v4  ;;  %vm3023_vm11 = vcmp.gt.f32.partialorder %v3002_v3, 0.0  ;;  %v3044_v33 = vmul.f32 0.2, %v3002_v3 }
 0x65d   :  { %v3061_v50 = vsel %vm3019_vm15, %v2998_v2, %v3040_v51  ;;  %v3038_v61 = vmul.f32 0.2, %v2996_v10  ;;  %v2995_v24 = vadd.f32 %v2974_v39, %v9274_v38  ;;  %vm3017_vm12 = vcmp.gt.f32.partialorder %v2996_v10, 0.0  ;;  %v3072_v39 = vld [vmem:[%s11368_s3 + $0x1a0] sm:$0xff]  ;;  %v3081_v2 = vld [vmem:[%s11368_s3 + $0x1e8] sm:$0xff]  ;;  %v3421_v63 = vld [vmem:[%s11366_s2 + $0x358] sm:$0xff] }
 0x65e   :  { %3121 = vmatpush.msrb.mxu1 %v3061_v50  ;;  %3176 = vmatpush.msrb.mxu3 %v3066_v11  ;;  %v2973_v14 = vmul.f32 %v9266_v41, %v9089_v20  ;;  %v3060_v40 = vsel %vm3018_vm0, %v2997_v4, %v3039_v35  ;;  %v3065_v60 = vsel %vm3023_vm11, %v3002_v3, %v3044_v33  ;;  %v3215_v7 = vld [vmem:[%s11366_s2 + $0x308] sm:$0xff]  ;;  %v3076_v4 = vld [vmem:[%s11368_s3 + $0x1c0] sm:$0xff]  ;;  %v3083_v3 = vld [vmem:[%s11368_s3 + $0x1f8] sm:$0xff] }
 0x65f   :  { %v3037_v16 = vmul.f32 0.2, %v2995_v24  ;;  %v2972_v17 = vmul.f32 %v9266_v41, %v9101_v58  ;;  %vm3016_vm10 = vcmp.gt.f32.partialorder %v2995_v24, 0.0  ;;  %v2971_v57 = vmul.f32 %v9266_v41, %v9113_v53  ;;  %3261 = vmatpush.msra.mxu0 %v3215_v7  ;;  %3460 = vmatpush.msrb.mxu2 %v3421_v63  ;;  %v3210_v13 = vld [vmem:[%s11366_s2 + $0x2e0] sm:$0xff]  ;;  %v3209_v51 = vld [vmem:[%s11366_s2 + $0x2d8] sm:$0xff]  ;;  %v3420_v35 = vld [vmem:[%s11366_s2 + $0x350] sm:$0xff] }
 0x660   :  { %3122 = vmatpush.msrb.mxu1 %v3060_v40  ;;  %3177 = vmatpush.msrb.mxu3 %v3065_v60  ;;  %v2994_v26 = vadd.f32 %v2973_v14, %v9274_v38  ;;  %v3059_v46 = vsel %vm3017_vm12, %v2996_v10, %v3038_v61  ;;  %v2970_v1 = vmul.f32 %v9266_v41, %v9124_v42  ;;  %v3214_v10 = vld [vmem:[%s11366_s2 + $0x300] sm:$0xff]  ;;  %v3208_v33 = vld [vmem:[%s11366_s2 + $0x2d0] sm:$0xff]  ;;  %v3085_v11 = vld [vmem:[%s11368_s3 + $0x208] sm:$0xff] }
 0x661   :  { %v2993_v20 = vadd.f32 %v2972_v17, %v9274_v38  ;;  %6531 = vmatmul.msk.f32.vlgmr.msrb.gmra.mxu3 %vm2697_vm9, %v3071_v8  ;;  %v2992_v58 = vadd.f32 %v2971_v57, %v9274_v38  ;;  %v3058_v29 = vsel %vm3016_vm10, %v2995_v24, %v3037_v16  ;;  %v2969_v53 = vmul.f32 %v9266_v41, %v9131_v19  ;;  %v3078_v50 = vld [vmem:[%s11368_s3 + $0x1d0] sm:$0xff]  ;;  %v3080_v61 = vld [vmem:[%s11368_s3 + $0x1e0] sm:$0xff]  ;;  %v3087_v24 = vld [vmem:[%s11368_s3 + $0x218] sm:$0xff] }
 0x662   :  { %3123 = vmatpush.msrb.mxu1 %v3059_v46  ;;  %vm3015_vm13 = vcmp.gt.f32.partialorder %v2994_v26, 0.0  ;;  %v3036_v54 = vmul.f32 0.2, %v2994_v26  ;;  %v2991_v56 = vadd.f32 %v2970_v1, %v9274_v38  ;;  %v2968_v37 = vmul.f32 %v9266_v41, %v9139_v49  ;;  %3313 = vmatpush.msra.mxu3 %v3210_v13  ;;  %v3082_v14 = vld [vmem:[%s11368_s3 + $0x1f0] sm:$0xff]  ;;  %v3084_v8 = vld [vmem:[%s11368_s3 + $0x200] sm:$0xff]  ;;  %v3207_v40 = vld [vmem:[%s11366_s2 + $0x2c8] sm:$0xff] }
 0x663   :  { %v3035_v52 = vmul.f32 0.2, %v2993_v20  ;;  %vm3014_vm14 = vcmp.gt.f32.partialorder %v2993_v20, 0.0  ;;  %v3034_v47 = vmul.f32 0.2, %v2992_v58  ;;  %v2990_v42 = vadd.f32 %v2969_v53, %v9274_v38  ;;  %3262 = vmatpush.msra.mxu0 %v3214_v10  ;;  %3461 = vmatpush.msrb.mxu2 %v3420_v35  ;;  %v3206_v60 = vld [vmem:[%s11366_s2 + $0x2c0] sm:$0xff] }
 0x664   :  { %3124 = vmatpush.msrb.mxu1 %v3058_v29  ;;  %v3057_v45 = vsel %vm3015_vm13, %v2994_v26, %v3036_v54  ;;  %vm3013_vm15 = vcmp.gt.f32.partialorder %v2992_v58, 0.0  ;;  %v3033_v12 = vmul.f32 0.2, %v2991_v56  ;;  %v2989_v0 = vadd.f32 %v2968_v37, %v9274_v38  ;;  %3314 = vmatpush.msra.mxu3 %v3209_v51  ;;  %v3086_v16 = vld [vmem:[%s11368_s3 + $0x210] sm:$0xff]  ;;  %v3343_v26 = vld [vmem:[%s11366_s2 + $0x328] sm:$0xff]  ;;  %v3213_v57 = vld [vmem:[%s11366_s2 + $0x2f8] sm:$0xff] }
 0x665   :  { %v3056_v48 = vsel %vm3014_vm14, %v2993_v20, %v3035_v52  ;;  %v2967_v19 = vmul.f32 %v9266_v41, %v9146_v6  ;;  %vm3012_vm0 = vcmp.gt.f32.partialorder %v2991_v56, 0.0  ;;  %v3055_v59 = vsel %vm3013_vm15, %v2992_v58, %v3034_v47  ;;  %v3344_v17 = vld [vmem:[%s11366_s2 + $0x330] sm:$0xff]  ;;  %v3342_v46 = vld [vmem:[%s11366_s2 + $0x320] sm:$0xff]  ;;  %v3419_v20 = vld [vmem:[%s11366_s2 + $0x348] sm:$0xff]  ;;  %3263 = vmatpush.msra.mxu0 %v3213_v57 }
 0x666   :  { %3125 = vmatpush.msrb.mxu1 %v3057_v45  ;;  %v3032_v18 = vmul.f32 0.2, %v2990_v42  ;;  %v2966_v49 = vmul.f32 %v9266_v41, %v9153_v21  ;;  %vm3011_vm11 = vcmp.gt.f32.partialorder %v2990_v42, 0.0  ;;  %v3054_v22 = vsel %vm3012_vm0, %v2991_v56, %v3033_v12  ;;  %v3075_v21 = vld [vmem:[%s11368_s3 + $0x1b8] sm:$0xff]  ;;  %3315 = vmatpush.msra.mxu3 %v3208_v33  ;;  %v3212_v1 = vld [vmem:[%s11366_s2 + $0x2f0] sm:$0xff]  ;;  %v3418_v58 = vld [vmem:[%s11366_s2 + $0x340] sm:$0xff] }
 0x667   :  { %v2988_v9 = vadd.f32 %v2967_v19, %v9274_v38  ;;  %v3031_v62 = vmul.f32 0.2, %v2989_v0  ;;  %v2965_v6 = vmul.f32 %v9266_v41, %v9158_v5  ;;  %vm3010_vm12 = vcmp.gt.f32.partialorder %v2989_v0, 0.0  ;;  %v3070_v41 = vld [vmem:[%s11368_s3 + $0x190] sm:$0xff]  ;;  %3462 = vmatpush.msrb.mxu2 %v3419_v20  ;;  %v3341_v54 = vld [vmem:[%s11366_s2 + $0x318] sm:$0xff]  ;;  %v3211_v29 = vld [vmem:[%s11366_s2 + $0x2e8] sm:$0xff]  ;;  %3264 = vmatpush.msra.mxu0 %v3212_v1 }
 0x668   :  { %3126 = vmatpush.msrb.mxu1 %v3056_v48  ;;  %v2987_v32 = vadd.f32 %v2966_v49, %v9274_v38  ;;  %v3053_v23 = vsel %vm3011_vm11, %v2990_v42, %v3032_v18  ;;  %3316 = vmatpush.msra.mxu3 %v3207_v40  ;;  %v3340_v52 = vld [vmem:[%s11366_s2 + $0x310] sm:$0xff]  ;;  %v3417_v56 = vld [vmem:[%s11366_s2 + $0x338] sm:$0xff]  ;;  %v3574_v13 = vld [vmem:[%s11366_s2 + $0x388] sm:$0xff]  ;;  %vm11817_vm15 = vcmask 64512  }
 0x669   :  { %6532 = vmatmul.msk.f32.gmra.mxu3 %vm2697_vm9, %v3073_v27  ;;  %v3030_v25 = vmul.f32 0.2, %v2988_v9  ;;  %v2986_v36 = vadd.f32 %v2965_v6, %v9274_v38  ;;  %vm3009_vm10 = vcmp.gt.f32.partialorder %v2988_v9, 0.0  ;;  %v3052_v55 = vsel %vm3010_vm12, %v2989_v0, %v3031_v62  ;;  %3463 = vmatpush.msrb.mxu2 %v3418_v58  ;;  %v3575_v7 = vld [vmem:[%s11366_s2 + $0x390] sm:$0xff]  ;;  %v3498_v33 = vld [vmem:[%s11366_s2 + $0x380] sm:$0xff]  ;;  %vm11818_vm0 = vmmov %vm11817_vm15 }
 0x66a   :  { %3127 = vmatpush.msrb.mxu1 %v3055_v59  ;;  %v3029_v30 = vmul.f32 0.2, %v2987_v32  ;;  %vm3008_vm13 = vcmp.gt.f32.partialorder %v2987_v32, 0.0  ;;  %3317 = vmatpush.msra.mxu3 %v3206_v60  ;;  %v3496_v20 = vld [vmem:[%s11366_s2 + $0x370] sm:$0xff]  ;;  %v3655_v1 = vld [vmem:[%s11366_s2 + $0x3c0] sm:$0xff] }
 0x66b   :  { %v3051_v31 = vsel %vm3009_vm10, %v2988_v9, %v3030_v25  ;;  %v3028_v44 = vmul.f32 0.2, %v2986_v36  ;;  %vm3007_vm14 = vcmp.gt.f32.partialorder %v2986_v36, 0.0  ;;  %3265 = vmatpush.msra.mxu0 %v3211_v29  ;;  %3464 = vmatpush.msrb.mxu2 %v3417_v56  ;;  %v3578_v25 = vld [vmem:[%s11366_s2 + $0x3a8] sm:$0xff] }
 0x66c   :  { %3128 = vmatpush.msrb.mxu1 %v3054_v22  ;;  %v3050_v5 = vsel %vm3008_vm13, %v2987_v32, %v3029_v30  ;;  %3619 = vmatpush.msrb.mxu3 %v3578_v25  ;;  %v3577_v30 = vld [vmem:[%s11366_s2 + $0x3a0] sm:$0xff]  ;;  %v3495_v29 = vld [vmem:[%s11366_s2 + $0x368] sm:$0xff] }
 0x66d   :  { %v3049_v38 = vsel %vm3007_vm14, %v2986_v36, %v3028_v44  ;;  %3540 = vmatpush.msrb.mxu0 %v3498_v33 }
 0x66e   :  { %3129 = vmatpush.msrb.mxu1 %v3053_v23  ;;  %3620 = vmatpush.msrb.mxu3 %v3577_v30 }
 0x670   :  { %3130 = vmatpush.msrb.mxu1 %v3052_v55 }
 0x671   :  { %6533 = vmatmul.msk.f32.gmra.mxu3 %vm2697_vm9, %v3075_v21 }
 0x672   :  { %3131 = vmatpush.msrb.mxu1 %v3051_v31 }
 0x674   :  { %3132 = vmatpush.msrb.mxu1 %v3050_v5 }
 0x676   :  { %3133 = vmatpush.msrb.mxu1 %v3049_v38 }
 0x677   :  { %3134 = vmatmul.f32.vlgmr.msrb.gmra.mxu1 %v3070_v41 }
 0x678   :  { %3383 = vmatpush.msra.mxu1 %v3344_v17  ;;  %v3656_v17 = vld [vmem:[%s11366_s2 + $0x3c8] sm:$0xff] }
 0x679   :  { %6534 = vmatmul.msk.f32.gmra.mxu3 %vm2697_vm9, %v3077_v28 }
 0x67a   :  { %3384 = vmatpush.msra.mxu1 %v3343_v26  ;;  %v3708_v26 = vld [vmem:[%s11366_s2 + $0x3f0] sm:$0xff] }
 0x67c   :  { %3385 = vmatpush.msra.mxu1 %v3342_v46 }
 0x67e   :  { %3386 = vmatpush.msra.mxu1 %v3341_v54  ;;  %v3707_v54 = vld [vmem:[%s11366_s2 + $0x3e8] sm:$0xff] }
 0x67f   :  { %3137 = vmatmul.f32.gmra.mxu1 %v3072_v39 }
 0x680   :  { %3387 = vmatpush.msra.mxu1 %v3340_v52 }
 0x681   :  { %6535 = vmatmul.msk.f32.gmra.mxu3 %vm2697_vm9, %v3079_v15 }
 0x687   :  { %3140 = vmatmul.f32.gmra.mxu1 %v3074_v34 }
 0x689   :  { %6536 = vmatmul.msk.f32.gmra.mxu3 %vm2697_vm9, %v3081_v2  ;;  %v3576_v2 = vld [vmem:[%s11366_s2 + $0x398] sm:$0xff] }
 0x68a   :  { %3621 = vmatpush.msrb.mxu3 %v3576_v2 }
 0x68c   :  { %3622 = vmatpush.msrb.mxu3 %v3575_v7 }
 0x68e   :  { %3623 = vmatpush.msrb.mxu3 %v3574_v13 }
 0x68f   :  { %3143 = vmatmul.f32.gmra.mxu1 %v3076_v4 }
 0x691   :  { %6537 = vmatmul.msk.f32.gmra.mxu3 %vm2697_vm9, %v3083_v3 }
 0x697   :  { %3146 = vmatmul.f32.gmra.mxu1 %v3078_v50  ;;  %v3657_v50 = vld [vmem:[%s11366_s2 + $0x3d0] sm:$0xff] }
 0x698   :  { %3671 = vmatpush.msrb.mxu1 %v3657_v50 }
 0x699   :  { %6538 = vmatmul.msk.f32.gmra.mxu3 %vm2697_vm9, %v3085_v11  ;;  %v3709_v11 = vld [vmem:[%s11366_s2 + $0x3f8] sm:$0xff] }
 0x69a   :  { %3727 = vmatpush.msra.mxu2 %v3709_v11  ;;  %3672 = vmatpush.msrb.mxu1 %v3656_v17 }
 0x69c   :  { %3728 = vmatpush.msra.mxu2 %v3708_v26  ;;  %3673 = vmatpush.msrb.mxu1 %v3655_v1 }
 0x69e   :  { %3729 = vmatpush.msra.mxu2 %v3707_v54 }
 0x69f   :  { %3149 = vmatmul.f32.gmra.mxu1 %v3080_v61 }
 0x6a1   :  { %6539 = vmatmul.msk.f32.gmra.mxu3 %vm2697_vm9, %v3087_v24  ;;  %vm4257_vm9 = vcmask 416768  }
 0x6a7   :  { %3152 = vmatmul.f32.gmra.mxu1 %v3082_v14 }
 0x6af   :  { %3155 = vmatmul.f32.gmra.mxu1 %v3084_v8 }
 0x6b7   :  { %3158 = vmatmul.f32.gmra.mxu1 %v3086_v16  ;;  %v3497_v16 = vld [vmem:[%s11366_s2 + $0x378] sm:$0xff] }
 0x6b8   :  { %3541 = vmatpush.msrb.mxu0 %v3497_v16 }
 0x6ba   :  { %3542 = vmatpush.msrb.mxu0 %v3496_v20 }
 0x6bc   :  { %3543 = vmatpush.msrb.mxu0 %v3495_v29 }
 0x6e4   :  { %v3179_v53 = vpop.f32.mrf.mxu3 }
 0x6ec   :  { %v3182_v45 = vpop.f32.mrf.mxu3 }
 0x6f4   :  { %v3135_v47 = vpop.f32.mrf.mxu1  ;;  %v3185_v37 = vpop.f32.mrf.mxu3 }
 0x6f5   :  { %v9443_v42 = vadd.f32 %v3179_v53, %v3135_v47  ;;  %v3654_v47 = vld [vmem:[%s11366_s2 + $0x3b8] sm:$0xff] }
 0x6f6   :  { %3674 = vmatpush.msrb.mxu1 %v3654_v47 }
 0x6f7   :  { %6547 = vmatmul.msk.f32.vlgmr.msra.gmra.mxu3 %vm396_vm1, %v9443_v42  ;;  %v3223_v12 = vrot.slane %v9443_v42, 1  ;;  %v3345_v0 = vrot.slane %v9443_v42, 2  ;;  %v3422_v18 = vrot.slane %v9443_v42, 3  ;;  %v3579_v17 = vrot.slane %v9443_v42, 7 }
 0x6f8   :  { %v3500_v47 = vrot.slane %v9443_v42, 6 }
 0x6fc   :  { %v3138_v27 = vpop.f32.mrf.mxu1  ;;  %v3188_v32 = vpop.f32.mrf.mxu3 }
 0x6fd   :  { %v9447_v48 = vadd.f32 %v3182_v45, %v3138_v27  ;;  %v3494_v27 = vld [vmem:[%s11366_s2 + $0x360] sm:$0xff] }
 0x6fe   :  { %3544 = vmatpush.msrb.mxu0 %v3494_v27 }
 0x6ff   :  { %6548 = vmatmul.msk.f32.gmra.mxu3 %vm396_vm1, %v9447_v48  ;;  %v3224_v19 = vrot.slane %v9447_v48, 1  ;;  %v3346_v59 = vrot.slane %v9447_v48, 2  ;;  %v3423_v9 = vrot.slane %v9447_v48, 3  ;;  %v3843_v31 = vrot.slane %v9447_v48, 5 }
 0x700   :  { %v3766_v5 = vrot.slane %v9447_v48, 4  ;;  %v3580_v11 = vrot.slane %v9447_v48, 7 }
 0x701   :  { %v3225_v49 = vsel %vm354_vm2, %v3223_v12, %v3224_v19  ;;  %v3347_v22 = vsel %vm647_vm3, %v3345_v0, %v3346_v59  ;;  %v3424_v62 = vsel %vm839_vm4, %v3422_v18, %v3423_v9 }
 0x702   :  { %6540 = vmatmul.msk.f32.vlgmr.msra.gmra.mxu0 %vm396_vm1, %v3225_v49  ;;  %6554 = vmatmul.msk.f32.vlgmr.msra.gmra.mxu1 %vm396_vm1, %v3347_v22  ;;  %v3705_v49 = vld [vmem:[%s11366_s2 + $0x3d8] sm:$0xff]  ;;  %v3581_v20 = vsel %vm2049_vm8, %v3579_v17, %v3580_v11  ;;  %v3762_v17 = vld [vmem:[%s11366_s2 + $0x408] sm:$0xff] }
 0x703   :  { %6561 = vmatmul.msk.f32.vlgmr.msrb.gmra.mxu2 %vm396_vm1, %v3424_v62 }
 0x704   :  { %v3141_v6 = vpop.f32.mrf.mxu1  ;;  %v3191_v4 = vpop.f32.mrf.mxu3 }
 0x705   :  { %v9463_v23 = vadd.f32 %v3185_v37, %v3141_v6  ;;  %v3706_v37 = vld [vmem:[%s11366_s2 + $0x3e0] sm:$0xff] }
 0x706   :  { %3730 = vmatpush.msra.mxu2 %v3706_v37 }
 0x707   :  { %6549 = vmatmul.msk.f32.gmra.mxu3 %vm396_vm1, %v9463_v23  ;;  %v3226_v36 = vrot.slane %v9463_v23, 1  ;;  %v3348_v21 = vrot.slane %v9463_v23, 2  ;;  %v3425_v55 = vrot.slane %v9463_v23, 3  ;;  %v3844_v44 = vrot.slane %v9463_v23, 5 }
 0x708   :  { %v3767_v41 = vrot.slane %v9463_v23, 4  ;;  %3731 = vmatpush.msra.mxu2 %v3705_v49  ;;  %v3582_v29 = vrot.slane %v9463_v23, 7  ;;  %v3840_v49 = vld [vmem:[%s11366_s2 + $0x438] sm:$0xff] }
 0x709   :  { %v9481_v38 = vsel %vm354_vm2, %v3224_v19, %v3226_v36  ;;  %v3349_v28 = vsel %vm647_vm3, %v3346_v59, %v3348_v21  ;;  %v3426_v39 = vsel %vm839_vm4, %v3423_v9, %v3425_v55  ;;  %v9489_v15 = vsel %vm1444_vm6, %v3843_v31, %v3844_v44  ;;  %v3653_v9 = vld [vmem:[%s11366_s2 + $0x3b0] sm:$0xff] }
 0x70a   :  { %6541 = vmatmul.msk.f32.gmra.mxu0 %vm396_vm1, %v9481_v38  ;;  %6555 = vmatmul.msk.f32.gmra.mxu1 %vm396_vm1, %v3349_v28  ;;  %v9492_v34 = vsel %vm1252_vm5, %v3766_v5, %v3767_v41 }
 0x70b   :  { %6562 = vmatmul.msk.f32.gmra.mxu2 %vm396_vm1, %v3426_v39  ;;  %3675 = vmatpush.msrb.mxu1 %v3653_v9 }
 0x70c   :  { %v3144_v63 = vpop.f32.mrf.mxu1  ;;  %v3194_v52 = vpop.f32.mrf.mxu3 }
 0x70d   :  { %v9501_v3 = vadd.f32 %v3188_v32, %v3144_v63 }
 0x70f   :  { %6550 = vmatmul.msk.f32.gmra.mxu3 %vm396_vm1, %v9501_v3  ;;  %v3228_v51 = vrot.slane %v9501_v3, 1  ;;  %v3350_v10 = vrot.slane %v9501_v3, 2  ;;  %v3427_v35 = vrot.slane %v9501_v3, 3  ;;  %v3846_v61 = vrot.slane %v9501_v3, 5 }
 0x710   :  { %v3769_v24 = vrot.slane %v9501_v3, 4  ;;  %v3584_v27 = vrot.slane %v9501_v3, 7 }
 0x711   :  { %v9523_v14 = vsel %vm354_vm2, %v3226_v36, %v3228_v51  ;;  %v9526_v8 = vsel %vm647_vm3, %v3348_v21, %v3350_v10  ;;  %v9529_v40 = vsel %vm839_vm4, %v3425_v55, %v3427_v35  ;;  %v9536_v60 = vsel %vm1444_vm6, %v3844_v44, %v3846_v61 }
 0x712   :  { %6542 = vmatmul.msk.f32.gmra.mxu0 %vm396_vm1, %v9523_v14  ;;  %6556 = vmatmul.msk.f32.gmra.mxu1 %vm396_vm1, %v9526_v8  ;;  %v9550_v57 = vsel %vm1252_vm5, %v3767_v41, %v3769_v24  ;;  %v9718_v42 = vsel %vm2049_vm8, %v3582_v29, %v3584_v27 }
 0x713   :  { %6563 = vmatmul.msk.f32.gmra.mxu2 %vm396_vm1, %v9529_v40 }
 0x714   :  { %v3147_v46 = vpop.f32.mrf.mxu1  ;;  %v3197_v55 = vpop.f32.mrf.mxu3 }
 0x715   :  { %v9561_v58 = vadd.f32 %v3191_v4, %v3147_v46 }
 0x717   :  { %6551 = vmatmul.msk.f32.gmra.mxu3 %vm396_vm1, %v9561_v58  ;;  %v3230_v56 = vrot.slane %v9561_v58, 1  ;;  %v3352_v53 = vrot.slane %v9561_v58, 2  ;;  %v3429_v45 = vrot.slane %v9561_v58, 3  ;;  %v3848_v12 = vrot.slane %v9561_v58, 5 }
 0x718   :  { %v3771_v0 = vrot.slane %v9561_v58, 4  ;;  %v3586_v9 = vrot.slane %v9561_v58, 7 }
 0x719   :  { %v9583_v19 = vsel %vm354_vm2, %v3228_v51, %v3230_v56  ;;  %v9586_v59 = vsel %vm647_vm3, %v3350_v10, %v3352_v53  ;;  %v9589_v18 = vsel %vm839_vm4, %v3427_v35, %v3429_v45  ;;  %v9602_v22 = vsel %vm1444_vm6, %v3846_v61, %v3848_v12 }
 0x71a   :  { %6543 = vmatmul.msk.f32.gmra.mxu0 %vm396_vm1, %v9583_v19  ;;  %6557 = vmatmul.msk.f32.gmra.mxu1 %vm396_vm1, %v9586_v59  ;;  %v9607_v62 = vsel %vm1252_vm5, %v3769_v24, %v3771_v0 }
 0x71b   :  { %6564 = vmatmul.msk.f32.gmra.mxu2 %vm396_vm1, %v9589_v18 }
 0x71c   :  { %v3150_v32 = vpop.f32.mrf.mxu1  ;;  %v3200_v61 = vpop.f32.mrf.mxu3 }
 0x71d   :  { %v9609_v6 = vadd.f32 %v3194_v52, %v3150_v32  ;;  %v3839_v32 = vld [vmem:[%s11366_s2 + $0x430] sm:$0xff] }
 0x71f   :  { %6552 = vmatmul.msk.f32.gmra.mxu3 %vm396_vm1, %v9609_v6  ;;  %v3232_v25 = vrot.slane %v9609_v6, 1  ;;  %v3354_v36 = vrot.slane %v9609_v6, 2  ;;  %v3431_v21 = vrot.slane %v9609_v6, 3  ;;  %v3850_v30 = vrot.slane %v9609_v6, 5 }
 0x720   :  { %v3773_v31 = vrot.slane %v9609_v6, 4 }
 0x721   :  { %v9619_v44 = vsel %vm354_vm2, %v3230_v56, %v3232_v25  ;;  %v9622_v5 = vsel %vm647_vm3, %v3352_v53, %v3354_v36  ;;  %v9625_v41 = vsel %vm839_vm4, %v3429_v45, %v3431_v21  ;;  %v9632_v28 = vsel %vm1444_vm6, %v3848_v12, %v3850_v30  ;;  %v3842_v12 = vld [vmem:[%s11366_s2 + $0x448] sm:$0xff] }
 0x722   :  { %6544 = vmatmul.msk.f32.gmra.mxu0 %vm396_vm1, %v9619_v44  ;;  %6558 = vmatmul.msk.f32.gmra.mxu1 %vm396_vm1, %v9622_v5  ;;  %v9635_v39 = vsel %vm1252_vm5, %v3771_v0, %v3773_v31  ;;  %v3501_v53 = vrot.slane %v9447_v48, 6  ;;  %v9701_v45 = vsel %vm2049_vm8, %v3580_v11, %v3582_v29  ;;  %v3503_v0 = vrot.slane %v9463_v23, 6  ;;  %v3972_v11 = vld [vmem:[%s11366_s2 + $0x488] sm:$0xff]  ;;  %v3971_v29 = vld [vmem:[%s11366_s2 + $0x480] sm:$0xff] }
 0x723   :  { %6565 = vmatmul.msk.f32.gmra.mxu2 %vm396_vm1, %v9625_v41  ;;  %3881 = vmatpush.msra.mxu3 %v3842_v12 }
 0x724   :  { %v3153_v2 = vpop.f32.mrf.mxu1  ;;  %v3502_v37 = vsel %vm1857_vm7, %v3500_v47, %v3501_v53 }
 0x725   :  { %v9639_v7 = vadd.f32 %v3197_v55, %v3153_v2  ;;  %v3974_v55 = vld [vmem:[%s11366_s2 + $0x498] sm:$0xff] }
 0x726   :  { %3990 = vmatpush.msrb.mxu2 %v3974_v55  ;;  %v3764_v2 = vld [vmem:[%s11366_s2 + $0x418] sm:$0xff] }
 0x727   :  { %6553 = vmatmul.msk.f32.gmra.mxu3 %vm396_vm1, %v9639_v7  ;;  %v9644_v63 = vrot.slane %v9639_v7, 1  ;;  %v3356_v4 = vrot.slane %v9639_v7, 2  ;;  %v3433_v13 = vrot.slane %v9639_v7, 3  ;;  %v3852_v51 = vrot.slane %v9639_v7, 5 }
 0x728   :  { %v3775_v10 = vrot.slane %v9639_v7, 4  ;;  %v3590_v12 = vrot.slane %v9639_v7, 7 }
 0x729   :  { %v9652_v35 = vsel %vm354_vm2, %v3232_v25, %v9644_v63  ;;  %v9655_v33 = vsel %vm647_vm3, %v3354_v36, %v3356_v4  ;;  %v9658_v50 = vsel %vm839_vm4, %v3431_v21, %v3433_v13  ;;  %v9668_v24 = vsel %vm1444_vm6, %v3850_v30, %v3852_v51  ;;  %v3919_v21 = vld [vmem:[%s11366_s2 + $0x470] sm:$0xff] }
 0x72a   :  { %6545 = vmatmul.msk.f32.gmra.mxu0 %vm396_vm1, %v9652_v35  ;;  %6559 = vmatmul.msk.f32.gmra.mxu1 %vm396_vm1, %v9655_v33  ;;  %v9673_v16 = vsel %vm1252_vm5, %v3773_v31, %v3775_v10  ;;  %v3505_v25 = vrot.slane %v9501_v3, 6  ;;  %v9746_v36 = vsel %vm2049_vm8, %v3584_v27, %v3586_v9  ;;  %v3588_v31 = vrot.slane %v9609_v6, 7  ;;  %v3970_v27 = vld [vmem:[%s11366_s2 + $0x478] sm:$0xff] }
 0x72b   :  { %6566 = vmatmul.msk.f32.gmra.mxu2 %vm396_vm1, %v9658_v50  ;;  %3936 = vmatpush.msra.mxu1 %v3919_v21 }
 0x72c   :  { %v3156_v26 = vpop.f32.mrf.mxu1  ;;  %v9760_v30 = vsel %vm1857_vm7, %v3503_v0, %v3505_v25 }
 0x72d   :  { %v9678_v46 = vadd.f32 %v3200_v61, %v3156_v26  ;;  %v3507_v61 = vrot.slane %v9561_v58, 6  ;;  %v9792_v26 = vsel %vm2049_vm8, %v3586_v9, %v3588_v31 }
 0x72f   :  { %6575 = vmatmul.msk.f32.vlgmr.msrb.gmra.mxu3 %vm396_vm1, %v3581_v20  ;;  %v4089_v1 = vrot.slane %v9678_v46, 3  ;;  %v4029_v54 = vrot.slane %v9678_v46, 2  ;;  %v3916_v20 = vld [vmem:[%s11366_s2 + $0x458] sm:$0xff]  ;;  %v3508_v47 = vsel %vm1857_vm7, %v3505_v25, %v3507_v61 }
 0x731   :  { %v9691_v52 = vsel %vm839_vm4, %v3433_v13, %v4089_v1  ;;  %v9696_v56 = vsel %vm647_vm3, %v3356_v4, %v4029_v54 }
 0x732   :  { %6546 = vmatmul.msk.f32.gmra.mxu0 %vm396_vm1, %v9644_v63  ;;  %6560 = vmatmul.msk.f32.gmra.mxu1 %vm396_vm1, %v3356_v4  ;;  %v3918_v4 = vld [vmem:[%s11366_s2 + $0x468] sm:$0xff] }
 0x733   :  { %6567 = vmatmul.msk.f32.gmra.mxu2 %vm396_vm1, %v3433_v13  ;;  %v3973_v13 = vld [vmem:[%s11366_s2 + $0x490] sm:$0xff]  ;;  %3937 = vmatpush.msra.mxu1 %v3918_v4 }
 0x734   :  { %3991 = vmatpush.msrb.mxu2 %v3973_v13  ;;  %v4028_v13 = vld [vmem:[%s11366_s2 + $0x4c0] sm:$0xff] }
 0x736   :  { %3992 = vmatpush.msrb.mxu2 %v3972_v11  ;;  %v4027_v11 = vld [vmem:[%s11366_s2 + $0x4b8] sm:$0xff] }
 0x737   :  { %6576 = vmatmul.msk.f32.gmra.mxu3 %vm396_vm1, %v9701_v45 }
 0x738   :  { %3993 = vmatpush.msrb.mxu2 %v3971_v29 }
 0x73a   :  { %6568 = vmatmul.msk.f32.vlgmr.msrb.gmra.mxu0 %vm396_vm1, %v3502_v37  ;;  %6582 = vmatmul.msk.f32.vlgmr.msrb.gmra.mxu1 %vm396_vm1, %v9447_v48  ;;  %v3841_v48 = vld [vmem:[%s11366_s2 + $0x440] sm:$0xff]  ;;  %v3915_v37 = vld [vmem:[%s11366_s2 + $0x450] sm:$0xff] }
 0x73b   :  { %6589 = vmatmul.msk.f32.vlgmr.msra.gmra.mxu2 %vm396_vm1, %v9481_v38  ;;  %3882 = vmatpush.msra.mxu3 %v3841_v48  ;;  %v9726_v38 = vsel %vm1857_vm7, %v3501_v53, %v3503_v0  ;;  %v3761_v53 = vld [vmem:[%s11366_s2 + $0x400] sm:$0xff]  ;;  %v3509_v0 = vrot.slane %v9609_v6, 6  ;;  %v9820_v48 = vsel %vm2049_vm8, %v3588_v31, %v3590_v12 }
 0x73c   :  { %3994 = vmatpush.msrb.mxu2 %v3970_v27  ;;  %v4202_v27 = vld [vmem:[%s11366_s2 + $0x528] sm:$0xff] }
 0x73d   :  { %3883 = vmatpush.msra.mxu3 %v3840_v49  ;;  %v9825_v9 = vsel %vm1857_vm7, %v3507_v61, %v3509_v0  ;;  %v4147_v61 = vld [vmem:[%s11366_s2 + $0x508] sm:$0xff] }
 0x73f   :  { %6577 = vmatmul.msk.f32.gmra.mxu3 %vm396_vm1, %v9718_v42 }
 0x740   :  { %3884 = vmatpush.msra.mxu3 %v3839_v32  ;;  %v3710_v32 = vrot.slane %v9678_v46, 1 }
 0x742   :  { %6569 = vmatmul.msk.f32.gmra.mxu0 %vm396_vm1, %v9726_v38  ;;  %6583 = vmatmul.msk.f32.gmra.mxu1 %vm396_vm1, %v9463_v23  ;;  %v3838_v23 = vld [vmem:[%s11366_s2 + $0x428] sm:$0xff] }
 0x743   :  { %6590 = vmatmul.msk.f32.gmra.mxu2 %vm396_vm1, %v9523_v14  ;;  %v3765_v14 = vld [vmem:[%s11366_s2 + $0x420] sm:$0xff]  ;;  %3885 = vmatpush.msra.mxu3 %v3838_v23 }
 0x744   :  { %3804 = vmatpush.msra.mxu0 %v3765_v14  ;;  %v4088_v14 = vld [vmem:[%s11366_s2 + $0x4e8] sm:$0xff] }
 0x745   :  { %4110 = vmatpush.msrb.mxu3 %v4088_v14  ;;  %v4145_v14 = vld [vmem:[%s11366_s2 + $0x4f8] sm:$0xff] }
 0x746   :  { %3805 = vmatpush.msra.mxu0 %v3764_v2 }
 0x747   :  { %6578 = vmatmul.msk.f32.gmra.mxu3 %vm396_vm1, %v9746_v36 }
 0x74a   :  { %6570 = vmatmul.msk.f32.gmra.mxu0 %vm396_vm1, %v9760_v30  ;;  %6584 = vmatmul.msk.f32.gmra.mxu1 %vm396_vm1, %v9501_v3  ;;  %v3763_v3 = vld [vmem:[%s11366_s2 + $0x410] sm:$0xff] }
 0x74b   :  { %6591 = vmatmul.msk.f32.gmra.mxu2 %vm396_vm1, %v9583_v19  ;;  %v3917_v19 = vld [vmem:[%s11366_s2 + $0x460] sm:$0xff]  ;;  %3806 = vmatpush.msra.mxu0 %v3763_v3  ;;  %v4148_v3 = vld [vmem:[%s11366_s2 + $0x510] sm:$0xff] }
 0x74c   :  { %3938 = vmatpush.msra.mxu1 %v3917_v19  ;;  %v4204_v19 = vld [vmem:[%s11366_s2 + $0x538] sm:$0xff] }
 0x74d   :  { %3807 = vmatpush.msra.mxu0 %v3762_v17  ;;  %v4203_v17 = vld [vmem:[%s11366_s2 + $0x530] sm:$0xff]  ;;  %4222 = vmatpush.msra.mxu2 %v4204_v19 }
 0x74e   :  { %3939 = vmatpush.msra.mxu1 %v3916_v20 }
 0x74f   :  { %6579 = vmatmul.msk.f32.gmra.mxu3 %vm396_vm1, %v9792_v26  ;;  %3808 = vmatpush.msra.mxu0 %v3761_v53 }
 0x750   :  { %3940 = vmatpush.msra.mxu1 %v3915_v37  ;;  %4223 = vmatpush.msra.mxu2 %v4203_v17  ;;  %v4146_v37 = vld [vmem:[%s11366_s2 + $0x500] sm:$0xff] }
 0x751   :  { %4050 = vmatpush.msrb.mxu0 %v4028_v13 }
 0x752   :  { %6571 = vmatmul.msk.f32.gmra.mxu0 %vm396_vm1, %v3508_v47  ;;  %6585 = vmatmul.msk.f32.gmra.mxu1 %vm396_vm1, %v9561_v58  ;;  %v3592_v58 = vrot.slane %v9678_v46, 7 }
 0x753   :  { %6592 = vmatmul.msk.f32.gmra.mxu2 %vm396_vm1, %v9619_v44  ;;  %v3511_v44 = vrot.slane %v9639_v7, 6  ;;  %4166 = vmatpush.msrb.mxu1 %v4148_v3 }
 0x754   :  { %v9838_v49 = vsel %vm2049_vm8, %v3590_v12, %v3592_v58  ;;  %4051 = vmatpush.msrb.mxu0 %v4027_v11  ;;  %4224 = vmatpush.msra.mxu2 %v4202_v27 }
 0x755   :  { %v9844_v25 = vsel %vm1857_vm7, %v3509_v0, %v3511_v44  ;;  %4167 = vmatpush.msrb.mxu1 %v4147_v61 }
 0x757   :  { %6580 = vmatmul.msk.f32.gmra.mxu3 %vm396_vm1, %v9820_v48  ;;  %4168 = vmatpush.msrb.mxu1 %v4146_v37 }
 0x759   :  { %4169 = vmatpush.msrb.mxu1 %v4145_v14 }
 0x75a   :  { %6572 = vmatmul.msk.f32.gmra.mxu0 %vm396_vm1, %v9825_v9  ;;  %6586 = vmatmul.msk.f32.gmra.mxu1 %vm396_vm1, %v9609_v6  ;;  %v3711_v6 = vsel %vm354_vm2, %v9644_v63, %v3710_v32  ;;  %v9868_v63 = vpop.f32.mrf.mxu3 }
 0x75b   :  { %6593 = vmatmul.msk.f32.gmra.mxu2 %vm396_vm1, %v9652_v35  ;;  %v3513_v35 = vrot.slane %v9678_v46, 6 }
 0x75d   :  { %v9859_v23 = vsel %vm1857_vm7, %v3511_v44, %v3513_v35 }
 0x75f   :  { %6581 = vmatmul.msk.f32.gmra.mxu3 %vm396_vm1, %v9838_v49 }
 0x762   :  { %6573 = vmatmul.msk.f32.gmra.mxu0 %vm396_vm1, %v9844_v25  ;;  %6587 = vmatmul.msk.f32.gmra.mxu1 %vm396_vm1, %v9639_v7 }
 0x763   :  { %6594 = vmatmul.msk.f32.gmra.mxu2 %vm396_vm1, %v3711_v6  ;;  %v4025_v6 = vld [vmem:[%s11366_s2 + $0x4a8] sm:$0xff] }
 0x767   :  { %6603 = vmatmul.msk.f32.vlgmr.msra.gmra.mxu3 %vm396_vm1, %v9489_v15  ;;  %v9876_v15 = vpop.f32.mrf.mxu1 }
 0x768   :  { %v9991_v17 = vadd.f32 %v9868_v63, %v9876_v15 }
 0x76a   :  { %6574 = vmatmul.msk.f32.gmra.mxu0 %vm396_vm1, %v9859_v23  ;;  %6588 = vmatmul.msk.f32.gmra.mxu1 %vm396_vm1, %v9678_v46  ;;  %v3975_v15 = vrot.slane %v9991_v17, 7 }
 0x76b   :  { %6595 = vmatmul.msk.f32.gmra.mxu2 %vm396_vm1, %v3710_v32  ;;  %v9944_v32 = vrot.slane %v9678_v46, 5 }
 0x76f   :  { %6604 = vmatmul.msk.f32.gmra.mxu3 %vm396_vm1, %v9536_v60 }
 0x772   :  { %6596 = vmatmul.msk.f32.vlgmr.msra.gmra.mxu0 %vm396_vm1, %v9492_v34  ;;  %6610 = vmatmul.msk.f32.vlgmr.msra.gmra.mxu1 %vm396_vm1, %v9726_v38  ;;  %v4087_v34 = vld [vmem:[%s11366_s2 + $0x4e0] sm:$0xff]  ;;  %v4085_v38 = vld [vmem:[%s11366_s2 + $0x4d0] sm:$0xff] }
 0x773   :  { %6617 = vmatmul.msk.f32.vlgmr.msrb.gmra.mxu2 %vm396_vm1, %v9701_v45  ;;  %4111 = vmatpush.msrb.mxu3 %v4087_v34  ;;  %v4086_v45 = vld [vmem:[%s11366_s2 + $0x4d8] sm:$0xff]  ;;  %v4144_v34 = vld [vmem:[%s11366_s2 + $0x4f0] sm:$0xff] }
 0x774   :  { %4170 = vmatpush.msrb.mxu1 %v4144_v34 }
 0x775   :  { %4112 = vmatpush.msrb.mxu3 %v4086_v45  ;;  %v4200_v45 = vld [vmem:[%s11366_s2 + $0x518] sm:$0xff] }
 0x777   :  { %6605 = vmatmul.msk.f32.gmra.mxu3 %vm396_vm1, %v9602_v22 }
 0x778   :  { %4113 = vmatpush.msrb.mxu3 %v4085_v38 }
 0x77a   :  { %v3319_v21 = vpop.f32.mrf.mxu3  ;;  %6597 = vmatmul.msk.f32.gmra.mxu0 %vm396_vm1, %v9550_v57  ;;  %6611 = vmatmul.msk.f32.gmra.mxu1 %vm396_vm1, %v9760_v30 }
 0x77b   :  { %6618 = vmatmul.msk.f32.gmra.mxu2 %vm396_vm1, %v9718_v42  ;;  %v4084_v42 = vld [vmem:[%s11366_s2 + $0x4c8] sm:$0xff] }
 0x77c   :  { %4114 = vmatpush.msrb.mxu3 %v4084_v42 }
 0x77f   :  { %v3267_v55 = vpop.f32.mrf.mxu0  ;;  %v3389_v31 = vpop.f32.mrf.mxu1  ;;  %6606 = vmatmul.msk.f32.gmra.mxu3 %vm396_vm1, %v9632_v28 }
 0x780   :  { %v3320_v30 = vadd.f32 %v3319_v21, %v3267_v55  ;;  %v4201_v21 = vld [vmem:[%s11366_s2 + $0x520] sm:$0xff] }
 0x781   :  { %4225 = vmatpush.msra.mxu2 %v4201_v21 }
 0x782   :  { %v3410_v2 = vadd.f32 %v3389_v31, %v3320_v30  ;;  %v3322_v4 = vpop.f32.mrf.mxu3  ;;  %6598 = vmatmul.msk.f32.gmra.mxu0 %vm396_vm1, %v9607_v62  ;;  %6612 = vmatmul.msk.f32.gmra.mxu1 %vm396_vm1, %v3508_v47  ;;  %v4026_v47 = vld [vmem:[%s11366_s2 + $0x4b0] sm:$0xff] }
 0x783   :  { %6619 = vmatmul.msk.f32.gmra.mxu2 %vm396_vm1, %v9746_v36  ;;  %4052 = vmatpush.msrb.mxu0 %v4026_v47 }
 0x784   :  { %4226 = vmatpush.msra.mxu2 %v4200_v45 }
 0x785   :  { %4053 = vmatpush.msrb.mxu0 %v4025_v6  ;;  %v4205_v6 = vrot.slane %v9991_v17, 5 }
 0x786   :  { %v3466_v20 = vpop.f32.mrf.mxu2 }
 0x787   :  { %v9926_v36 = vadd.f32 %v3466_v20, %v3410_v2  ;;  %v3270_v29 = vpop.f32.mrf.mxu0  ;;  %v3392_v53 = vpop.f32.mrf.mxu1  ;;  %6607 = vmatmul.msk.f32.gmra.mxu3 %vm396_vm1, %v9668_v24  ;;  %v4206_v45 = vsel %vm1444_vm6, %v9944_v32, %v4205_v6 }
 0x788   :  { %v3323_v12 = vadd.f32 %v3322_v4, %v3270_v29  ;;  %v3921_v29 = vrot.slane %v9991_v17, 6 }
 0x78a   :  { %v3411_v0 = vadd.f32 %v3392_v53, %v3323_v12  ;;  %v3325_v44 = vpop.f32.mrf.mxu3  ;;  %6599 = vmatmul.msk.f32.gmra.mxu0 %vm396_vm1, %v9635_v39  ;;  %6613 = vmatmul.msk.f32.gmra.mxu1 %vm396_vm1, %v9825_v9  ;;  %v4024_v9 = vld [vmem:[%s11366_s2 + $0x4a0] sm:$0xff] }
 0x78b   :  { %6620 = vmatmul.msk.f32.gmra.mxu2 %vm396_vm1, %v9792_v26  ;;  %4054 = vmatpush.msrb.mxu0 %v4024_v9  ;;  %v9970_v26 = vsel %vm1444_vm6, %v3852_v51, %v9944_v32  ;;  %v9983_v51 = vrot.slane %v9678_v46, 4 }
 0x78e   :  { %v3469_v38 = vpop.f32.mrf.mxu2 }
 0x78f   :  { %v9972_v55 = vadd.f32 %v3469_v38, %v3411_v0  ;;  %v3273_v31 = vpop.f32.mrf.mxu0  ;;  %v3395_v30 = vpop.f32.mrf.mxu1  ;;  %6608 = vmatmul.msk.f32.gmra.mxu3 %vm396_vm1, %v9970_v26 }
 0x790   :  { %v3326_v42 = vadd.f32 %v3325_v44, %v3273_v31 }
 0x792   :  { %v3412_v2 = vadd.f32 %v3395_v30, %v3326_v42  ;;  %v3328_v4 = vpop.f32.mrf.mxu3  ;;  %6600 = vmatmul.msk.f32.gmra.mxu0 %vm396_vm1, %v9673_v16  ;;  %6614 = vmatmul.msk.f32.gmra.mxu1 %vm396_vm1, %v9844_v25 }
 0x793   :  { %6621 = vmatmul.msk.f32.gmra.mxu2 %vm396_vm1, %v9820_v48  ;;  %v3778_v48 = vsel %vm1252_vm5, %v3775_v10, %v9983_v51 }
 0x796   :  { %v3472_v13 = vpop.f32.mrf.mxu2 }
 0x797   :  { %v9985_v3 = vadd.f32 %v3472_v13, %v3412_v2  ;;  %v3276_v19 = vpop.f32.mrf.mxu0  ;;  %v3398_v11 = vpop.f32.mrf.mxu1  ;;  %6609 = vmatmul.msk.f32.gmra.mxu3 %vm396_vm1, %v9944_v32 }
 0x798   :  { %v3329_v61 = vadd.f32 %v3328_v4, %v3276_v19 }
 0x79a   :  { %v3413_v25 = vadd.f32 %v3398_v11, %v3329_v61  ;;  %v9997_v20 = vpop.f32.mrf.mxu3  ;;  %6601 = vmatmul.msk.f32.gmra.mxu0 %vm396_vm1, %v3778_v48  ;;  %6615 = vmatmul.msk.f32.gmra.mxu1 %vm396_vm1, %v9859_v23  ;;  %v3922_v23 = vsel %vm1857_vm7, %v3513_v35, %v3921_v29 }
 0x79b   :  { %6622 = vmatmul.msk.f32.gmra.mxu2 %vm396_vm1, %v9838_v49  ;;  %v3976_v49 = vsel %vm2049_vm8, %v3592_v58, %v3975_v15 }
 0x79e   :  { %v3475_v63 = vpop.f32.mrf.mxu2 }
 0x79f   :  { %v10006_v53 = vadd.f32 %v3475_v63, %v3413_v25  ;;  %v10008_v7 = vpop.f32.mrf.mxu0  ;;  %v10010_v10 = vpop.f32.mrf.mxu1  ;;  %6631 = vmatmul.msk.f32.vlgmr.msrb.gmra.mxu3 %vm396_vm1, %v9529_v40 }
 0x7a2   :  { %v10017_v47 = vpop.f32.mrf.mxu3  ;;  %6602 = vmatmul.msk.f32.gmra.mxu0 %vm396_vm1, %v9983_v51  ;;  %6616 = vmatmul.msk.f32.gmra.mxu1 %vm396_vm1, %v3922_v23 }
 0x7a3   :  { %6623 = vmatmul.msk.f32.gmra.mxu2 %vm396_vm1, %v3976_v49 }
 0x7a6   :  { %v10026_v37 = vpop.f32.mrf.mxu2 }
 0x7a7   :  { %v10028_v40 = vpop.f32.mrf.mxu0  ;;  %v10030_v27 = vpop.f32.mrf.mxu1  ;;  %6632 = vmatmul.msk.f32.gmra.mxu3 %vm396_vm1, %v9589_v18 }
 0x7aa   :  { %v10034_v35 = vpop.f32.mrf.mxu3  ;;  %6624 = vmatmul.msk.f32.vlgmr.msrb.gmra.mxu0 %vm396_vm1, %v9526_v8  ;;  %6638 = vmatmul.msk.f32.vlgmr.msrb.gmra.mxu1 %vm396_vm1, %v9550_v57 }
 0x7ab   :  { %6645 = vmatmul.msk.f32.vlgmr.msra.gmra.mxu2 %vm396_vm1, %v9536_v60 }
 0x7ae   :  { %v10042_v58 = vpop.f32.mrf.mxu2 }
 0x7af   :  { %v10044_v12 = vpop.f32.mrf.mxu0  ;;  %v10046_v0 = vpop.f32.mrf.mxu1  ;;  %6633 = vmatmul.msk.f32.gmra.mxu3 %vm396_vm1, %v9625_v41 }
 0x7b2   :  { %v10050_v18 = vpop.f32.mrf.mxu3  ;;  %6625 = vmatmul.msk.f32.gmra.mxu0 %vm396_vm1, %v9586_v59  ;;  %6639 = vmatmul.msk.f32.gmra.mxu1 %vm396_vm1, %v9607_v62 }
 0x7b3   :  { %6646 = vmatmul.msk.f32.gmra.mxu2 %vm396_vm1, %v9602_v22 }
 0x7b6   :  { %v10058_v8 = vpop.f32.mrf.mxu2 }
 0x7b7   :  { %v10060_v60 = vpop.f32.mrf.mxu0  ;;  %v10062_v57 = vpop.f32.mrf.mxu1  ;;  %6634 = vmatmul.msk.f32.gmra.mxu3 %vm396_vm1, %v9658_v50 }
 0x7ba   :  { %v10066_v41 = vpop.f32.mrf.mxu3  ;;  %6626 = vmatmul.msk.f32.gmra.mxu0 %vm396_vm1, %v9622_v5  ;;  %6640 = vmatmul.msk.f32.gmra.mxu1 %vm396_vm1, %v9635_v39  ;;  %v4091_v5 = vrot.slane %v9991_v17, 3 }
 0x7bb   :  { %6647 = vmatmul.msk.f32.gmra.mxu2 %vm396_vm1, %v9632_v28 }
 0x7bc   :  { %v4092_v39 = vsel %vm839_vm4, %v4089_v1, %v4091_v5 }
 0x7be   :  { %v10074_v59 = vpop.f32.mrf.mxu2 }
 0x7bf   :  { %v10076_v22 = vpop.f32.mrf.mxu0  ;;  %v10078_v62 = vpop.f32.mrf.mxu1  ;;  %6635 = vmatmul.msk.f32.gmra.mxu3 %vm396_vm1, %v9691_v52 }
 0x7c2   :  { %v10082_v50 = vpop.f32.mrf.mxu3  ;;  %6627 = vmatmul.msk.f32.gmra.mxu0 %vm396_vm1, %v9655_v33  ;;  %6641 = vmatmul.msk.f32.gmra.mxu1 %vm396_vm1, %v9673_v16  ;;  %v4149_v16 = vrot.slane %v9991_v17, 4 }
 0x7c3   :  { %6648 = vmatmul.msk.f32.gmra.mxu2 %vm396_vm1, %v9668_v24  ;;  %v4031_v24 = vrot.slane %v9991_v17, 2 }
 0x7c4   :  { %v4150_v9 = vsel %vm1252_vm5, %v9983_v51, %v4149_v16 }
 0x7c6   :  { %v10091_v28 = vpop.f32.mrf.mxu2 }
 0x7c7   :  { %v10096_v52 = vpop.f32.mrf.mxu0  ;;  %v10098_v44 = vpop.f32.mrf.mxu1  ;;  %6636 = vmatmul.msk.f32.gmra.mxu3 %vm396_vm1, %v4092_v39 }
 0x7ca   :  { %v10101_v33 = vpop.f32.mrf.mxu3  ;;  %6628 = vmatmul.msk.f32.gmra.mxu0 %vm396_vm1, %v9696_v56  ;;  %6642 = vmatmul.msk.f32.gmra.mxu1 %vm396_vm1, %v3778_v48  ;;  %v4032_v56 = vsel %vm647_vm3, %v4029_v54, %v4031_v24 }
 0x7cb   :  { %6649 = vmatmul.msk.f32.gmra.mxu2 %vm396_vm1, %v9970_v26 }
 0x7ce   :  { %v10110_v1 = vpop.f32.mrf.mxu2 }
 0x7cf   :  { %v10113_v14 = vpop.f32.mrf.mxu0  ;;  %v10115_v21 = vpop.f32.mrf.mxu1  ;;  %6637 = vmatmul.msk.f32.gmra.mxu3 %vm396_vm1, %v4091_v5 }
 0x7d2   :  { %v10123_v34 = vpop.f32.mrf.mxu3  ;;  %6629 = vmatmul.msk.f32.gmra.mxu0 %vm396_vm1, %v4032_v56  ;;  %6643 = vmatmul.msk.f32.gmra.mxu1 %vm396_vm1, %v4150_v9 }
 0x7d3   :  { %6650 = vmatmul.msk.f32.gmra.mxu2 %vm396_vm1, %v4206_v45 }
 0x7d6   :  { %v10130_v38 = vpop.f32.mrf.mxu2 }
 0x7d7   :  { %v3558_v26 = vpop.f32.mrf.mxu0  ;;  %v10132_v46 = vpop.f32.mrf.mxu1 }
 0x7da   :  { %v10134_v54 = vpop.f32.mrf.mxu3  ;;  %6630 = vmatmul.msk.f32.gmra.mxu0 %vm396_vm1, %v4031_v24  ;;  %6644 = vmatmul.msk.f32.gmra.mxu1 %vm396_vm1, %v4149_v16 }
 0x7db   :  { %6651 = vmatmul.msk.f32.gmra.mxu2 %vm396_vm1, %v4205_v6 }
 0x7de   :  { %v10139_v31 = vpop.f32.mrf.mxu2 }
 0x7df   :  { %v3561_v30 = vpop.f32.mrf.mxu0  ;;  %v10141_v42 = vpop.f32.mrf.mxu1 }
 0x7e2   :  { %v10143_v32 = vpop.f32.mrf.mxu3 }
 0x7e6   :  { %v10145_v2 = vpop.f32.mrf.mxu2 }
 0x7e7   :  { %v3564_v4 = vpop.f32.mrf.mxu0  ;;  %v10147_v51 = vpop.f32.mrf.mxu1 }
 0x7ea   :  { %v10149_v13 = vpop.f32.mrf.mxu3 }
 0x7eb   :  { %11767 = vst [vmem:[#allocation5_spill] sm:$0xff] %v10149_v13 }
 0x7ee   :  { %v10151_v19 = vpop.f32.mrf.mxu2 }
 0x7ef   :  { %v10153_v11 = vpop.f32.mrf.mxu0  ;;  %v10155_v61 = vpop.f32.mrf.mxu1 }
 0x7f0   :  { %11768 = vst [vmem:[#allocation6_spill] sm:$0xff] %v10153_v11  ;;  %v3335_v11 = vadd.f32 %v10017_v47, %v10028_v40 }
 0x7f1   :  { %11769 = vst [vmem:[#allocation7_spill] sm:$0xff] %v10155_v61 }
 0x7f2   :  { %v10157_v17 = vpop.f32.mrf.mxu3 }
 0x7f3   :  { %11770 = vst [vmem:[#allocation8_spill] sm:$0xff] %v10157_v17 }
 0x7f6   :  { %v10159_v48 = vpop.f32.mrf.mxu2 }
 0x7f7   :  { %11771 = vst [vmem:[#allocation9_spill] sm:$0xff] %v10159_v48  ;;  %v10161_v25 = vpop.f32.mrf.mxu0  ;;  %v10163_v29 = vpop.f32.mrf.mxu1 }
 0x7f8   :  { %11772 = vst [vmem:[#allocation31_spill] sm:$0xff] %v10163_v29 }
 0x7fa   :  { %v10165_v63 = vpop.f32.mrf.mxu3 }
 0x7fb   :  { %11773 = vst [vmem:[#allocation10_spill] sm:$0xff] %v10165_v63 }
 0x7fe   :  { %v10167_v15 = vpop.f32.mrf.mxu2 }
 0x7ff   :  { %11774 = vst [vmem:[#allocation12_spill] sm:$0xff] %v10167_v15  ;;  %v10169_v23 = vpop.f32.mrf.mxu0  ;;  %v10171_v49 = vpop.f32.mrf.mxu1 }
 0x800   :  { %11775 = vst [vmem:[#allocation14_spill] sm:$0xff] %v10171_v49 }
 0x802   :  { %v10173_v5 = vpop.f32.mrf.mxu3 }
 0x806   :  { %v10175_v39 = vpop.f32.mrf.mxu2 }
 0x807   :  { %11776 = vst [vmem:[#allocation15_spill] sm:$0xff] %v10175_v39  ;;  %v10177_v24 = vpop.f32.mrf.mxu0  ;;  %v10179_v16 = vpop.f32.mrf.mxu1 }
 0x808   :  { %11777 = vst [vmem:[#allocation16_spill] sm:$0xff] %v10179_v16 }
 0x80a   :  { %v10181_v6 = vpop.f32.mrf.mxu3 }
 0x80e   :  { %v10183_v56 = vpop.f32.mrf.mxu2 }
 0x80f   :  { %11778 = vst [vmem:[#allocation17_spill] sm:$0xff] %v10183_v56  ;;  %v3822_v9 = vpop.f32.mrf.mxu0  ;;  %v10185_v45 = vpop.f32.mrf.mxu1 }
 0x810   :  { %11779 = vst [vmem:[#allocation18_spill] sm:$0xff] %v10185_v45 }
 0x812   :  { %v10187_v43 = vpop.f32.mrf.mxu3 }
 0x816   :  { %v10189_v48 = vpop.f32.mrf.mxu2 }
 0x817   :  { %11780 = vst [vmem:[#allocation19_spill] sm:$0xff] %v10189_v48  ;;  %v3825_v15 = vpop.f32.mrf.mxu0  ;;  %v10191_v61 = vpop.f32.mrf.mxu1 }
 0x81a   :  { %v10193_v29 = vpop.f32.mrf.mxu3 }
 0x81b   :  { %11781 = vst [vmem:[#allocation22_spill] sm:$0xff] %v10193_v29 }
 0x81e   :  { %v10195_v39 = vpop.f32.mrf.mxu2 }
 0x81f   :  { %11782 = vst [vmem:[#allocation25_spill] sm:$0xff] %v10195_v39  ;;  %v3828_v49 = vpop.f32.mrf.mxu0  ;;  %v10197_v13 = vpop.f32.mrf.mxu1 }
 0x820   :  { %11783 = vst [vmem:[#allocation29_spill] sm:$0xff] %v10197_v13 }
 0x822   :  { %v10199_v16 = vpop.f32.mrf.mxu3 }
 0x823   :  { %11784 = vst [vmem:[#allocation27_spill] sm:$0xff] %v10199_v16  ;;  %v3332_v16 = vadd.f32 %v9997_v20, %v10008_v7 }
 0x826   :  { %v10201_v56 = vpop.f32.mrf.mxu2 }
 0x827   :  { %11785 = vst [vmem:[#allocation55_spill] sm:$0xff] %v10201_v56  ;;  %v10203_v17 = vpop.f32.mrf.mxu0  ;;  %v10205_v45 = vpop.f32.mrf.mxu1 }
 0x828   :  { %11786 = vst [vmem:[#allocation30_spill] sm:$0xff] %v10203_v17  ;;  %v3415_v17 = vadd.f32 %v10030_v27, %v3335_v11 }
 0x829   :  { %11787 = vst [vmem:[#allocation28_spill] sm:$0xff] %v10205_v45  ;;  %v3338_v45 = vadd.f32 %v10034_v35, %v10044_v12  ;;  %v3570_v35 = vadd.f32 %v10113_v14, %v10006_v53 }
 0x82a   :  { %v10207_v63 = vpop.f32.mrf.mxu3 }
 0x82b   :  { %11788 = vst [vmem:[#allocation66_spill] sm:$0xff] %v10207_v63  ;;  %v3414_v63 = vadd.f32 %v10010_v10, %v3332_v16  ;;  %v3416_v20 = vadd.f32 %v10046_v0, %v3338_v45  ;;  %v3568_v0 = vadd.f32 %v10076_v22, %v9972_v55 }
 0x82d   :  { %v3491_v47 = vadd.f32 %v10026_v37, %v3414_v63  ;;  %v3493_v27 = vadd.f32 %v10058_v8, %v3416_v20  ;;  %v3569_v37 = vadd.f32 %v10096_v52, %v9985_v3  ;;  %v3649_v8 = vadd.f32 %v10101_v33, %v3570_v35 }
 0x82e   :  { %v10209_v48 = vpop.f32.mrf.mxu2 }
 0x82f   :  { %11789 = vst [vmem:[#allocation48_spill] sm:$0xff] %v10209_v48  ;;  %v10213_v29 = vpop.f32.mrf.mxu0  ;;  %v10215_v39 = vpop.f32.mrf.mxu1  ;;  %v3492_v48 = vadd.f32 %v10042_v58, %v3415_v17  ;;  %v3571_v7 = vadd.f32 %v3558_v26, %v3491_v47  ;;  %v3573_v12 = vadd.f32 %v3564_v4, %v3493_v27  ;;  %v3567_v4 = vadd.f32 %v10060_v60, %v9926_v36 }
 0x830   :  { %11790 = vst [vmem:[#allocation11_spill] sm:$0xff] %v10213_v29  ;;  %v3648_v3 = vadd.f32 %v10082_v50, %v3569_v37  ;;  %v3701_v55 = vadd.f32 %v10115_v21, %v3649_v8  ;;  %v11799_v37 = vld [vmem:[#allocation29_spill] sm:$0xff]  ;;  %v11801_v8 = vld [vmem:[#allocation14_spill] sm:$0xff] }
 0x831   :  { %11791 = vst [vmem:[#allocation54_spill] sm:$0xff] %v10215_v39  ;;  %v3572_v40 = vadd.f32 %v3561_v30, %v3492_v48  ;;  %v3650_v30 = vadd.f32 %v10123_v34, %v3571_v7  ;;  %v3647_v34 = vadd.f32 %v10066_v41, %v3568_v0 }
 0x832   :  { %v10219_v13 = vpop.f32.mrf.mxu3  ;;  %v3700_v17 = vadd.f32 %v10098_v44, %v3648_v3  ;;  %v3757_v41 = vadd.f32 %v10130_v38, %v3701_v55  ;;  %v11804_v55 = vld [vmem:[#allocation17_spill] sm:$0xff] }
 0x833   :  { %v3651_v10 = vadd.f32 %v10134_v54, %v3572_v40  ;;  %v3652_v54 = vadd.f32 %v10143_v32, %v3573_v12  ;;  %v3702_v52 = vadd.f32 %v10132_v46, %v3650_v30  ;;  %v3699_v50 = vadd.f32 %v10078_v62, %v3647_v34  ;;  %v11793_v40 = vld [vmem:[#allocation6_spill] sm:$0xff]  ;;  %v11800_v30 = vld [vmem:[#allocation5_spill] sm:$0xff] }
 0x834   :  { %v3834_v44 = vadd.f32 %v10177_v24, %v3757_v41  ;;  %v11807_v41 = vld [vmem:[#allocation15_spill] sm:$0xff] }
 0x835   :  { %v3703_v26 = vadd.f32 %v10141_v42, %v3651_v10  ;;  %v3704_v33 = vadd.f32 %v10147_v51, %v3652_v54  ;;  %v3646_v42 = vadd.f32 %v10050_v18, %v3567_v4  ;;  %v3758_v32 = vadd.f32 %v10139_v31, %v3702_v52  ;;  %v11802_v54 = vld [vmem:[#allocation19_spill] sm:$0xff] }
 0x836   :  { %v10226_v56 = vpop.f32.mrf.mxu2  ;;  %v3756_v18 = vadd.f32 %v10110_v1, %v3700_v17  ;;  %v3755_v16 = vadd.f32 %v10091_v28, %v3699_v50  ;;  %v11792_v1 = vld [vmem:[#allocation22_spill] sm:$0xff]  ;;  %v11803_v52 = vld [vmem:[#allocation31_spill] sm:$0xff] }
 0x837   :  { %v10229_v39 = vpop.f32.mrf.mxu0  ;;  %v10231_v29 = vpop.f32.mrf.mxu1  ;;  %v3759_v22 = vadd.f32 %v10145_v2, %v3703_v26  ;;  %v3835_v46 = vadd.f32 %v3822_v9, %v3758_v32  ;;  %v3760_v2 = vadd.f32 %v10151_v19, %v3704_v33  ;;  %v3698_v51 = vadd.f32 %v10062_v57, %v3646_v42  ;;  %v11795_v28 = vld [vmem:[#allocation18_spill] sm:$0xff]  ;;  %v11805_v42 = vld [vmem:[#allocation55_spill] sm:$0xff] }
 0x838   :  { %v3833_v62 = vadd.f32 %v10169_v23, %v3756_v18  ;;  %v3832_v45 = vadd.f32 %v10161_v25, %v3755_v16  ;;  %v3911_v19 = vadd.f32 %v10173_v5, %v3834_v44  ;;  %v11798_v25 = vld [vmem:[#allocation25_spill] sm:$0xff] }
 0x839   :  { %v3836_v48 = vadd.f32 %v3825_v15, %v3759_v22  ;;  %v3837_v15 = vadd.f32 %v3828_v49, %v3760_v2  ;;  %v3912_v38 = vadd.f32 %v10181_v6, %v3835_v46  ;;  %v3754_v9 = vadd.f32 %v10074_v59, %v3698_v51  ;;  %v11794_v49 = vld [vmem:[#allocation10_spill] sm:$0xff]  ;;  %v11796_v6 = vld [vmem:[#allocation8_spill] sm:$0xff] }
 0x83a   :  { %v10238_v58 = vpop.f32.mrf.mxu3  ;;  %v3910_v20 = vadd.f32 %v11794_v49, %v3833_v62  ;;  %v3909_v35 = vadd.f32 %v11796_v6, %v3832_v45  ;;  %v11797_v59 = vld [vmem:[#allocation16_spill] sm:$0xff]  ;;  %v11809_v45 = vld [vmem:[#allocation9_spill] sm:$0xff] }
 0x83b   :  { %v3913_v31 = vadd.f32 %v10187_v43, %v3836_v48  ;;  %v3914_v47 = vadd.f32 %v11792_v1, %v3837_v15  ;;  %v3831_v43 = vadd.f32 %v11793_v40, %v3754_v9  ;;  %v3967_v7 = vadd.f32 %v11795_v28, %v3912_v38  ;;  %v11806_v48 = vld [vmem:[#allocation7_spill] sm:$0xff] }
 0x83c   :  { %v3966_v10 = vadd.f32 %v11797_v59, %v3911_v19  ;;  %v3965_v26 = vadd.f32 %v11801_v8, %v3910_v20  ;;  %v3964_v34 = vadd.f32 %v11803_v52, %v3909_v35  ;;  %v11810_v19 = vld [vmem:[#allocation11_spill] sm:$0xff]  ;;  %v4318_v8 = vld [vmem:[%s11366_s2 + $0xa70] sm:$0xff] }
 0x83d   :  { %v3968_v57 = vadd.f32 %v10191_v61, %v3913_v31  ;;  %v3969_v61 = vadd.f32 %v11799_v37, %v3914_v47  ;;  %v3908_v0 = vadd.f32 %v11800_v30, %v3831_v43  ;;  %v4021_v4 = vadd.f32 %v11802_v54, %v3967_v7  ;;  %v11808_v31 = vld [vmem:[#allocation12_spill] sm:$0xff]  ;;  %v11813_v35 = vld [vmem:[#allocation27_spill] sm:$0xff] }
 0x83e   :  { %v10243_v11 = vpop.f32.mrf.mxu2  ;;  %v4020_v22 = vadd.f32 %v11804_v55, %v3966_v10  ;;  %v4019_v46 = vadd.f32 %v11807_v41, %v3965_v26  ;;  %v4018_v15 = vadd.f32 %v11808_v31, %v3964_v34  ;;  %v11816_v30 = vld [vmem:[#allocation48_spill] sm:$0xff] }
 0x83f   :  { %v4065_v53 = vpop.f32.mrf.mxu0  ;;  %v10249_v14 = vpop.f32.mrf.mxu1  ;;  %v4022_v12 = vadd.f32 %v11798_v25, %v3968_v57  ;;  %v4023_v17 = vadd.f32 %v11805_v42, %v3969_v61  ;;  %v3963_v50 = vadd.f32 %v11806_v48, %v3908_v0  ;;  %v4256_v54 = vld [vmem:[%s11368_s3 + $0x2f0] sm:$0x3] }
 0x840   :  { %v4080_v2 = vadd.f32 %v4065_v53, %v4020_v22  ;;  %v4079_v16 = vadd.f32 %v10229_v39, %v4019_v46  ;;  %v4078_v57 = vadd.f32 %v11810_v19, %v4018_v15  ;;  %v11811_v53 = vld [vmem:[#allocation30_spill] sm:$0xff]  ;;  %v11819_v15 = vld [vmem:[#allocation61_spill] sm:$0xff] }
 0x842   :  { %v4128_v36 = vpop.f32.mrf.mxu3  ;;  %v4140_v1 = vadd.f32 %v10238_v58, %v4080_v2  ;;  %v4139_v20 = vadd.f32 %v10219_v13, %v4079_v16  ;;  %v11814_v13 = vld [vmem:[#allocation54_spill] sm:$0xff]  ;;  %v6796_v2 = vld [vmem:[%s11366_s2 + $0xa78] ss:$0 sm:$0xff]  ;;  %v2881_v16 = vadd.s32 32, %v11819_v15 }
 0x844   :  { %v4195_v58 = vadd.f32 %v10231_v29, %v4139_v20  ;;  %vm4384_vm13 = vcmp.lt.s32.totalorder %v2881_v16, 36  ;;  %v4605_v16 = vld [vmem:[%s11366_s2 + $0x590] sm:$0xff] }
 0x846   :  { %v10263_v60 = vpop.f32.mrf.mxu2 }
 0x847   :  { %v4068_v21 = vpop.f32.mrf.mxu0  ;;  %v4184_v63 = vpop.f32.mrf.mxu1 }
 0x848   :  { %v4081_v33 = vadd.f32 %v4068_v21, %v4021_v4  ;;  %v4017_v21 = vadd.f32 %v11809_v45, %v3963_v50  ;;  %v4341_v4 = vld [vmem:[%s11366_s2 + $0xa80] sm:$0xff] }
 0x84a   :  { %v4131_v23 = vpop.f32.mrf.mxu3  ;;  %v4141_v62 = vadd.f32 %v4128_v36, %v4081_v33  ;;  %v4077_v49 = vadd.f32 %v11811_v53, %v4017_v21  ;;  %v4196_v36 = vadd.f32 %v10249_v14, %v4140_v1 }
 0x84c   :  { %v4197_v28 = vadd.f32 %v4184_v63, %v4141_v62  ;;  %v4137_v59 = vadd.f32 %v11813_v35, %v4077_v49  ;;  %v10318_v14 = vadd.f32 %v10263_v60, %v4196_v36 }
 0x84e   :  { %v4240_v24 = vpop.f32.mrf.mxu2  ;;  %v4287_v61 = vmul.f32 %v10318_v14, %v10318_v14 }
 0x84f   :  { %v4071_v27 = vpop.f32.mrf.mxu0  ;;  %v4187_v5 = vpop.f32.mrf.mxu1  ;;  %v10310_v10 = vadd.f32 %v4240_v24, %v4197_v28  ;;  %v11815_v24 = vld [vmem:[#allocation28_spill] sm:$0xff] }
 0x850   :  { %v4082_v3 = vadd.f32 %v4071_v27, %v4022_v12  ;;  %v4193_v12 = vadd.f32 %v11815_v24, %v4137_v59 }
 0x851   :  { %v4288_v37 = vmul.f32 %v10310_v10, %v10310_v10 }
 0x852   :  { %v4142_v51 = vadd.f32 %v4131_v23, %v4082_v3  ;;  %v4134_v38 = vpop.f32.mrf.mxu3  ;;  %v11812_v23 = vld [vmem:[#allocation66_spill] sm:$0xff]  ;;  %v10338_v0 = vadd.f32 %v11816_v30, %v4193_v12 }
 0x853   :  { %v4138_v39 = vadd.f32 %v11812_v23, %v4078_v57  ;;  %v10363_v3 = vld [vmem:[%s11369_s1] sm:$0x3] }
 0x854   :  { %v4198_v47 = vadd.f32 %v4187_v5, %v4142_v51  ;;  %v10326_v5 = vadd.f32 %v10243_v11, %v4195_v58  ;;  %v4284_v26 = vmul.f32 %v10338_v0, %v10338_v0 }
 0x855   :  { %v4194_v63 = vadd.f32 %v11814_v13, %v4138_v39 }
 0x856   :  { %v4243_v32 = vpop.f32.mrf.mxu2  ;;  %v4286_v11 = vmul.f32 %v10326_v5, %v10326_v5 }
 0x857   :  { %v4074_v18 = vpop.f32.mrf.mxu0  ;;  %v4190_v40 = vpop.f32.mrf.mxu1  ;;  %v10304_v27 = vadd.f32 %v4243_v32, %v4198_v47  ;;  %v10332_v60 = vadd.f32 %v10226_v56, %v4194_v63 }
 0x858   :  { %v4083_v44 = vadd.f32 %v4074_v18, %v4023_v17  ;;  %v6797_v18 = vld [vmem:[%s11366_s2 + $0xa88] ss:$0 sm:$0xff] }
 0x859   :  { %v4289_v29 = vmul.f32 %v10304_v27, %v10304_v27  ;;  %v4285_v56 = vmul.f32 %v10332_v60, %v10332_v60 }
 0x85a   :  { %v4143_v9 = vadd.f32 %v4134_v38, %v4083_v44 }
 0x85c   :  { %v4199_v43 = vadd.f32 %v4190_v40, %v4143_v9 }
 0x85e   :  { %v4246_v7 = vpop.f32.mrf.mxu2 }
 0x85f   :  { %v10306_v6 = vadd.f32 %v4246_v7, %v4199_v43 }
 0x861   :  { %v4290_v25 = vmul.f32 %v10306_v6, %v10306_v6  ;;  %6652 = vmatpush.msk.msra.mxu0 %vm1444_vm6, %v10306_v6 }
 0x863   :  { %4274 = vmatpush.msra.mxu0 %v10304_v27  ;;  %6654 = vmatpush.msk.msra.mxu3 %vm1444_vm6, %v4290_v25 }
 0x865   :  { %4275 = vmatpush.msra.mxu0 %v10310_v10  ;;  %4304 = vmatpush.msra.mxu3 %v4289_v29 }
 0x867   :  { %4276 = vmatpush.msra.mxu0 %v10318_v14  ;;  %4305 = vmatpush.msra.mxu3 %v4288_v37 }
 0x869   :  { %4277 = vmatpush.msra.mxu0 %v10326_v5  ;;  %4306 = vmatpush.msra.mxu3 %v4287_v61 }
 0x86b   :  { %4278 = vmatpush.msra.mxu0 %v10332_v60  ;;  %4307 = vmatpush.msra.mxu3 %v4286_v11 }
 0x86d   :  { %4279 = vmatpush.msra.mxu0 %v10338_v0  ;;  %4308 = vmatpush.msra.mxu3 %v4285_v56 }
 0x86e   :  { %6653 = vmatmul.msk.f32.vlgmr.msra.gmra.mxu0 %vm4257_vm9, %v4256_v54 }
 0x86f   :  { %4309 = vmatpush.msra.mxu3 %v4284_v26  ;;  %4336 = vmatpush.msrb.mxu0 %v4318_v8  ;;  %v4439_v26 = vld [vmem:[%s11368_s3 + $0x230] sm:$0xff] }
 0x870   :  { %6655 = vmatmul.msk.f32.vlgmr.msra.gmra.mxu3 %vm4257_vm9, %v4256_v54  ;;  %v4440_v54 = vld [vmem:[%s11368_s3 + $0x240] sm:$0xff] }
 0x871   :  { %4359 = vmatpush.msra.mxu0 %v4341_v4  ;;  %v4441_v4 = vld [vmem:[%s11368_s3 + $0x250] sm:$0xff] }
 0x876   :  { %6656 = vmatmul.msk.f32.vlgmr.msrb.gmra.mxu0 %vm11817_vm15, %v10363_v3 }
 0x87e   :  { %6657 = vmatmul.msk.f32.vlgmr.msra.gmra.mxu0 %vm11818_vm0, %v10363_v3 }
 0x8eb   :  { %v4281_v52 = vpop.f32.mrf.mxu0 }
 0x8ec   :  { %v4314_v34 = vmul.f32 0.11111111, %v4281_v52  ;;  %v4442_v52 = vld [vmem:[%s11368_s3 + $0x260] sm:$0xff] }
 0x8ee   :  { %v4316_v55 = vmul.f32 %v4314_v34, %v4314_v34 }
 0x8f3   :  { %v4311_v22 = vpop.f32.mrf.mxu3  ;;  %v4338_v32 = vpop.f32.mrf.mxu0 }
 0x8f4   :  { %v4315_v33 = vmul.f32 0.11111111, %v4311_v22  ;;  %v4339_v62 = vadd.f32 %v6796_v2, %v4338_v32  ;;  %v4511_v22 = vld [vmem:[%s11366_s2 + $0x560] sm:$0xff]  ;;  %v4508_v2 = vld [vmem:[%s11366_s2 + $0x548] sm:$0xff] }
 0x8f5   :  { %4587 = vmatpush.msrb.mxu0 %v4511_v22  ;;  %v4515_v32 = vld [vmem:[%s11366_s2 + $0x580] sm:$0xff] }
 0x8f6   :  { %v4317_v42 = vsub.f32 %v4315_v33, %v4316_v55  ;;  %v4444_v55 = vld [vmem:[%s11368_s3 + $0x280] sm:$0x3]  ;;  %v4510_v33 = vld [vmem:[%s11366_s2 + $0x558] sm:$0xff] }
 0x8f7   :  { %4588 = vmatpush.msrb.mxu0 %v4510_v33  ;;  %v4924_v33 = vld [vmem:[%s11366_s2 + $0x6a0] sm:$0xff] }
 0x8f8   :  { %v4364_v17 = vadd.f32 1e-05, %v4317_v42  ;;  %v4516_v42 = vld [vmem:[%s11366_s2 + $0x588] sm:$0xff] }
 0x8f9   :  { %4550 = vmatpush.msra.mxu1 %v4516_v42  ;;  %v4923_v42 = vld [vmem:[%s11366_s2 + $0x698] sm:$0xff] }
 0x8fa   :  { %6803 = vrsqrt.f32 %v4364_v17  ;;  %vm4371_vm12 = vweird.f32 %v4364_v17 }
 0x8fb   :  { %v4361_v31 = vpop.f32.mrf.mxu0  ;;  %4551 = vmatpush.msra.mxu1 %v4515_v32  ;;  %v4967_v32 = vld [vmem:[%s11366_s2 + $0x6c8] sm:$0xff] }
 0x8fc   :  { %v4362_v45 = vadd.f32 %v6797_v18, %v4361_v31  ;;  %v4513_v18 = vld [vmem:[%s11366_s2 + $0x570] sm:$0xff]  ;;  %v4512_v31 = vld [vmem:[%s11366_s2 + $0x568] sm:$0xff] }
 0x900   :  { %v6804_v48 = vpop.eup %6803 }
 0x901   :  { %v4366_v50 = vmul.f32 %v6804_v48, %v4364_v17  ;;  %vm4372_vm11 = vweird.f32 %v6804_v48  ;;  %v4609_v17 = vld [vmem:[%s11366_s2 + $0x5b0] sm:$0xff] }
 0x902   :  { %vm4373_vm10 = vmor %vm4371_vm12, %vm4372_vm11  ;;  %4638 = vmatpush.msrb.mxu2 %v4609_v17  ;;  %v4884_v17 = vld [vmem:[%s11366_s2 + $0x678] sm:$0xff] }
 0x903   :  { %v4367_v41 = vmul.f32 %v6804_v48, %v4366_v50  ;;  %v4608_v50 = vld [vmem:[%s11366_s2 + $0x5a8] sm:$0xff] }
 0x904   :  { %4639 = vmatpush.msrb.mxu2 %v4608_v50  ;;  %v5007_v50 = vld [vmem:[%s11366_s2 + $0x6e0] sm:$0xff] }
 0x905   :  { %v4368_v46 = vmul.f32 0.5, %v4367_v41  ;;  %v4514_v41 = vld [vmem:[%s11366_s2 + $0x578] sm:$0xff] }
 0x906   :  { %4552 = vmatpush.msra.mxu1 %v4514_v41 }
 0x907   :  { %v4369_v51 = vsub.f32 1.5, %v4368_v46  ;;  %v4607_v46 = vld [vmem:[%s11366_s2 + $0x5a0] sm:$0xff] }
 0x908   :  { %4640 = vmatpush.msrb.mxu2 %v4607_v46  ;;  %4553 = vmatpush.msra.mxu1 %v4513_v18 }
 0x909   :  { %v4370_v44 = vmul.f32 %v6804_v48, %v4369_v51  ;;  %v4507_v51 = vld [vmem:[%s11366_s2 + $0x540] sm:$0xff] }
 0x90a   :  { %4554 = vmatpush.msra.mxu1 %v4512_v31 }
 0x90b   :  { %v4374_v38 = vsel %vm4373_vm10, %v6804_v48, %v4370_v44  ;;  %v4509_v48 = vld [vmem:[%s11366_s2 + $0x550] sm:$0xff]  ;;  %v4606_v44 = vld [vmem:[%s11366_s2 + $0x598] sm:$0xff] }
 0x90c   :  { %v4375_v9 = vmul.f32 %v4374_v38, %v4339_v62  ;;  %4589 = vmatpush.msrb.mxu0 %v4509_v48  ;;  %4641 = vmatpush.msrb.mxu2 %v4606_v44  ;;  %v4829_v62 = vld [vmem:[%s11366_s2 + $0x650] sm:$0xff]  ;;  %v4828_v38 = vld [vmem:[%s11366_s2 + $0x648] sm:$0xff] }
 0x90e   :  { %v4378_v21 = vperm.slane %v4375_v9, 1  ;;  %v4387_v19 = vperm.slane %v4375_v9, 0  ;;  %v4376_v57 = vmul.f32 %v4375_v9, %v4314_v34  ;;  %v4443_v34 = vld [vmem:[%s11368_s3 + $0x270] sm:$0xff]  ;;  %4590 = vmatpush.msrb.mxu0 %v4508_v2  ;;  %4642 = vmatpush.msrb.mxu2 %v4605_v16  ;;  %v4827_v9 = vld [vmem:[%s11366_s2 + $0x640] sm:$0xff]  ;;  %v5006_v2 = vld [vmem:[%s11366_s2 + $0x6d8] sm:$0xff] }
 0x910   :  { %v4377_v1 = vsub.f32 %v4362_v45, %v4376_v57  ;;  %v4392_v47 = vsel %vm4384_vm13, %v4387_v19, %v4378_v21  ;;  %v4409_v53 = vmul.f32 %v4378_v21, %v10306_v6  ;;  %v4408_v49 = vmul.f32 %v4378_v21, %v10304_v27  ;;  %4591 = vmatpush.msrb.mxu0 %v4507_v51  ;;  %v4826_v45 = vld [vmem:[%s11366_s2 + $0x638] sm:$0xff] }
 0x911   :  { %v4407_v20 = vmul.f32 %v4392_v47, %v10310_v10  ;;  %v4406_v39 = vmul.f32 %v4387_v19, %v10318_v14  ;;  %v4405_v35 = vmul.f32 %v4387_v19, %v10326_v5  ;;  %v4404_v27 = vmul.f32 %v4387_v19, %v10332_v60  ;;  %v4664_v57 = vld [vmem:[%s11366_s2 + $0x5d8] sm:$0xff]  ;;  %v4774_v47 = vld [vmem:[%s11366_s2 + $0x628] sm:$0xff] }
 0x912   :  { %v4379_v40 = vperm.slane %v4377_v1, 1  ;;  %v4395_v43 = vperm.slane %v4377_v1, 0  ;;  %v4403_v14 = vmul.f32 %v4387_v19, %v10338_v0  ;;  %v4438_v0 = vld [vmem:[%s11368_s3 + $0x220] sm:$0xff]  ;;  %v4718_v1 = vld [vmem:[%s11366_s2 + $0x5f8] sm:$0xff]  ;;  %4693 = vmatpush.msrb.mxu1 %v4664_v57  ;;  %4803 = vmatpush.msra.mxu2 %v4774_v47  ;;  %v4882_v47 = vld [vmem:[%s11366_s2 + $0x668] sm:$0xff] }
 0x913   :  { %v4719_v19 = vld [vmem:[%s11366_s2 + $0x600] sm:$0xff] }
 0x914   :  { %v4416_v28 = vadd.f32 %v4409_v53, %v4379_v40  ;;  %v4415_v7 = vadd.f32 %v4408_v49, %v4379_v40  ;;  %v4400_v23 = vsel %vm4384_vm13, %v4395_v43, %v4379_v40  ;;  %v4413_v25 = vadd.f32 %v4406_v39, %v4395_v43  ;;  %v4825_v40 = vld [vmem:[%s11366_s2 + $0x630] sm:$0xff]  ;;  %4748 = vmatpush.msra.mxu0 %v4719_v19  ;;  %v4773_v49 = vld [vmem:[%s11366_s2 + $0x620] sm:$0xff] }
 0x915   :  { %v4414_v36 = vadd.f32 %v4407_v20, %v4400_v23  ;;  %v4412_v6 = vadd.f32 %v4405_v35, %v4395_v43  ;;  %v4411_v24 = vadd.f32 %v4404_v27, %v4395_v43  ;;  %v4410_v37 = vadd.f32 %v4403_v14, %v4395_v43  ;;  %v4717_v43 = vld [vmem:[%s11366_s2 + $0x5f0] sm:$0xff]  ;;  %4804 = vmatpush.msra.mxu2 %v4773_v49  ;;  %v4716_v20 = vld [vmem:[%s11366_s2 + $0x5e8] sm:$0xff]  ;;  %v4661_v23 = vld [vmem:[%s11366_s2 + $0x5c0] sm:$0xff] }
 0x916   :  { %vm4423_vm14 = vcmp.gt.f32.partialorder %v4416_v28, 0.0  ;;  %v4430_v59 = vmul.f32 0.2, %v4416_v28  ;;  %v4429_v58 = vmul.f32 0.2, %v4415_v7  ;;  %vm4422_vm15 = vcmp.gt.f32.partialorder %v4415_v7, 0.0  ;;  %4749 = vmatpush.msra.mxu0 %v4718_v1 }
 0x917   :  { %v4428_v63 = vmul.f32 0.2, %v4414_v36  ;;  %vm4421_vm0 = vcmp.gt.f32.partialorder %v4414_v36, 0.0  ;;  %v4427_v29 = vmul.f32 0.2, %v4413_v25  ;;  %vm4420_vm11 = vcmp.gt.f32.partialorder %v4413_v25, 0.0 }
 0x918   :  { %v4437_v13 = vsel %vm4423_vm14, %v4416_v28, %v4430_v59  ;;  %v4436_v10 = vsel %vm4422_vm15, %v4415_v7, %v4429_v58  ;;  %v4426_v5 = vmul.f32 0.2, %v4412_v6  ;;  %vm4419_vm12 = vcmp.gt.f32.partialorder %v4412_v6, 0.0  ;;  %v4663_v53 = vld [vmem:[%s11366_s2 + $0x5d0] sm:$0xff]  ;;  %v4662_v28 = vld [vmem:[%s11366_s2 + $0x5c8] sm:$0xff]  ;;  %v4772_v7 = vld [vmem:[%s11366_s2 + $0x618] sm:$0xff]  ;;  %4750 = vmatpush.msra.mxu0 %v4717_v43 }
 0x919   :  { %6658 = vmatpush.msk.msrb.mxu3 %vm1444_vm6, %v4437_v13  ;;  %v4435_v12 = vsel %vm4421_vm0, %v4414_v36, %v4428_v63  ;;  %v4434_v61 = vsel %vm4420_vm11, %v4413_v25, %v4427_v29  ;;  %v4425_v30 = vmul.f32 0.2, %v4411_v24  ;;  %vm4418_vm10 = vcmp.gt.f32.partialorder %v4411_v24, 0.0  ;;  %4694 = vmatpush.msrb.mxu1 %v4663_v53  ;;  %v4715_v39 = vld [vmem:[%s11366_s2 + $0x5e0] sm:$0xff]  ;;  %v4771_v36 = vld [vmem:[%s11366_s2 + $0x610] sm:$0xff]  ;;  %v4660_v59 = vld [vmem:[%s11366_s2 + $0x5b8] sm:$0xff] }
 0x91a   :  { %v4433_v60 = vsel %vm4419_vm12, %v4412_v6, %v4426_v5  ;;  %v4424_v11 = vmul.f32 0.2, %v4410_v37  ;;  %vm4417_vm13 = vcmp.gt.f32.partialorder %v4410_v37, 0.0  ;;  %4805 = vmatpush.msra.mxu2 %v4772_v7  ;;  %4751 = vmatpush.msra.mxu0 %v4716_v20  ;;  %v4770_v6 = vld [vmem:[%s11366_s2 + $0x608] sm:$0xff]  ;;  %v4966_v19 = vld [vmem:[%s11366_s2 + $0x6c0] sm:$0xff]  ;;  %vm5274_vm14 = vcmask 261120  }
 0x91b   :  { %4479 = vmatpush.msrb.mxu3 %v4436_v10  ;;  %v4432_v56 = vsel %vm4418_vm10, %v4411_v24, %v4425_v30  ;;  %4695 = vmatpush.msrb.mxu1 %v4662_v28  ;;  %v4921_v1 = vld [vmem:[%s11366_s2 + $0x688] sm:$0xff]  ;;  %v4881_v43 = vld [vmem:[%s11366_s2 + $0x660] sm:$0xff]  ;;  %v4964_v28 = vld [vmem:[%s11366_s2 + $0x6b0] sm:$0xff] }
 0x91c   :  { %v4431_v8 = vsel %vm4417_vm13, %v4410_v37, %v4424_v11  ;;  %4752 = vmatpush.msra.mxu0 %v4715_v39  ;;  %4806 = vmatpush.msra.mxu2 %v4771_v36  ;;  %v4920_v20 = vld [vmem:[%s11366_s2 + $0x680] sm:$0xff] }
 0x91d   :  { %4480 = vmatpush.msrb.mxu3 %v4435_v12  ;;  %4696 = vmatpush.msrb.mxu1 %v4661_v23  ;;  %v4880_v23 = vld [vmem:[%s11366_s2 + $0x658] sm:$0xff] }
 0x91e   :  { %4807 = vmatpush.msra.mxu2 %v4770_v6 }
 0x91f   :  { %4481 = vmatpush.msrb.mxu3 %v4434_v61  ;;  %4697 = vmatpush.msrb.mxu1 %v4660_v59 }
 0x921   :  { %4482 = vmatpush.msrb.mxu3 %v4433_v60 }
 0x923   :  { %4483 = vmatpush.msrb.mxu3 %v4432_v56 }
 0x925   :  { %4484 = vmatpush.msrb.mxu3 %v4431_v8 }
 0x926   :  { %6659 = vmatmul.msk.f32.vlgmr.msrb.gmra.mxu3 %vm4257_vm9, %v4438_v0 }
 0x927   :  { %4858 = vmatpush.msra.mxu3 %v4829_v62  ;;  %v5005_v62 = vld [vmem:[%s11366_s2 + $0x6d0] sm:$0xff] }
 0x929   :  { %4859 = vmatpush.msra.mxu3 %v4828_v38 }
 0x92b   :  { %4860 = vmatpush.msra.mxu3 %v4827_v9  ;;  %v4922_v9 = vld [vmem:[%s11366_s2 + $0x690] sm:$0xff] }
 0x92d   :  { %4861 = vmatpush.msra.mxu3 %v4826_v45  ;;  %v4883_v45 = vld [vmem:[%s11366_s2 + $0x670] sm:$0xff] }
 0x92e   :  { %6660 = vmatmul.msk.f32.gmra.mxu3 %vm4257_vm9, %v4439_v26  ;;  %v5009_v26 = vld [vmem:[%s11366_s2 + $0x6f0] sm:$0xff] }
 0x92f   :  { %4862 = vmatpush.msra.mxu3 %v4825_v40  ;;  %v4965_v40 = vld [vmem:[%s11366_s2 + $0x6b8] sm:$0xff] }
 0x931   :  { %5038 = vmatpush.msrb.mxu3 %v5009_v26 }
 0x936   :  { %6661 = vmatmul.msk.f32.gmra.mxu3 %vm4257_vm9, %v4440_v54 }
 0x93e   :  { %6662 = vmatmul.msk.f32.gmra.mxu3 %vm4257_vm9, %v4441_v4 }
 0x946   :  { %6663 = vmatmul.msk.f32.gmra.mxu3 %vm4257_vm9, %v4442_v52 }
 0x94e   :  { %6664 = vmatmul.msk.f32.gmra.mxu3 %vm4257_vm9, %v4443_v34  ;;  %v5008_v34 = vld [vmem:[%s11366_s2 + $0x6e8] sm:$0xff] }
 0x94f   :  { %5039 = vmatpush.msrb.mxu3 %v5008_v34 }
 0x951   :  { %5040 = vmatpush.msrb.mxu3 %v5007_v50  ;;  %v5148_v50 = vld [vmem:[%s11366_s2 + $0x768] sm:$0xff] }
 0x953   :  { %5041 = vmatpush.msrb.mxu3 %v5006_v2  ;;  %v5186_v2 = vld [vmem:[%s11366_s2 + $0x780] sm:$0xff] }
 0x955   :  { %5042 = vmatpush.msrb.mxu3 %v5005_v62 }
 0x956   :  { %6665 = vmatmul.msk.f32.gmra.mxu3 %vm4257_vm9, %v4444_v55  ;;  %vm11823_vm9 = vcmask 64512  }
 0x957   :  { %vm11827_vm15 = vmmov %vm11823_vm9 }
 0x9a9   :  { %v10469_v21 = vpop.f32.mrf.mxu3 }
 0x9aa   :  { %6670 = vmatmul.msk.f32.vlgmr.msrb.gmra.mxu0 %vm396_vm1, %v10469_v21  ;;  %v4522_v58 = vrot.slane %v10469_v21, 1  ;;  %v4610_v13 = vrot.slane %v10469_v21, 2  ;;  %v4830_v27 = vrot.slane %v10469_v21, 7  ;;  %v4720_v48 = vrot.slane %v10469_v21, 5 }
 0x9ab   :  { %4941 = vmatpush.msrb.mxu0 %v4924_v33  ;;  %v4665_v39 = vrot.slane %v10469_v21, 3  ;;  %v4775_v36 = vrot.slane %v10469_v21, 6  ;;  %v5187_v33 = vld [vmem:[%s11366_s2 + $0x788] sm:$0xff] }
 0x9ad   :  { %4942 = vmatpush.msrb.mxu0 %v4923_v42  ;;  %v5106_v42 = vld [vmem:[%s11366_s2 + $0x740] sm:$0xff] }
 0x9af   :  { %4943 = vmatpush.msrb.mxu0 %v4922_v9  ;;  %v5185_v9 = vld [vmem:[%s11366_s2 + $0x778] sm:$0xff] }
 0x9b1   :  { %v10515_v35 = vpop.f32.mrf.mxu3  ;;  %4944 = vmatpush.msrb.mxu0 %v4921_v1 }
 0x9b2   :  { %v4523_v25 = vrot.slane %v10515_v35, 1  ;;  %v4611_v63 = vrot.slane %v10515_v35, 2  ;;  %6671 = vmatmul.msk.f32.gmra.mxu0 %vm396_vm1, %v10515_v35  ;;  %v4831_v10 = vrot.slane %v10515_v35, 7  ;;  %v4721_v55 = vrot.slane %v10515_v35, 5 }
 0x9b3   :  { %v4666_v53 = vrot.slane %v10515_v35, 3  ;;  %v4776_v49 = vrot.slane %v10515_v35, 6  ;;  %4945 = vmatpush.msrb.mxu0 %v4920_v20  ;;  %v5062_v20 = vld [vmem:[%s11366_s2 + $0x708] sm:$0xff] }
 0x9b4   :  { %v4524_v29 = vsel %vm354_vm2, %v4522_v58, %v4523_v25  ;;  %v4612_v24 = vsel %vm647_vm3, %v4610_v13, %v4611_v63  ;;  %v4832_v14 = vsel %vm2049_vm8, %v4830_v27, %v4831_v10  ;;  %v4722_v46 = vsel %vm1444_vm6, %v4720_v48, %v4721_v55  ;;  %v4963_v58 = vld [vmem:[%s11366_s2 + $0x6a8] sm:$0xff] }
 0x9b5   :  { %6666 = vmatmul.msk.f32.vlgmr.msra.gmra.mxu1 %vm396_vm1, %v4524_v29  ;;  %6674 = vmatmul.msk.f32.vlgmr.msrb.gmra.mxu2 %vm396_vm1, %v4612_v24  ;;  %v4777_v13 = vsel %vm1857_vm7, %v4775_v36, %v4776_v49  ;;  %v5145_v36 = vld [vmem:[%s11366_s2 + $0x750] sm:$0xff] }
 0x9b6   :  { %6690 = vmatmul.msk.f32.vlgmr.msra.gmra.mxu3 %vm396_vm1, %v4832_v14  ;;  %4898 = vmatpush.msra.mxu1 %v4884_v17  ;;  %v5105_v17 = vld [vmem:[%s11366_s2 + $0x738] sm:$0xff] }
 0x9b7   :  { %4983 = vmatpush.msrb.mxu2 %v4967_v32  ;;  %v5064_v32 = vld [vmem:[%s11366_s2 + $0x718] sm:$0xff] }
 0x9b8   :  { %4899 = vmatpush.msra.mxu1 %v4883_v45 }
 0x9b9   :  { %v10537_v12 = vpop.f32.mrf.mxu3  ;;  %4984 = vmatpush.msrb.mxu2 %v4966_v19 }
 0x9ba   :  { %v4525_v5 = vrot.slane %v10537_v12, 1  ;;  %v4613_v37 = vrot.slane %v10537_v12, 2  ;;  %6672 = vmatmul.msk.f32.gmra.mxu0 %vm396_vm1, %v10537_v12  ;;  %v4833_v61 = vrot.slane %v10537_v12, 7  ;;  %v4723_v38 = vrot.slane %v10537_v12, 5  ;;  %4900 = vmatpush.msra.mxu1 %v4882_v47  ;;  %v5184_v47 = vld [vmem:[%s11366_s2 + $0x770] sm:$0xff] }
 0x9bb   :  { %4985 = vmatpush.msrb.mxu2 %v4965_v40  ;;  %v5011_v59 = vrot.slane %v10537_v12, 4  ;;  %v4668_v27 = vrot.slane %v10537_v12, 3  ;;  %v5063_v40 = vld [vmem:[%s11366_s2 + $0x710] sm:$0xff] }
 0x9bc   :  { %v4526_v30 = vsel %vm354_vm2, %v4523_v25, %v4525_v5  ;;  %v10546_v60 = vsel %vm647_vm3, %v4611_v63, %v4613_v37  ;;  %v10552_v11 = vsel %vm2049_vm8, %v4831_v10, %v4833_v61  ;;  %v10666_v7 = vsel %vm1444_vm6, %v4721_v55, %v4723_v38  ;;  %4901 = vmatpush.msra.mxu1 %v4881_v43  ;;  %v5147_v43 = vld [vmem:[%s11366_s2 + $0x760] sm:$0xff] }
 0x9bd   :  { %6667 = vmatmul.msk.f32.gmra.mxu1 %vm396_vm1, %v4526_v30  ;;  %6675 = vmatmul.msk.f32.gmra.mxu2 %vm396_vm1, %v10546_v60  ;;  %v4667_v25 = vsel %vm839_vm4, %v4665_v39, %v4666_v53  ;;  %v5010_v63 = vrot.slane %v10515_v35, 4  ;;  %v4778_v10 = vrot.slane %v10537_v12, 6  ;;  %v10696_v14 = vsel %vm839_vm4, %v4666_v53, %v4668_v27  ;;  %v5102_v39 = vld [vmem:[%s11366_s2 + $0x720] sm:$0xff] }
 0x9be   :  { %6691 = vmatmul.msk.f32.gmra.mxu3 %vm396_vm1, %v10552_v11  ;;  %4986 = vmatpush.msrb.mxu2 %v4964_v28  ;;  %v5146_v28 = vld [vmem:[%s11366_s2 + $0x758] sm:$0xff] }
 0x9bf   :  { %4902 = vmatpush.msra.mxu1 %v4880_v23  ;;  %v5012_v6 = vsel %vm1252_vm5, %v5010_v63, %v5011_v59  ;;  %v5061_v23 = vld [vmem:[%s11366_s2 + $0x700] sm:$0xff] }
 0x9c0   :  { %4987 = vmatpush.msrb.mxu2 %v4963_v58  ;;  %v5144_v58 = vld [vmem:[%s11366_s2 + $0x748] sm:$0xff] }
 0x9c1   :  { %v10556_v56 = vpop.f32.mrf.mxu3 }
 0x9c2   :  { %v4527_v0 = vrot.slane %v10556_v56, 1  ;;  %v4615_v8 = vrot.slane %v10556_v56, 2  ;;  %6673 = vmatmul.msk.f32.gmra.mxu0 %vm396_vm1, %v10556_v56  ;;  %v4835_v54 = vrot.slane %v10556_v56, 7  ;;  %v4725_v21 = vrot.slane %v10556_v56, 5 }
 0x9c3   :  { %v5013_v24 = vrot.slane %v10556_v56, 4  ;;  %v4670_v30 = vrot.slane %v10556_v56, 3 }
 0x9c4   :  { %v10567_v4 = vsel %vm354_vm2, %v4525_v5, %v4527_v0  ;;  %v10570_v52 = vsel %vm647_vm3, %v4613_v37, %v4615_v8  ;;  %v10581_v22 = vsel %vm2049_vm8, %v4833_v61, %v4835_v54  ;;  %v10690_v29 = vsel %vm1444_vm6, %v4723_v38, %v4725_v21 }
 0x9c5   :  { %6668 = vmatmul.msk.f32.gmra.mxu1 %vm396_vm1, %v10567_v4  ;;  %6676 = vmatmul.msk.f32.gmra.mxu2 %vm396_vm1, %v10570_v52  ;;  %v4779_v5 = vsel %vm1857_vm7, %v4776_v49, %v4778_v10  ;;  %v5014_v61 = vsel %vm1252_vm5, %v5011_v59, %v5013_v24  ;;  %v4671_v34 = vsel %vm839_vm4, %v4668_v27, %v4670_v30  ;;  %v5103_v49 = vld [vmem:[%s11366_s2 + $0x728] sm:$0xff]  ;;  %v5060_v59 = vld [vmem:[%s11366_s2 + $0x6f8] sm:$0xff] }
 0x9c6   :  { %6692 = vmatmul.msk.f32.gmra.mxu3 %vm396_vm1, %v10581_v22 }
 0x9c9   :  { %v10601_v41 = vpop.f32.mrf.mxu3 }
 0x9ca   :  { %v4529_v51 = vrot.slane %v10601_v41, 1  ;;  %v4617_v18 = vrot.slane %v10601_v41, 2  ;;  %6682 = vmatmul.msk.f32.vlgmr.msra.gmra.mxu0 %vm396_vm1, %v4722_v46  ;;  %v4837_v44 = vrot.slane %v10601_v41, 7  ;;  %v4727_v37 = vrot.slane %v10601_v41, 5 }
 0x9cb   :  { %v5015_v26 = vrot.slane %v10601_v41, 4  ;;  %5122 = vmatpush.msra.mxu0 %v5106_v42  ;;  %v4672_v62 = vrot.slane %v10601_v41, 3  ;;  %v4782_v38 = vrot.slane %v10601_v41, 6 }
 0x9cc   :  { %v10614_v31 = vsel %vm354_vm2, %v4527_v0, %v4529_v51  ;;  %v10619_v16 = vsel %vm647_vm3, %v4615_v8, %v4617_v18  ;;  %v10641_v57 = vsel %vm2049_vm8, %v4835_v54, %v4837_v44  ;;  %v4780_v0 = vrot.slane %v10556_v56, 6  ;;  %v5188_v54 = vld [vmem:[%s11366_s2 + $0x790] sm:$0xff] }
 0x9cd   :  { %6669 = vmatmul.msk.f32.gmra.mxu1 %vm396_vm1, %v10614_v31  ;;  %6677 = vmatmul.msk.f32.gmra.mxu2 %vm396_vm1, %v10619_v16  ;;  %v10710_v8 = vsel %vm1444_vm6, %v4725_v21, %v4727_v37  ;;  %v5016_v48 = vsel %vm1252_vm5, %v5013_v24, %v5015_v26  ;;  %v4673_v19 = vsel %vm839_vm4, %v4670_v30, %v4672_v62  ;;  %v5231_v24 = vld [vmem:[%s11366_s2 + $0x798] sm:$0xff] }
 0x9ce   :  { %6693 = vmatmul.msk.f32.gmra.mxu3 %vm396_vm1, %v10641_v57  ;;  %v4781_v55 = vsel %vm1857_vm7, %v4778_v10, %v4780_v0  ;;  %5123 = vmatpush.msra.mxu0 %v5105_v17  ;;  %v4783_v1 = vsel %vm1857_vm7, %v4780_v0, %v4782_v38  ;;  %v5233_v10 = vld [vmem:[%s11366_s2 + $0x7a8] sm:$0xff] }
 0x9cf   :  { %5209 = vmatpush.msra.mxu3 %v5188_v54 }
 0x9d1   :  { %v10738_v46 = vpop.f32.mrf.mxu3  ;;  %5210 = vmatpush.msra.mxu3 %v5187_v33 }
 0x9d2   :  { %6683 = vmatmul.msk.f32.gmra.mxu0 %vm396_vm1, %v10666_v7  ;;  %v5017_v45 = vrot.slane %v10738_v46, 4 }
 0x9d3   :  { %5211 = vmatpush.msra.mxu3 %v5186_v2 }
 0x9d4   :  { %v5018_v53 = vsel %vm1252_vm5, %v5015_v26, %v5017_v45 }
 0x9d5   :  { %6678 = vmatmul.msk.f32.vlgmr.msrb.gmra.mxu1 %vm396_vm1, %v4667_v25  ;;  %6686 = vmatmul.msk.f32.vlgmr.msra.gmra.mxu2 %vm396_vm1, %v4777_v13  ;;  %v4926_v25 = vrot.slane %v10738_v46, 2  ;;  %v5235_v13 = vld [vmem:[%s11366_s2 + $0x7b8] sm:$0xff] }
 0x9d6   :  { %6706 = vmatmul.msk.f32.vlgmr.msrb.gmra.mxu3 %vm396_vm1, %v5012_v6  ;;  %5080 = vmatpush.msrb.mxu1 %v5064_v32 }
 0x9d7   :  { %5162 = vmatpush.msra.mxu2 %v5148_v50  ;;  %5212 = vmatpush.msra.mxu3 %v5185_v9 }
 0x9d8   :  { %5081 = vmatpush.msrb.mxu1 %v5063_v40 }
 0x9d9   :  { %5163 = vmatpush.msra.mxu2 %v5147_v43  ;;  %5213 = vmatpush.msra.mxu3 %v5184_v47  ;;  %v4504_v63 = vpop.f32.mrf.mxu3 }
 0x9da   :  { %6684 = vmatmul.msk.f32.gmra.mxu0 %vm396_vm1, %v10690_v29  ;;  %5082 = vmatpush.msrb.mxu1 %v5062_v20  ;;  %v5192_v21 = vrot.slane %v4504_v63, 1 }
 0x9db   :  { %5164 = vmatpush.msra.mxu2 %v5146_v28 }
 0x9dc   :  { %5083 = vmatpush.msrb.mxu1 %v5061_v23 }
 0x9dd   :  { %6679 = vmatmul.msk.f32.gmra.mxu1 %vm396_vm1, %v10696_v14  ;;  %6687 = vmatmul.msk.f32.gmra.mxu2 %vm396_vm1, %v4779_v5 }
 0x9de   :  { %6707 = vmatmul.msk.f32.gmra.mxu3 %vm396_vm1, %v5014_v61  ;;  %5165 = vmatpush.msra.mxu2 %v5145_v36 }
 0x9df   :  { %5084 = vmatpush.msrb.mxu1 %v5060_v59 }
 0x9e0   :  { %5166 = vmatpush.msra.mxu2 %v5144_v58 }
 0x9e2   :  { %6685 = vmatmul.msk.f32.gmra.mxu0 %vm396_vm1, %v10710_v8 }
 0x9e5   :  { %6680 = vmatmul.msk.f32.gmra.mxu1 %vm396_vm1, %v4671_v34  ;;  %6688 = vmatmul.msk.f32.gmra.mxu2 %vm396_vm1, %v4781_v55 }
 0x9e6   :  { %6708 = vmatmul.msk.f32.gmra.mxu3 %vm396_vm1, %v5016_v48 }
 0x9ea   :  { %6698 = vmatmul.msk.f32.vlgmr.msrb.gmra.mxu0 %vm396_vm1, %v10546_v60  ;;  %v5104_v60 = vld [vmem:[%s11366_s2 + $0x730] sm:$0xff] }
 0x9eb   :  { %5124 = vmatpush.msra.mxu0 %v5104_v60 }
 0x9ed   :  { %6681 = vmatmul.msk.f32.gmra.mxu1 %vm396_vm1, %v4673_v19  ;;  %6689 = vmatmul.msk.f32.gmra.mxu2 %vm396_vm1, %v4783_v1 }
 0x9ee   :  { %6709 = vmatmul.msk.f32.gmra.mxu3 %vm396_vm1, %v5018_v53  ;;  %5125 = vmatpush.msra.mxu0 %v5103_v49 }
 0x9f0   :  { %5126 = vmatpush.msra.mxu0 %v5102_v39 }
 0x9f2   :  { %6699 = vmatmul.msk.f32.gmra.mxu0 %vm396_vm1, %v10570_v52 }
 0x9f5   :  { %6694 = vmatmul.msk.f32.vlgmr.msra.gmra.mxu1 %vm396_vm1, %v10515_v35  ;;  %6702 = vmatmul.msk.f32.vlgmr.msrb.gmra.mxu2 %vm396_vm1, %v10696_v14  ;;  %v4927_v35 = vsel %vm647_vm3, %v4617_v18, %v4926_v25  ;;  %v4968_v18 = vrot.slane %v10738_v46, 3 }
 0x9f6   :  { %6722 = vmatmul.msk.f32.vlgmr.msra.gmra.mxu3 %vm396_vm1, %v10567_v4  ;;  %v5190_v4 = vrot.slane %v10738_v46, 1  ;;  %5251 = vmatpush.msra.mxu1 %v5235_v13 }
 0x9f7   :  { %v4969_v6 = vsel %vm839_vm4, %v4672_v62, %v4968_v18 }
 0x9f8   :  { %v5193_v27 = vsel %vm354_vm2, %v5190_v4, %v5192_v21 }
 0x9fa   :  { %6700 = vmatmul.msk.f32.gmra.mxu0 %vm396_vm1, %v10619_v16 }
 0x9fd   :  { %6695 = vmatmul.msk.f32.gmra.mxu1 %vm396_vm1, %v10537_v12  ;;  %6703 = vmatmul.msk.f32.gmra.mxu2 %vm396_vm1, %v4671_v34 }
 0x9fe   :  { %6723 = vmatmul.msk.f32.gmra.mxu3 %vm396_vm1, %v10614_v31  ;;  %v5191_v31 = vsel %vm354_vm2, %v4529_v51, %v5190_v4  ;;  %v5234_v51 = vld [vmem:[%s11366_s2 + $0x7b0] sm:$0xff] }
 0x9ff   :  { %5252 = vmatpush.msra.mxu1 %v5234_v51 }
 0xa01   :  { %5253 = vmatpush.msra.mxu1 %v5233_v10 }
 0xa02   :  { %6701 = vmatmul.msk.f32.gmra.mxu0 %vm396_vm1, %v4927_v35 }
 0xa05   :  { %6696 = vmatmul.msk.f32.gmra.mxu1 %vm396_vm1, %v10556_v56  ;;  %6704 = vmatmul.msk.f32.gmra.mxu2 %vm396_vm1, %v4673_v19 }
 0xa06   :  { %6724 = vmatmul.msk.f32.gmra.mxu3 %vm396_vm1, %v5191_v31 }
 0xa0a   :  { %6714 = vmatmul.msk.f32.vlgmr.msra.gmra.mxu0 %vm396_vm1, %v10552_v11  ;;  %v5232_v11 = vld [vmem:[%s11366_s2 + $0x7a0] sm:$0xff] }
 0xa0b   :  { %5254 = vmatpush.msra.mxu1 %v5232_v11 }
 0xa0d   :  { %6697 = vmatmul.msk.f32.gmra.mxu1 %vm396_vm1, %v10601_v41  ;;  %6705 = vmatmul.msk.f32.gmra.mxu2 %vm396_vm1, %v4969_v6 }
 0xa0e   :  { %6725 = vmatmul.msk.f32.gmra.mxu3 %vm396_vm1, %v5193_v27  ;;  %5255 = vmatpush.msra.mxu1 %v5231_v24 }
 0xa12   :  { %6715 = vmatmul.msk.f32.gmra.mxu0 %vm396_vm1, %v10581_v22  ;;  %v5107_v22 = vrot.slane %v10738_v46, 7 }
 0xa14   :  { %v5108_v14 = vsel %vm2049_vm8, %v4837_v44, %v5107_v22 }
 0xa15   :  { %6710 = vmatmul.msk.f32.vlgmr.msrb.gmra.mxu1 %vm396_vm1, %v10666_v7  ;;  %6718 = vmatmul.msk.f32.vlgmr.msra.gmra.mxu2 %vm396_vm1, %v10537_v12  ;;  %v5065_v12 = vrot.slane %v10738_v46, 5 }
 0xa1a   :  { %6716 = vmatmul.msk.f32.gmra.mxu0 %vm396_vm1, %v10641_v57 }
 0xa1d   :  { %6711 = vmatmul.msk.f32.gmra.mxu1 %vm396_vm1, %v10690_v29  ;;  %6719 = vmatmul.msk.f32.gmra.mxu2 %vm396_vm1, %v10556_v56  ;;  %v5066_v56 = vsel %vm1444_vm6, %v4727_v37, %v5065_v12  ;;  %v5236_v37 = vrot.slane %v4504_v63, 2 }
 0xa1f   :  { %v5237_v54 = vsel %vm647_vm3, %v4926_v25, %v5236_v37 }
 0xa22   :  { %6717 = vmatmul.msk.f32.gmra.mxu0 %vm396_vm1, %v5108_v14 }
 0xa25   :  { %6712 = vmatmul.msk.f32.gmra.mxu1 %vm396_vm1, %v10710_v8  ;;  %6720 = vmatmul.msk.f32.gmra.mxu2 %vm396_vm1, %v10601_v41 }
 0xa27   :  { %v10868_v57 = vpop.f32.mrf.mxu0 }
 0xa2d   :  { %6713 = vmatmul.msk.f32.gmra.mxu1 %vm396_vm1, %v5066_v56  ;;  %6721 = vmatmul.msk.f32.gmra.mxu2 %vm396_vm1, %v10738_v46 }
 0xa2f   :  { %v4596_v7 = vpop.f32.mrf.mxu0 }
 0xa32   :  { %v4556_v44 = vpop.f32.mrf.mxu1 }
 0xa33   :  { %v4594_v24 = vadd.f32 %v10868_v57, %v4556_v44 }
 0xa35   :  { %6726 = vmatmul.msk.f32.vlgmr.msra.gmra.mxu1 %vm396_vm1, %v10570_v52 }
 0xa37   :  { %v4599_v61 = vpop.f32.mrf.mxu0 }
 0xa38   :  { %v4644_v29 = vpop.f32.mrf.mxu2 }
 0xa39   :  { %v10883_v17 = vpop.f32.mrf.mxu3  ;;  %v4656_v56 = vadd.f32 %v4644_v29, %v4594_v24 }
 0xa3a   :  { %v4559_v5 = vpop.f32.mrf.mxu1 }
 0xa3b   :  { %v4597_v27 = vadd.f32 %v4596_v7, %v4559_v5 }
 0xa3d   :  { %6727 = vmatmul.msk.f32.gmra.mxu1 %vm396_vm1, %v10619_v16 }
 0xa3f   :  { %v4602_v8 = vpop.f32.mrf.mxu0 }
 0xa40   :  { %v4647_v30 = vpop.f32.mrf.mxu2 }
 0xa41   :  { %v4867_v50 = vpop.f32.mrf.mxu3  ;;  %v4657_v22 = vadd.f32 %v4647_v30, %v4597_v27 }
 0xa42   :  { %v4562_v41 = vpop.f32.mrf.mxu1 }
 0xa43   :  { %v4600_v6 = vadd.f32 %v4599_v61, %v4562_v41 }
 0xa45   :  { %6728 = vmatmul.msk.f32.gmra.mxu1 %vm396_vm1, %v4927_v35 }
 0xa47   :  { %v4754_v55 = vpop.f32.mrf.mxu0 }
 0xa48   :  { %v4650_v0 = vpop.f32.mrf.mxu2 }
 0xa49   :  { %v4870_v38 = vpop.f32.mrf.mxu3  ;;  %v4658_v10 = vadd.f32 %v4650_v0, %v4600_v6 }
 0xa4a   :  { %v4565_v26 = vpop.f32.mrf.mxu1 }
 0xa4b   :  { %v4603_v63 = vadd.f32 %v4602_v8, %v4565_v26 }
 0xa4d   :  { %6729 = vmatmul.msk.f32.gmra.mxu1 %vm396_vm1, %v5237_v54 }
 0xa4f   :  { %v4757_v16 = vpop.f32.mrf.mxu0 }
 0xa50   :  { %v4653_v52 = vpop.f32.mrf.mxu2 }
 0xa51   :  { %v4873_v1 = vpop.f32.mrf.mxu3  ;;  %v4659_v51 = vadd.f32 %v4653_v52, %v4603_v63 }
 0xa52   :  { %v4699_v34 = vpop.f32.mrf.mxu1 }
 0xa53   :  { %v4711_v8 = vadd.f32 %v4699_v34, %v4656_v56 }
 0xa55   :  { %v4766_v7 = vadd.f32 %v4754_v55, %v4711_v8 }
 0xa57   :  { %v4760_v46 = vpop.f32.mrf.mxu0 }
 0xa58   :  { %v4809_v33 = vpop.f32.mrf.mxu2 }
 0xa59   :  { %v10887_v53 = vpop.f32.mrf.mxu3  ;;  %v4821_v57 = vadd.f32 %v4809_v33, %v4766_v7  ;;  %v5326_v33 = vld [vmem:[%s11366_s2 + $0xa90] sm:$0xff]  ;;  %v6808_v7 = vld [vmem:[%s11369_s1] sm:$0x3] }
 0xa5a   :  { %v4702_v42 = vpop.f32.mrf.mxu1  ;;  %5344 = vmatpush.msrb.mxu2 %v5326_v33 }
 0xa5b   :  { %v4712_v37 = vadd.f32 %v4702_v42, %v4657_v22  ;;  %6732 = vmatmul.msk.f32.vlgmr.msrb.gmra.mxu2 %vm11823_vm9, %v10363_v3 }
 0xa5d   :  { %v4767_v61 = vadd.f32 %v4757_v16, %v4712_v37 }
 0xa5f   :  { %v4763_v9 = vpop.f32.mrf.mxu0 }
 0xa60   :  { %v4812_v32 = vpop.f32.mrf.mxu2 }
 0xa61   :  { %v10889_v23 = vpop.f32.mrf.mxu3  ;;  %v4822_v5 = vadd.f32 %v4812_v32, %v4767_v61 }
 0xa62   :  { %v4705_v48 = vpop.f32.mrf.mxu1 }
 0xa63   :  { %v4713_v14 = vadd.f32 %v4705_v48, %v4658_v10  ;;  %v4877_v48 = vadd.f32 %v4867_v50, %v4822_v5 }
 0xa65   :  { %v4768_v26 = vadd.f32 %v4760_v46, %v4713_v14 }
 0xa67   :  { %v4947_v60 = vpop.f32.mrf.mxu0 }
 0xa68   :  { %v4815_v2 = vpop.f32.mrf.mxu2 }
 0xa69   :  { %v5050_v58 = vpop.f32.mrf.mxu3  ;;  %v4823_v41 = vadd.f32 %v4815_v2, %v4768_v26 }
 0xa6a   :  { %v4708_v62 = vpop.f32.mrf.mxu1 }
 0xa6b   :  { %v4714_v11 = vadd.f32 %v4708_v62, %v4659_v51  ;;  %v4878_v44 = vadd.f32 %v4870_v38, %v4823_v41  ;;  %v4876_v62 = vadd.f32 %v10883_v17, %v4821_v57 }
 0xa6d   :  { %v4769_v54 = vadd.f32 %v4763_v9, %v4714_v11 }
 0xa6f   :  { %v4950_v49 = vpop.f32.mrf.mxu0 }
 0xa70   :  { %v4818_v45 = vpop.f32.mrf.mxu2 }
 0xa71   :  { %v5053_v13 = vpop.f32.mrf.mxu3 }
 0xa72   :  { %v4904_v19 = vpop.f32.mrf.mxu1 }
 0xa73   :  { %v4916_v63 = vadd.f32 %v4904_v19, %v4876_v62 }
 0xa75   :  { %v4959_v38 = vadd.f32 %v4947_v60, %v4916_v63 }
 0xa77   :  { %v4953_v39 = vpop.f32.mrf.mxu0 }
 0xa78   :  { %v10885_v40 = vpop.f32.mrf.mxu2 }
 0xa79   :  { %v10900_v15 = vpop.f32.mrf.mxu3  ;;  %v5001_v17 = vadd.f32 %v10885_v40, %v4959_v38 }
 0xa7a   :  { %v4907_v47 = vpop.f32.mrf.mxu1 }
 0xa7b   :  { %v4917_v9 = vadd.f32 %v4907_v47, %v4877_v48 }
 0xa7d   :  { %v4960_v55 = vadd.f32 %v4950_v49, %v4917_v9  ;;  %v6798_v9 = vld [vmem:[%s11366_s2 + $0xa98] ss:$0 sm:$0xff] }
 0xa7f   :  { %v4956_v25 = vpop.f32.mrf.mxu0 }
 0xa80   :  { %v4992_v20 = vpop.f32.mrf.mxu2 }
 0xa81   :  { %v5218_v42 = vpop.f32.mrf.mxu3  ;;  %v5002_v50 = vadd.f32 %v4992_v20, %v4960_v55  ;;  %v11828_v55 = vld [vmem:[#allocation61_spill] sm:$0xff] }
 0xa82   :  { %v4910_v43 = vpop.f32.mrf.mxu1 }
 0xa83   :  { %v4918_v29 = vadd.f32 %v4910_v43, %v4878_v44 }
 0xa85   :  { %v4961_v6 = vadd.f32 %v4953_v39, %v4918_v29 }
 0xa87   :  { %v10895_v18 = vpop.f32.mrf.mxu0 }
 0xa88   :  { %v4995_v36 = vpop.f32.mrf.mxu2  ;;  %11821 = vst [vmem:[#allocation60_spill] sm:$0xff] %v10895_v18  ;;  %v4824_v18 = vadd.f32 %v4818_v45, %v4769_v54 }
 0xa89   :  { %v5003_v32 = vadd.f32 %v4995_v36, %v4961_v6  ;;  %v5221_v43 = vpop.f32.mrf.mxu3  ;;  %v6799_v6 = vld [vmem:[%s11366_s2 + $0xaa8] ss:$0 sm:$0xff] }
 0xa8a   :  { %v4913_v28 = vpop.f32.mrf.mxu1  ;;  %v4879_v0 = vadd.f32 %v4873_v1, %v4824_v18 }
 0xa8b   :  { %v5058_v47 = vadd.f32 %v5050_v58, %v5003_v32  ;;  %v2880_v32 = vadd.s32 24, %v11828_v55 }
 0xa8c   :  { %v4919_v30 = vadd.f32 %v4913_v28, %v4879_v0  ;;  %v5057_v28 = vadd.f32 %v10889_v23, %v5002_v50 }
 0xa8d   :  { %vm5391_vm10 = vcmp.lt.s32.totalorder %v2880_v32, 25 }
 0xa8e   :  { %v4962_v34 = vadd.f32 %v4956_v25, %v4919_v30 }
 0xa8f   :  { %v11825_v10 = vld [vmem:[#allocation60_spill] sm:$0xff] }
 0xa90   :  { %v4998_v35 = vpop.f32.mrf.mxu2 }
 0xa91   :  { %v5004_v16 = vadd.f32 %v4998_v35, %v4962_v34  ;;  %v5056_v35 = vadd.f32 %v10887_v53, %v5001_v17  ;;  %v5224_v58 = vpop.f32.mrf.mxu3 }
 0xa92   :  { %v10891_v59 = vpop.f32.mrf.mxu1 }
 0xa93   :  { %11820 = vst [vmem:[#allocation59_spill] sm:$0xff] %v10891_v59  ;;  %v5131_v59 = vpop.f32.mrf.mxu0  ;;  %v5059_v1 = vadd.f32 %v5053_v13, %v5004_v16 }
 0xa98   :  { %v10897_v21 = vpop.f32.mrf.mxu2 }
 0xa99   :  { %11822 = vst [vmem:[#allocation2_spill] sm:$0xff] %v10897_v21 }
 0xa9a   :  { %v10893_v4 = vpop.f32.mrf.mxu1  ;;  %v11824_v13 = vld [vmem:[#allocation59_spill] sm:$0xff] }
 0xa9b   :  { %v5134_v46 = vpop.f32.mrf.mxu0  ;;  %v5099_v60 = vadd.f32 %v10893_v4, %v5057_v28  ;;  %v5098_v18 = vadd.f32 %v11824_v13, %v5056_v35 }
 0xa9d   :  { %v5141_v27 = vadd.f32 %v5131_v59, %v5099_v60  ;;  %v5140_v11 = vadd.f32 %v11825_v10, %v5098_v18  ;;  %v5273_v59 = vld [vmem:[%s11368_s3 + $0x300] sm:$0x3] }
 0xaa0   :  { %v5171_v21 = vpop.f32.mrf.mxu2  ;;  %v11826_v22 = vld [vmem:[#allocation2_spill] sm:$0xff] }
 0xaa1   :  { %v5181_v24 = vadd.f32 %v5171_v21, %v5141_v27  ;;  %v5180_v14 = vadd.f32 %v11826_v22, %v5140_v11  ;;  %v5423_v22 = vld [vmem:[%s11368_s3 + $0x2a0] sm:$0xff] }
 0xaa2   :  { %v5092_v31 = vpop.f32.mrf.mxu1 }
 0xaa3   :  { %v5100_v49 = vadd.f32 %v5092_v31, %v5058_v47  ;;  %v5137_v39 = vpop.f32.mrf.mxu0  ;;  %v5228_v53 = vadd.f32 %v5218_v42, %v5181_v24  ;;  %v5227_v4 = vadd.f32 %v10900_v15, %v5180_v14  ;;  %v5349_v15 = vld [vmem:[%s11366_s2 + $0xaa0] sm:$0xff]  ;;  %v5424_v14 = vld [vmem:[%s11368_s3 + $0x2b0] sm:$0xff] }
 0xaa5   :  { %v5142_v51 = vadd.f32 %v5134_v46, %v5100_v49 }
 0xaa8   :  { %v5174_v45 = vpop.f32.mrf.mxu2 }
 0xaa9   :  { %v5182_v40 = vadd.f32 %v5174_v45, %v5142_v51 }
 0xaaa   :  { %v5095_v12 = vpop.f32.mrf.mxu1 }
 0xaab   :  { %v5101_v19 = vadd.f32 %v5095_v12, %v5059_v1  ;;  %v5229_v12 = vadd.f32 %v5221_v43, %v5182_v40 }
 0xaad   :  { %v5143_v20 = vadd.f32 %v5137_v39, %v5101_v19 }
 0xab0   :  { %v5177_v36 = vpop.f32.mrf.mxu2 }
 0xab1   :  { %v5183_v3 = vadd.f32 %v5177_v36, %v5143_v20 }
 0xab2   :  { %v5257_v52 = vpop.f32.mrf.mxu1 }
 0xab3   :  { %v5230_v23 = vadd.f32 %v5224_v58, %v5183_v3  ;;  %v5269_v8 = vadd.f32 %v5257_v52, %v5227_v4  ;;  %v5473_v4 = vld [vmem:[%s11366_s2 + $0x7f0] sm:$0xff] }
 0xab5   :  { %v5298_v41 = vmul.f32 %v5269_v8, %v5269_v8 }
 0xaba   :  { %v5260_v2 = vpop.f32.mrf.mxu1 }
 0xabb   :  { %v5270_v54 = vadd.f32 %v5260_v2, %v5228_v53  ;;  %v5475_v53 = vld [vmem:[%s11366_s2 + $0x800] sm:$0xff] }
 0xabd   :  { %v5299_v61 = vmul.f32 %v5270_v54, %v5270_v54 }
 0xac2   :  { %v5263_v25 = vpop.f32.mrf.mxu1 }
 0xac3   :  { %v5271_v37 = vadd.f32 %v5263_v25, %v5229_v12  ;;  %v5425_v12 = vld [vmem:[%s11368_s3 + $0x2c0] sm:$0xff] }
 0xac5   :  { %v5300_v26 = vmul.f32 %v5271_v37, %v5271_v37 }
 0xaca   :  { %v5266_v31 = vpop.f32.mrf.mxu1 }
 0xacb   :  { %v5272_v56 = vadd.f32 %v5266_v31, %v5230_v23  ;;  %v5422_v23 = vld [vmem:[%s11368_s3 + $0x290] sm:$0xff] }
 0xacd   :  { %5290 = vmatpush.msrb.mxu0 %v5272_v56  ;;  %v5301_v21 = vmul.f32 %v5272_v56, %v5272_v56 }
 0xacf   :  { %5291 = vmatpush.msrb.mxu0 %v5271_v37 }
 0xad1   :  { %5292 = vmatpush.msrb.mxu0 %v5270_v54 }
 0xad3   :  { %5293 = vmatpush.msrb.mxu0 %v5269_v8 }
 0xad4   :  { %6730 = vmatmul.msk.f32.vlgmr.msrb.gmra.mxu0 %vm5274_vm14, %v5273_v59 }
 0xad5   :  { %5314 = vmatpush.msra.mxu0 %v5301_v21  ;;  %v5469_v21 = vld [vmem:[%s11366_s2 + $0x7d0] sm:$0xff] }
 0xad7   :  { %5315 = vmatpush.msra.mxu0 %v5300_v26  ;;  %v5598_v26 = vld [vmem:[%s11366_s2 + $0x858] sm:$0xff] }
 0xad9   :  { %5316 = vmatpush.msra.mxu0 %v5299_v61  ;;  %v5468_v61 = vld [vmem:[%s11366_s2 + $0x7c8] sm:$0xff] }
 0xadb   :  { %5317 = vmatpush.msra.mxu0 %v5298_v41  ;;  %v5467_v41 = vld [vmem:[%s11366_s2 + $0x7c0] sm:$0xff] }
 0xadc   :  { %6731 = vmatmul.msk.f32.vlgmr.msra.gmra.mxu0 %vm5274_vm14, %v5273_v59  ;;  %v5470_v59 = vld [vmem:[%s11366_s2 + $0x7d8] sm:$0xff] }
 0xadd   :  { %5367 = vmatpush.msrb.mxu0 %v5349_v15  ;;  %v5553_v15 = vld [vmem:[%s11366_s2 + $0x830] sm:$0xff] }
 0xade   :  { %v5346_v46 = vpop.f32.mrf.mxu2  ;;  %5576 = vmatpush.msrb.mxu1 %v5553_v15 }
 0xadf   :  { %v5347_v63 = vadd.f32 %v6798_v9, %v5346_v46  ;;  %v5594_v9 = vld [vmem:[%s11366_s2 + $0x838] sm:$0xff]  ;;  %v5639_v46 = vld [vmem:[%s11366_s2 + $0x860] sm:$0xff] }
 0xae4   :  { %6733 = vmatmul.msk.f32.vlgmr.msrb.gmra.mxu0 %vm11827_vm15, %v6808_v7  ;;  %v5643_v7 = vld [vmem:[%s11366_s2 + $0x880] sm:$0xff] }
 0xb51   :  { %v5295_v5 = vpop.f32.mrf.mxu0 }
 0xb52   :  { %v5322_v0 = vmul.f32 0.25, %v5295_v5  ;;  %v5552_v5 = vld [vmem:[%s11366_s2 + $0x828] sm:$0xff] }
 0xb53   :  { %5577 = vmatpush.msrb.mxu1 %v5552_v5  ;;  %v5940_v5 = vld [vmem:[%s11366_s2 + $0x998] sm:$0xff] }
 0xb54   :  { %v5324_v57 = vmul.f32 %v5322_v0, %v5322_v0 }
 0xb59   :  { %v5319_v52 = vpop.f32.mrf.mxu0 }
 0xb5a   :  { %v5323_v44 = vmul.f32 0.25, %v5319_v52  ;;  %v5597_v52 = vld [vmem:[%s11366_s2 + $0x850] sm:$0xff] }
 0xb5c   :  { %v5325_v30 = vsub.f32 %v5323_v44, %v5324_v57  ;;  %v5596_v57 = vld [vmem:[%s11366_s2 + $0x848] sm:$0xff]  ;;  %v5551_v44 = vld [vmem:[%s11366_s2 + $0x820] sm:$0xff] }
 0xb5d   :  { %5578 = vmatpush.msrb.mxu1 %v5551_v44 }
 0xb5e   :  { %v5372_v48 = vadd.f32 1e-05, %v5325_v30  ;;  %v5550_v30 = vld [vmem:[%s11366_s2 + $0x818] sm:$0xff] }
 0xb5f   :  { %5579 = vmatpush.msrb.mxu1 %v5550_v30  ;;  %v5900_v30 = vld [vmem:[%s11366_s2 + $0x970] sm:$0xff] }
 0xb60   :  { %6805 = vrsqrt.f32 %v5372_v48  ;;  %vm5379_vm11 = vweird.f32 %v5372_v48 }
 0xb61   :  { %v5369_v2 = vpop.f32.mrf.mxu0 }
 0xb62   :  { %v5370_v50 = vadd.f32 %v6799_v6, %v5369_v2  ;;  %v5687_v2 = vld [vmem:[%s11366_s2 + $0x8a0] sm:$0xff] }
 0xb66   :  { %v6806_v29 = vpop.eup %6805 }
 0xb67   :  { %v5374_v42 = vmul.f32 %v6806_v29, %v5372_v48  ;;  %vm5380_vm0 = vweird.f32 %v6806_v29  ;;  %v5595_v48 = vld [vmem:[%s11366_s2 + $0x840] sm:$0xff] }
 0xb68   :  { %vm5381_vm12 = vmor %vm5379_vm11, %vm5380_vm0 }
 0xb69   :  { %v5375_v62 = vmul.f32 %v6806_v29, %v5374_v42  ;;  %v5640_v42 = vld [vmem:[%s11366_s2 + $0x868] sm:$0xff] }
 0xb6b   :  { %v5376_v34 = vmul.f32 0.5, %v5375_v62 }
 0xb6d   :  { %v5377_v45 = vsub.f32 1.5, %v5376_v34  ;;  %v5549_v34 = vld [vmem:[%s11366_s2 + $0x810] sm:$0xff] }
 0xb6e   :  { %5580 = vmatpush.msrb.mxu1 %v5549_v34  ;;  %v5939_v34 = vld [vmem:[%s11366_s2 + $0x990] sm:$0xff] }
 0xb6f   :  { %v5378_v16 = vmul.f32 %v6806_v29, %v5377_v45  ;;  %v5688_v45 = vld [vmem:[%s11366_s2 + $0x8a8] sm:$0xff] }
 0xb71   :  { %v5382_v33 = vsel %vm5381_vm12, %v6806_v29, %v5378_v16  ;;  %v5641_v29 = vld [vmem:[%s11366_s2 + $0x870] sm:$0xff] }
 0xb72   :  { %v5383_v38 = vmul.f32 %v5382_v33, %v5347_v63 }
 0xb74   :  { %v5386_v1 = vperm.slane %v5383_v38, 1  ;;  %v5392_v17 = vperm.slane %v5383_v38, 0  ;;  %v5384_v47 = vmul.f32 %v5383_v38, %v5322_v0  ;;  %v5642_v0 = vld [vmem:[%s11366_s2 + $0x878] sm:$0xff] }
 0xb76   :  { %v5385_v19 = vsub.f32 %v5370_v50, %v5384_v47  ;;  %v5396_v43 = vsel %vm5391_vm10, %v5392_v17, %v5386_v1  ;;  %v5404_v39 = vmul.f32 %v5392_v17, %v5271_v37  ;;  %v5403_v25 = vmul.f32 %v5392_v17, %v5270_v54  ;;  %v5474_v37 = vld [vmem:[%s11366_s2 + $0x7f8] sm:$0xff]  ;;  %v5472_v54 = vld [vmem:[%s11366_s2 + $0x7e8] sm:$0xff] }
 0xb77   :  { %v5405_v36 = vmul.f32 %v5396_v43, %v5272_v56  ;;  %v5402_v18 = vmul.f32 %v5392_v17, %v5269_v8  ;;  %v5476_v56 = vld [vmem:[%s11366_s2 + $0x808] sm:$0xff]  ;;  %v5471_v8 = vld [vmem:[%s11366_s2 + $0x7e0] sm:$0xff]  ;;  %v5686_v47 = vld [vmem:[%s11366_s2 + $0x898] sm:$0xff] }
 0xb78   :  { %v5387_v28 = vperm.slane %v5385_v19, 1  ;;  %v5397_v49 = vperm.slane %v5385_v19, 0  ;;  %5502 = vmatpush.msrb.mxu3 %v5476_v56  ;;  %5534 = vmatpush.msra.mxu0 %v5471_v8  ;;  %v5778_v19 = vld [vmem:[%s11366_s2 + $0x8f8] sm:$0xff]  ;;  %v5685_v43 = vld [vmem:[%s11366_s2 + $0x890] sm:$0xff]  ;;  %v5820_v56 = vld [vmem:[%s11366_s2 + $0x908] sm:$0xff] }
 0xb7a   :  { %v5401_v35 = vsel %vm5391_vm10, %v5397_v49, %v5387_v28  ;;  %v5408_v60 = vadd.f32 %v5404_v39, %v5397_v49  ;;  %v5407_v13 = vadd.f32 %v5403_v25, %v5397_v49  ;;  %v5406_v27 = vadd.f32 %v5402_v18, %v5397_v49  ;;  %5503 = vmatpush.msrb.mxu3 %v5475_v53  ;;  %v5684_v28 = vld [vmem:[%s11366_s2 + $0x888] sm:$0xff]  ;;  %v5733_v25 = vld [vmem:[%s11366_s2 + $0x8d0] sm:$0xff]  ;;  %v5819_v53 = vld [vmem:[%s11366_s2 + $0x900] sm:$0xff] }
 0xb7b   :  { %v5409_v20 = vadd.f32 %v5405_v36, %v5401_v35  ;;  %5535 = vmatpush.msra.mxu0 %v5470_v59  ;;  %5756 = vmatpush.msra.mxu1 %v5733_v25  ;;  %v5732_v18 = vld [vmem:[%s11366_s2 + $0x8c8] sm:$0xff]  ;;  %v5859_v59 = vld [vmem:[%s11366_s2 + $0x940] sm:$0xff] }
 0xb7c   :  { %v5416_v3 = vmul.f32 0.2, %v5408_v60  ;;  %vm5412_vm9 = vcmp.gt.f32.partialorder %v5408_v60, 0.0  ;;  %v5415_v58 = vmul.f32 0.2, %v5407_v13  ;;  %vm5411_vm15 = vcmp.gt.f32.partialorder %v5407_v13, 0.0  ;;  %5504 = vmatpush.msrb.mxu3 %v5474_v37 }
 0xb7d   :  { %vm5413_vm13 = vcmp.gt.f32.partialorder %v5409_v20, 0.0  ;;  %v5417_v51 = vmul.f32 0.2, %v5409_v20  ;;  %v5414_v11 = vmul.f32 0.2, %v5406_v27  ;;  %vm5410_vm0 = vcmp.gt.f32.partialorder %v5406_v27, 0.0  ;;  %5536 = vmatpush.msra.mxu0 %v5469_v21  ;;  %5757 = vmatpush.msra.mxu1 %v5732_v18 }
 0xb7e   :  { %v5420_v10 = vsel %vm5412_vm9, %v5408_v60, %v5416_v3  ;;  %v5419_v24 = vsel %vm5411_vm15, %v5407_v13, %v5415_v58  ;;  %5505 = vmatpush.msrb.mxu3 %v5473_v4  ;;  %v5823_v60 = vld [vmem:[%s11366_s2 + $0x920] sm:$0xff]  ;;  %v5777_v3 = vld [vmem:[%s11366_s2 + $0x8f0] sm:$0xff]  ;;  %v5860_v4 = vld [vmem:[%s11366_s2 + $0x948] sm:$0xff] }
 0xb7f   :  { %v5421_v40 = vsel %vm5413_vm13, %v5409_v20, %v5417_v51  ;;  %v5418_v31 = vsel %vm5410_vm0, %v5406_v27, %v5414_v11  ;;  %5537 = vmatpush.msra.mxu0 %v5468_v61  ;;  %v5776_v27 = vld [vmem:[%s11366_s2 + $0x8e8] sm:$0xff]  ;;  %v5775_v11 = vld [vmem:[%s11366_s2 + $0x8e0] sm:$0xff] }
 0xb80   :  { %5450 = vmatpush.msra.mxu2 %v5421_v40  ;;  %5506 = vmatpush.msrb.mxu3 %v5472_v54  ;;  %v5731_v40 = vld [vmem:[%s11366_s2 + $0x8c0] sm:$0xff] }
 0xb81   :  { %5538 = vmatpush.msra.mxu0 %v5467_v41  ;;  %5758 = vmatpush.msra.mxu1 %v5731_v40  ;;  %v5858_v41 = vld [vmem:[%s11366_s2 + $0x938] sm:$0xff] }
 0xb82   :  { %5451 = vmatpush.msra.mxu2 %v5420_v10  ;;  %5621 = vmatpush.msra.mxu3 %v5598_v26  ;;  %v5822_v10 = vld [vmem:[%s11366_s2 + $0x918] sm:$0xff] }
 0xb83   :  { %5711 = vmatpush.msrb.mxu0 %v5688_v45  ;;  %v5898_v45 = vld [vmem:[%s11366_s2 + $0x960] sm:$0xff] }
 0xb84   :  { %5452 = vmatpush.msra.mxu2 %v5419_v24  ;;  %5622 = vmatpush.msra.mxu3 %v5597_v52  ;;  %v5730_v24 = vld [vmem:[%s11366_s2 + $0x8b8] sm:$0xff]  ;;  %v5856_v52 = vld [vmem:[%s11366_s2 + $0x928] sm:$0xff] }
 0xb85   :  { %5712 = vmatpush.msrb.mxu0 %v5687_v2  ;;  %5759 = vmatpush.msra.mxu1 %v5730_v24  ;;  %v5897_v2 = vld [vmem:[%s11366_s2 + $0x958] sm:$0xff]  ;;  %v6097_v24 = vld [vmem:[%s11366_s2 + $0xa20] sm:$0xff] }
 0xb86   :  { %5453 = vmatpush.msra.mxu2 %v5418_v31  ;;  %5623 = vmatpush.msra.mxu3 %v5596_v57  ;;  %v5821_v31 = vld [vmem:[%s11366_s2 + $0x910] sm:$0xff] }
 0xb87   :  { %6734 = vmatmul.msk.f32.vlgmr.msra.gmra.mxu2 %vm5274_vm14, %v5422_v23  ;;  %5713 = vmatpush.msrb.mxu0 %v5686_v47  ;;  %v6020_v47 = vld [vmem:[%s11366_s2 + $0x9e8] sm:$0xff] }
 0xb88   :  { %5666 = vmatpush.msrb.mxu2 %v5643_v7  ;;  %5624 = vmatpush.msra.mxu3 %v5595_v48  ;;  %v5980_v48 = vld [vmem:[%s11366_s2 + $0x9c0] sm:$0xff] }
 0xb89   :  { %5714 = vmatpush.msrb.mxu0 %v5685_v43  ;;  %v6019_v43 = vld [vmem:[%s11366_s2 + $0x9e0] sm:$0xff] }
 0xb8a   :  { %5667 = vmatpush.msrb.mxu2 %v5642_v0  ;;  %5625 = vmatpush.msra.mxu3 %v5594_v9  ;;  %v5857_v0 = vld [vmem:[%s11366_s2 + $0x930] sm:$0xff]  ;;  %v5899_v9 = vld [vmem:[%s11366_s2 + $0x968] sm:$0xff] }
 0xb8b   :  { %5715 = vmatpush.msrb.mxu0 %v5684_v28 }
 0xb8c   :  { %5668 = vmatpush.msrb.mxu2 %v5641_v29 }
 0xb8e   :  { %5669 = vmatpush.msrb.mxu2 %v5640_v42 }
 0xb8f   :  { %6735 = vmatmul.msk.f32.gmra.mxu2 %vm5274_vm14, %v5423_v22  ;;  %v5774_v22 = vld [vmem:[%s11366_s2 + $0x8d8] sm:$0xff] }
 0xb90   :  { %5670 = vmatpush.msrb.mxu2 %v5639_v46  ;;  %v5938_v46 = vld [vmem:[%s11366_s2 + $0x988] sm:$0xff] }
 0xb92   :  { %5838 = vmatpush.msra.mxu2 %v5823_v60  ;;  %v6018_v60 = vld [vmem:[%s11366_s2 + $0x9d8] sm:$0xff] }
 0xb94   :  { %5839 = vmatpush.msra.mxu2 %v5822_v10  ;;  %v6098_v10 = vld [vmem:[%s11366_s2 + $0xa28] sm:$0xff] }
 0xb96   :  { %5840 = vmatpush.msra.mxu2 %v5821_v31  ;;  %v6096_v31 = vld [vmem:[%s11366_s2 + $0xa18] sm:$0xff] }
 0xb97   :  { %6736 = vmatmul.msk.f32.gmra.mxu2 %vm5274_vm14, %v5424_v14 }
 0xb98   :  { %5841 = vmatpush.msra.mxu2 %v5820_v56 }
 0xb9a   :  { %5842 = vmatpush.msra.mxu2 %v5819_v53 }
 0xb9f   :  { %6737 = vmatmul.msk.f32.gmra.mxu2 %vm5274_vm14, %v5425_v12  ;;  %v5729_v12 = vld [vmem:[%s11366_s2 + $0x8b0] sm:$0xff] }
 0xba0   :  { %5760 = vmatpush.msra.mxu1 %v5729_v12 }
 0xc0a   :  { %v11017_v62 = vpop.f32.mrf.mxu2 }
 0xc0b   :  { %6741 = vmatmul.msk.f32.vlgmr.msra.gmra.mxu0 %vm396_vm1, %v11017_v62  ;;  %v5480_v6 = vrot.slane %v11017_v62, 1  ;;  %v5554_v16 = vrot.slane %v11017_v62, 2  ;;  %v5644_v33 = vrot.slane %v11017_v62, 4  ;;  %v5689_v23 = vrot.slane %v11017_v62, 5 }
 0xc0c   :  { %5878 = vmatpush.msra.mxu0 %v5860_v4  ;;  %v5599_v21 = vrot.slane %v11017_v62, 3  ;;  %v5734_v26 = vrot.slane %v11017_v62, 6  ;;  %v5779_v28 = vrot.slane %v11017_v62, 7  ;;  %v6100_v62 = vld [vmem:[%s11366_s2 + $0xa38] sm:$0xff] }
 0xc0e   :  { %5879 = vmatpush.msra.mxu0 %v5859_v59 }
 0xc10   :  { %5880 = vmatpush.msra.mxu0 %v5858_v41 }
 0xc12   :  { %v11033_v63 = vpop.f32.mrf.mxu2  ;;  %5881 = vmatpush.msra.mxu0 %v5857_v0 }
 0xc13   :  { %v5481_v55 = vrot.slane %v11033_v63, 1  ;;  %v5555_v32 = vrot.slane %v11033_v63, 2  ;;  %6742 = vmatmul.msk.f32.gmra.mxu0 %vm396_vm1, %v11033_v63  ;;  %v5645_v38 = vrot.slane %v11033_v63, 4  ;;  %v5690_v58 = vrot.slane %v11033_v63, 5 }
 0xc14   :  { %v5600_v54 = vrot.slane %v11033_v63, 3  ;;  %v5735_v8 = vrot.slane %v11033_v63, 6  ;;  %5882 = vmatpush.msra.mxu0 %v5856_v52 }
 0xc15   :  { %v5482_v50 = vsel %vm354_vm2, %v5480_v6, %v5481_v55  ;;  %v5556_v1 = vsel %vm647_vm3, %v5554_v16, %v5555_v32  ;;  %v5646_v17 = vsel %vm1252_vm5, %v5644_v33, %v5645_v38  ;;  %v5691_v14 = vsel %vm1444_vm6, %v5689_v23, %v5690_v58  ;;  %v5979_v6 = vld [vmem:[%s11366_s2 + $0x9b8] sm:$0xff]  ;;  %v5937_v16 = vld [vmem:[%s11366_s2 + $0x980] sm:$0xff]  ;;  %v5896_v33 = vld [vmem:[%s11366_s2 + $0x950] sm:$0xff] }
 0xc16   :  { %6738 = vmatmul.msk.f32.vlgmr.msrb.gmra.mxu3 %vm396_vm1, %v5482_v50  ;;  %6744 = vmatmul.msk.f32.vlgmr.msrb.gmra.mxu1 %vm396_vm1, %v5556_v1  ;;  %v5601_v15 = vsel %vm839_vm4, %v5599_v21, %v5600_v54  ;;  %v5736_v7 = vsel %vm1857_vm7, %v5734_v26, %v5735_v8  ;;  %v5977_v50 = vld [vmem:[%s11366_s2 + $0x9a8] sm:$0xff]  ;;  %v5976_v1 = vld [vmem:[%s11366_s2 + $0x9a0] sm:$0xff]  ;;  %v6057_v23 = vld [vmem:[%s11366_s2 + $0x9f8] sm:$0xff] }
 0xc17   :  { %5801 = vmatpush.msrb.mxu3 %v5778_v19  ;;  %6750 = vmatmul.msk.f32.vlgmr.msrb.gmra.mxu2 %vm396_vm1, %v5646_v17  ;;  %v5780_v19 = vrot.slane %v11033_v63, 7 }
 0xc18   :  { %5918 = vmatpush.msrb.mxu1 %v5900_v30  ;;  %5998 = vmatpush.msrb.mxu2 %v5980_v48 }
 0xc19   :  { %5802 = vmatpush.msrb.mxu3 %v5777_v3  ;;  %v6060_v3 = vld [vmem:[%s11366_s2 + $0xa10] sm:$0xff] }
 0xc1a   :  { %v11064_v49 = vpop.f32.mrf.mxu2  ;;  %5919 = vmatpush.msrb.mxu1 %v5899_v9  ;;  %5999 = vmatpush.msrb.mxu2 %v5979_v6 }
 0xc1b   :  { %v11067_v39 = vrot.slane %v11064_v49, 1  ;;  %v11070_v36 = vrot.slane %v11064_v49, 2  ;;  %6743 = vmatmul.msk.f32.gmra.mxu0 %vm396_vm1, %v11064_v49  ;;  %v11078_v35 = vrot.slane %v11064_v49, 4  ;;  %5803 = vmatpush.msrb.mxu3 %v5776_v27  ;;  %v11146_v37 = vrot.slane %v11064_v49, 5 }
 0xc1c   :  { %v11185_v57 = vrot.slane %v11064_v49, 3  ;;  %v11188_v44 = vrot.slane %v11064_v49, 6  ;;  %5920 = vmatpush.msrb.mxu1 %v5898_v45  ;;  %v5782_v18 = vrot.slane %v11064_v49, 7 }
 0xc1d   :  { %v11085_v20 = vsel %vm354_vm2, %v5481_v55, %v11067_v39  ;;  %v11089_v13 = vsel %vm647_vm3, %v5555_v32, %v11070_v36  ;;  %v11096_v51 = vsel %vm1252_vm5, %v5645_v38, %v11078_v35  ;;  %5804 = vmatpush.msrb.mxu3 %v5775_v11  ;;  %v11162_v61 = vsel %vm1444_vm6, %v5690_v58, %v11146_v37  ;;  %v5978_v55 = vld [vmem:[%s11366_s2 + $0x9b0] sm:$0xff]  ;;  %v5936_v32 = vld [vmem:[%s11366_s2 + $0x978] sm:$0xff] }
 0xc1e   :  { %6739 = vmatmul.msk.f32.gmra.mxu3 %vm396_vm1, %v11085_v20  ;;  %6745 = vmatmul.msk.f32.gmra.mxu1 %vm396_vm1, %v11089_v13  ;;  %v11200_v29 = vsel %vm839_vm4, %v5600_v54, %v11185_v57  ;;  %v11204_v42 = vsel %vm1857_vm7, %v5735_v8, %v11188_v44  ;;  %v6099_v58 = vld [vmem:[%s11366_s2 + $0xa30] sm:$0xff] }
 0xc1f   :  { %6751 = vmatmul.msk.f32.gmra.mxu2 %vm396_vm1, %v11096_v51  ;;  %5805 = vmatpush.msrb.mxu3 %v5774_v22 }
 0xc20   :  { %5921 = vmatpush.msrb.mxu1 %v5897_v2  ;;  %6000 = vmatpush.msrb.mxu2 %v5978_v55 }
 0xc22   :  { %v11244_v38 = vpop.f32.mrf.mxu2  ;;  %5922 = vmatpush.msrb.mxu1 %v5896_v33  ;;  %6001 = vmatpush.msrb.mxu2 %v5977_v50 }
 0xc23   :  { %6753 = vmatmul.msk.f32.vlgmr.msrb.gmra.mxu0 %vm396_vm1, %v5691_v14  ;;  %v5861_v17 = vrot.slane %v11244_v38, 1  ;;  %v5981_v27 = vrot.slane %v11244_v38, 4  ;;  %v6021_v22 = vrot.slane %v11244_v38, 5  ;;  %v5941_v12 = vrot.slane %v11244_v38, 3 }
 0xc24   :  { %6002 = vmatpush.msrb.mxu2 %v5976_v1  ;;  %6038 = vmatpush.msrb.mxu0 %v6020_v47  ;;  %v6061_v56 = vrot.slane %v11244_v38, 6  ;;  %v6101_v4 = vrot.slane %v11244_v38, 7 }
 0xc25   :  { %v5862_v25 = vsel %vm354_vm2, %v11067_v39, %v5861_v17  ;;  %v5982_v11 = vsel %vm1252_vm5, %v11078_v35, %v5981_v27  ;;  %v6022_v14 = vsel %vm1444_vm6, %v11146_v37, %v6021_v22  ;;  %v5942_v53 = vsel %vm839_vm4, %v11185_v57, %v5941_v12 }
 0xc26   :  { %6740 = vmatmul.msk.f32.gmra.mxu3 %vm396_vm1, %v11067_v39  ;;  %6746 = vmatmul.msk.f32.gmra.mxu1 %vm396_vm1, %v11070_v36  ;;  %v6017_v39 = vld [vmem:[%s11366_s2 + $0x9d0] sm:$0xff]  ;;  %v6102_v54 = vsel %vm2049_vm8, %v5782_v18, %v6101_v4  ;;  %vm6166_vm2 = vcmask 320512  }
 0xc27   :  { %6752 = vmatmul.msk.f32.gmra.mxu2 %vm396_vm1, %v11078_v35  ;;  %6039 = vmatpush.msrb.mxu0 %v6019_v43  ;;  %v6056_v35 = vld [vmem:[%s11366_s2 + $0x9f0] sm:$0xff] }
 0xc29   :  { %6040 = vmatpush.msrb.mxu0 %v6018_v60 }
 0xc2b   :  { %6754 = vmatmul.msk.f32.gmra.mxu0 %vm396_vm1, %v11162_v61 }
 0xc2c   :  { %6041 = vmatpush.msrb.mxu0 %v6017_v39 }
 0xc2e   :  { %6747 = vmatmul.msk.f32.vlgmr.msra.gmra.mxu3 %vm396_vm1, %v5601_v15  ;;  %6756 = vmatmul.msk.f32.vlgmr.msra.gmra.mxu1 %vm396_vm1, %v5736_v7 }
 0xc2f   :  { %5958 = vmatpush.msra.mxu3 %v5940_v5  ;;  %6762 = vmatmul.msk.f32.vlgmr.msra.gmra.mxu2 %vm396_vm1, %v11033_v63  ;;  %v5781_v63 = vsel %vm2049_vm8, %v5779_v28, %v5780_v19 }
 0xc30   :  { %6078 = vmatpush.msra.mxu1 %v6060_v3 }
 0xc31   :  { %5959 = vmatpush.msra.mxu3 %v5939_v34 }
 0xc33   :  { %6755 = vmatmul.msk.f32.gmra.mxu0 %vm396_vm1, %v11146_v37  ;;  %5960 = vmatpush.msra.mxu3 %v5938_v46  ;;  %v6062_v37 = vsel %vm1857_vm7, %v11188_v44, %v6061_v56 }
 0xc35   :  { %5961 = vmatpush.msra.mxu3 %v5937_v16 }
 0xc36   :  { %6748 = vmatmul.msk.f32.gmra.mxu3 %vm396_vm1, %v11200_v29  ;;  %6757 = vmatmul.msk.f32.gmra.mxu1 %vm396_vm1, %v11204_v42 }
 0xc37   :  { %6763 = vmatmul.msk.f32.gmra.mxu2 %vm396_vm1, %v11064_v49  ;;  %5962 = vmatpush.msra.mxu3 %v5936_v32  ;;  %v6059_v49 = vld [vmem:[%s11366_s2 + $0xa08] sm:$0xff] }
 0xc38   :  { %6079 = vmatpush.msra.mxu1 %v6059_v49 }
 0xc3b   :  { %6765 = vmatmul.msk.f32.vlgmr.msra.gmra.mxu0 %vm396_vm1, %v11085_v20  ;;  %v6016_v20 = vld [vmem:[%s11366_s2 + $0x9c8] sm:$0xff] }
 0xc3c   :  { %6042 = vmatpush.msrb.mxu0 %v6016_v20 }
 0xc3e   :  { %6749 = vmatmul.msk.f32.gmra.mxu3 %vm396_vm1, %v11185_v57  ;;  %6758 = vmatmul.msk.f32.gmra.mxu1 %vm396_vm1, %v11188_v44 }
 0xc3f   :  { %6764 = vmatmul.msk.f32.gmra.mxu2 %vm396_vm1, %v11244_v38 }
 0xc43   :  { %6766 = vmatmul.msk.f32.gmra.mxu0 %vm396_vm1, %v5862_v25 }
 0xc46   :  { %6759 = vmatmul.msk.f32.vlgmr.msrb.gmra.mxu3 %vm396_vm1, %v5781_v63  ;;  %6768 = vmatmul.msk.f32.vlgmr.msrb.gmra.mxu1 %vm396_vm1, %v11089_v13  ;;  %v5901_v13 = vrot.slane %v11244_v38, 2 }
 0xc47   :  { %6118 = vmatpush.msrb.mxu3 %v6100_v62  ;;  %6774 = vmatmul.msk.f32.vlgmr.msrb.gmra.mxu2 %vm396_vm1, %v11096_v51  ;;  %v5783_v51 = vsel %vm2049_vm8, %v5780_v19, %v5782_v18 }
 0xc48   :  { %v5902_v40 = vsel %vm647_vm3, %v11070_v36, %v5901_v13  ;;  %v6058_v36 = vld [vmem:[%s11366_s2 + $0xa00] sm:$0xff] }
 0xc49   :  { %6119 = vmatpush.msrb.mxu3 %v6099_v58  ;;  %6080 = vmatpush.msra.mxu1 %v6058_v36 }
 0xc4b   :  { %6767 = vmatmul.msk.f32.gmra.mxu0 %vm396_vm1, %v5861_v17  ;;  %6120 = vmatpush.msrb.mxu3 %v6098_v10 }
 0xc4c   :  { %6081 = vmatpush.msra.mxu1 %v6057_v23 }
 0xc4d   :  { %6121 = vmatpush.msrb.mxu3 %v6097_v24 }
 0xc4e   :  { %6760 = vmatmul.msk.f32.gmra.mxu3 %vm396_vm1, %v5783_v51  ;;  %6769 = vmatmul.msk.f32.gmra.mxu1 %vm396_vm1, %v5902_v40 }
 0xc4f   :  { %6775 = vmatmul.msk.f32.gmra.mxu2 %vm396_vm1, %v5982_v11  ;;  %6122 = vmatpush.msrb.mxu3 %v6096_v31 }
 0xc50   :  { %6082 = vmatpush.msra.mxu1 %v6056_v35 }
 0xc53   :  { %6777 = vmatmul.msk.f32.vlgmr.msrb.gmra.mxu0 %vm396_vm1, %v11162_v61 }
 0xc56   :  { %6761 = vmatmul.msk.f32.gmra.mxu3 %vm396_vm1, %v5782_v18  ;;  %6770 = vmatmul.msk.f32.gmra.mxu1 %vm396_vm1, %v5901_v13 }
 0xc57   :  { %6776 = vmatmul.msk.f32.gmra.mxu2 %vm396_vm1, %v5981_v27 }
 0xc5b   :  { %6778 = vmatmul.msk.f32.gmra.mxu0 %vm396_vm1, %v6022_v14 }
 0xc5e   :  { %6771 = vmatmul.msk.f32.vlgmr.msra.gmra.mxu3 %vm396_vm1, %v11200_v29  ;;  %6780 = vmatmul.msk.f32.vlgmr.msra.gmra.mxu1 %vm396_vm1, %v11204_v42 }
 0xc63   :  { %6779 = vmatmul.msk.f32.gmra.mxu0 %vm396_vm1, %v6021_v22 }
 0xc66   :  { %6772 = vmatmul.msk.f32.gmra.mxu3 %vm396_vm1, %v5942_v53  ;;  %6781 = vmatmul.msk.f32.gmra.mxu1 %vm396_vm1, %v6062_v37 }
 0xc6e   :  { %6773 = vmatmul.msk.f32.gmra.mxu3 %vm396_vm1, %v5941_v12  ;;  %6782 = vmatmul.msk.f32.gmra.mxu1 %vm396_vm1, %v6061_v56 }
 0xc76   :  { %6783 = vmatmul.msk.f32.vlgmr.msrb.gmra.mxu3 %vm396_vm1, %v5783_v51 }
 0xc7e   :  { %6784 = vmatmul.msk.f32.gmra.mxu3 %vm396_vm1, %v6102_v54 }
 0xc86   :  { %6785 = vmatmul.msk.f32.gmra.mxu3 %vm396_vm1, %v6101_v4  ;;  %vm6139_vm1 = vcmask 138240  }
 0xc88   :  { %v5540_v8 = vpop.f32.mrf.mxu0 }
 0xc90   :  { %v5543_v15 = vpop.f32.mrf.mxu0 }
 0xc93   :  { %v5582_v21 = vpop.f32.mrf.mxu1 }
 0xc98   :  { %v5546_v0 = vpop.f32.mrf.mxu0 }
 0xc99   :  { %v5508_v59 = vpop.f32.mrf.mxu3 }
 0xc9a   :  { %v5541_v26 = vadd.f32 %v5540_v8, %v5508_v59  ;;  %v5672_v44 = vpop.f32.mrf.mxu2 }
 0xc9b   :  { %v5585_v7 = vpop.f32.mrf.mxu1 }
 0xc9c   :  { %v5591_v61 = vadd.f32 %v5582_v21, %v5541_v26 }
 0xca0   :  { %v5717_v48 = vpop.f32.mrf.mxu0 }
 0xca1   :  { %v5511_v41 = vpop.f32.mrf.mxu3 }
 0xca2   :  { %v5675_v9 = vpop.f32.mrf.mxu2  ;;  %v5544_v19 = vadd.f32 %v5543_v15, %v5511_v41 }
 0xca3   :  { %v5588_v52 = vpop.f32.mrf.mxu1 }
 0xca4   :  { %v5592_v60 = vadd.f32 %v5585_v7, %v5544_v19 }
 0xca8   :  { %v5720_v34 = vpop.f32.mrf.mxu0 }
 0xca9   :  { %v5514_v5 = vpop.f32.mrf.mxu3 }
 0xcaa   :  { %v5678_v6 = vpop.f32.mrf.mxu2  ;;  %v5547_v47 = vadd.f32 %v5546_v0, %v5514_v5 }
 0xcab   :  { %v5762_v29 = vpop.f32.mrf.mxu1 }
 0xcac   :  { %v5593_v28 = vadd.f32 %v5588_v52, %v5547_v47 }
 0xcb0   :  { %v5723_v2 = vpop.f32.mrf.mxu0 }
 0xcb1   :  { %v5627_v57 = vpop.f32.mrf.mxu3 }
 0xcb2   :  { %v5636_v30 = vadd.f32 %v5627_v57, %v5591_v61  ;;  %v5844_v32 = vpop.f32.mrf.mxu2 }
 0xcb3   :  { %v5765_v45 = vpop.f32.mrf.mxu1 }
 0xcb4   :  { %v5681_v27 = vadd.f32 %v5672_v44, %v5636_v30 }
 0xcb6   :  { %v5726_v10 = vadd.f32 %v5717_v48, %v5681_v27 }
 0xcb8   :  { %v5884_v38 = vpop.f32.mrf.mxu0  ;;  %v5771_v31 = vadd.f32 %v5762_v29, %v5726_v10 }
 0xcb9   :  { %v5630_v42 = vpop.f32.mrf.mxu3 }
 0xcba   :  { %v5847_v17 = vpop.f32.mrf.mxu2  ;;  %v5637_v39 = vadd.f32 %v5630_v42, %v5592_v60 }
 0xcbb   :  { %v5768_v55 = vpop.f32.mrf.mxu1 }
 0xcbc   :  { %v5682_v13 = vadd.f32 %v5675_v9, %v5637_v39 }
 0xcbe   :  { %v5727_v58 = vadd.f32 %v5720_v34, %v5682_v13 }
 0xcc0   :  { %v5887_v43 = vpop.f32.mrf.mxu0  ;;  %v5772_v24 = vadd.f32 %v5765_v45, %v5727_v58 }
 0xcc1   :  { %v5633_v46 = vpop.f32.mrf.mxu3 }
 0xcc2   :  { %v5638_v63 = vadd.f32 %v5633_v46, %v5593_v28  ;;  %v5850_v20 = vpop.f32.mrf.mxu2 }
 0xcc3   :  { %v5924_v50 = vpop.f32.mrf.mxu1 }
 0xcc4   :  { %v5683_v18 = vadd.f32 %v5678_v6, %v5638_v63 }
 0xcc6   :  { %v5728_v51 = vadd.f32 %v5723_v2, %v5683_v18 }
 0xcc8   :  { %v5890_v3 = vpop.f32.mrf.mxu0  ;;  %v5773_v36 = vadd.f32 %v5768_v55, %v5728_v51 }
 0xcc9   :  { %v5807_v16 = vpop.f32.mrf.mxu3 }
 0xcca   :  { %v6004_v11 = vpop.f32.mrf.mxu2  ;;  %v5816_v12 = vadd.f32 %v5807_v16, %v5771_v31 }
 0xccb   :  { %v5927_v25 = vpop.f32.mrf.mxu1 }
 0xccc   :  { %v5853_v4 = vadd.f32 %v5844_v32, %v5816_v12 }
 0xcce   :  { %v5893_v26 = vadd.f32 %v5884_v38, %v5853_v4 }
 0xcd0   :  { %v6044_v14 = vpop.f32.mrf.mxu0  ;;  %v5933_v0 = vadd.f32 %v5924_v50, %v5893_v26 }
 0xcd1   :  { %v5810_v33 = vpop.f32.mrf.mxu3 }
 0xcd2   :  { %v5817_v35 = vadd.f32 %v5810_v33, %v5772_v24  ;;  %v6007_v8 = vpop.f32.mrf.mxu2 }
 0xcd3   :  { %v5930_v49 = vpop.f32.mrf.mxu1 }
 0xcd4   :  { %v5854_v37 = vadd.f32 %v5847_v17, %v5817_v35  ;;  %v6800_v17 = vld [vmem:[%s11366_s2 + $0xa48] ss:$0 sm:$0xff] }
 0xcd6   :  { %v5894_v59 = vadd.f32 %v5887_v43, %v5854_v37 }
 0xcd8   :  { %v6047_v41 = vpop.f32.mrf.mxu0  ;;  %v5934_v15 = vadd.f32 %v5927_v25, %v5894_v59 }
 0xcd9   :  { %v5813_v1 = vpop.f32.mrf.mxu3 }
 0xcda   :  { %v5818_v23 = vadd.f32 %v5813_v1, %v5773_v36  ;;  %v6010_v57 = vpop.f32.mrf.mxu2  ;;  %v6136_v1 = vld [vmem:[%s11368_s3 + $0x2d0] sm:$0x3] }
 0xcdb   :  { %v6084_v53 = vpop.f32.mrf.mxu1 }
 0xcdc   :  { %v5855_v56 = vadd.f32 %v5850_v20, %v5818_v23 }
 0xcde   :  { %v5895_v54 = vadd.f32 %v5890_v3, %v5855_v56 }
 0xce0   :  { %v5935_v61 = vadd.f32 %v5930_v49, %v5895_v54  ;;  %v6050_v42 = vpop.f32.mrf.mxu0 }
 0xce1   :  { %v5964_v62 = vpop.f32.mrf.mxu3 }
 0xce2   :  { %v5973_v44 = vadd.f32 %v5964_v62, %v5933_v0 }
 0xce3   :  { %v6087_v5 = vpop.f32.mrf.mxu1 }
 0xce4   :  { %v6013_v9 = vadd.f32 %v6004_v11, %v5973_v44 }
 0xce6   :  { %v6053_v6 = vadd.f32 %v6044_v14, %v6013_v9 }
 0xce8   :  { %v6093_v33 = vadd.f32 %v6084_v53, %v6053_v6 }
 0xce9   :  { %v5967_v40 = vpop.f32.mrf.mxu3 }
 0xcea   :  { %v5974_v52 = vadd.f32 %v5967_v40, %v5934_v15 }
 0xceb   :  { %v6090_v45 = vpop.f32.mrf.mxu1 }
 0xcec   :  { %v6014_v29 = vadd.f32 %v6007_v8, %v5974_v52 }
 0xcee   :  { %v6054_v46 = vadd.f32 %v6047_v41, %v6014_v29 }
 0xcf0   :  { %v6094_v55 = vadd.f32 %v6087_v5, %v6054_v46 }
 0xcf1   :  { %v5970_v22 = vpop.f32.mrf.mxu3 }
 0xcf2   :  { %v5975_v7 = vadd.f32 %v5970_v22, %v5935_v61 }
 0xcf4   :  { %v6015_v30 = vadd.f32 %v6010_v57, %v5975_v7 }
 0xcf6   :  { %v6055_v34 = vadd.f32 %v6050_v42, %v6015_v30 }
 0xcf8   :  { %v6095_v16 = vadd.f32 %v6090_v45, %v6055_v34 }
 0xcf9   :  { %v6124_v21 = vpop.f32.mrf.mxu3 }
 0xcfa   :  { %v6133_v50 = vadd.f32 %v6124_v21, %v6093_v33 }
 0xd01   :  { %v6127_v48 = vpop.f32.mrf.mxu3 }
 0xd02   :  { %v6134_v38 = vadd.f32 %v6127_v48, %v6094_v55 }
 0xd09   :  { %v6130_v2 = vpop.f32.mrf.mxu3 }
 0xd0a   :  { %v6135_v32 = vadd.f32 %v6130_v2, %v6095_v16 }
 0xd0c   :  { %6786 = vmatpush.msk.msra.mxu2 %vm2049_vm8, %v6135_v32 }
 0xd0e   :  { %6160 = vmatpush.msra.mxu2 %v6134_v38 }
 0xd10   :  { %6161 = vmatpush.msra.mxu2 %v6133_v50 }
 0xd11   :  { %6787 = vmatmul.msk.f32.vlgmr.msra.gmra.mxu2 %vm6139_vm1, %v6136_v1 }
 0xd94   :  { %v6163_v47 = vpop.f32.mrf.mxu2 }
 0xd95   :  { %v6164_v19 = vadd.f32 %v6800_v17, %v6163_v47 }
 0xd97   :  { %6167 = vst.msk [vmem:[%s11370_s4] sm:$0x3] %vm6166_vm2, %v6164_v19 }

</bundles_post_ra>
